<compile_context>
chip_gen: v7x
topology: tpu7x:2x2x1
jax: 0.10.0
libtpu: 0.0.40
codegen_flags: <defaults>
</compile_context>

<pallas_src>
import functools

import jax
import jax.numpy as jnp
from jax.experimental import pallas as pl
from jax.experimental.pallas import tpu as pltpu

LANES = 128
SMALL_N = 1 << 20            # below this, plain XLA beats launch + pipeline ramp
_DEFAULT_BLOCK_ROWS = 4096   # 2 MiB f32 / input tile: safe on every generation


def _round_up(a, b):
    return ((a + b - 1) // b) * b


def _tpu_info():
    try:
        return pltpu.get_tpu_info()
    except Exception:
        return None


def _block_rows_for_chip():
    """~2 MiB/input tile on 128-MiB-VMEM chips, ~4 MiB on 64-MiB-VMEM chips (v7x)."""
    info = _tpu_info()
    vmem = getattr(info, "vmem_capacity_bytes", None) if info is not None else None
    if isinstance(vmem, int) and 0 < vmem <= 96 * 1024 * 1024:
        # Small-VMEM / fast-HBM generation: bigger tiles amortize per-step
        # overhead; 2 inputs x 2 buffers x 4 MiB = 16 MiB < 32 MiB default scoped.
        return 8192
    return _DEFAULT_BLOCK_ROWS


def _num_tensorcores():
    info = _tpu_info()
    if info is not None:
        for name in ("num_cores", "core_count", "num_tensorcores",
                     "tensorcore_count", "num_cores_per_chip"):
            v = getattr(info, name, None)
            if isinstance(v, int) and v >= 1:
                return v
    return 1


_BLOCK_ROWS = _block_rows_for_chip()
_NUM_TC = _num_tensorcores()


def _sse_kernel(x_ref, y_ref, o_ref, *, total_rows, block_rows,
                tiles_per_shard, tiles_total, has_tail, has_phantom):
    """Accumulate sum((x - y)^2) into the resident (8, LANES) output block.

    Grid: (shard, tile-within-shard).  The output block index depends only on
    the shard, so it stays resident in VMEM across the reduction axis.
    """
    s = pl.program_id(0)   # shard (core-parallel on multi-TC chips)
    k = pl.program_id(1)   # tile within shard ("arbitrary" reduction axis)
    tile_idx = s * tiles_per_shard + k

    @pl.when(k == 0)
    def _():
        o_ref[...] = jnp.zeros_like(o_ref)

    def accumulate(masked):
        # Per-tile upcast keeps HBM traffic at the source dtype.
        d = x_ref[...].astype(jnp.float32) - y_ref[...].astype(jnp.float32)
        if masked:
            # Mask BEFORE squaring so garbage in out-of-range rows of the edge
            # block cannot produce NaN/Inf.
            row0 = tile_idx * block_rows
            row_ids = row0 + jax.lax.broadcasted_iota(
                jnp.int32, (block_rows, LANES), 0)
            d = jnp.where(row_ids < total_rows, d, 0.0)
        sq = d * d
        # VALU-only accumulation; the single cross-lane reduce happens in the
        # wrapper.  (Reshape is aligned with (8,128) tiling -> no relayout.)
        o_ref[...] += jnp.sum(sq.reshape(block_rows // 8, 8, LANES), axis=0)

    if not has_tail and not has_phantom:
        # Common path: every tile is dense and in range -> no mask, no gate.
        accumulate(masked=False)
    elif not has_tail:
        @pl.when(tile_idx < tiles_total)
        def _():
            accumulate(masked=False)
    else:
        # Dense in-range tiles: no mask work.
        @pl.when(tile_idx < tiles_total - 1)
        def _():
            accumulate(masked=False)

        # The single ragged tail tile: masked.  Phantom tiles
        # (tile_idx >= tiles_total) fall through both branches.
        @pl.when(tile_idx == tiles_total - 1)
        def _():
            accumulate(masked=True)


def _sse_pallas_2d(x2, y2, rows):
    """Sum of squared differences of two lane-dense (rows, LANES) slabs."""
    block_rows = min(_BLOCK_ROWS, _round_up(rows, 8))
    tiles_total = pl.cdiv(rows, block_rows)
    n_shards = _NUM_TC if (_NUM_TC > 1 and tiles_total >= _NUM_TC) else 1
    tiles_per_shard = pl.cdiv(tiles_total, n_shards)

    has_tail = (rows % block_rows) != 0
    has_phantom = (n_shards * tiles_per_shard) != tiles_total

    kernel = functools.partial(
        _sse_kernel,
        total_rows=rows,
        block_rows=block_rows,
        tiles_per_shard=tiles_per_shard,
        tiles_total=tiles_total,
        has_tail=has_tail,
        has_phantom=has_phantom,
    )

    def in_map(s, k):
        # Clamp so we never request a block past the end of the array; the
        # in-kernel gating/mask keeps clamped phantom/tail data out of the sum.
        return (jnp.minimum(s * tiles_per_shard + k, tiles_total - 1), 0)

    if n_shards > 1:
        semantics = (pltpu.CORE_PARALLEL, pltpu.ARBITRARY)
    else:
        semantics = (pltpu.ARBITRARY, pltpu.ARBITRARY)

    partials = pl.pallas_call(
        kernel,
        out_shape=jax.ShapeDtypeStruct((n_shards * 8, LANES), jnp.float32),
        grid_spec=pltpu.PrefetchScalarGridSpec(
            num_scalar_prefetch=0,
            grid=(n_shards, tiles_per_shard),
            in_specs=[
                pl.BlockSpec((block_rows, LANES), in_map),
                pl.BlockSpec((block_rows, LANES), in_map),
            ],
            out_specs=pl.BlockSpec((8, LANES), lambda s, k: (s, 0)),
        ),
        compiler_params=pltpu.CompilerParams(dimension_semantics=semantics),
    )(x2, y2)

    return jnp.sum(partials)


@jax.jit
def _mse_loss_pallas(x, y):
    """MSE between two equally-shaped tensors; hot path in Pallas."""
    assert x.shape == y.shape, (x.shape, y.shape)
    n = x.size

    # Small tensors: XLA's fused sub-square-reduce is already near the HBM
    # roofline; a kernel launch + pipeline ramp only loses there.
    if n <= SMALL_N:
        d = x.astype(jnp.float32) - y.astype(jnp.float32)
        return jnp.mean(d * d)

    xf = x.reshape(-1)
    yf = y.reshape(-1)

    n_main = (n // LANES) * LANES
    rem = n - n_main

    if rem == 0:
        x_main, y_main = xf, yf
        tail_sse = jnp.float32(0.0)
    else:
        # Rare ragged-lane path: the kernel handles the lane-aligned prefix,
        # XLA adds the < LANES-element remainder (no full-array jnp.pad copy).
        x_main, y_main = xf[:n_main], yf[:n_main]
        dt = xf[n_main:].astype(jnp.float32) - yf[n_main:].astype(jnp.float32)
        tail_sse = jnp.sum(dt * dt)

    rows = n_main // LANES
    x2 = x_main.reshape(rows, LANES)   # contiguous -> free reshape, orig dtype
    y2 = y_main.reshape(rows, LANES)

    sse = _sse_pallas_2d(x2, y2, rows) + tail_sse
    return sse / jnp.float32(n)


class ContentLoss:
    """JAX/Pallas port of the PyTorch ContentLoss criterion."""

    def __init__(self, block_indices=None):
        if block_indices is None:
            block_indices = [4]
        self._block_indices = list(block_indices)

    def __call__(self, result_predictions, target_predictions):
        # TODO(synk): when len(block_indices) > 1, fuse the per-index MSEs into
        # a single pallas_call (scalar-prefetched per-block offsets + pl.ANY
        # inputs) so launch + pipeline-ramp cost is paid once.
        result_loss = jnp.float32(0.0)
        for index in self._block_indices:
            result_loss = result_loss + _mse_loss_pallas(
                result_predictions[index], target_predictions[index]
            )
        return result_loss


if __name__ == "__main__":
    key = jax.random.PRNGKey(0)

    # "VGG-like" feature maps (NCHW).  Index 4 (the default block index) is
    # large enough to take the Pallas kernel path (multiple tiles + ragged
    # block tail); the others stay tiny and hit the small-size fast path.
    shapes = [
        (2, 4, 16, 16),   # 0
        (2, 4, 16, 16),   # 1
        (2, 8, 8, 8),     # 2
        (2, 8, 8, 8),     # 3
        (2, 64, 96, 96),  # 4  <- 1,179,648 elems -> kernel path
    ]
    result_predictions = []
    target_predictions = []
    for s in shapes:
        key, k1, k2 = jax.random.split(key, 3)
        result_predictions.append(jax.random.normal(k1, s, dtype=jnp.float32))
        target_predictions.append(jax.random.normal(k2, s, dtype=jnp.float32))

    # Default criterion: block_indices = [4] (Pallas kernel path).
    criterion = ContentLoss()
    loss = jax.block_until_ready(criterion(result_predictions, target_predictions))
    ref = jnp.mean((result_predictions[4] - target_predictions[4]) ** 2)
    assert jnp.allclose(loss, ref, rtol=1e-4, atol=1e-6), (loss, ref)

    # Multi-index criterion: small fast path + kernel path, summed.
    criterion2 = ContentLoss([1, 4])
    loss2 = jax.block_until_ready(criterion2(result_predictions, target_predictions))
    ref2 = (
        jnp.mean((result_predictions[1] - target_predictions[1]) ** 2)
        + jnp.mean((result_predictions[4] - target_predictions[4]) ** 2)
    )
    assert jnp.allclose(loss2, ref2, rtol=1e-4, atol=1e-6), (loss2, ref2)

    # Lane-ragged large tensor: kernel on the 128-aligned prefix + XLA tail.
    key, k1, k2 = jax.random.split(key, 3)
    a = jax.random.normal(k1, (2, 5, 331, 357), dtype=jnp.float32)  # n % 128 = 102
    b = jax.random.normal(k2, (2, 5, 331, 357), dtype=jnp.float32)
    loss3 = jax.block_until_ready(_mse_loss_pallas(a, b))
    ref3 = jnp.mean((a - b) ** 2)
    assert jnp.allclose(loss3, ref3, rtol=1e-4, atol=1e-6), (loss3, ref3)

    print("KERNEL_OK")
</pallas_src>

<mosaic_0001>
module attributes {stable_mosaic.version = 11 : i64} {
  func.func @_sse_kernel(%arg0: i32, %arg1: i32, %arg2: memref<4096x128xf32, #tpu.memory_space<vmem>>, %arg3: memref<4096x128xf32, #tpu.memory_space<vmem>>, %arg4: memref<8x128xf32, #tpu.memory_space<vmem>>) attributes {dimension_semantics = [#tpu.dimension_semantics<arbitrary>, #tpu.dimension_semantics<arbitrary>], iteration_bounds = array<i64: 1, 3>, scalar_prefetch = 0 : i64, scratch_operands = 0 : i64, tpu.core_type = #tpu.core_type<tc>, window_params = [{transform_indices = @transform_0, window_bounds = array<i64: 4096, 128>}, {transform_indices = @transform_1, window_bounds = array<i64: 4096, 128>}, {transform_indices = @transform_2, window_bounds = array<i64: 8, 128>}]} {
    %c3_i32 = arith.constant 3 : i32
    %0 = arith.muli %arg0, %c3_i32 : i32
    %1 = arith.addi %0, %arg1 : i32
    %c0_i32 = arith.constant 0 : i32
    %2 = arith.cmpi eq, %arg1, %c0_i32 : i32
    %3 = arith.extui %2 : i1 to i32
    %c0_i32_0 = arith.constant 0 : i32
    %4 = arith.cmpi ne, %3, %c0_i32_0 : i32
    scf.if %4 {
      %cst = arith.constant 0.000000e+00 : f32
      %11 = vector.broadcast %cst : f32 to vector<8x128xf32>
      %c0 = arith.constant 0 : index
      %c0_4 = arith.constant 0 : index
      %12 = vector.load %arg4[%c0, %c0_4] : memref<8x128xf32, #tpu.memory_space<vmem>>, vector<8x128xf32>
      tpu.vector_store %arg4[%c0, %c0_4], %11 {strides = array<i32>} : memref<8x128xf32, #tpu.memory_space<vmem>>, vector<8x128xf32>,
    } else {
    }
    %c2_i32 = arith.constant 2 : i32
    %5 = arith.cmpi slt, %1, %c2_i32 : i32
    %6 = arith.extui %5 : i1 to i32
    %c0_i32_1 = arith.constant 0 : i32
    %7 = arith.cmpi ne, %6, %c0_i32_1 : i32
    scf.if %7 {
      %c0 = arith.constant 0 : index
      %c0_4 = arith.constant 0 : index
      %11 = vector.load %arg2[%c0, %c0_4] : memref<4096x128xf32, #tpu.memory_space<vmem>>, vector<4096x128xf32>
      %c0_5 = arith.constant 0 : index
      %c0_6 = arith.constant 0 : index
      %12 = vector.load %arg3[%c0_5, %c0_6] : memref<4096x128xf32, #tpu.memory_space<vmem>>, vector<4096x128xf32>
      %13 = arith.subf %11, %12 : vector<4096x128xf32>
      %14 = arith.mulf %13, %13 : vector<4096x128xf32>
      %c0_7 = arith.constant 0 : index
      %c0_8 = arith.constant 0 : index
      %15 = vector.load %arg4[%c0_7, %c0_8] : memref<8x128xf32, #tpu.memory_space<vmem>>, vector<8x128xf32>
      %16 = vector.shape_cast %14 : vector<4096x128xf32> to vector<512x8x128xf32>
      %cst = arith.constant dense<0.000000e+00> : vector<8x128xf32>
      %17 = vector.multi_reduction <add>, %16, %cst [0] : vector<512x8x128xf32> to vector<8x128xf32>
      %18 = arith.addf %15, %17 : vector<8x128xf32>
      %c0_9 = arith.constant 0 : index
      %c0_10 = arith.constant 0 : index
      %19 = vector.load %arg4[%c0_9, %c0_10] : memref<8x128xf32, #tpu.memory_space<vmem>>, vector<8x128xf32>
      tpu.vector_store %arg4[%c0_9, %c0_10], %18 {strides = array<i32>} : memref<8x128xf32, #tpu.memory_space<vmem>>, vector<8x128xf32>,
    } else {
    }
    %c2_i32_2 = arith.constant 2 : i32
    %8 = arith.cmpi eq, %1, %c2_i32_2 : i32
    %9 = arith.extui %8 : i1 to i32
    %c0_i32_3 = arith.constant 0 : i32
    %10 = arith.cmpi ne, %9, %c0_i32_3 : i32
    scf.if %10 {
      %c0 = arith.constant 0 : index
      %c0_4 = arith.constant 0 : index
      %11 = vector.load %arg2[%c0, %c0_4] : memref<4096x128xf32, #tpu.memory_space<vmem>>, vector<4096x128xf32>
      %c0_5 = arith.constant 0 : index
      %c0_6 = arith.constant 0 : index
      %12 = vector.load %arg3[%c0_5, %c0_6] : memref<4096x128xf32, #tpu.memory_space<vmem>>, vector<4096x128xf32>
      %13 = arith.subf %11, %12 : vector<4096x128xf32>
      %c4096_i32 = arith.constant 4096 : i32
      %14 = arith.muli %1, %c4096_i32 : i32
      %15 = tpu.iota {dimensions = array<i32: 0>} : vector<4096x128xi32>
      %16 = vector.broadcast %14 : i32 to vector<4096x128xi32>
      %17 = arith.addi %16, %15 : vector<4096x128xi32>
      %c9216_i32 = arith.constant 9216 : i32
      %18 = vector.broadcast %c9216_i32 : i32 to vector<4096x128xi32>
      %19 = arith.cmpi slt, %17, %18 : vector<4096x128xi32>
      %cst = arith.constant 0.000000e+00 : f32
      %20 = vector.broadcast %cst : f32 to vector<4096x128xf32>
      %21 = arith.select %19, %13, %20 : vector<4096x128xi1>, vector<4096x128xf32>
      %22 = arith.mulf %21, %21 : vector<4096x128xf32>
      %c0_7 = arith.constant 0 : index
      %c0_8 = arith.constant 0 : index
      %23 = vector.load %arg4[%c0_7, %c0_8] : memref<8x128xf32, #tpu.memory_space<vmem>>, vector<8x128xf32>
      %24 = vector.shape_cast %22 : vector<4096x128xf32> to vector<512x8x128xf32>
      %cst_9 = arith.constant dense<0.000000e+00> : vector<8x128xf32>
      %25 = vector.multi_reduction <add>, %24, %cst_9 [0] : vector<512x8x128xf32> to vector<8x128xf32>
      %26 = arith.addf %23, %25 : vector<8x128xf32>
      %c0_10 = arith.constant 0 : index
      %c0_11 = arith.constant 0 : index
      %27 = vector.load %arg4[%c0_10, %c0_11] : memref<8x128xf32, #tpu.memory_space<vmem>>, vector<8x128xf32>
      tpu.vector_store %arg4[%c0_10, %c0_11], %26 {strides = array<i32>} : memref<8x128xf32, #tpu.memory_space<vmem>>, vector<8x128xf32>,
    } else {
    }
    return
  }
  func.func @transform_0(%arg0: i32, %arg1: i32) -> (i32, i32) {
    %c3_i32 = arith.constant 3 : i32
    %0 = arith.muli %arg0, %c3_i32 : i32
    %1 = arith.addi %0, %arg1 : i32
    %c2_i32 = arith.constant 2 : i32
    %2 = arith.minsi %1, %c2_i32 : i32
    %c0_i32 = arith.constant 0 : i32
    %c0_i32_0 = arith.constant 0 : i32
    return %2, %c0_i32 : i32, i32
  }
  func.func @transform_1(%arg0: i32, %arg1: i32) -> (i32, i32) {
    %c3_i32 = arith.constant 3 : i32
    %0 = arith.muli %arg0, %c3_i32 : i32
    %1 = arith.addi %0, %arg1 : i32
    %c2_i32 = arith.constant 2 : i32
    %2 = arith.minsi %1, %c2_i32 : i32
    %c0_i32 = arith.constant 0 : i32
    %c0_i32_0 = arith.constant 0 : i32
    return %2, %c0_i32 : i32, i32
  }
  func.func @transform_2(%arg0: i32, %arg1: i32) -> (i32, i32) {
    %c0_i32 = arith.constant 0 : i32
    %c0_i32_0 = arith.constant 0 : i32
    return %arg0, %c0_i32 : i32, i32
  }
}

</mosaic_0001>

<bundles_post_ra>
// kernel: _mse_loss_pallas.1
= control target key start
LH: loop header
LB: loop body
LE: loop exit
PB: predicated region body
PF: predicated region fallthrough
CT: control target
= control target key end

     0   :  { %s7615_s9 = smov 0   ;;  %s7617_s10 = smov 0   ;;  %s10751_s0 = inlined_call_operand.vmem [shape: f32[9216,128], index: 0, kind: input, shape index: {}]   ;;  %s10752_s1 = inlined_call_operand.vmem [shape: f32[9216,128], index: 1, kind: input, shape index: {}]   ;;  %s10753_s2 = inlined_call_operand.vmem [shape: f32[8,128], index: 2, kind: output, shape index: {}]  }
   0x1   :  { %s7619_s11 = smov 0  }
   0x2 LB: > { %s21_s12 = sadd.s32 1, %s7593_s10  ;;  %p7538_p0 = scmp.ge.s32.totalorder %s7597_s11, 1  ;;  %s7597_s11 = sphi %s7619_s11, %s12_s11   ;;  %s7593_s10 = sphi %s7617_s10, %s10755_s10   ;;  %s7589_s9 = sphi %s7615_s9, %s10754_s9  }
   0x3   : > { %p22_p1 = scmp.ge.s32.totalorder %s21_s12, 3  ;;  %p184_p2 = scmp.lt.s32.totalorder %s7597_s11, 4 }
   0x5   : > { %s10757_s12 = smov (%p22_p1, %s21_s12), 0  ;;  %p185_p3 = pnand %p7538_p0, %p184_p2 }
   0x6   : > { %p228_p4 = scmp.lt.s32.totalorder (!%p185_p3), %s7589_s9, 2  ;;  %p7543_p6 = scmp.ne.s32.totalorder (!%p185_p3), %s7589_s9, 0 }
   0x7   : > { %188 = sbr.rel (%p185_p3) target bundleno = 2093 (0x82d), region = 28 }
   0xe   : > { %s229_s13 = scalar_select %p228_p4, %s7589_s9, 2 }
   0xf   : > { %279 = sbr.rel (%p7543_p6) target bundleno = 22 (0x16), region = 32  ;;  %v7599_v0 = vmov (!%p7543_p6), 0.0  }
  0x10   : > { %s7539_s14 = sshll.u32 %s229_s13, 9  ;;  %280 = vst [vmem:[%s10753_s2] sm:$0xff] (!%p7543_p6), %v7599_v0 }
  0x11   : > { %p235_p5 = scmp.lt.s32.totalorder %s7539_s14, 1151 }
  0x13   : > { %s10759_s14 = smov (!%p235_p5, %s7539_s14), 1151 }
  0x14   : > { %s7540_s15 = sshll.u32 %s10759_s14, 3 }
  0x15   : > { %s7640_s18 = scalar_lea.vmem %s10751_s0, %s7540_s15  ;;  %s7645_s21 = scalar_lea.vmem %s10752_s1, %s7540_s15 }
  0x16 PF: > { %p7544_p7 = scmp.ge.s32.totalorder %s7589_s9, 2 }
  0x17   : > { %v285_v1 = vld [vmem:[%s7640_s18] sm:$0xff] (!%p7544_p7)  ;;  %v286_v2 = vld [vmem:[%s7640_s18 + $0x8] sm:$0xff] (!%p7544_p7)  ;;  %v287_v5 = vld [vmem:[%s7640_s18 + $0x10] sm:$0xff] (!%p7544_p7) }
  0x18   : > { %284 = sbr.rel (%p7544_p7) target bundleno = 1054 (0x41e), region = 36  ;;  %v797_v3 = vld [vmem:[%s7645_s21] sm:$0xff] (!%p7544_p7)  ;;  %v798_v4 = vld [vmem:[%s7645_s21 + $0x8] sm:$0xff] (!%p7544_p7)  ;;  %v799_v6 = vld [vmem:[%s7645_s21 + $0x10] sm:$0xff] (!%p7544_p7) }
  0x19   : > { %v1309_v7 = vsub.f32 (!%p7544_p7), %v285_v1, %v797_v3  ;;  %v1310_v8 = vsub.f32 (!%p7544_p7), %v286_v2, %v798_v4  ;;  %v288_v9 = vld [vmem:[%s7640_s18 + $0x18] sm:$0xff] (!%p7544_p7)  ;;  %v1311_v11 = vsub.f32 (!%p7544_p7), %v287_v5, %v799_v6  ;;  %v289_v12 = vld [vmem:[%s7640_s18 + $0x20] sm:$0xff] (!%p7544_p7)  ;;  %v290_v17 = vld [vmem:[%s7640_s18 + $0x28] sm:$0xff] (!%p7544_p7) }
  0x1a   : > { %v800_v10 = vld [vmem:[%s7645_s21 + $0x18] sm:$0xff] (!%p7544_p7)  ;;  %v801_v13 = vld [vmem:[%s7645_s21 + $0x20] sm:$0xff] (!%p7544_p7)  ;;  %v802_v18 = vld [vmem:[%s7645_s21 + $0x28] sm:$0xff] (!%p7544_p7) }
  0x1b   : > { %v1312_v14 = vsub.f32 (!%p7544_p7), %v288_v9, %v800_v10  ;;  %v1821_v15 = vmul.f32 (!%p7544_p7), %v1309_v7, %v1309_v7  ;;  %v1822_v16 = vmul.f32 (!%p7544_p7), %v1310_v8, %v1310_v8  ;;  %v1313_v19 = vsub.f32 (!%p7544_p7), %v289_v12, %v801_v13  ;;  %v291_v21 = vld [vmem:[%s7640_s18 + $0x30] sm:$0xff] (!%p7544_p7)  ;;  %v292_v26 = vld [vmem:[%s7640_s18 + $0x38] sm:$0xff] (!%p7544_p7)  ;;  %v293_v31 = vld [vmem:[%s7640_s18 + $0x40] sm:$0xff] (!%p7544_p7) }
  0x1c   : > { %v1823_v20 = vmul.f32 (!%p7544_p7), %v1311_v11, %v1311_v11  ;;  %v803_v22 = vld [vmem:[%s7645_s21 + $0x30] sm:$0xff] (!%p7544_p7)  ;;  %v1314_v23 = vsub.f32 (!%p7544_p7), %v290_v17, %v802_v18  ;;  %v804_v27 = vld [vmem:[%s7645_s21 + $0x38] sm:$0xff] (!%p7544_p7)  ;;  %v805_v32 = vld [vmem:[%s7645_s21 + $0x40] sm:$0xff] (!%p7544_p7) }
  0x1d   : > { %v1824_v24 = vmul.f32 (!%p7544_p7), %v1312_v14, %v1312_v14  ;;  %v2334_v25 = vadd.f32 (!%p7544_p7), %v1822_v16, %v1821_v15  ;;  %v1315_v28 = vsub.f32 (!%p7544_p7), %v291_v21, %v803_v22  ;;  %v1825_v29 = vmul.f32 (!%p7544_p7), %v1313_v19, %v1313_v19  ;;  %v294_v36 = vld [vmem:[%s7640_s18 + $0x48] sm:$0xff] (!%p7544_p7)  ;;  %v295_v41 = vld [vmem:[%s7640_s18 + $0x50] sm:$0xff] (!%p7544_p7)  ;;  %v296_v46 = vld [vmem:[%s7640_s18 + $0x58] sm:$0xff] (!%p7544_p7) }
  0x1e   : > { %v1316_v33 = vsub.f32 (!%p7544_p7), %v292_v26, %v804_v27  ;;  %v1826_v34 = vmul.f32 (!%p7544_p7), %v1314_v23, %v1314_v23  ;;  %v806_v37 = vld [vmem:[%s7645_s21 + $0x48] sm:$0xff] (!%p7544_p7)  ;;  %v1317_v38 = vsub.f32 (!%p7544_p7), %v293_v31, %v805_v32  ;;  %v807_v42 = vld [vmem:[%s7645_s21 + $0x50] sm:$0xff] (!%p7544_p7)  ;;  %v808_v47 = vld [vmem:[%s7645_s21 + $0x58] sm:$0xff] (!%p7544_p7) }
  0x1f   : > { %v2335_v30 = vadd.f32 %v2334_v25, %v1823_v20  ;;  %v1827_v39 = vmul.f32 %v1315_v28, %v1315_v28  ;;  %v1318_v43 = vsub.f32 %v294_v36, %v806_v37  ;;  %v1319_v48 = vsub.f32 %v295_v41, %v807_v42  ;;  %v297_v51 = vld [vmem:[%s7640_s18 + $0x60] sm:$0xff]  ;;  %v298_v56 = vld [vmem:[%s7640_s18 + $0x68] sm:$0xff]  ;;  %v299_v61 = vld [vmem:[%s7640_s18 + $0x70] sm:$0xff] }
  0x20   : > { %v1828_v44 = vmul.f32 %v1316_v33, %v1316_v33  ;;  %v1829_v49 = vmul.f32 %v1317_v38, %v1317_v38  ;;  %v809_v52 = vld [vmem:[%s7645_s21 + $0x60] sm:$0xff]  ;;  %v1320_v53 = vsub.f32 %v296_v46, %v808_v47  ;;  %v810_v57 = vld [vmem:[%s7645_s21 + $0x68] sm:$0xff]  ;;  %v811_v62 = vld [vmem:[%s7645_s21 + $0x70] sm:$0xff] }
  0x21   : > { %v2336_v35 = vadd.f32 %v2335_v30, %v1824_v24  ;;  %v1830_v54 = vmul.f32 %v1318_v43, %v1318_v43  ;;  %v1321_v58 = vsub.f32 %v297_v51, %v809_v52  ;;  %v1831_v59 = vmul.f32 %v1319_v48, %v1319_v48  ;;  %v300_v2 = vld [vmem:[%s7640_s18 + $0x78] sm:$0xff]  ;;  %v301_v7 = vld [vmem:[%s7640_s18 + $0x80] sm:$0xff]  ;;  %v302_v12 = vld [vmem:[%s7640_s18 + $0x88] sm:$0xff] }
  0x22   : > { %v1322_v63 = vsub.f32 %v298_v56, %v810_v57  ;;  %v1832_v0 = vmul.f32 %v1320_v53, %v1320_v53  ;;  %v812_v3 = vld [vmem:[%s7645_s21 + $0x78] sm:$0xff]  ;;  %v1323_v4 = vsub.f32 %v299_v61, %v811_v62  ;;  %v813_v8 = vld [vmem:[%s7645_s21 + $0x80] sm:$0xff]  ;;  %v814_v13 = vld [vmem:[%s7645_s21 + $0x88] sm:$0xff] }
  0x23   : > { %v2337_v40 = vadd.f32 %v2336_v35, %v1825_v29  ;;  %v1833_v5 = vmul.f32 %v1321_v58, %v1321_v58  ;;  %v1324_v9 = vsub.f32 %v300_v2, %v812_v3  ;;  %v1325_v14 = vsub.f32 %v301_v7, %v813_v8  ;;  %v303_v17 = vld [vmem:[%s7640_s18 + $0x90] sm:$0xff]  ;;  %v304_v22 = vld [vmem:[%s7640_s18 + $0x98] sm:$0xff]  ;;  %v305_v27 = vld [vmem:[%s7640_s18 + $0xa0] sm:$0xff] }
  0x24   : > { %v1834_v10 = vmul.f32 %v1322_v63, %v1322_v63  ;;  %v1835_v15 = vmul.f32 %v1323_v4, %v1323_v4  ;;  %v815_v18 = vld [vmem:[%s7645_s21 + $0x90] sm:$0xff]  ;;  %v1326_v19 = vsub.f32 %v302_v12, %v814_v13  ;;  %v816_v23 = vld [vmem:[%s7645_s21 + $0x98] sm:$0xff]  ;;  %v817_v28 = vld [vmem:[%s7645_s21 + $0xa0] sm:$0xff] }
  0x25   : > { %v2338_v45 = vadd.f32 %v2337_v40, %v1826_v34  ;;  %v1836_v20 = vmul.f32 %v1324_v9, %v1324_v9  ;;  %v1327_v24 = vsub.f32 %v303_v17, %v815_v18  ;;  %v1837_v25 = vmul.f32 %v1325_v14, %v1325_v14  ;;  %v306_v32 = vld [vmem:[%s7640_s18 + $0xa8] sm:$0xff]  ;;  %v307_v37 = vld [vmem:[%s7640_s18 + $0xb0] sm:$0xff]  ;;  %v308_v42 = vld [vmem:[%s7640_s18 + $0xb8] sm:$0xff] }
  0x26   : > { %v1328_v29 = vsub.f32 %v304_v22, %v816_v23  ;;  %v1838_v30 = vmul.f32 %v1326_v19, %v1326_v19  ;;  %v818_v33 = vld [vmem:[%s7645_s21 + $0xa8] sm:$0xff]  ;;  %v1329_v34 = vsub.f32 %v305_v27, %v817_v28  ;;  %v819_v38 = vld [vmem:[%s7645_s21 + $0xb0] sm:$0xff]  ;;  %v820_v43 = vld [vmem:[%s7645_s21 + $0xb8] sm:$0xff] }
  0x27   : > { %v2339_v50 = vadd.f32 %v2338_v45, %v1827_v39  ;;  %v1839_v35 = vmul.f32 %v1327_v24, %v1327_v24  ;;  %v1330_v39 = vsub.f32 %v306_v32, %v818_v33  ;;  %v309_v47 = vld [vmem:[%s7640_s18 + $0xc0] sm:$0xff]  ;;  %v310_v52 = vld [vmem:[%s7640_s18 + $0xc8] sm:$0xff]  ;;  %v311_v57 = vld [vmem:[%s7640_s18 + $0xd0] sm:$0xff] }
  0x28   : > { %v1840_v40 = vmul.f32 %v1328_v29, %v1328_v29  ;;  %v1841_v45 = vmul.f32 %v1329_v34, %v1329_v34  ;;  %v821_v48 = vld [vmem:[%s7645_s21 + $0xc0] sm:$0xff]  ;;  %v822_v53 = vld [vmem:[%s7645_s21 + $0xc8] sm:$0xff]  ;;  %v823_v58 = vld [vmem:[%s7645_s21 + $0xd0] sm:$0xff] }
  0x29   : > { %v2340_v55 = vadd.f32 %v2339_v50, %v1828_v44  ;;  %v1331_v44 = vsub.f32 %v307_v37, %v819_v38  ;;  %v1842_v50 = vmul.f32 %v1330_v39, %v1330_v39  ;;  %v312_v62 = vld [vmem:[%s7640_s18 + $0xd8] sm:$0xff]  ;;  %v313_v3 = vld [vmem:[%s7640_s18 + $0xe0] sm:$0xff]  ;;  %v314_v8 = vld [vmem:[%s7640_s18 + $0xe8] sm:$0xff] }
  0x2a   : > { %v824_v63 = vld [vmem:[%s7645_s21 + $0xd8] sm:$0xff]  ;;  %v825_v4 = vld [vmem:[%s7645_s21 + $0xe0] sm:$0xff]  ;;  %v826_v9 = vld [vmem:[%s7645_s21 + $0xe8] sm:$0xff] }
  0x2b   : > { %v2341_v60 = vadd.f32 %v2340_v55, %v1829_v49  ;;  %v1332_v49 = vsub.f32 %v308_v42, %v820_v43  ;;  %v1843_v55 = vmul.f32 %v1331_v44, %v1331_v44  ;;  %v315_v13 = vld [vmem:[%s7640_s18 + $0xf0] sm:$0xff]  ;;  %v316_v18 = vld [vmem:[%s7640_s18 + $0xf8] sm:$0xff]  ;;  %v317_v23 = vld [vmem:[%s7640_s18 + $0x100] sm:$0xff] }
  0x2c   : > { %v827_v14 = vld [vmem:[%s7645_s21 + $0xf0] sm:$0xff]  ;;  %v828_v19 = vld [vmem:[%s7645_s21 + $0xf8] sm:$0xff]  ;;  %v829_v24 = vld [vmem:[%s7645_s21 + $0x100] sm:$0xff] }
  0x2d   : > { %v2342_v1 = vadd.f32 %v2341_v60, %v1830_v54  ;;  %v1333_v54 = vsub.f32 %v309_v47, %v821_v48  ;;  %v1844_v60 = vmul.f32 %v1332_v49, %v1332_v49  ;;  %v318_v28 = vld [vmem:[%s7640_s18 + $0x108] sm:$0xff]  ;;  %v319_v33 = vld [vmem:[%s7640_s18 + $0x110] sm:$0xff]  ;;  %v320_v38 = vld [vmem:[%s7640_s18 + $0x118] sm:$0xff] }
  0x2e   : > { %v830_v29 = vld [vmem:[%s7645_s21 + $0x108] sm:$0xff]  ;;  %v831_v34 = vld [vmem:[%s7645_s21 + $0x110] sm:$0xff]  ;;  %v832_v39 = vld [vmem:[%s7645_s21 + $0x118] sm:$0xff] }
  0x2f   : > { %v2343_v6 = vadd.f32 %v2342_v1, %v1831_v59  ;;  %v1334_v59 = vsub.f32 %v310_v52, %v822_v53  ;;  %v1845_v1 = vmul.f32 %v1333_v54, %v1333_v54  ;;  %v321_v43 = vld [vmem:[%s7640_s18 + $0x120] sm:$0xff]  ;;  %v322_v48 = vld [vmem:[%s7640_s18 + $0x128] sm:$0xff]  ;;  %v323_v53 = vld [vmem:[%s7640_s18 + $0x130] sm:$0xff] }
  0x30   : > { %v833_v44 = vld [vmem:[%s7645_s21 + $0x120] sm:$0xff]  ;;  %v834_v49 = vld [vmem:[%s7645_s21 + $0x128] sm:$0xff]  ;;  %v835_v54 = vld [vmem:[%s7645_s21 + $0x130] sm:$0xff] }
  0x31   : > { %v2344_v11 = vadd.f32 %v2343_v6, %v1832_v0  ;;  %v1335_v0 = vsub.f32 %v311_v57, %v823_v58  ;;  %v1846_v6 = vmul.f32 %v1334_v59, %v1334_v59  ;;  %v324_v58 = vld [vmem:[%s7640_s18 + $0x138] sm:$0xff] }
  0x32   : > { %v836_v59 = vld [vmem:[%s7645_s21 + $0x138] sm:$0xff] }
  0x33   : > { %v2345_v16 = vadd.f32 %v2344_v11, %v1833_v5  ;;  %v1336_v5 = vsub.f32 %v312_v62, %v824_v63  ;;  %v1847_v11 = vmul.f32 %v1335_v0, %v1335_v0  ;;  %v325_v63 = vld [vmem:[%s7640_s18 + $0x140] sm:$0xff] }
  0x34   : > { %v837_v0 = vld [vmem:[%s7645_s21 + $0x140] sm:$0xff] }
  0x35   : > { %v2346_v21 = vadd.f32 %v2345_v16, %v1834_v10  ;;  %v1337_v10 = vsub.f32 %v313_v3, %v825_v4  ;;  %v1848_v16 = vmul.f32 %v1336_v5, %v1336_v5  ;;  %v326_v4 = vld [vmem:[%s7640_s18 + $0x148] sm:$0xff] }
  0x36   : > { %v838_v5 = vld [vmem:[%s7645_s21 + $0x148] sm:$0xff] }
  0x37   : > { %v2347_v26 = vadd.f32 %v2346_v21, %v1835_v15  ;;  %v1338_v15 = vsub.f32 %v314_v8, %v826_v9  ;;  %v1849_v21 = vmul.f32 %v1337_v10, %v1337_v10  ;;  %v327_v9 = vld [vmem:[%s7640_s18 + $0x150] sm:$0xff] }
  0x38   : > { %v839_v10 = vld [vmem:[%s7645_s21 + $0x150] sm:$0xff] }
  0x39   : > { %v2348_v31 = vadd.f32 %v2347_v26, %v1836_v20  ;;  %v1339_v20 = vsub.f32 %v315_v13, %v827_v14  ;;  %v1850_v26 = vmul.f32 %v1338_v15, %v1338_v15  ;;  %v328_v14 = vld [vmem:[%s7640_s18 + $0x158] sm:$0xff] }
  0x3a   : > { %v840_v15 = vld [vmem:[%s7645_s21 + $0x158] sm:$0xff] }
  0x3b   : > { %v2349_v36 = vadd.f32 %v2348_v31, %v1837_v25  ;;  %v1340_v25 = vsub.f32 %v316_v18, %v828_v19  ;;  %v1851_v31 = vmul.f32 %v1339_v20, %v1339_v20  ;;  %v329_v19 = vld [vmem:[%s7640_s18 + $0x160] sm:$0xff] }
  0x3c   : > { %v841_v20 = vld [vmem:[%s7645_s21 + $0x160] sm:$0xff] }
  0x3d   : > { %v2350_v41 = vadd.f32 %v2349_v36, %v1838_v30  ;;  %v1341_v30 = vsub.f32 %v317_v23, %v829_v24  ;;  %v1852_v36 = vmul.f32 %v1340_v25, %v1340_v25  ;;  %v330_v24 = vld [vmem:[%s7640_s18 + $0x168] sm:$0xff] }
  0x3e   : > { %v842_v25 = vld [vmem:[%s7645_s21 + $0x168] sm:$0xff] }
  0x3f   : > { %v2351_v46 = vadd.f32 %v2350_v41, %v1839_v35  ;;  %v1342_v35 = vsub.f32 %v318_v28, %v830_v29  ;;  %v1853_v41 = vmul.f32 %v1341_v30, %v1341_v30  ;;  %v331_v29 = vld [vmem:[%s7640_s18 + $0x170] sm:$0xff] }
  0x40   : > { %v843_v30 = vld [vmem:[%s7645_s21 + $0x170] sm:$0xff] }
  0x41   : > { %v2352_v51 = vadd.f32 %v2351_v46, %v1840_v40  ;;  %v1343_v40 = vsub.f32 %v319_v33, %v831_v34  ;;  %v1854_v46 = vmul.f32 %v1342_v35, %v1342_v35  ;;  %v332_v34 = vld [vmem:[%s7640_s18 + $0x178] sm:$0xff] }
  0x42   : > { %v844_v35 = vld [vmem:[%s7645_s21 + $0x178] sm:$0xff] }
  0x43   : > { %v2353_v56 = vadd.f32 %v2352_v51, %v1841_v45  ;;  %v1344_v45 = vsub.f32 %v320_v38, %v832_v39  ;;  %v1855_v51 = vmul.f32 %v1343_v40, %v1343_v40  ;;  %v333_v39 = vld [vmem:[%s7640_s18 + $0x180] sm:$0xff] }
  0x44   : > { %v845_v40 = vld [vmem:[%s7645_s21 + $0x180] sm:$0xff] }
  0x45   : > { %v2354_v61 = vadd.f32 %v2353_v56, %v1842_v50  ;;  %v1345_v50 = vsub.f32 %v321_v43, %v833_v44  ;;  %v1856_v56 = vmul.f32 %v1344_v45, %v1344_v45  ;;  %v334_v44 = vld [vmem:[%s7640_s18 + $0x188] sm:$0xff] }
  0x46   : > { %v846_v45 = vld [vmem:[%s7645_s21 + $0x188] sm:$0xff] }
  0x47   : > { %v2355_v2 = vadd.f32 %v2354_v61, %v1843_v55  ;;  %v1346_v55 = vsub.f32 %v322_v48, %v834_v49  ;;  %v1857_v61 = vmul.f32 %v1345_v50, %v1345_v50  ;;  %v335_v49 = vld [vmem:[%s7640_s18 + $0x190] sm:$0xff] }
  0x48   : > { %v847_v50 = vld [vmem:[%s7645_s21 + $0x190] sm:$0xff] }
  0x49   : > { %v2356_v7 = vadd.f32 %v2355_v2, %v1844_v60  ;;  %v1347_v60 = vsub.f32 %v323_v53, %v835_v54  ;;  %v1858_v2 = vmul.f32 %v1346_v55, %v1346_v55  ;;  %v336_v54 = vld [vmem:[%s7640_s18 + $0x198] sm:$0xff] }
  0x4a   : > { %v848_v55 = vld [vmem:[%s7645_s21 + $0x198] sm:$0xff] }
  0x4b   : > { %v2357_v12 = vadd.f32 %v2356_v7, %v1845_v1  ;;  %v1348_v1 = vsub.f32 %v324_v58, %v836_v59  ;;  %v1859_v7 = vmul.f32 %v1347_v60, %v1347_v60  ;;  %v337_v59 = vld [vmem:[%s7640_s18 + $0x1a0] sm:$0xff] }
  0x4c   : > { %v849_v60 = vld [vmem:[%s7645_s21 + $0x1a0] sm:$0xff] }
  0x4d   : > { %v2358_v17 = vadd.f32 %v2357_v12, %v1846_v6  ;;  %v1349_v6 = vsub.f32 %v325_v63, %v837_v0  ;;  %v1860_v12 = vmul.f32 %v1348_v1, %v1348_v1  ;;  %v338_v0 = vld [vmem:[%s7640_s18 + $0x1a8] sm:$0xff] }
  0x4e   : > { %v850_v1 = vld [vmem:[%s7645_s21 + $0x1a8] sm:$0xff] }
  0x4f   : > { %v2359_v22 = vadd.f32 %v2358_v17, %v1847_v11  ;;  %v1350_v11 = vsub.f32 %v326_v4, %v838_v5  ;;  %v1861_v17 = vmul.f32 %v1349_v6, %v1349_v6  ;;  %v339_v5 = vld [vmem:[%s7640_s18 + $0x1b0] sm:$0xff] }
  0x50   : > { %v851_v6 = vld [vmem:[%s7645_s21 + $0x1b0] sm:$0xff] }
  0x51   : > { %v2360_v27 = vadd.f32 %v2359_v22, %v1848_v16  ;;  %v1351_v16 = vsub.f32 %v327_v9, %v839_v10  ;;  %v1862_v22 = vmul.f32 %v1350_v11, %v1350_v11  ;;  %v340_v10 = vld [vmem:[%s7640_s18 + $0x1b8] sm:$0xff] }
  0x52   : > { %v852_v11 = vld [vmem:[%s7645_s21 + $0x1b8] sm:$0xff] }
  0x53   : > { %v2361_v32 = vadd.f32 %v2360_v27, %v1849_v21  ;;  %v1352_v21 = vsub.f32 %v328_v14, %v840_v15  ;;  %v1863_v27 = vmul.f32 %v1351_v16, %v1351_v16  ;;  %v341_v15 = vld [vmem:[%s7640_s18 + $0x1c0] sm:$0xff] }
  0x54   : > { %v853_v16 = vld [vmem:[%s7645_s21 + $0x1c0] sm:$0xff] }
  0x55   : > { %v2362_v37 = vadd.f32 %v2361_v32, %v1850_v26  ;;  %v1353_v26 = vsub.f32 %v329_v19, %v841_v20  ;;  %v1864_v32 = vmul.f32 %v1352_v21, %v1352_v21  ;;  %v342_v20 = vld [vmem:[%s7640_s18 + $0x1c8] sm:$0xff] }
  0x56   : > { %v854_v21 = vld [vmem:[%s7645_s21 + $0x1c8] sm:$0xff] }
  0x57   : > { %v2363_v42 = vadd.f32 %v2362_v37, %v1851_v31  ;;  %v1354_v31 = vsub.f32 %v330_v24, %v842_v25  ;;  %v1865_v37 = vmul.f32 %v1353_v26, %v1353_v26  ;;  %v343_v25 = vld [vmem:[%s7640_s18 + $0x1d0] sm:$0xff] }
  0x58   : > { %v855_v26 = vld [vmem:[%s7645_s21 + $0x1d0] sm:$0xff] }
  0x59   : > { %v2364_v47 = vadd.f32 %v2363_v42, %v1852_v36  ;;  %v1355_v36 = vsub.f32 %v331_v29, %v843_v30  ;;  %v1866_v42 = vmul.f32 %v1354_v31, %v1354_v31  ;;  %v344_v30 = vld [vmem:[%s7640_s18 + $0x1d8] sm:$0xff] }
  0x5a   : > { %v856_v31 = vld [vmem:[%s7645_s21 + $0x1d8] sm:$0xff] }
  0x5b   : > { %v2365_v52 = vadd.f32 %v2364_v47, %v1853_v41  ;;  %v1356_v41 = vsub.f32 %v332_v34, %v844_v35  ;;  %v1867_v47 = vmul.f32 %v1355_v36, %v1355_v36  ;;  %v345_v35 = vld [vmem:[%s7640_s18 + $0x1e0] sm:$0xff] }
  0x5c   : > { %v857_v36 = vld [vmem:[%s7645_s21 + $0x1e0] sm:$0xff] }
  0x5d   : > { %v2366_v57 = vadd.f32 %v2365_v52, %v1854_v46  ;;  %v1357_v46 = vsub.f32 %v333_v39, %v845_v40  ;;  %v1868_v52 = vmul.f32 %v1356_v41, %v1356_v41  ;;  %v346_v40 = vld [vmem:[%s7640_s18 + $0x1e8] sm:$0xff] }
  0x5e   : > { %v858_v41 = vld [vmem:[%s7645_s21 + $0x1e8] sm:$0xff] }
  0x5f   : > { %v2367_v62 = vadd.f32 %v2366_v57, %v1855_v51  ;;  %v1358_v51 = vsub.f32 %v334_v44, %v846_v45  ;;  %v1869_v57 = vmul.f32 %v1357_v46, %v1357_v46  ;;  %v347_v45 = vld [vmem:[%s7640_s18 + $0x1f0] sm:$0xff] }
  0x60   : > { %v859_v46 = vld [vmem:[%s7645_s21 + $0x1f0] sm:$0xff] }
  0x61   : > { %v2368_v3 = vadd.f32 %v2367_v62, %v1856_v56  ;;  %v1359_v56 = vsub.f32 %v335_v49, %v847_v50  ;;  %v1870_v62 = vmul.f32 %v1358_v51, %v1358_v51  ;;  %v348_v50 = vld [vmem:[%s7640_s18 + $0x1f8] sm:$0xff] }
  0x62   : > { %v860_v51 = vld [vmem:[%s7645_s21 + $0x1f8] sm:$0xff] }
  0x63   : > { %v2369_v8 = vadd.f32 %v2368_v3, %v1857_v61  ;;  %v1360_v61 = vsub.f32 %v336_v54, %v848_v55  ;;  %v1871_v3 = vmul.f32 %v1359_v56, %v1359_v56  ;;  %v349_v55 = vld [vmem:[%s7640_s18 + $0x200] sm:$0xff] }
  0x64   : > { %v861_v56 = vld [vmem:[%s7645_s21 + $0x200] sm:$0xff] }
  0x65   : > { %v2370_v13 = vadd.f32 %v2369_v8, %v1858_v2  ;;  %v1361_v2 = vsub.f32 %v337_v59, %v849_v60  ;;  %v1872_v8 = vmul.f32 %v1360_v61, %v1360_v61  ;;  %v350_v60 = vld [vmem:[%s7640_s18 + $0x208] sm:$0xff] }
  0x66   : > { %v862_v61 = vld [vmem:[%s7645_s21 + $0x208] sm:$0xff] }
  0x67   : > { %v2371_v18 = vadd.f32 %v2370_v13, %v1859_v7  ;;  %v1362_v7 = vsub.f32 %v338_v0, %v850_v1  ;;  %v1873_v13 = vmul.f32 %v1361_v2, %v1361_v2  ;;  %v351_v1 = vld [vmem:[%s7640_s18 + $0x210] sm:$0xff] }
  0x68   : > { %v863_v2 = vld [vmem:[%s7645_s21 + $0x210] sm:$0xff] }
  0x69   : > { %v2372_v23 = vadd.f32 %v2371_v18, %v1860_v12  ;;  %v1363_v12 = vsub.f32 %v339_v5, %v851_v6  ;;  %v1874_v18 = vmul.f32 %v1362_v7, %v1362_v7  ;;  %v352_v6 = vld [vmem:[%s7640_s18 + $0x218] sm:$0xff] }
  0x6a   : > { %v864_v7 = vld [vmem:[%s7645_s21 + $0x218] sm:$0xff] }
  0x6b   : > { %v2373_v28 = vadd.f32 %v2372_v23, %v1861_v17  ;;  %v1364_v17 = vsub.f32 %v340_v10, %v852_v11  ;;  %v1875_v23 = vmul.f32 %v1363_v12, %v1363_v12  ;;  %v353_v11 = vld [vmem:[%s7640_s18 + $0x220] sm:$0xff] }
  0x6c   : > { %v865_v12 = vld [vmem:[%s7645_s21 + $0x220] sm:$0xff] }
  0x6d   : > { %v2374_v33 = vadd.f32 %v2373_v28, %v1862_v22  ;;  %v1365_v22 = vsub.f32 %v341_v15, %v853_v16  ;;  %v1876_v28 = vmul.f32 %v1364_v17, %v1364_v17  ;;  %v354_v16 = vld [vmem:[%s7640_s18 + $0x228] sm:$0xff] }
  0x6e   : > { %v866_v17 = vld [vmem:[%s7645_s21 + $0x228] sm:$0xff] }
  0x6f   : > { %v2375_v38 = vadd.f32 %v2374_v33, %v1863_v27  ;;  %v1366_v27 = vsub.f32 %v342_v20, %v854_v21  ;;  %v1877_v33 = vmul.f32 %v1365_v22, %v1365_v22  ;;  %v355_v21 = vld [vmem:[%s7640_s18 + $0x230] sm:$0xff] }
  0x70   : > { %v867_v22 = vld [vmem:[%s7645_s21 + $0x230] sm:$0xff] }
  0x71   : > { %v2376_v43 = vadd.f32 %v2375_v38, %v1864_v32  ;;  %v1367_v32 = vsub.f32 %v343_v25, %v855_v26  ;;  %v1878_v38 = vmul.f32 %v1366_v27, %v1366_v27  ;;  %v356_v26 = vld [vmem:[%s7640_s18 + $0x238] sm:$0xff] }
  0x72   : > { %v868_v27 = vld [vmem:[%s7645_s21 + $0x238] sm:$0xff] }
  0x73   : > { %v2377_v48 = vadd.f32 %v2376_v43, %v1865_v37  ;;  %v1368_v37 = vsub.f32 %v344_v30, %v856_v31  ;;  %v1879_v43 = vmul.f32 %v1367_v32, %v1367_v32  ;;  %v357_v31 = vld [vmem:[%s7640_s18 + $0x240] sm:$0xff] }
  0x74   : > { %v869_v32 = vld [vmem:[%s7645_s21 + $0x240] sm:$0xff] }
  0x75   : > { %v2378_v53 = vadd.f32 %v2377_v48, %v1866_v42  ;;  %v1369_v42 = vsub.f32 %v345_v35, %v857_v36  ;;  %v1880_v48 = vmul.f32 %v1368_v37, %v1368_v37  ;;  %v358_v36 = vld [vmem:[%s7640_s18 + $0x248] sm:$0xff] }
  0x76   : > { %v870_v37 = vld [vmem:[%s7645_s21 + $0x248] sm:$0xff] }
  0x77   : > { %v2379_v58 = vadd.f32 %v2378_v53, %v1867_v47  ;;  %v1370_v47 = vsub.f32 %v346_v40, %v858_v41  ;;  %v1881_v53 = vmul.f32 %v1369_v42, %v1369_v42  ;;  %v359_v41 = vld [vmem:[%s7640_s18 + $0x250] sm:$0xff] }
  0x78   : > { %v871_v42 = vld [vmem:[%s7645_s21 + $0x250] sm:$0xff] }
  0x79   : > { %v2380_v63 = vadd.f32 %v2379_v58, %v1868_v52  ;;  %v1371_v52 = vsub.f32 %v347_v45, %v859_v46  ;;  %v1882_v58 = vmul.f32 %v1370_v47, %v1370_v47  ;;  %v360_v46 = vld [vmem:[%s7640_s18 + $0x258] sm:$0xff] }
  0x7a   : > { %v872_v47 = vld [vmem:[%s7645_s21 + $0x258] sm:$0xff] }
  0x7b   : > { %v2381_v4 = vadd.f32 %v2380_v63, %v1869_v57  ;;  %v1372_v57 = vsub.f32 %v348_v50, %v860_v51  ;;  %v1883_v63 = vmul.f32 %v1371_v52, %v1371_v52  ;;  %v361_v51 = vld [vmem:[%s7640_s18 + $0x260] sm:$0xff] }
  0x7c   : > { %v873_v52 = vld [vmem:[%s7645_s21 + $0x260] sm:$0xff] }
  0x7d   : > { %v2382_v9 = vadd.f32 %v2381_v4, %v1870_v62  ;;  %v1373_v62 = vsub.f32 %v349_v55, %v861_v56  ;;  %v1884_v4 = vmul.f32 %v1372_v57, %v1372_v57  ;;  %v362_v56 = vld [vmem:[%s7640_s18 + $0x268] sm:$0xff] }
  0x7e   : > { %v874_v57 = vld [vmem:[%s7645_s21 + $0x268] sm:$0xff] }
  0x7f   : > { %v2383_v14 = vadd.f32 %v2382_v9, %v1871_v3  ;;  %v1374_v3 = vsub.f32 %v350_v60, %v862_v61  ;;  %v1885_v9 = vmul.f32 %v1373_v62, %v1373_v62  ;;  %v363_v61 = vld [vmem:[%s7640_s18 + $0x270] sm:$0xff] }
  0x80   : > { %v875_v62 = vld [vmem:[%s7645_s21 + $0x270] sm:$0xff] }
  0x81   : > { %v2384_v19 = vadd.f32 %v2383_v14, %v1872_v8  ;;  %v1375_v8 = vsub.f32 %v351_v1, %v863_v2  ;;  %v1886_v14 = vmul.f32 %v1374_v3, %v1374_v3  ;;  %v364_v2 = vld [vmem:[%s7640_s18 + $0x278] sm:$0xff] }
  0x82   : > { %v876_v3 = vld [vmem:[%s7645_s21 + $0x278] sm:$0xff] }
  0x83   : > { %v2385_v24 = vadd.f32 %v2384_v19, %v1873_v13  ;;  %v1376_v13 = vsub.f32 %v352_v6, %v864_v7  ;;  %v1887_v19 = vmul.f32 %v1375_v8, %v1375_v8  ;;  %v365_v7 = vld [vmem:[%s7640_s18 + $0x280] sm:$0xff] }
  0x84   : > { %v877_v8 = vld [vmem:[%s7645_s21 + $0x280] sm:$0xff] }
  0x85   : > { %v2386_v29 = vadd.f32 %v2385_v24, %v1874_v18  ;;  %v1377_v18 = vsub.f32 %v353_v11, %v865_v12  ;;  %v1888_v24 = vmul.f32 %v1376_v13, %v1376_v13  ;;  %v366_v12 = vld [vmem:[%s7640_s18 + $0x288] sm:$0xff] }
  0x86   : > { %v878_v13 = vld [vmem:[%s7645_s21 + $0x288] sm:$0xff] }
  0x87   : > { %v2387_v34 = vadd.f32 %v2386_v29, %v1875_v23  ;;  %v1378_v23 = vsub.f32 %v354_v16, %v866_v17  ;;  %v1889_v29 = vmul.f32 %v1377_v18, %v1377_v18  ;;  %v367_v17 = vld [vmem:[%s7640_s18 + $0x290] sm:$0xff] }
  0x88   : > { %v879_v18 = vld [vmem:[%s7645_s21 + $0x290] sm:$0xff] }
  0x89   : > { %v2388_v39 = vadd.f32 %v2387_v34, %v1876_v28  ;;  %v1379_v28 = vsub.f32 %v355_v21, %v867_v22  ;;  %v1890_v34 = vmul.f32 %v1378_v23, %v1378_v23  ;;  %v368_v22 = vld [vmem:[%s7640_s18 + $0x298] sm:$0xff] }
  0x8a   : > { %v880_v23 = vld [vmem:[%s7645_s21 + $0x298] sm:$0xff] }
  0x8b   : > { %v2389_v44 = vadd.f32 %v2388_v39, %v1877_v33  ;;  %v1380_v33 = vsub.f32 %v356_v26, %v868_v27  ;;  %v1891_v39 = vmul.f32 %v1379_v28, %v1379_v28  ;;  %v369_v27 = vld [vmem:[%s7640_s18 + $0x2a0] sm:$0xff] }
  0x8c   : > { %v881_v28 = vld [vmem:[%s7645_s21 + $0x2a0] sm:$0xff] }
  0x8d   : > { %v2390_v49 = vadd.f32 %v2389_v44, %v1878_v38  ;;  %v1381_v38 = vsub.f32 %v357_v31, %v869_v32  ;;  %v1892_v44 = vmul.f32 %v1380_v33, %v1380_v33  ;;  %v370_v32 = vld [vmem:[%s7640_s18 + $0x2a8] sm:$0xff] }
  0x8e   : > { %v882_v33 = vld [vmem:[%s7645_s21 + $0x2a8] sm:$0xff] }
  0x8f   : > { %v2391_v54 = vadd.f32 %v2390_v49, %v1879_v43  ;;  %v1382_v43 = vsub.f32 %v358_v36, %v870_v37  ;;  %v1893_v49 = vmul.f32 %v1381_v38, %v1381_v38  ;;  %v371_v37 = vld [vmem:[%s7640_s18 + $0x2b0] sm:$0xff] }
  0x90   : > { %v883_v38 = vld [vmem:[%s7645_s21 + $0x2b0] sm:$0xff] }
  0x91   : > { %v2392_v59 = vadd.f32 %v2391_v54, %v1880_v48  ;;  %v1383_v48 = vsub.f32 %v359_v41, %v871_v42  ;;  %v1894_v54 = vmul.f32 %v1382_v43, %v1382_v43  ;;  %v372_v42 = vld [vmem:[%s7640_s18 + $0x2b8] sm:$0xff] }
  0x92   : > { %v884_v43 = vld [vmem:[%s7645_s21 + $0x2b8] sm:$0xff] }
  0x93   : > { %v2393_v0 = vadd.f32 %v2392_v59, %v1881_v53  ;;  %v1384_v53 = vsub.f32 %v360_v46, %v872_v47  ;;  %v1895_v59 = vmul.f32 %v1383_v48, %v1383_v48  ;;  %v373_v47 = vld [vmem:[%s7640_s18 + $0x2c0] sm:$0xff] }
  0x94   : > { %v885_v48 = vld [vmem:[%s7645_s21 + $0x2c0] sm:$0xff] }
  0x95   : > { %v2394_v5 = vadd.f32 %v2393_v0, %v1882_v58  ;;  %v1385_v58 = vsub.f32 %v361_v51, %v873_v52  ;;  %v1896_v0 = vmul.f32 %v1384_v53, %v1384_v53  ;;  %v374_v52 = vld [vmem:[%s7640_s18 + $0x2c8] sm:$0xff] }
  0x96   : > { %v886_v53 = vld [vmem:[%s7645_s21 + $0x2c8] sm:$0xff] }
  0x97   : > { %v2395_v10 = vadd.f32 %v2394_v5, %v1883_v63  ;;  %v1386_v63 = vsub.f32 %v362_v56, %v874_v57  ;;  %v1897_v5 = vmul.f32 %v1385_v58, %v1385_v58  ;;  %v375_v57 = vld [vmem:[%s7640_s18 + $0x2d0] sm:$0xff] }
  0x98   : > { %v887_v58 = vld [vmem:[%s7645_s21 + $0x2d0] sm:$0xff] }
  0x99   : > { %v2396_v15 = vadd.f32 %v2395_v10, %v1884_v4  ;;  %v1387_v4 = vsub.f32 %v363_v61, %v875_v62  ;;  %v1898_v10 = vmul.f32 %v1386_v63, %v1386_v63  ;;  %v376_v62 = vld [vmem:[%s7640_s18 + $0x2d8] sm:$0xff] }
  0x9a   : > { %v888_v63 = vld [vmem:[%s7645_s21 + $0x2d8] sm:$0xff] }
  0x9b   : > { %v2397_v20 = vadd.f32 %v2396_v15, %v1885_v9  ;;  %v1388_v9 = vsub.f32 %v364_v2, %v876_v3  ;;  %v1899_v15 = vmul.f32 %v1387_v4, %v1387_v4  ;;  %v377_v3 = vld [vmem:[%s7640_s18 + $0x2e0] sm:$0xff] }
  0x9c   : > { %v889_v4 = vld [vmem:[%s7645_s21 + $0x2e0] sm:$0xff] }
  0x9d   : > { %v2398_v25 = vadd.f32 %v2397_v20, %v1886_v14  ;;  %v1389_v14 = vsub.f32 %v365_v7, %v877_v8  ;;  %v1900_v20 = vmul.f32 %v1388_v9, %v1388_v9  ;;  %v378_v8 = vld [vmem:[%s7640_s18 + $0x2e8] sm:$0xff] }
  0x9e   : > { %v890_v9 = vld [vmem:[%s7645_s21 + $0x2e8] sm:$0xff] }
  0x9f   : > { %v2399_v30 = vadd.f32 %v2398_v25, %v1887_v19  ;;  %v1390_v19 = vsub.f32 %v366_v12, %v878_v13  ;;  %v1901_v25 = vmul.f32 %v1389_v14, %v1389_v14  ;;  %v379_v13 = vld [vmem:[%s7640_s18 + $0x2f0] sm:$0xff] }
  0xa0   : > { %v891_v14 = vld [vmem:[%s7645_s21 + $0x2f0] sm:$0xff] }
  0xa1   : > { %v2400_v35 = vadd.f32 %v2399_v30, %v1888_v24  ;;  %v1391_v24 = vsub.f32 %v367_v17, %v879_v18  ;;  %v1902_v30 = vmul.f32 %v1390_v19, %v1390_v19  ;;  %v380_v18 = vld [vmem:[%s7640_s18 + $0x2f8] sm:$0xff] }
  0xa2   : > { %v892_v19 = vld [vmem:[%s7645_s21 + $0x2f8] sm:$0xff] }
  0xa3   : > { %v2401_v40 = vadd.f32 %v2400_v35, %v1889_v29  ;;  %v1392_v29 = vsub.f32 %v368_v22, %v880_v23  ;;  %v1903_v35 = vmul.f32 %v1391_v24, %v1391_v24  ;;  %v381_v23 = vld [vmem:[%s7640_s18 + $0x300] sm:$0xff] }
  0xa4   : > { %v893_v24 = vld [vmem:[%s7645_s21 + $0x300] sm:$0xff] }
  0xa5   : > { %v2402_v45 = vadd.f32 %v2401_v40, %v1890_v34  ;;  %v1393_v34 = vsub.f32 %v369_v27, %v881_v28  ;;  %v1904_v40 = vmul.f32 %v1392_v29, %v1392_v29  ;;  %v382_v28 = vld [vmem:[%s7640_s18 + $0x308] sm:$0xff] }
  0xa6   : > { %v894_v29 = vld [vmem:[%s7645_s21 + $0x308] sm:$0xff] }
  0xa7   : > { %v2403_v50 = vadd.f32 %v2402_v45, %v1891_v39  ;;  %v1394_v39 = vsub.f32 %v370_v32, %v882_v33  ;;  %v1905_v45 = vmul.f32 %v1393_v34, %v1393_v34  ;;  %v383_v33 = vld [vmem:[%s7640_s18 + $0x310] sm:$0xff] }
  0xa8   : > { %v895_v34 = vld [vmem:[%s7645_s21 + $0x310] sm:$0xff] }
  0xa9   : > { %v2404_v55 = vadd.f32 %v2403_v50, %v1892_v44  ;;  %v1395_v44 = vsub.f32 %v371_v37, %v883_v38  ;;  %v1906_v50 = vmul.f32 %v1394_v39, %v1394_v39  ;;  %v384_v38 = vld [vmem:[%s7640_s18 + $0x318] sm:$0xff] }
  0xaa   : > { %v896_v39 = vld [vmem:[%s7645_s21 + $0x318] sm:$0xff] }
  0xab   : > { %v2405_v60 = vadd.f32 %v2404_v55, %v1893_v49  ;;  %v1396_v49 = vsub.f32 %v372_v42, %v884_v43  ;;  %v1907_v55 = vmul.f32 %v1395_v44, %v1395_v44  ;;  %v385_v43 = vld [vmem:[%s7640_s18 + $0x320] sm:$0xff] }
  0xac   : > { %v897_v44 = vld [vmem:[%s7645_s21 + $0x320] sm:$0xff] }
  0xad   : > { %v2406_v1 = vadd.f32 %v2405_v60, %v1894_v54  ;;  %v1397_v54 = vsub.f32 %v373_v47, %v885_v48  ;;  %v1908_v60 = vmul.f32 %v1396_v49, %v1396_v49  ;;  %v386_v48 = vld [vmem:[%s7640_s18 + $0x328] sm:$0xff] }
  0xae   : > { %v898_v49 = vld [vmem:[%s7645_s21 + $0x328] sm:$0xff] }
  0xaf   : > { %v2407_v6 = vadd.f32 %v2406_v1, %v1895_v59  ;;  %v1398_v59 = vsub.f32 %v374_v52, %v886_v53  ;;  %v1909_v1 = vmul.f32 %v1397_v54, %v1397_v54  ;;  %v387_v53 = vld [vmem:[%s7640_s18 + $0x330] sm:$0xff] }
  0xb0   : > { %v899_v54 = vld [vmem:[%s7645_s21 + $0x330] sm:$0xff] }
  0xb1   : > { %v2408_v11 = vadd.f32 %v2407_v6, %v1896_v0  ;;  %v1399_v0 = vsub.f32 %v375_v57, %v887_v58  ;;  %v1910_v6 = vmul.f32 %v1398_v59, %v1398_v59  ;;  %v388_v58 = vld [vmem:[%s7640_s18 + $0x338] sm:$0xff] }
  0xb2   : > { %v900_v59 = vld [vmem:[%s7645_s21 + $0x338] sm:$0xff] }
  0xb3   : > { %v2409_v16 = vadd.f32 %v2408_v11, %v1897_v5  ;;  %v1400_v5 = vsub.f32 %v376_v62, %v888_v63  ;;  %v1911_v11 = vmul.f32 %v1399_v0, %v1399_v0  ;;  %v389_v63 = vld [vmem:[%s7640_s18 + $0x340] sm:$0xff] }
  0xb4   : > { %v901_v0 = vld [vmem:[%s7645_s21 + $0x340] sm:$0xff] }
  0xb5   : > { %v2410_v21 = vadd.f32 %v2409_v16, %v1898_v10  ;;  %v1401_v10 = vsub.f32 %v377_v3, %v889_v4  ;;  %v1912_v16 = vmul.f32 %v1400_v5, %v1400_v5  ;;  %v390_v4 = vld [vmem:[%s7640_s18 + $0x348] sm:$0xff] }
  0xb6   : > { %v902_v5 = vld [vmem:[%s7645_s21 + $0x348] sm:$0xff] }
  0xb7   : > { %v2411_v26 = vadd.f32 %v2410_v21, %v1899_v15  ;;  %v1402_v15 = vsub.f32 %v378_v8, %v890_v9  ;;  %v1913_v21 = vmul.f32 %v1401_v10, %v1401_v10  ;;  %v391_v9 = vld [vmem:[%s7640_s18 + $0x350] sm:$0xff] }
  0xb8   : > { %v903_v10 = vld [vmem:[%s7645_s21 + $0x350] sm:$0xff] }
  0xb9   : > { %v2412_v31 = vadd.f32 %v2411_v26, %v1900_v20  ;;  %v1403_v20 = vsub.f32 %v379_v13, %v891_v14  ;;  %v1914_v26 = vmul.f32 %v1402_v15, %v1402_v15  ;;  %v392_v14 = vld [vmem:[%s7640_s18 + $0x358] sm:$0xff] }
  0xba   : > { %v904_v15 = vld [vmem:[%s7645_s21 + $0x358] sm:$0xff] }
  0xbb   : > { %v2413_v36 = vadd.f32 %v2412_v31, %v1901_v25  ;;  %v1404_v25 = vsub.f32 %v380_v18, %v892_v19  ;;  %v1915_v31 = vmul.f32 %v1403_v20, %v1403_v20  ;;  %v393_v19 = vld [vmem:[%s7640_s18 + $0x360] sm:$0xff] }
  0xbc   : > { %v905_v20 = vld [vmem:[%s7645_s21 + $0x360] sm:$0xff] }
  0xbd   : > { %v2414_v41 = vadd.f32 %v2413_v36, %v1902_v30  ;;  %v1405_v30 = vsub.f32 %v381_v23, %v893_v24  ;;  %v1916_v36 = vmul.f32 %v1404_v25, %v1404_v25  ;;  %v394_v24 = vld [vmem:[%s7640_s18 + $0x368] sm:$0xff] }
  0xbe   : > { %v906_v25 = vld [vmem:[%s7645_s21 + $0x368] sm:$0xff] }
  0xbf   : > { %v2415_v46 = vadd.f32 %v2414_v41, %v1903_v35  ;;  %v1406_v35 = vsub.f32 %v382_v28, %v894_v29  ;;  %v1917_v41 = vmul.f32 %v1405_v30, %v1405_v30  ;;  %v395_v29 = vld [vmem:[%s7640_s18 + $0x370] sm:$0xff] }
  0xc0   : > { %v907_v30 = vld [vmem:[%s7645_s21 + $0x370] sm:$0xff] }
  0xc1   : > { %v2416_v51 = vadd.f32 %v2415_v46, %v1904_v40  ;;  %v1407_v40 = vsub.f32 %v383_v33, %v895_v34  ;;  %v1918_v46 = vmul.f32 %v1406_v35, %v1406_v35  ;;  %v396_v34 = vld [vmem:[%s7640_s18 + $0x378] sm:$0xff] }
  0xc2   : > { %v908_v35 = vld [vmem:[%s7645_s21 + $0x378] sm:$0xff] }
  0xc3   : > { %v2417_v56 = vadd.f32 %v2416_v51, %v1905_v45  ;;  %v1408_v45 = vsub.f32 %v384_v38, %v896_v39  ;;  %v1919_v51 = vmul.f32 %v1407_v40, %v1407_v40  ;;  %v397_v39 = vld [vmem:[%s7640_s18 + $0x380] sm:$0xff] }
  0xc4   : > { %v909_v40 = vld [vmem:[%s7645_s21 + $0x380] sm:$0xff] }
  0xc5   : > { %v2418_v61 = vadd.f32 %v2417_v56, %v1906_v50  ;;  %v1409_v50 = vsub.f32 %v385_v43, %v897_v44  ;;  %v1920_v56 = vmul.f32 %v1408_v45, %v1408_v45  ;;  %v398_v44 = vld [vmem:[%s7640_s18 + $0x388] sm:$0xff] }
  0xc6   : > { %v910_v45 = vld [vmem:[%s7645_s21 + $0x388] sm:$0xff] }
  0xc7   : > { %v2419_v2 = vadd.f32 %v2418_v61, %v1907_v55  ;;  %v1410_v55 = vsub.f32 %v386_v48, %v898_v49  ;;  %v1921_v61 = vmul.f32 %v1409_v50, %v1409_v50  ;;  %v399_v49 = vld [vmem:[%s7640_s18 + $0x390] sm:$0xff] }
  0xc8   : > { %v911_v50 = vld [vmem:[%s7645_s21 + $0x390] sm:$0xff] }
  0xc9   : > { %v2420_v7 = vadd.f32 %v2419_v2, %v1908_v60  ;;  %v1411_v60 = vsub.f32 %v387_v53, %v899_v54  ;;  %v1922_v2 = vmul.f32 %v1410_v55, %v1410_v55  ;;  %v400_v54 = vld [vmem:[%s7640_s18 + $0x398] sm:$0xff] }
  0xca   : > { %v912_v55 = vld [vmem:[%s7645_s21 + $0x398] sm:$0xff] }
  0xcb   : > { %v2421_v12 = vadd.f32 %v2420_v7, %v1909_v1  ;;  %v1412_v1 = vsub.f32 %v388_v58, %v900_v59  ;;  %v1923_v7 = vmul.f32 %v1411_v60, %v1411_v60  ;;  %v401_v59 = vld [vmem:[%s7640_s18 + $0x3a0] sm:$0xff] }
  0xcc   : > { %v913_v60 = vld [vmem:[%s7645_s21 + $0x3a0] sm:$0xff] }
  0xcd   : > { %v2422_v17 = vadd.f32 %v2421_v12, %v1910_v6  ;;  %v1413_v6 = vsub.f32 %v389_v63, %v901_v0  ;;  %v1924_v12 = vmul.f32 %v1412_v1, %v1412_v1  ;;  %v402_v0 = vld [vmem:[%s7640_s18 + $0x3a8] sm:$0xff] }
  0xce   : > { %v914_v1 = vld [vmem:[%s7645_s21 + $0x3a8] sm:$0xff] }
  0xcf   : > { %v2423_v22 = vadd.f32 %v2422_v17, %v1911_v11  ;;  %v1414_v11 = vsub.f32 %v390_v4, %v902_v5  ;;  %v1925_v17 = vmul.f32 %v1413_v6, %v1413_v6  ;;  %v403_v5 = vld [vmem:[%s7640_s18 + $0x3b0] sm:$0xff] }
  0xd0   : > { %v915_v6 = vld [vmem:[%s7645_s21 + $0x3b0] sm:$0xff] }
  0xd1   : > { %v2424_v27 = vadd.f32 %v2423_v22, %v1912_v16  ;;  %v1415_v16 = vsub.f32 %v391_v9, %v903_v10  ;;  %v1926_v22 = vmul.f32 %v1414_v11, %v1414_v11  ;;  %v404_v10 = vld [vmem:[%s7640_s18 + $0x3b8] sm:$0xff] }
  0xd2   : > { %v916_v11 = vld [vmem:[%s7645_s21 + $0x3b8] sm:$0xff] }
  0xd3   : > { %v2425_v32 = vadd.f32 %v2424_v27, %v1913_v21  ;;  %v1416_v21 = vsub.f32 %v392_v14, %v904_v15  ;;  %v1927_v27 = vmul.f32 %v1415_v16, %v1415_v16  ;;  %v405_v15 = vld [vmem:[%s7640_s18 + $0x3c0] sm:$0xff] }
  0xd4   : > { %v917_v16 = vld [vmem:[%s7645_s21 + $0x3c0] sm:$0xff] }
  0xd5   : > { %v2426_v37 = vadd.f32 %v2425_v32, %v1914_v26  ;;  %v1417_v26 = vsub.f32 %v393_v19, %v905_v20  ;;  %v1928_v32 = vmul.f32 %v1416_v21, %v1416_v21  ;;  %v406_v20 = vld [vmem:[%s7640_s18 + $0x3c8] sm:$0xff] }
  0xd6   : > { %v918_v21 = vld [vmem:[%s7645_s21 + $0x3c8] sm:$0xff] }
  0xd7   : > { %v2427_v42 = vadd.f32 %v2426_v37, %v1915_v31  ;;  %v1418_v31 = vsub.f32 %v394_v24, %v906_v25  ;;  %v1929_v37 = vmul.f32 %v1417_v26, %v1417_v26  ;;  %v407_v25 = vld [vmem:[%s7640_s18 + $0x3d0] sm:$0xff] }
  0xd8   : > { %v919_v26 = vld [vmem:[%s7645_s21 + $0x3d0] sm:$0xff] }
  0xd9   : > { %v2428_v47 = vadd.f32 %v2427_v42, %v1916_v36  ;;  %v1419_v36 = vsub.f32 %v395_v29, %v907_v30  ;;  %v1930_v42 = vmul.f32 %v1418_v31, %v1418_v31  ;;  %v408_v30 = vld [vmem:[%s7640_s18 + $0x3d8] sm:$0xff] }
  0xda   : > { %v920_v31 = vld [vmem:[%s7645_s21 + $0x3d8] sm:$0xff] }
  0xdb   : > { %v2429_v52 = vadd.f32 %v2428_v47, %v1917_v41  ;;  %v1420_v41 = vsub.f32 %v396_v34, %v908_v35  ;;  %v1931_v47 = vmul.f32 %v1419_v36, %v1419_v36  ;;  %v409_v35 = vld [vmem:[%s7640_s18 + $0x3e0] sm:$0xff] }
  0xdc   : > { %v921_v36 = vld [vmem:[%s7645_s21 + $0x3e0] sm:$0xff] }
  0xdd   : > { %v2430_v57 = vadd.f32 %v2429_v52, %v1918_v46  ;;  %v1421_v46 = vsub.f32 %v397_v39, %v909_v40  ;;  %v1932_v52 = vmul.f32 %v1420_v41, %v1420_v41  ;;  %v410_v40 = vld [vmem:[%s7640_s18 + $0x3e8] sm:$0xff] }
  0xde   : > { %v922_v41 = vld [vmem:[%s7645_s21 + $0x3e8] sm:$0xff] }
  0xdf   : > { %v2431_v62 = vadd.f32 %v2430_v57, %v1919_v51  ;;  %v1422_v51 = vsub.f32 %v398_v44, %v910_v45  ;;  %v1933_v57 = vmul.f32 %v1421_v46, %v1421_v46  ;;  %v411_v45 = vld [vmem:[%s7640_s18 + $0x3f0] sm:$0xff] }
  0xe0   : > { %v923_v46 = vld [vmem:[%s7645_s21 + $0x3f0] sm:$0xff] }
  0xe1   : > { %v2432_v3 = vadd.f32 %v2431_v62, %v1920_v56  ;;  %v1423_v56 = vsub.f32 %v399_v49, %v911_v50  ;;  %v1934_v62 = vmul.f32 %v1422_v51, %v1422_v51  ;;  %v412_v50 = vld [vmem:[%s7640_s18 + $0x3f8] sm:$0xff] }
  0xe2   : > { %v924_v51 = vld [vmem:[%s7645_s21 + $0x3f8] sm:$0xff] }
  0xe3   : > { %v2433_v8 = vadd.f32 %v2432_v3, %v1921_v61  ;;  %v1424_v61 = vsub.f32 %v400_v54, %v912_v55  ;;  %v1935_v3 = vmul.f32 %v1423_v56, %v1423_v56  ;;  %v413_v55 = vld [vmem:[%s7640_s18 + $0x400] sm:$0xff] }
  0xe4   : > { %v925_v56 = vld [vmem:[%s7645_s21 + $0x400] sm:$0xff] }
  0xe5   : > { %v2434_v13 = vadd.f32 %v2433_v8, %v1922_v2  ;;  %v1425_v2 = vsub.f32 %v401_v59, %v913_v60  ;;  %v1936_v8 = vmul.f32 %v1424_v61, %v1424_v61  ;;  %v414_v60 = vld [vmem:[%s7640_s18 + $0x408] sm:$0xff] }
  0xe6   : > { %v926_v61 = vld [vmem:[%s7645_s21 + $0x408] sm:$0xff] }
  0xe7   : > { %v2435_v18 = vadd.f32 %v2434_v13, %v1923_v7  ;;  %v1426_v7 = vsub.f32 %v402_v0, %v914_v1  ;;  %v1937_v13 = vmul.f32 %v1425_v2, %v1425_v2  ;;  %v415_v1 = vld [vmem:[%s7640_s18 + $0x410] sm:$0xff] }
  0xe8   : > { %v927_v2 = vld [vmem:[%s7645_s21 + $0x410] sm:$0xff] }
  0xe9   : > { %v2436_v23 = vadd.f32 %v2435_v18, %v1924_v12  ;;  %v1427_v12 = vsub.f32 %v403_v5, %v915_v6  ;;  %v1938_v18 = vmul.f32 %v1426_v7, %v1426_v7  ;;  %v416_v6 = vld [vmem:[%s7640_s18 + $0x418] sm:$0xff] }
  0xea   : > { %v928_v7 = vld [vmem:[%s7645_s21 + $0x418] sm:$0xff] }
  0xeb   : > { %v2437_v28 = vadd.f32 %v2436_v23, %v1925_v17  ;;  %v1428_v17 = vsub.f32 %v404_v10, %v916_v11  ;;  %v1939_v23 = vmul.f32 %v1427_v12, %v1427_v12  ;;  %v417_v11 = vld [vmem:[%s7640_s18 + $0x420] sm:$0xff] }
  0xec   : > { %v929_v12 = vld [vmem:[%s7645_s21 + $0x420] sm:$0xff] }
  0xed   : > { %v2438_v33 = vadd.f32 %v2437_v28, %v1926_v22  ;;  %v1429_v22 = vsub.f32 %v405_v15, %v917_v16  ;;  %v1940_v28 = vmul.f32 %v1428_v17, %v1428_v17  ;;  %v418_v16 = vld [vmem:[%s7640_s18 + $0x428] sm:$0xff] }
  0xee   : > { %v930_v17 = vld [vmem:[%s7645_s21 + $0x428] sm:$0xff] }
  0xef   : > { %v2439_v38 = vadd.f32 %v2438_v33, %v1927_v27  ;;  %v1430_v27 = vsub.f32 %v406_v20, %v918_v21  ;;  %v1941_v33 = vmul.f32 %v1429_v22, %v1429_v22  ;;  %v419_v21 = vld [vmem:[%s7640_s18 + $0x430] sm:$0xff] }
  0xf0   : > { %v931_v22 = vld [vmem:[%s7645_s21 + $0x430] sm:$0xff] }
  0xf1   : > { %v2440_v43 = vadd.f32 %v2439_v38, %v1928_v32  ;;  %v1431_v32 = vsub.f32 %v407_v25, %v919_v26  ;;  %v1942_v38 = vmul.f32 %v1430_v27, %v1430_v27  ;;  %v420_v26 = vld [vmem:[%s7640_s18 + $0x438] sm:$0xff] }
  0xf2   : > { %v932_v27 = vld [vmem:[%s7645_s21 + $0x438] sm:$0xff] }
  0xf3   : > { %v2441_v48 = vadd.f32 %v2440_v43, %v1929_v37  ;;  %v1432_v37 = vsub.f32 %v408_v30, %v920_v31  ;;  %v1943_v43 = vmul.f32 %v1431_v32, %v1431_v32  ;;  %v421_v31 = vld [vmem:[%s7640_s18 + $0x440] sm:$0xff] }
  0xf4   : > { %v933_v32 = vld [vmem:[%s7645_s21 + $0x440] sm:$0xff] }
  0xf5   : > { %v2442_v53 = vadd.f32 %v2441_v48, %v1930_v42  ;;  %v1433_v42 = vsub.f32 %v409_v35, %v921_v36  ;;  %v1944_v48 = vmul.f32 %v1432_v37, %v1432_v37  ;;  %v422_v36 = vld [vmem:[%s7640_s18 + $0x448] sm:$0xff] }
  0xf6   : > { %v934_v37 = vld [vmem:[%s7645_s21 + $0x448] sm:$0xff] }
  0xf7   : > { %v2443_v58 = vadd.f32 %v2442_v53, %v1931_v47  ;;  %v1434_v47 = vsub.f32 %v410_v40, %v922_v41  ;;  %v1945_v53 = vmul.f32 %v1433_v42, %v1433_v42  ;;  %v423_v41 = vld [vmem:[%s7640_s18 + $0x450] sm:$0xff] }
  0xf8   : > { %v935_v42 = vld [vmem:[%s7645_s21 + $0x450] sm:$0xff] }
  0xf9   : > { %v2444_v63 = vadd.f32 %v2443_v58, %v1932_v52  ;;  %v1435_v52 = vsub.f32 %v411_v45, %v923_v46  ;;  %v1946_v58 = vmul.f32 %v1434_v47, %v1434_v47  ;;  %v424_v46 = vld [vmem:[%s7640_s18 + $0x458] sm:$0xff] }
  0xfa   : > { %v936_v47 = vld [vmem:[%s7645_s21 + $0x458] sm:$0xff] }
  0xfb   : > { %v2445_v4 = vadd.f32 %v2444_v63, %v1933_v57  ;;  %v1436_v57 = vsub.f32 %v412_v50, %v924_v51  ;;  %v1947_v63 = vmul.f32 %v1435_v52, %v1435_v52  ;;  %v425_v51 = vld [vmem:[%s7640_s18 + $0x460] sm:$0xff] }
  0xfc   : > { %v937_v52 = vld [vmem:[%s7645_s21 + $0x460] sm:$0xff] }
  0xfd   : > { %v2446_v9 = vadd.f32 %v2445_v4, %v1934_v62  ;;  %v1437_v62 = vsub.f32 %v413_v55, %v925_v56  ;;  %v1948_v4 = vmul.f32 %v1436_v57, %v1436_v57  ;;  %v426_v56 = vld [vmem:[%s7640_s18 + $0x468] sm:$0xff] }
  0xfe   : > { %v938_v57 = vld [vmem:[%s7645_s21 + $0x468] sm:$0xff] }
  0xff   : > { %v2447_v14 = vadd.f32 %v2446_v9, %v1935_v3  ;;  %v1438_v3 = vsub.f32 %v414_v60, %v926_v61  ;;  %v1949_v9 = vmul.f32 %v1437_v62, %v1437_v62  ;;  %v427_v61 = vld [vmem:[%s7640_s18 + $0x470] sm:$0xff] }
 0x100   : > { %v939_v62 = vld [vmem:[%s7645_s21 + $0x470] sm:$0xff] }
 0x101   : > { %v2448_v19 = vadd.f32 %v2447_v14, %v1936_v8  ;;  %v1439_v8 = vsub.f32 %v415_v1, %v927_v2  ;;  %v1950_v14 = vmul.f32 %v1438_v3, %v1438_v3  ;;  %v428_v2 = vld [vmem:[%s7640_s18 + $0x478] sm:$0xff] }
 0x102   : > { %v940_v3 = vld [vmem:[%s7645_s21 + $0x478] sm:$0xff] }
 0x103   : > { %v2449_v24 = vadd.f32 %v2448_v19, %v1937_v13  ;;  %v1440_v13 = vsub.f32 %v416_v6, %v928_v7  ;;  %v1951_v19 = vmul.f32 %v1439_v8, %v1439_v8  ;;  %v429_v7 = vld [vmem:[%s7640_s18 + $0x480] sm:$0xff] }
 0x104   : > { %v941_v8 = vld [vmem:[%s7645_s21 + $0x480] sm:$0xff] }
 0x105   : > { %v2450_v29 = vadd.f32 %v2449_v24, %v1938_v18  ;;  %v1441_v18 = vsub.f32 %v417_v11, %v929_v12  ;;  %v1952_v24 = vmul.f32 %v1440_v13, %v1440_v13  ;;  %v430_v12 = vld [vmem:[%s7640_s18 + $0x488] sm:$0xff] }
 0x106   : > { %v942_v13 = vld [vmem:[%s7645_s21 + $0x488] sm:$0xff] }
 0x107   : > { %v2451_v34 = vadd.f32 %v2450_v29, %v1939_v23  ;;  %v1442_v23 = vsub.f32 %v418_v16, %v930_v17  ;;  %v1953_v29 = vmul.f32 %v1441_v18, %v1441_v18  ;;  %v431_v17 = vld [vmem:[%s7640_s18 + $0x490] sm:$0xff] }
 0x108   : > { %v943_v18 = vld [vmem:[%s7645_s21 + $0x490] sm:$0xff] }
 0x109   : > { %v2452_v39 = vadd.f32 %v2451_v34, %v1940_v28  ;;  %v1443_v28 = vsub.f32 %v419_v21, %v931_v22  ;;  %v1954_v34 = vmul.f32 %v1442_v23, %v1442_v23  ;;  %v432_v22 = vld [vmem:[%s7640_s18 + $0x498] sm:$0xff] }
 0x10a   : > { %v944_v23 = vld [vmem:[%s7645_s21 + $0x498] sm:$0xff] }
 0x10b   : > { %v2453_v44 = vadd.f32 %v2452_v39, %v1941_v33  ;;  %v1444_v33 = vsub.f32 %v420_v26, %v932_v27  ;;  %v1955_v39 = vmul.f32 %v1443_v28, %v1443_v28  ;;  %v433_v27 = vld [vmem:[%s7640_s18 + $0x4a0] sm:$0xff] }
 0x10c   : > { %v945_v28 = vld [vmem:[%s7645_s21 + $0x4a0] sm:$0xff] }
 0x10d   : > { %v2454_v49 = vadd.f32 %v2453_v44, %v1942_v38  ;;  %v1445_v38 = vsub.f32 %v421_v31, %v933_v32  ;;  %v1956_v44 = vmul.f32 %v1444_v33, %v1444_v33  ;;  %v434_v32 = vld [vmem:[%s7640_s18 + $0x4a8] sm:$0xff] }
 0x10e   : > { %v946_v33 = vld [vmem:[%s7645_s21 + $0x4a8] sm:$0xff] }
 0x10f   : > { %v2455_v54 = vadd.f32 %v2454_v49, %v1943_v43  ;;  %v1446_v43 = vsub.f32 %v422_v36, %v934_v37  ;;  %v1957_v49 = vmul.f32 %v1445_v38, %v1445_v38  ;;  %v435_v37 = vld [vmem:[%s7640_s18 + $0x4b0] sm:$0xff] }
 0x110   : > { %v947_v38 = vld [vmem:[%s7645_s21 + $0x4b0] sm:$0xff] }
 0x111   : > { %v2456_v59 = vadd.f32 %v2455_v54, %v1944_v48  ;;  %v1447_v48 = vsub.f32 %v423_v41, %v935_v42  ;;  %v1958_v54 = vmul.f32 %v1446_v43, %v1446_v43  ;;  %v436_v42 = vld [vmem:[%s7640_s18 + $0x4b8] sm:$0xff] }
 0x112   : > { %v948_v43 = vld [vmem:[%s7645_s21 + $0x4b8] sm:$0xff] }
 0x113   : > { %v2457_v0 = vadd.f32 %v2456_v59, %v1945_v53  ;;  %v1448_v53 = vsub.f32 %v424_v46, %v936_v47  ;;  %v1959_v59 = vmul.f32 %v1447_v48, %v1447_v48  ;;  %v437_v47 = vld [vmem:[%s7640_s18 + $0x4c0] sm:$0xff] }
 0x114   : > { %v949_v48 = vld [vmem:[%s7645_s21 + $0x4c0] sm:$0xff] }
 0x115   : > { %v2458_v5 = vadd.f32 %v2457_v0, %v1946_v58  ;;  %v1449_v58 = vsub.f32 %v425_v51, %v937_v52  ;;  %v1960_v0 = vmul.f32 %v1448_v53, %v1448_v53  ;;  %v438_v52 = vld [vmem:[%s7640_s18 + $0x4c8] sm:$0xff] }
 0x116   : > { %v950_v53 = vld [vmem:[%s7645_s21 + $0x4c8] sm:$0xff] }
 0x117   : > { %v2459_v10 = vadd.f32 %v2458_v5, %v1947_v63  ;;  %v1450_v63 = vsub.f32 %v426_v56, %v938_v57  ;;  %v1961_v5 = vmul.f32 %v1449_v58, %v1449_v58  ;;  %v439_v57 = vld [vmem:[%s7640_s18 + $0x4d0] sm:$0xff] }
 0x118   : > { %v951_v58 = vld [vmem:[%s7645_s21 + $0x4d0] sm:$0xff] }
 0x119   : > { %v2460_v15 = vadd.f32 %v2459_v10, %v1948_v4  ;;  %v1451_v4 = vsub.f32 %v427_v61, %v939_v62  ;;  %v1962_v10 = vmul.f32 %v1450_v63, %v1450_v63  ;;  %v440_v62 = vld [vmem:[%s7640_s18 + $0x4d8] sm:$0xff] }
 0x11a   : > { %v952_v63 = vld [vmem:[%s7645_s21 + $0x4d8] sm:$0xff] }
 0x11b   : > { %v2461_v20 = vadd.f32 %v2460_v15, %v1949_v9  ;;  %v1452_v9 = vsub.f32 %v428_v2, %v940_v3  ;;  %v1963_v15 = vmul.f32 %v1451_v4, %v1451_v4  ;;  %v441_v3 = vld [vmem:[%s7640_s18 + $0x4e0] sm:$0xff] }
 0x11c   : > { %v953_v4 = vld [vmem:[%s7645_s21 + $0x4e0] sm:$0xff] }
 0x11d   : > { %v2462_v25 = vadd.f32 %v2461_v20, %v1950_v14  ;;  %v1453_v14 = vsub.f32 %v429_v7, %v941_v8  ;;  %v1964_v20 = vmul.f32 %v1452_v9, %v1452_v9  ;;  %v442_v8 = vld [vmem:[%s7640_s18 + $0x4e8] sm:$0xff] }
 0x11e   : > { %v954_v9 = vld [vmem:[%s7645_s21 + $0x4e8] sm:$0xff] }
 0x11f   : > { %v2463_v30 = vadd.f32 %v2462_v25, %v1951_v19  ;;  %v1454_v19 = vsub.f32 %v430_v12, %v942_v13  ;;  %v1965_v25 = vmul.f32 %v1453_v14, %v1453_v14  ;;  %v443_v13 = vld [vmem:[%s7640_s18 + $0x4f0] sm:$0xff] }
 0x120   : > { %v955_v14 = vld [vmem:[%s7645_s21 + $0x4f0] sm:$0xff] }
 0x121   : > { %v2464_v35 = vadd.f32 %v2463_v30, %v1952_v24  ;;  %v1455_v24 = vsub.f32 %v431_v17, %v943_v18  ;;  %v1966_v30 = vmul.f32 %v1454_v19, %v1454_v19  ;;  %v444_v18 = vld [vmem:[%s7640_s18 + $0x4f8] sm:$0xff] }
 0x122   : > { %v956_v19 = vld [vmem:[%s7645_s21 + $0x4f8] sm:$0xff] }
 0x123   : > { %v2465_v40 = vadd.f32 %v2464_v35, %v1953_v29  ;;  %v1456_v29 = vsub.f32 %v432_v22, %v944_v23  ;;  %v1967_v35 = vmul.f32 %v1455_v24, %v1455_v24  ;;  %v445_v23 = vld [vmem:[%s7640_s18 + $0x500] sm:$0xff] }
 0x124   : > { %v957_v24 = vld [vmem:[%s7645_s21 + $0x500] sm:$0xff] }
 0x125   : > { %v2466_v45 = vadd.f32 %v2465_v40, %v1954_v34  ;;  %v1457_v34 = vsub.f32 %v433_v27, %v945_v28  ;;  %v1968_v40 = vmul.f32 %v1456_v29, %v1456_v29  ;;  %v446_v28 = vld [vmem:[%s7640_s18 + $0x508] sm:$0xff] }
 0x126   : > { %v958_v29 = vld [vmem:[%s7645_s21 + $0x508] sm:$0xff] }
 0x127   : > { %v2467_v50 = vadd.f32 %v2466_v45, %v1955_v39  ;;  %v1458_v39 = vsub.f32 %v434_v32, %v946_v33  ;;  %v1969_v45 = vmul.f32 %v1457_v34, %v1457_v34  ;;  %v447_v33 = vld [vmem:[%s7640_s18 + $0x510] sm:$0xff] }
 0x128   : > { %v959_v34 = vld [vmem:[%s7645_s21 + $0x510] sm:$0xff] }
 0x129   : > { %v2468_v55 = vadd.f32 %v2467_v50, %v1956_v44  ;;  %v1459_v44 = vsub.f32 %v435_v37, %v947_v38  ;;  %v1970_v50 = vmul.f32 %v1458_v39, %v1458_v39  ;;  %v448_v38 = vld [vmem:[%s7640_s18 + $0x518] sm:$0xff] }
 0x12a   : > { %v960_v39 = vld [vmem:[%s7645_s21 + $0x518] sm:$0xff] }
 0x12b   : > { %v2469_v60 = vadd.f32 %v2468_v55, %v1957_v49  ;;  %v1460_v49 = vsub.f32 %v436_v42, %v948_v43  ;;  %v1971_v55 = vmul.f32 %v1459_v44, %v1459_v44  ;;  %v449_v43 = vld [vmem:[%s7640_s18 + $0x520] sm:$0xff] }
 0x12c   : > { %v961_v44 = vld [vmem:[%s7645_s21 + $0x520] sm:$0xff] }
 0x12d   : > { %v2470_v1 = vadd.f32 %v2469_v60, %v1958_v54  ;;  %v1461_v54 = vsub.f32 %v437_v47, %v949_v48  ;;  %v1972_v60 = vmul.f32 %v1460_v49, %v1460_v49  ;;  %v450_v48 = vld [vmem:[%s7640_s18 + $0x528] sm:$0xff] }
 0x12e   : > { %v962_v49 = vld [vmem:[%s7645_s21 + $0x528] sm:$0xff] }
 0x12f   : > { %v2471_v6 = vadd.f32 %v2470_v1, %v1959_v59  ;;  %v1462_v59 = vsub.f32 %v438_v52, %v950_v53  ;;  %v1973_v1 = vmul.f32 %v1461_v54, %v1461_v54  ;;  %v451_v53 = vld [vmem:[%s7640_s18 + $0x530] sm:$0xff] }
 0x130   : > { %v963_v54 = vld [vmem:[%s7645_s21 + $0x530] sm:$0xff] }
 0x131   : > { %v2472_v11 = vadd.f32 %v2471_v6, %v1960_v0  ;;  %v1463_v0 = vsub.f32 %v439_v57, %v951_v58  ;;  %v1974_v6 = vmul.f32 %v1462_v59, %v1462_v59  ;;  %v452_v58 = vld [vmem:[%s7640_s18 + $0x538] sm:$0xff] }
 0x132   : > { %v964_v59 = vld [vmem:[%s7645_s21 + $0x538] sm:$0xff] }
 0x133   : > { %v2473_v16 = vadd.f32 %v2472_v11, %v1961_v5  ;;  %v1464_v5 = vsub.f32 %v440_v62, %v952_v63  ;;  %v1975_v11 = vmul.f32 %v1463_v0, %v1463_v0  ;;  %v453_v63 = vld [vmem:[%s7640_s18 + $0x540] sm:$0xff] }
 0x134   : > { %v965_v0 = vld [vmem:[%s7645_s21 + $0x540] sm:$0xff] }
 0x135   : > { %v2474_v21 = vadd.f32 %v2473_v16, %v1962_v10  ;;  %v1465_v10 = vsub.f32 %v441_v3, %v953_v4  ;;  %v1976_v16 = vmul.f32 %v1464_v5, %v1464_v5  ;;  %v454_v4 = vld [vmem:[%s7640_s18 + $0x548] sm:$0xff] }
 0x136   : > { %v966_v5 = vld [vmem:[%s7645_s21 + $0x548] sm:$0xff] }
 0x137   : > { %v2475_v26 = vadd.f32 %v2474_v21, %v1963_v15  ;;  %v1466_v15 = vsub.f32 %v442_v8, %v954_v9  ;;  %v1977_v21 = vmul.f32 %v1465_v10, %v1465_v10  ;;  %v455_v9 = vld [vmem:[%s7640_s18 + $0x550] sm:$0xff] }
 0x138   : > { %v967_v10 = vld [vmem:[%s7645_s21 + $0x550] sm:$0xff] }
 0x139   : > { %v2476_v31 = vadd.f32 %v2475_v26, %v1964_v20  ;;  %v1467_v20 = vsub.f32 %v443_v13, %v955_v14  ;;  %v1978_v26 = vmul.f32 %v1466_v15, %v1466_v15  ;;  %v456_v14 = vld [vmem:[%s7640_s18 + $0x558] sm:$0xff] }
 0x13a   : > { %v968_v15 = vld [vmem:[%s7645_s21 + $0x558] sm:$0xff] }
 0x13b   : > { %v2477_v36 = vadd.f32 %v2476_v31, %v1965_v25  ;;  %v1468_v25 = vsub.f32 %v444_v18, %v956_v19  ;;  %v1979_v31 = vmul.f32 %v1467_v20, %v1467_v20  ;;  %v457_v19 = vld [vmem:[%s7640_s18 + $0x560] sm:$0xff] }
 0x13c   : > { %v969_v20 = vld [vmem:[%s7645_s21 + $0x560] sm:$0xff] }
 0x13d   : > { %v2478_v41 = vadd.f32 %v2477_v36, %v1966_v30  ;;  %v1469_v30 = vsub.f32 %v445_v23, %v957_v24  ;;  %v1980_v36 = vmul.f32 %v1468_v25, %v1468_v25  ;;  %v458_v24 = vld [vmem:[%s7640_s18 + $0x568] sm:$0xff] }
 0x13e   : > { %v970_v25 = vld [vmem:[%s7645_s21 + $0x568] sm:$0xff] }
 0x13f   : > { %v2479_v46 = vadd.f32 %v2478_v41, %v1967_v35  ;;  %v1470_v35 = vsub.f32 %v446_v28, %v958_v29  ;;  %v1981_v41 = vmul.f32 %v1469_v30, %v1469_v30  ;;  %v459_v29 = vld [vmem:[%s7640_s18 + $0x570] sm:$0xff] }
 0x140   : > { %v971_v30 = vld [vmem:[%s7645_s21 + $0x570] sm:$0xff] }
 0x141   : > { %v2480_v51 = vadd.f32 %v2479_v46, %v1968_v40  ;;  %v1471_v40 = vsub.f32 %v447_v33, %v959_v34  ;;  %v1982_v46 = vmul.f32 %v1470_v35, %v1470_v35  ;;  %v460_v34 = vld [vmem:[%s7640_s18 + $0x578] sm:$0xff] }
 0x142   : > { %v972_v35 = vld [vmem:[%s7645_s21 + $0x578] sm:$0xff] }
 0x143   : > { %v2481_v56 = vadd.f32 %v2480_v51, %v1969_v45  ;;  %v1472_v45 = vsub.f32 %v448_v38, %v960_v39  ;;  %v1983_v51 = vmul.f32 %v1471_v40, %v1471_v40  ;;  %v461_v39 = vld [vmem:[%s7640_s18 + $0x580] sm:$0xff] }
 0x144   : > { %v973_v40 = vld [vmem:[%s7645_s21 + $0x580] sm:$0xff] }
 0x145   : > { %v2482_v61 = vadd.f32 %v2481_v56, %v1970_v50  ;;  %v1473_v50 = vsub.f32 %v449_v43, %v961_v44  ;;  %v1984_v56 = vmul.f32 %v1472_v45, %v1472_v45  ;;  %v462_v44 = vld [vmem:[%s7640_s18 + $0x588] sm:$0xff] }
 0x146   : > { %v974_v45 = vld [vmem:[%s7645_s21 + $0x588] sm:$0xff] }
 0x147   : > { %v2483_v2 = vadd.f32 %v2482_v61, %v1971_v55  ;;  %v1474_v55 = vsub.f32 %v450_v48, %v962_v49  ;;  %v1985_v61 = vmul.f32 %v1473_v50, %v1473_v50  ;;  %v463_v49 = vld [vmem:[%s7640_s18 + $0x590] sm:$0xff] }
 0x148   : > { %v975_v50 = vld [vmem:[%s7645_s21 + $0x590] sm:$0xff] }
 0x149   : > { %v2484_v7 = vadd.f32 %v2483_v2, %v1972_v60  ;;  %v1475_v60 = vsub.f32 %v451_v53, %v963_v54  ;;  %v1986_v2 = vmul.f32 %v1474_v55, %v1474_v55  ;;  %v464_v54 = vld [vmem:[%s7640_s18 + $0x598] sm:$0xff] }
 0x14a   : > { %v976_v55 = vld [vmem:[%s7645_s21 + $0x598] sm:$0xff] }
 0x14b   : > { %v2485_v12 = vadd.f32 %v2484_v7, %v1973_v1  ;;  %v1476_v1 = vsub.f32 %v452_v58, %v964_v59  ;;  %v1987_v7 = vmul.f32 %v1475_v60, %v1475_v60  ;;  %v465_v59 = vld [vmem:[%s7640_s18 + $0x5a0] sm:$0xff] }
 0x14c   : > { %v977_v60 = vld [vmem:[%s7645_s21 + $0x5a0] sm:$0xff] }
 0x14d   : > { %v2486_v17 = vadd.f32 %v2485_v12, %v1974_v6  ;;  %v1477_v6 = vsub.f32 %v453_v63, %v965_v0  ;;  %v1988_v12 = vmul.f32 %v1476_v1, %v1476_v1  ;;  %v466_v0 = vld [vmem:[%s7640_s18 + $0x5a8] sm:$0xff] }
 0x14e   : > { %v978_v1 = vld [vmem:[%s7645_s21 + $0x5a8] sm:$0xff] }
 0x14f   : > { %v2487_v22 = vadd.f32 %v2486_v17, %v1975_v11  ;;  %v1478_v11 = vsub.f32 %v454_v4, %v966_v5  ;;  %v1989_v17 = vmul.f32 %v1477_v6, %v1477_v6  ;;  %v467_v5 = vld [vmem:[%s7640_s18 + $0x5b0] sm:$0xff] }
 0x150   : > { %v979_v6 = vld [vmem:[%s7645_s21 + $0x5b0] sm:$0xff] }
 0x151   : > { %v2488_v27 = vadd.f32 %v2487_v22, %v1976_v16  ;;  %v1479_v16 = vsub.f32 %v455_v9, %v967_v10  ;;  %v1990_v22 = vmul.f32 %v1478_v11, %v1478_v11  ;;  %v468_v10 = vld [vmem:[%s7640_s18 + $0x5b8] sm:$0xff] }
 0x152   : > { %v980_v11 = vld [vmem:[%s7645_s21 + $0x5b8] sm:$0xff] }
 0x153   : > { %v2489_v32 = vadd.f32 %v2488_v27, %v1977_v21  ;;  %v1480_v21 = vsub.f32 %v456_v14, %v968_v15  ;;  %v1991_v27 = vmul.f32 %v1479_v16, %v1479_v16  ;;  %v469_v15 = vld [vmem:[%s7640_s18 + $0x5c0] sm:$0xff] }
 0x154   : > { %v981_v16 = vld [vmem:[%s7645_s21 + $0x5c0] sm:$0xff] }
 0x155   : > { %v2490_v37 = vadd.f32 %v2489_v32, %v1978_v26  ;;  %v1481_v26 = vsub.f32 %v457_v19, %v969_v20  ;;  %v1992_v32 = vmul.f32 %v1480_v21, %v1480_v21  ;;  %v470_v20 = vld [vmem:[%s7640_s18 + $0x5c8] sm:$0xff] }
 0x156   : > { %v982_v21 = vld [vmem:[%s7645_s21 + $0x5c8] sm:$0xff] }
 0x157   : > { %v2491_v42 = vadd.f32 %v2490_v37, %v1979_v31  ;;  %v1482_v31 = vsub.f32 %v458_v24, %v970_v25  ;;  %v1993_v37 = vmul.f32 %v1481_v26, %v1481_v26  ;;  %v471_v25 = vld [vmem:[%s7640_s18 + $0x5d0] sm:$0xff] }
 0x158   : > { %v983_v26 = vld [vmem:[%s7645_s21 + $0x5d0] sm:$0xff] }
 0x159   : > { %v2492_v47 = vadd.f32 %v2491_v42, %v1980_v36  ;;  %v1483_v36 = vsub.f32 %v459_v29, %v971_v30  ;;  %v1994_v42 = vmul.f32 %v1482_v31, %v1482_v31  ;;  %v472_v30 = vld [vmem:[%s7640_s18 + $0x5d8] sm:$0xff] }
 0x15a   : > { %v984_v31 = vld [vmem:[%s7645_s21 + $0x5d8] sm:$0xff] }
 0x15b   : > { %v2493_v52 = vadd.f32 %v2492_v47, %v1981_v41  ;;  %v1484_v41 = vsub.f32 %v460_v34, %v972_v35  ;;  %v1995_v47 = vmul.f32 %v1483_v36, %v1483_v36  ;;  %v473_v35 = vld [vmem:[%s7640_s18 + $0x5e0] sm:$0xff] }
 0x15c   : > { %v985_v36 = vld [vmem:[%s7645_s21 + $0x5e0] sm:$0xff] }
 0x15d   : > { %v2494_v57 = vadd.f32 %v2493_v52, %v1982_v46  ;;  %v1485_v46 = vsub.f32 %v461_v39, %v973_v40  ;;  %v1996_v52 = vmul.f32 %v1484_v41, %v1484_v41  ;;  %v474_v40 = vld [vmem:[%s7640_s18 + $0x5e8] sm:$0xff] }
 0x15e   : > { %v986_v41 = vld [vmem:[%s7645_s21 + $0x5e8] sm:$0xff] }
 0x15f   : > { %v2495_v62 = vadd.f32 %v2494_v57, %v1983_v51  ;;  %v1486_v51 = vsub.f32 %v462_v44, %v974_v45  ;;  %v1997_v57 = vmul.f32 %v1485_v46, %v1485_v46  ;;  %v475_v45 = vld [vmem:[%s7640_s18 + $0x5f0] sm:$0xff] }
 0x160   : > { %v987_v46 = vld [vmem:[%s7645_s21 + $0x5f0] sm:$0xff] }
 0x161   : > { %v2496_v3 = vadd.f32 %v2495_v62, %v1984_v56  ;;  %v1487_v56 = vsub.f32 %v463_v49, %v975_v50  ;;  %v1998_v62 = vmul.f32 %v1486_v51, %v1486_v51  ;;  %v476_v50 = vld [vmem:[%s7640_s18 + $0x5f8] sm:$0xff] }
 0x162   : > { %v988_v51 = vld [vmem:[%s7645_s21 + $0x5f8] sm:$0xff] }
 0x163   : > { %v2497_v8 = vadd.f32 %v2496_v3, %v1985_v61  ;;  %v1488_v61 = vsub.f32 %v464_v54, %v976_v55  ;;  %v1999_v3 = vmul.f32 %v1487_v56, %v1487_v56  ;;  %v477_v55 = vld [vmem:[%s7640_s18 + $0x600] sm:$0xff] }
 0x164   : > { %v989_v56 = vld [vmem:[%s7645_s21 + $0x600] sm:$0xff] }
 0x165   : > { %v2498_v13 = vadd.f32 %v2497_v8, %v1986_v2  ;;  %v1489_v2 = vsub.f32 %v465_v59, %v977_v60  ;;  %v2000_v8 = vmul.f32 %v1488_v61, %v1488_v61  ;;  %v478_v60 = vld [vmem:[%s7640_s18 + $0x608] sm:$0xff] }
 0x166   : > { %v990_v61 = vld [vmem:[%s7645_s21 + $0x608] sm:$0xff] }
 0x167   : > { %v2499_v18 = vadd.f32 %v2498_v13, %v1987_v7  ;;  %v1490_v7 = vsub.f32 %v466_v0, %v978_v1  ;;  %v2001_v13 = vmul.f32 %v1489_v2, %v1489_v2  ;;  %v479_v1 = vld [vmem:[%s7640_s18 + $0x610] sm:$0xff] }
 0x168   : > { %v991_v2 = vld [vmem:[%s7645_s21 + $0x610] sm:$0xff] }
 0x169   : > { %v2500_v23 = vadd.f32 %v2499_v18, %v1988_v12  ;;  %v1491_v12 = vsub.f32 %v467_v5, %v979_v6  ;;  %v2002_v18 = vmul.f32 %v1490_v7, %v1490_v7  ;;  %v480_v6 = vld [vmem:[%s7640_s18 + $0x618] sm:$0xff] }
 0x16a   : > { %v992_v7 = vld [vmem:[%s7645_s21 + $0x618] sm:$0xff] }
 0x16b   : > { %v2501_v28 = vadd.f32 %v2500_v23, %v1989_v17  ;;  %v1492_v17 = vsub.f32 %v468_v10, %v980_v11  ;;  %v2003_v23 = vmul.f32 %v1491_v12, %v1491_v12  ;;  %v481_v11 = vld [vmem:[%s7640_s18 + $0x620] sm:$0xff] }
 0x16c   : > { %v993_v12 = vld [vmem:[%s7645_s21 + $0x620] sm:$0xff] }
 0x16d   : > { %v2502_v33 = vadd.f32 %v2501_v28, %v1990_v22  ;;  %v1493_v22 = vsub.f32 %v469_v15, %v981_v16  ;;  %v2004_v28 = vmul.f32 %v1492_v17, %v1492_v17  ;;  %v482_v16 = vld [vmem:[%s7640_s18 + $0x628] sm:$0xff] }
 0x16e   : > { %v994_v17 = vld [vmem:[%s7645_s21 + $0x628] sm:$0xff] }
 0x16f   : > { %v2503_v38 = vadd.f32 %v2502_v33, %v1991_v27  ;;  %v1494_v27 = vsub.f32 %v470_v20, %v982_v21  ;;  %v2005_v33 = vmul.f32 %v1493_v22, %v1493_v22  ;;  %v483_v21 = vld [vmem:[%s7640_s18 + $0x630] sm:$0xff] }
 0x170   : > { %v995_v22 = vld [vmem:[%s7645_s21 + $0x630] sm:$0xff] }
 0x171   : > { %v2504_v43 = vadd.f32 %v2503_v38, %v1992_v32  ;;  %v1495_v32 = vsub.f32 %v471_v25, %v983_v26  ;;  %v2006_v38 = vmul.f32 %v1494_v27, %v1494_v27  ;;  %v484_v26 = vld [vmem:[%s7640_s18 + $0x638] sm:$0xff] }
 0x172   : > { %v996_v27 = vld [vmem:[%s7645_s21 + $0x638] sm:$0xff] }
 0x173   : > { %v2505_v48 = vadd.f32 %v2504_v43, %v1993_v37  ;;  %v1496_v37 = vsub.f32 %v472_v30, %v984_v31  ;;  %v2007_v43 = vmul.f32 %v1495_v32, %v1495_v32  ;;  %v485_v31 = vld [vmem:[%s7640_s18 + $0x640] sm:$0xff] }
 0x174   : > { %v997_v32 = vld [vmem:[%s7645_s21 + $0x640] sm:$0xff] }
 0x175   : > { %v2506_v53 = vadd.f32 %v2505_v48, %v1994_v42  ;;  %v1497_v42 = vsub.f32 %v473_v35, %v985_v36  ;;  %v2008_v48 = vmul.f32 %v1496_v37, %v1496_v37  ;;  %v486_v36 = vld [vmem:[%s7640_s18 + $0x648] sm:$0xff] }
 0x176   : > { %v998_v37 = vld [vmem:[%s7645_s21 + $0x648] sm:$0xff] }
 0x177   : > { %v2507_v58 = vadd.f32 %v2506_v53, %v1995_v47  ;;  %v1498_v47 = vsub.f32 %v474_v40, %v986_v41  ;;  %v2009_v53 = vmul.f32 %v1497_v42, %v1497_v42  ;;  %v487_v41 = vld [vmem:[%s7640_s18 + $0x650] sm:$0xff] }
 0x178   : > { %v999_v42 = vld [vmem:[%s7645_s21 + $0x650] sm:$0xff] }
 0x179   : > { %v2508_v63 = vadd.f32 %v2507_v58, %v1996_v52  ;;  %v1499_v52 = vsub.f32 %v475_v45, %v987_v46  ;;  %v2010_v58 = vmul.f32 %v1498_v47, %v1498_v47  ;;  %v488_v46 = vld [vmem:[%s7640_s18 + $0x658] sm:$0xff] }
 0x17a   : > { %v1000_v47 = vld [vmem:[%s7645_s21 + $0x658] sm:$0xff] }
 0x17b   : > { %v2509_v4 = vadd.f32 %v2508_v63, %v1997_v57  ;;  %v1500_v57 = vsub.f32 %v476_v50, %v988_v51  ;;  %v2011_v63 = vmul.f32 %v1499_v52, %v1499_v52  ;;  %v489_v51 = vld [vmem:[%s7640_s18 + $0x660] sm:$0xff] }
 0x17c   : > { %v1001_v52 = vld [vmem:[%s7645_s21 + $0x660] sm:$0xff] }
 0x17d   : > { %v2510_v9 = vadd.f32 %v2509_v4, %v1998_v62  ;;  %v1501_v62 = vsub.f32 %v477_v55, %v989_v56  ;;  %v2012_v4 = vmul.f32 %v1500_v57, %v1500_v57  ;;  %v490_v56 = vld [vmem:[%s7640_s18 + $0x668] sm:$0xff] }
 0x17e   : > { %v1002_v57 = vld [vmem:[%s7645_s21 + $0x668] sm:$0xff] }
 0x17f   : > { %v2511_v14 = vadd.f32 %v2510_v9, %v1999_v3  ;;  %v1502_v3 = vsub.f32 %v478_v60, %v990_v61  ;;  %v2013_v9 = vmul.f32 %v1501_v62, %v1501_v62  ;;  %v491_v61 = vld [vmem:[%s7640_s18 + $0x670] sm:$0xff] }
 0x180   : > { %v1003_v62 = vld [vmem:[%s7645_s21 + $0x670] sm:$0xff] }
 0x181   : > { %v2512_v19 = vadd.f32 %v2511_v14, %v2000_v8  ;;  %v1503_v8 = vsub.f32 %v479_v1, %v991_v2  ;;  %v2014_v14 = vmul.f32 %v1502_v3, %v1502_v3  ;;  %v492_v2 = vld [vmem:[%s7640_s18 + $0x678] sm:$0xff] }
 0x182   : > { %v1004_v3 = vld [vmem:[%s7645_s21 + $0x678] sm:$0xff] }
 0x183   : > { %v2513_v24 = vadd.f32 %v2512_v19, %v2001_v13  ;;  %v1504_v13 = vsub.f32 %v480_v6, %v992_v7  ;;  %v2015_v19 = vmul.f32 %v1503_v8, %v1503_v8  ;;  %v493_v7 = vld [vmem:[%s7640_s18 + $0x680] sm:$0xff] }
 0x184   : > { %v1005_v8 = vld [vmem:[%s7645_s21 + $0x680] sm:$0xff] }
 0x185   : > { %v2514_v29 = vadd.f32 %v2513_v24, %v2002_v18  ;;  %v1505_v18 = vsub.f32 %v481_v11, %v993_v12  ;;  %v2016_v24 = vmul.f32 %v1504_v13, %v1504_v13  ;;  %v494_v12 = vld [vmem:[%s7640_s18 + $0x688] sm:$0xff] }
 0x186   : > { %v1006_v13 = vld [vmem:[%s7645_s21 + $0x688] sm:$0xff] }
 0x187   : > { %v2515_v34 = vadd.f32 %v2514_v29, %v2003_v23  ;;  %v1506_v23 = vsub.f32 %v482_v16, %v994_v17  ;;  %v2017_v29 = vmul.f32 %v1505_v18, %v1505_v18  ;;  %v495_v17 = vld [vmem:[%s7640_s18 + $0x690] sm:$0xff] }
 0x188   : > { %v1007_v18 = vld [vmem:[%s7645_s21 + $0x690] sm:$0xff] }
 0x189   : > { %v2516_v39 = vadd.f32 %v2515_v34, %v2004_v28  ;;  %v1507_v28 = vsub.f32 %v483_v21, %v995_v22  ;;  %v2018_v34 = vmul.f32 %v1506_v23, %v1506_v23  ;;  %v496_v22 = vld [vmem:[%s7640_s18 + $0x698] sm:$0xff] }
 0x18a   : > { %v1008_v23 = vld [vmem:[%s7645_s21 + $0x698] sm:$0xff] }
 0x18b   : > { %v2517_v44 = vadd.f32 %v2516_v39, %v2005_v33  ;;  %v1508_v33 = vsub.f32 %v484_v26, %v996_v27  ;;  %v2019_v39 = vmul.f32 %v1507_v28, %v1507_v28  ;;  %v497_v27 = vld [vmem:[%s7640_s18 + $0x6a0] sm:$0xff] }
 0x18c   : > { %v1009_v28 = vld [vmem:[%s7645_s21 + $0x6a0] sm:$0xff] }
 0x18d   : > { %v2518_v49 = vadd.f32 %v2517_v44, %v2006_v38  ;;  %v1509_v38 = vsub.f32 %v485_v31, %v997_v32  ;;  %v2020_v44 = vmul.f32 %v1508_v33, %v1508_v33  ;;  %v498_v32 = vld [vmem:[%s7640_s18 + $0x6a8] sm:$0xff] }
 0x18e   : > { %v1010_v33 = vld [vmem:[%s7645_s21 + $0x6a8] sm:$0xff] }
 0x18f   : > { %v2519_v54 = vadd.f32 %v2518_v49, %v2007_v43  ;;  %v1510_v43 = vsub.f32 %v486_v36, %v998_v37  ;;  %v2021_v49 = vmul.f32 %v1509_v38, %v1509_v38  ;;  %v499_v37 = vld [vmem:[%s7640_s18 + $0x6b0] sm:$0xff] }
 0x190   : > { %v1011_v38 = vld [vmem:[%s7645_s21 + $0x6b0] sm:$0xff] }
 0x191   : > { %v2520_v59 = vadd.f32 %v2519_v54, %v2008_v48  ;;  %v1511_v48 = vsub.f32 %v487_v41, %v999_v42  ;;  %v2022_v54 = vmul.f32 %v1510_v43, %v1510_v43  ;;  %v500_v42 = vld [vmem:[%s7640_s18 + $0x6b8] sm:$0xff] }
 0x192   : > { %v1012_v43 = vld [vmem:[%s7645_s21 + $0x6b8] sm:$0xff] }
 0x193   : > { %v2521_v0 = vadd.f32 %v2520_v59, %v2009_v53  ;;  %v1512_v53 = vsub.f32 %v488_v46, %v1000_v47  ;;  %v2023_v59 = vmul.f32 %v1511_v48, %v1511_v48  ;;  %v501_v47 = vld [vmem:[%s7640_s18 + $0x6c0] sm:$0xff] }
 0x194   : > { %v1013_v48 = vld [vmem:[%s7645_s21 + $0x6c0] sm:$0xff] }
 0x195   : > { %v2522_v5 = vadd.f32 %v2521_v0, %v2010_v58  ;;  %v1513_v58 = vsub.f32 %v489_v51, %v1001_v52  ;;  %v2024_v0 = vmul.f32 %v1512_v53, %v1512_v53  ;;  %v502_v52 = vld [vmem:[%s7640_s18 + $0x6c8] sm:$0xff] }
 0x196   : > { %v1014_v53 = vld [vmem:[%s7645_s21 + $0x6c8] sm:$0xff] }
 0x197   : > { %v2523_v10 = vadd.f32 %v2522_v5, %v2011_v63  ;;  %v1514_v63 = vsub.f32 %v490_v56, %v1002_v57  ;;  %v2025_v5 = vmul.f32 %v1513_v58, %v1513_v58  ;;  %v503_v57 = vld [vmem:[%s7640_s18 + $0x6d0] sm:$0xff] }
 0x198   : > { %v1015_v58 = vld [vmem:[%s7645_s21 + $0x6d0] sm:$0xff] }
 0x199   : > { %v2524_v15 = vadd.f32 %v2523_v10, %v2012_v4  ;;  %v1515_v4 = vsub.f32 %v491_v61, %v1003_v62  ;;  %v2026_v10 = vmul.f32 %v1514_v63, %v1514_v63  ;;  %v504_v62 = vld [vmem:[%s7640_s18 + $0x6d8] sm:$0xff] }
 0x19a   : > { %v1016_v63 = vld [vmem:[%s7645_s21 + $0x6d8] sm:$0xff] }
 0x19b   : > { %v2525_v20 = vadd.f32 %v2524_v15, %v2013_v9  ;;  %v1516_v9 = vsub.f32 %v492_v2, %v1004_v3  ;;  %v2027_v15 = vmul.f32 %v1515_v4, %v1515_v4  ;;  %v505_v3 = vld [vmem:[%s7640_s18 + $0x6e0] sm:$0xff] }
 0x19c   : > { %v1017_v4 = vld [vmem:[%s7645_s21 + $0x6e0] sm:$0xff] }
 0x19d   : > { %v2526_v25 = vadd.f32 %v2525_v20, %v2014_v14  ;;  %v1517_v14 = vsub.f32 %v493_v7, %v1005_v8  ;;  %v2028_v20 = vmul.f32 %v1516_v9, %v1516_v9  ;;  %v506_v8 = vld [vmem:[%s7640_s18 + $0x6e8] sm:$0xff] }
 0x19e   : > { %v1018_v9 = vld [vmem:[%s7645_s21 + $0x6e8] sm:$0xff] }
 0x19f   : > { %v2527_v30 = vadd.f32 %v2526_v25, %v2015_v19  ;;  %v1518_v19 = vsub.f32 %v494_v12, %v1006_v13  ;;  %v2029_v25 = vmul.f32 %v1517_v14, %v1517_v14  ;;  %v507_v13 = vld [vmem:[%s7640_s18 + $0x6f0] sm:$0xff] }
 0x1a0   : > { %v1019_v14 = vld [vmem:[%s7645_s21 + $0x6f0] sm:$0xff] }
 0x1a1   : > { %v2528_v35 = vadd.f32 %v2527_v30, %v2016_v24  ;;  %v1519_v24 = vsub.f32 %v495_v17, %v1007_v18  ;;  %v2030_v30 = vmul.f32 %v1518_v19, %v1518_v19  ;;  %v508_v18 = vld [vmem:[%s7640_s18 + $0x6f8] sm:$0xff] }
 0x1a2   : > { %v1020_v19 = vld [vmem:[%s7645_s21 + $0x6f8] sm:$0xff] }
 0x1a3   : > { %v2529_v40 = vadd.f32 %v2528_v35, %v2017_v29  ;;  %v1520_v29 = vsub.f32 %v496_v22, %v1008_v23  ;;  %v2031_v35 = vmul.f32 %v1519_v24, %v1519_v24  ;;  %v509_v23 = vld [vmem:[%s7640_s18 + $0x700] sm:$0xff] }
 0x1a4   : > { %v1021_v24 = vld [vmem:[%s7645_s21 + $0x700] sm:$0xff] }
 0x1a5   : > { %v2530_v45 = vadd.f32 %v2529_v40, %v2018_v34  ;;  %v1521_v34 = vsub.f32 %v497_v27, %v1009_v28  ;;  %v2032_v40 = vmul.f32 %v1520_v29, %v1520_v29  ;;  %v510_v28 = vld [vmem:[%s7640_s18 + $0x708] sm:$0xff] }
 0x1a6   : > { %v1022_v29 = vld [vmem:[%s7645_s21 + $0x708] sm:$0xff] }
 0x1a7   : > { %v2531_v50 = vadd.f32 %v2530_v45, %v2019_v39  ;;  %v1522_v39 = vsub.f32 %v498_v32, %v1010_v33  ;;  %v2033_v45 = vmul.f32 %v1521_v34, %v1521_v34  ;;  %v511_v33 = vld [vmem:[%s7640_s18 + $0x710] sm:$0xff] }
 0x1a8   : > { %v1023_v34 = vld [vmem:[%s7645_s21 + $0x710] sm:$0xff] }
 0x1a9   : > { %v2532_v55 = vadd.f32 %v2531_v50, %v2020_v44  ;;  %v1523_v44 = vsub.f32 %v499_v37, %v1011_v38  ;;  %v2034_v50 = vmul.f32 %v1522_v39, %v1522_v39  ;;  %v512_v38 = vld [vmem:[%s7640_s18 + $0x718] sm:$0xff] }
 0x1aa   : > { %v1024_v39 = vld [vmem:[%s7645_s21 + $0x718] sm:$0xff] }
 0x1ab   : > { %v2533_v60 = vadd.f32 %v2532_v55, %v2021_v49  ;;  %v1524_v49 = vsub.f32 %v500_v42, %v1012_v43  ;;  %v2035_v55 = vmul.f32 %v1523_v44, %v1523_v44  ;;  %v513_v43 = vld [vmem:[%s7640_s18 + $0x720] sm:$0xff] }
 0x1ac   : > { %v1025_v44 = vld [vmem:[%s7645_s21 + $0x720] sm:$0xff] }
 0x1ad   : > { %v2534_v1 = vadd.f32 %v2533_v60, %v2022_v54  ;;  %v1525_v54 = vsub.f32 %v501_v47, %v1013_v48  ;;  %v2036_v60 = vmul.f32 %v1524_v49, %v1524_v49  ;;  %v514_v48 = vld [vmem:[%s7640_s18 + $0x728] sm:$0xff] }
 0x1ae   : > { %v1026_v49 = vld [vmem:[%s7645_s21 + $0x728] sm:$0xff] }
 0x1af   : > { %v2535_v6 = vadd.f32 %v2534_v1, %v2023_v59  ;;  %v1526_v59 = vsub.f32 %v502_v52, %v1014_v53  ;;  %v2037_v1 = vmul.f32 %v1525_v54, %v1525_v54  ;;  %v515_v53 = vld [vmem:[%s7640_s18 + $0x730] sm:$0xff] }
 0x1b0   : > { %v1027_v54 = vld [vmem:[%s7645_s21 + $0x730] sm:$0xff] }
 0x1b1   : > { %v2536_v11 = vadd.f32 %v2535_v6, %v2024_v0  ;;  %v1527_v0 = vsub.f32 %v503_v57, %v1015_v58  ;;  %v2038_v6 = vmul.f32 %v1526_v59, %v1526_v59  ;;  %v516_v58 = vld [vmem:[%s7640_s18 + $0x738] sm:$0xff] }
 0x1b2   : > { %v1028_v59 = vld [vmem:[%s7645_s21 + $0x738] sm:$0xff] }
 0x1b3   : > { %v2537_v16 = vadd.f32 %v2536_v11, %v2025_v5  ;;  %v1528_v5 = vsub.f32 %v504_v62, %v1016_v63  ;;  %v2039_v11 = vmul.f32 %v1527_v0, %v1527_v0  ;;  %v517_v63 = vld [vmem:[%s7640_s18 + $0x740] sm:$0xff] }
 0x1b4   : > { %v1029_v0 = vld [vmem:[%s7645_s21 + $0x740] sm:$0xff] }
 0x1b5   : > { %v2538_v21 = vadd.f32 %v2537_v16, %v2026_v10  ;;  %v1529_v10 = vsub.f32 %v505_v3, %v1017_v4  ;;  %v2040_v16 = vmul.f32 %v1528_v5, %v1528_v5  ;;  %v518_v4 = vld [vmem:[%s7640_s18 + $0x748] sm:$0xff] }
 0x1b6   : > { %v1030_v5 = vld [vmem:[%s7645_s21 + $0x748] sm:$0xff] }
 0x1b7   : > { %v2539_v26 = vadd.f32 %v2538_v21, %v2027_v15  ;;  %v1530_v15 = vsub.f32 %v506_v8, %v1018_v9  ;;  %v2041_v21 = vmul.f32 %v1529_v10, %v1529_v10  ;;  %v519_v9 = vld [vmem:[%s7640_s18 + $0x750] sm:$0xff] }
 0x1b8   : > { %v1031_v10 = vld [vmem:[%s7645_s21 + $0x750] sm:$0xff] }
 0x1b9   : > { %v2540_v31 = vadd.f32 %v2539_v26, %v2028_v20  ;;  %v1531_v20 = vsub.f32 %v507_v13, %v1019_v14  ;;  %v2042_v26 = vmul.f32 %v1530_v15, %v1530_v15  ;;  %v520_v14 = vld [vmem:[%s7640_s18 + $0x758] sm:$0xff] }
 0x1ba   : > { %v1032_v15 = vld [vmem:[%s7645_s21 + $0x758] sm:$0xff] }
 0x1bb   : > { %v2541_v36 = vadd.f32 %v2540_v31, %v2029_v25  ;;  %v1532_v25 = vsub.f32 %v508_v18, %v1020_v19  ;;  %v2043_v31 = vmul.f32 %v1531_v20, %v1531_v20  ;;  %v521_v19 = vld [vmem:[%s7640_s18 + $0x760] sm:$0xff] }
 0x1bc   : > { %v1033_v20 = vld [vmem:[%s7645_s21 + $0x760] sm:$0xff] }
 0x1bd   : > { %v2542_v41 = vadd.f32 %v2541_v36, %v2030_v30  ;;  %v1533_v30 = vsub.f32 %v509_v23, %v1021_v24  ;;  %v2044_v36 = vmul.f32 %v1532_v25, %v1532_v25  ;;  %v522_v24 = vld [vmem:[%s7640_s18 + $0x768] sm:$0xff] }
 0x1be   : > { %v1034_v25 = vld [vmem:[%s7645_s21 + $0x768] sm:$0xff] }
 0x1bf   : > { %v2543_v46 = vadd.f32 %v2542_v41, %v2031_v35  ;;  %v1534_v35 = vsub.f32 %v510_v28, %v1022_v29  ;;  %v2045_v41 = vmul.f32 %v1533_v30, %v1533_v30  ;;  %v523_v29 = vld [vmem:[%s7640_s18 + $0x770] sm:$0xff] }
 0x1c0   : > { %v1035_v30 = vld [vmem:[%s7645_s21 + $0x770] sm:$0xff] }
 0x1c1   : > { %v2544_v51 = vadd.f32 %v2543_v46, %v2032_v40  ;;  %v1535_v40 = vsub.f32 %v511_v33, %v1023_v34  ;;  %v2046_v46 = vmul.f32 %v1534_v35, %v1534_v35  ;;  %v524_v34 = vld [vmem:[%s7640_s18 + $0x778] sm:$0xff] }
 0x1c2   : > { %v1036_v35 = vld [vmem:[%s7645_s21 + $0x778] sm:$0xff] }
 0x1c3   : > { %v2545_v56 = vadd.f32 %v2544_v51, %v2033_v45  ;;  %v1536_v45 = vsub.f32 %v512_v38, %v1024_v39  ;;  %v2047_v51 = vmul.f32 %v1535_v40, %v1535_v40  ;;  %v525_v39 = vld [vmem:[%s7640_s18 + $0x780] sm:$0xff] }
 0x1c4   : > { %v1037_v40 = vld [vmem:[%s7645_s21 + $0x780] sm:$0xff] }
 0x1c5   : > { %v2546_v61 = vadd.f32 %v2545_v56, %v2034_v50  ;;  %v1537_v50 = vsub.f32 %v513_v43, %v1025_v44  ;;  %v2048_v56 = vmul.f32 %v1536_v45, %v1536_v45  ;;  %v526_v44 = vld [vmem:[%s7640_s18 + $0x788] sm:$0xff] }
 0x1c6   : > { %v1038_v45 = vld [vmem:[%s7645_s21 + $0x788] sm:$0xff] }
 0x1c7   : > { %v2547_v2 = vadd.f32 %v2546_v61, %v2035_v55  ;;  %v1538_v55 = vsub.f32 %v514_v48, %v1026_v49  ;;  %v2049_v61 = vmul.f32 %v1537_v50, %v1537_v50  ;;  %v527_v49 = vld [vmem:[%s7640_s18 + $0x790] sm:$0xff] }
 0x1c8   : > { %v1039_v50 = vld [vmem:[%s7645_s21 + $0x790] sm:$0xff] }
 0x1c9   : > { %v2548_v7 = vadd.f32 %v2547_v2, %v2036_v60  ;;  %v1539_v60 = vsub.f32 %v515_v53, %v1027_v54  ;;  %v2050_v2 = vmul.f32 %v1538_v55, %v1538_v55  ;;  %v528_v54 = vld [vmem:[%s7640_s18 + $0x798] sm:$0xff] }
 0x1ca   : > { %v1040_v55 = vld [vmem:[%s7645_s21 + $0x798] sm:$0xff] }
 0x1cb   : > { %v2549_v12 = vadd.f32 %v2548_v7, %v2037_v1  ;;  %v1540_v1 = vsub.f32 %v516_v58, %v1028_v59  ;;  %v2051_v7 = vmul.f32 %v1539_v60, %v1539_v60  ;;  %v529_v59 = vld [vmem:[%s7640_s18 + $0x7a0] sm:$0xff] }
 0x1cc   : > { %v1041_v60 = vld [vmem:[%s7645_s21 + $0x7a0] sm:$0xff] }
 0x1cd   : > { %v2550_v17 = vadd.f32 %v2549_v12, %v2038_v6  ;;  %v1541_v6 = vsub.f32 %v517_v63, %v1029_v0  ;;  %v2052_v12 = vmul.f32 %v1540_v1, %v1540_v1  ;;  %v530_v0 = vld [vmem:[%s7640_s18 + $0x7a8] sm:$0xff] }
 0x1ce   : > { %v1042_v1 = vld [vmem:[%s7645_s21 + $0x7a8] sm:$0xff] }
 0x1cf   : > { %v2551_v22 = vadd.f32 %v2550_v17, %v2039_v11  ;;  %v1542_v11 = vsub.f32 %v518_v4, %v1030_v5  ;;  %v2053_v17 = vmul.f32 %v1541_v6, %v1541_v6  ;;  %v531_v5 = vld [vmem:[%s7640_s18 + $0x7b0] sm:$0xff] }
 0x1d0   : > { %v1043_v6 = vld [vmem:[%s7645_s21 + $0x7b0] sm:$0xff] }
 0x1d1   : > { %v2552_v27 = vadd.f32 %v2551_v22, %v2040_v16  ;;  %v1543_v16 = vsub.f32 %v519_v9, %v1031_v10  ;;  %v2054_v22 = vmul.f32 %v1542_v11, %v1542_v11  ;;  %v532_v10 = vld [vmem:[%s7640_s18 + $0x7b8] sm:$0xff] }
 0x1d2   : > { %v1044_v11 = vld [vmem:[%s7645_s21 + $0x7b8] sm:$0xff] }
 0x1d3   : > { %v2553_v32 = vadd.f32 %v2552_v27, %v2041_v21  ;;  %v1544_v21 = vsub.f32 %v520_v14, %v1032_v15  ;;  %v2055_v27 = vmul.f32 %v1543_v16, %v1543_v16  ;;  %v533_v15 = vld [vmem:[%s7640_s18 + $0x7c0] sm:$0xff] }
 0x1d4   : > { %v1045_v16 = vld [vmem:[%s7645_s21 + $0x7c0] sm:$0xff] }
 0x1d5   : > { %v2554_v37 = vadd.f32 %v2553_v32, %v2042_v26  ;;  %v1545_v26 = vsub.f32 %v521_v19, %v1033_v20  ;;  %v2056_v32 = vmul.f32 %v1544_v21, %v1544_v21  ;;  %v534_v20 = vld [vmem:[%s7640_s18 + $0x7c8] sm:$0xff] }
 0x1d6   : > { %v1046_v21 = vld [vmem:[%s7645_s21 + $0x7c8] sm:$0xff] }
 0x1d7   : > { %v2555_v42 = vadd.f32 %v2554_v37, %v2043_v31  ;;  %v1546_v31 = vsub.f32 %v522_v24, %v1034_v25  ;;  %v2057_v37 = vmul.f32 %v1545_v26, %v1545_v26  ;;  %v535_v25 = vld [vmem:[%s7640_s18 + $0x7d0] sm:$0xff] }
 0x1d8   : > { %v1047_v26 = vld [vmem:[%s7645_s21 + $0x7d0] sm:$0xff] }
 0x1d9   : > { %v2556_v47 = vadd.f32 %v2555_v42, %v2044_v36  ;;  %v1547_v36 = vsub.f32 %v523_v29, %v1035_v30  ;;  %v2058_v42 = vmul.f32 %v1546_v31, %v1546_v31  ;;  %v536_v30 = vld [vmem:[%s7640_s18 + $0x7d8] sm:$0xff] }
 0x1da   : > { %v1048_v31 = vld [vmem:[%s7645_s21 + $0x7d8] sm:$0xff] }
 0x1db   : > { %v2557_v52 = vadd.f32 %v2556_v47, %v2045_v41  ;;  %v1548_v41 = vsub.f32 %v524_v34, %v1036_v35  ;;  %v2059_v47 = vmul.f32 %v1547_v36, %v1547_v36  ;;  %v537_v35 = vld [vmem:[%s7640_s18 + $0x7e0] sm:$0xff] }
 0x1dc   : > { %v1049_v36 = vld [vmem:[%s7645_s21 + $0x7e0] sm:$0xff] }
 0x1dd   : > { %v2558_v57 = vadd.f32 %v2557_v52, %v2046_v46  ;;  %v1549_v46 = vsub.f32 %v525_v39, %v1037_v40  ;;  %v2060_v52 = vmul.f32 %v1548_v41, %v1548_v41  ;;  %v538_v40 = vld [vmem:[%s7640_s18 + $0x7e8] sm:$0xff] }
 0x1de   : > { %v1050_v41 = vld [vmem:[%s7645_s21 + $0x7e8] sm:$0xff] }
 0x1df   : > { %v2559_v62 = vadd.f32 %v2558_v57, %v2047_v51  ;;  %v1550_v51 = vsub.f32 %v526_v44, %v1038_v45  ;;  %v2061_v57 = vmul.f32 %v1549_v46, %v1549_v46  ;;  %v539_v45 = vld [vmem:[%s7640_s18 + $0x7f0] sm:$0xff] }
 0x1e0   : > { %v1051_v46 = vld [vmem:[%s7645_s21 + $0x7f0] sm:$0xff] }
 0x1e1   : > { %v2560_v3 = vadd.f32 %v2559_v62, %v2048_v56  ;;  %v1551_v56 = vsub.f32 %v527_v49, %v1039_v50  ;;  %v2062_v62 = vmul.f32 %v1550_v51, %v1550_v51  ;;  %v540_v50 = vld [vmem:[%s7640_s18 + $0x7f8] sm:$0xff] }
 0x1e2   : > { %v1052_v51 = vld [vmem:[%s7645_s21 + $0x7f8] sm:$0xff] }
 0x1e3   : > { %v2561_v8 = vadd.f32 %v2560_v3, %v2049_v61  ;;  %v1552_v61 = vsub.f32 %v528_v54, %v1040_v55  ;;  %v2063_v3 = vmul.f32 %v1551_v56, %v1551_v56  ;;  %v541_v55 = vld [vmem:[%s7640_s18 + $0x800] sm:$0xff] }
 0x1e4   : > { %v1053_v56 = vld [vmem:[%s7645_s21 + $0x800] sm:$0xff] }
 0x1e5   : > { %v2562_v13 = vadd.f32 %v2561_v8, %v2050_v2  ;;  %v1553_v2 = vsub.f32 %v529_v59, %v1041_v60  ;;  %v2064_v8 = vmul.f32 %v1552_v61, %v1552_v61  ;;  %v542_v60 = vld [vmem:[%s7640_s18 + $0x808] sm:$0xff] }
 0x1e6   : > { %v1054_v61 = vld [vmem:[%s7645_s21 + $0x808] sm:$0xff] }
 0x1e7   : > { %v2563_v18 = vadd.f32 %v2562_v13, %v2051_v7  ;;  %v1554_v7 = vsub.f32 %v530_v0, %v1042_v1  ;;  %v2065_v13 = vmul.f32 %v1553_v2, %v1553_v2  ;;  %v543_v1 = vld [vmem:[%s7640_s18 + $0x810] sm:$0xff] }
 0x1e8   : > { %v1055_v2 = vld [vmem:[%s7645_s21 + $0x810] sm:$0xff] }
 0x1e9   : > { %v2564_v23 = vadd.f32 %v2563_v18, %v2052_v12  ;;  %v1555_v12 = vsub.f32 %v531_v5, %v1043_v6  ;;  %v2066_v18 = vmul.f32 %v1554_v7, %v1554_v7  ;;  %v544_v6 = vld [vmem:[%s7640_s18 + $0x818] sm:$0xff] }
 0x1ea   : > { %v1056_v7 = vld [vmem:[%s7645_s21 + $0x818] sm:$0xff] }
 0x1eb   : > { %v2565_v28 = vadd.f32 %v2564_v23, %v2053_v17  ;;  %v1556_v17 = vsub.f32 %v532_v10, %v1044_v11  ;;  %v2067_v23 = vmul.f32 %v1555_v12, %v1555_v12  ;;  %v545_v11 = vld [vmem:[%s7640_s18 + $0x820] sm:$0xff] }
 0x1ec   : > { %v1057_v12 = vld [vmem:[%s7645_s21 + $0x820] sm:$0xff] }
 0x1ed   : > { %v2566_v33 = vadd.f32 %v2565_v28, %v2054_v22  ;;  %v1557_v22 = vsub.f32 %v533_v15, %v1045_v16  ;;  %v2068_v28 = vmul.f32 %v1556_v17, %v1556_v17  ;;  %v546_v16 = vld [vmem:[%s7640_s18 + $0x828] sm:$0xff] }
 0x1ee   : > { %v1058_v17 = vld [vmem:[%s7645_s21 + $0x828] sm:$0xff] }
 0x1ef   : > { %v2567_v38 = vadd.f32 %v2566_v33, %v2055_v27  ;;  %v1558_v27 = vsub.f32 %v534_v20, %v1046_v21  ;;  %v2069_v33 = vmul.f32 %v1557_v22, %v1557_v22  ;;  %v547_v21 = vld [vmem:[%s7640_s18 + $0x830] sm:$0xff] }
 0x1f0   : > { %v1059_v22 = vld [vmem:[%s7645_s21 + $0x830] sm:$0xff] }
 0x1f1   : > { %v2568_v43 = vadd.f32 %v2567_v38, %v2056_v32  ;;  %v1559_v32 = vsub.f32 %v535_v25, %v1047_v26  ;;  %v2070_v38 = vmul.f32 %v1558_v27, %v1558_v27  ;;  %v548_v26 = vld [vmem:[%s7640_s18 + $0x838] sm:$0xff] }
 0x1f2   : > { %v1060_v27 = vld [vmem:[%s7645_s21 + $0x838] sm:$0xff] }
 0x1f3   : > { %v2569_v48 = vadd.f32 %v2568_v43, %v2057_v37  ;;  %v1560_v37 = vsub.f32 %v536_v30, %v1048_v31  ;;  %v2071_v43 = vmul.f32 %v1559_v32, %v1559_v32  ;;  %v549_v31 = vld [vmem:[%s7640_s18 + $0x840] sm:$0xff] }
 0x1f4   : > { %v1061_v32 = vld [vmem:[%s7645_s21 + $0x840] sm:$0xff] }
 0x1f5   : > { %v2570_v53 = vadd.f32 %v2569_v48, %v2058_v42  ;;  %v1561_v42 = vsub.f32 %v537_v35, %v1049_v36  ;;  %v2072_v48 = vmul.f32 %v1560_v37, %v1560_v37  ;;  %v550_v36 = vld [vmem:[%s7640_s18 + $0x848] sm:$0xff] }
 0x1f6   : > { %v1062_v37 = vld [vmem:[%s7645_s21 + $0x848] sm:$0xff] }
 0x1f7   : > { %v2571_v58 = vadd.f32 %v2570_v53, %v2059_v47  ;;  %v1562_v47 = vsub.f32 %v538_v40, %v1050_v41  ;;  %v2073_v53 = vmul.f32 %v1561_v42, %v1561_v42  ;;  %v551_v41 = vld [vmem:[%s7640_s18 + $0x850] sm:$0xff] }
 0x1f8   : > { %v1063_v42 = vld [vmem:[%s7645_s21 + $0x850] sm:$0xff] }
 0x1f9   : > { %v2572_v63 = vadd.f32 %v2571_v58, %v2060_v52  ;;  %v1563_v52 = vsub.f32 %v539_v45, %v1051_v46  ;;  %v2074_v58 = vmul.f32 %v1562_v47, %v1562_v47  ;;  %v552_v46 = vld [vmem:[%s7640_s18 + $0x858] sm:$0xff] }
 0x1fa   : > { %v1064_v47 = vld [vmem:[%s7645_s21 + $0x858] sm:$0xff] }
 0x1fb   : > { %v2573_v4 = vadd.f32 %v2572_v63, %v2061_v57  ;;  %v1564_v57 = vsub.f32 %v540_v50, %v1052_v51  ;;  %v2075_v63 = vmul.f32 %v1563_v52, %v1563_v52  ;;  %v553_v51 = vld [vmem:[%s7640_s18 + $0x860] sm:$0xff] }
 0x1fc   : > { %v1065_v52 = vld [vmem:[%s7645_s21 + $0x860] sm:$0xff] }
 0x1fd   : > { %v2574_v9 = vadd.f32 %v2573_v4, %v2062_v62  ;;  %v1565_v62 = vsub.f32 %v541_v55, %v1053_v56  ;;  %v2076_v4 = vmul.f32 %v1564_v57, %v1564_v57  ;;  %v554_v56 = vld [vmem:[%s7640_s18 + $0x868] sm:$0xff] }
 0x1fe   : > { %v1066_v57 = vld [vmem:[%s7645_s21 + $0x868] sm:$0xff] }
 0x1ff   : > { %v2575_v14 = vadd.f32 %v2574_v9, %v2063_v3  ;;  %v1566_v3 = vsub.f32 %v542_v60, %v1054_v61  ;;  %v2077_v9 = vmul.f32 %v1565_v62, %v1565_v62  ;;  %v555_v61 = vld [vmem:[%s7640_s18 + $0x870] sm:$0xff] }
 0x200   : > { %v1067_v62 = vld [vmem:[%s7645_s21 + $0x870] sm:$0xff] }
 0x201   : > { %v2576_v19 = vadd.f32 %v2575_v14, %v2064_v8  ;;  %v1567_v8 = vsub.f32 %v543_v1, %v1055_v2  ;;  %v2078_v14 = vmul.f32 %v1566_v3, %v1566_v3  ;;  %v556_v2 = vld [vmem:[%s7640_s18 + $0x878] sm:$0xff] }
 0x202   : > { %v1068_v3 = vld [vmem:[%s7645_s21 + $0x878] sm:$0xff] }
 0x203   : > { %v2577_v24 = vadd.f32 %v2576_v19, %v2065_v13  ;;  %v1568_v13 = vsub.f32 %v544_v6, %v1056_v7  ;;  %v2079_v19 = vmul.f32 %v1567_v8, %v1567_v8  ;;  %v557_v7 = vld [vmem:[%s7640_s18 + $0x880] sm:$0xff] }
 0x204   : > { %v1069_v8 = vld [vmem:[%s7645_s21 + $0x880] sm:$0xff] }
 0x205   : > { %v2578_v29 = vadd.f32 %v2577_v24, %v2066_v18  ;;  %v1569_v18 = vsub.f32 %v545_v11, %v1057_v12  ;;  %v2080_v24 = vmul.f32 %v1568_v13, %v1568_v13  ;;  %v558_v12 = vld [vmem:[%s7640_s18 + $0x888] sm:$0xff] }
 0x206   : > { %v1070_v13 = vld [vmem:[%s7645_s21 + $0x888] sm:$0xff] }
 0x207   : > { %v2579_v34 = vadd.f32 %v2578_v29, %v2067_v23  ;;  %v1570_v23 = vsub.f32 %v546_v16, %v1058_v17  ;;  %v2081_v29 = vmul.f32 %v1569_v18, %v1569_v18  ;;  %v559_v17 = vld [vmem:[%s7640_s18 + $0x890] sm:$0xff] }
 0x208   : > { %v1071_v18 = vld [vmem:[%s7645_s21 + $0x890] sm:$0xff] }
 0x209   : > { %v2580_v39 = vadd.f32 %v2579_v34, %v2068_v28  ;;  %v1571_v28 = vsub.f32 %v547_v21, %v1059_v22  ;;  %v2082_v34 = vmul.f32 %v1570_v23, %v1570_v23  ;;  %v560_v22 = vld [vmem:[%s7640_s18 + $0x898] sm:$0xff] }
 0x20a   : > { %v1072_v23 = vld [vmem:[%s7645_s21 + $0x898] sm:$0xff] }
 0x20b   : > { %v2581_v44 = vadd.f32 %v2580_v39, %v2069_v33  ;;  %v1572_v33 = vsub.f32 %v548_v26, %v1060_v27  ;;  %v2083_v39 = vmul.f32 %v1571_v28, %v1571_v28  ;;  %v561_v27 = vld [vmem:[%s7640_s18 + $0x8a0] sm:$0xff] }
 0x20c   : > { %v1073_v28 = vld [vmem:[%s7645_s21 + $0x8a0] sm:$0xff] }
 0x20d   : > { %v2582_v49 = vadd.f32 %v2581_v44, %v2070_v38  ;;  %v1573_v38 = vsub.f32 %v549_v31, %v1061_v32  ;;  %v2084_v44 = vmul.f32 %v1572_v33, %v1572_v33  ;;  %v562_v32 = vld [vmem:[%s7640_s18 + $0x8a8] sm:$0xff] }
 0x20e   : > { %v1074_v33 = vld [vmem:[%s7645_s21 + $0x8a8] sm:$0xff] }
 0x20f   : > { %v2583_v54 = vadd.f32 %v2582_v49, %v2071_v43  ;;  %v1574_v43 = vsub.f32 %v550_v36, %v1062_v37  ;;  %v2085_v49 = vmul.f32 %v1573_v38, %v1573_v38  ;;  %v563_v37 = vld [vmem:[%s7640_s18 + $0x8b0] sm:$0xff] }
 0x210   : > { %v1075_v38 = vld [vmem:[%s7645_s21 + $0x8b0] sm:$0xff] }
 0x211   : > { %v2584_v59 = vadd.f32 %v2583_v54, %v2072_v48  ;;  %v1575_v48 = vsub.f32 %v551_v41, %v1063_v42  ;;  %v2086_v54 = vmul.f32 %v1574_v43, %v1574_v43  ;;  %v564_v42 = vld [vmem:[%s7640_s18 + $0x8b8] sm:$0xff] }
 0x212   : > { %v1076_v43 = vld [vmem:[%s7645_s21 + $0x8b8] sm:$0xff] }
 0x213   : > { %v2585_v0 = vadd.f32 %v2584_v59, %v2073_v53  ;;  %v1576_v53 = vsub.f32 %v552_v46, %v1064_v47  ;;  %v2087_v59 = vmul.f32 %v1575_v48, %v1575_v48  ;;  %v565_v47 = vld [vmem:[%s7640_s18 + $0x8c0] sm:$0xff] }
 0x214   : > { %v1077_v48 = vld [vmem:[%s7645_s21 + $0x8c0] sm:$0xff] }
 0x215   : > { %v2586_v5 = vadd.f32 %v2585_v0, %v2074_v58  ;;  %v1577_v58 = vsub.f32 %v553_v51, %v1065_v52  ;;  %v2088_v0 = vmul.f32 %v1576_v53, %v1576_v53  ;;  %v566_v52 = vld [vmem:[%s7640_s18 + $0x8c8] sm:$0xff] }
 0x216   : > { %v1078_v53 = vld [vmem:[%s7645_s21 + $0x8c8] sm:$0xff] }
 0x217   : > { %v2587_v10 = vadd.f32 %v2586_v5, %v2075_v63  ;;  %v1578_v63 = vsub.f32 %v554_v56, %v1066_v57  ;;  %v2089_v5 = vmul.f32 %v1577_v58, %v1577_v58  ;;  %v567_v57 = vld [vmem:[%s7640_s18 + $0x8d0] sm:$0xff] }
 0x218   : > { %v1079_v58 = vld [vmem:[%s7645_s21 + $0x8d0] sm:$0xff] }
 0x219   : > { %v2588_v15 = vadd.f32 %v2587_v10, %v2076_v4  ;;  %v1579_v4 = vsub.f32 %v555_v61, %v1067_v62  ;;  %v2090_v10 = vmul.f32 %v1578_v63, %v1578_v63  ;;  %v568_v62 = vld [vmem:[%s7640_s18 + $0x8d8] sm:$0xff] }
 0x21a   : > { %v1080_v63 = vld [vmem:[%s7645_s21 + $0x8d8] sm:$0xff] }
 0x21b   : > { %v2589_v20 = vadd.f32 %v2588_v15, %v2077_v9  ;;  %v1580_v9 = vsub.f32 %v556_v2, %v1068_v3  ;;  %v2091_v15 = vmul.f32 %v1579_v4, %v1579_v4  ;;  %v569_v3 = vld [vmem:[%s7640_s18 + $0x8e0] sm:$0xff] }
 0x21c   : > { %v1081_v4 = vld [vmem:[%s7645_s21 + $0x8e0] sm:$0xff] }
 0x21d   : > { %v2590_v25 = vadd.f32 %v2589_v20, %v2078_v14  ;;  %v1581_v14 = vsub.f32 %v557_v7, %v1069_v8  ;;  %v2092_v20 = vmul.f32 %v1580_v9, %v1580_v9  ;;  %v570_v8 = vld [vmem:[%s7640_s18 + $0x8e8] sm:$0xff] }
 0x21e   : > { %v1082_v9 = vld [vmem:[%s7645_s21 + $0x8e8] sm:$0xff] }
 0x21f   : > { %v2591_v30 = vadd.f32 %v2590_v25, %v2079_v19  ;;  %v1582_v19 = vsub.f32 %v558_v12, %v1070_v13  ;;  %v2093_v25 = vmul.f32 %v1581_v14, %v1581_v14  ;;  %v571_v13 = vld [vmem:[%s7640_s18 + $0x8f0] sm:$0xff] }
 0x220   : > { %v1083_v14 = vld [vmem:[%s7645_s21 + $0x8f0] sm:$0xff] }
 0x221   : > { %v2592_v35 = vadd.f32 %v2591_v30, %v2080_v24  ;;  %v1583_v24 = vsub.f32 %v559_v17, %v1071_v18  ;;  %v2094_v30 = vmul.f32 %v1582_v19, %v1582_v19  ;;  %v572_v18 = vld [vmem:[%s7640_s18 + $0x8f8] sm:$0xff] }
 0x222   : > { %v1084_v19 = vld [vmem:[%s7645_s21 + $0x8f8] sm:$0xff] }
 0x223   : > { %v2593_v40 = vadd.f32 %v2592_v35, %v2081_v29  ;;  %v1584_v29 = vsub.f32 %v560_v22, %v1072_v23  ;;  %v2095_v35 = vmul.f32 %v1583_v24, %v1583_v24  ;;  %v573_v23 = vld [vmem:[%s7640_s18 + $0x900] sm:$0xff] }
 0x224   : > { %v1085_v24 = vld [vmem:[%s7645_s21 + $0x900] sm:$0xff] }
 0x225   : > { %v2594_v45 = vadd.f32 %v2593_v40, %v2082_v34  ;;  %v1585_v34 = vsub.f32 %v561_v27, %v1073_v28  ;;  %v2096_v40 = vmul.f32 %v1584_v29, %v1584_v29  ;;  %v574_v28 = vld [vmem:[%s7640_s18 + $0x908] sm:$0xff] }
 0x226   : > { %v1086_v29 = vld [vmem:[%s7645_s21 + $0x908] sm:$0xff] }
 0x227   : > { %v2595_v50 = vadd.f32 %v2594_v45, %v2083_v39  ;;  %v1586_v39 = vsub.f32 %v562_v32, %v1074_v33  ;;  %v2097_v45 = vmul.f32 %v1585_v34, %v1585_v34  ;;  %v575_v33 = vld [vmem:[%s7640_s18 + $0x910] sm:$0xff] }
 0x228   : > { %v1087_v34 = vld [vmem:[%s7645_s21 + $0x910] sm:$0xff] }
 0x229   : > { %v2596_v55 = vadd.f32 %v2595_v50, %v2084_v44  ;;  %v1587_v44 = vsub.f32 %v563_v37, %v1075_v38  ;;  %v2098_v50 = vmul.f32 %v1586_v39, %v1586_v39  ;;  %v576_v38 = vld [vmem:[%s7640_s18 + $0x918] sm:$0xff] }
 0x22a   : > { %v1088_v39 = vld [vmem:[%s7645_s21 + $0x918] sm:$0xff] }
 0x22b   : > { %v2597_v60 = vadd.f32 %v2596_v55, %v2085_v49  ;;  %v1588_v49 = vsub.f32 %v564_v42, %v1076_v43  ;;  %v2099_v55 = vmul.f32 %v1587_v44, %v1587_v44  ;;  %v577_v43 = vld [vmem:[%s7640_s18 + $0x920] sm:$0xff] }
 0x22c   : > { %v1089_v44 = vld [vmem:[%s7645_s21 + $0x920] sm:$0xff] }
 0x22d   : > { %v2598_v1 = vadd.f32 %v2597_v60, %v2086_v54  ;;  %v1589_v54 = vsub.f32 %v565_v47, %v1077_v48  ;;  %v2100_v60 = vmul.f32 %v1588_v49, %v1588_v49  ;;  %v578_v48 = vld [vmem:[%s7640_s18 + $0x928] sm:$0xff] }
 0x22e   : > { %v1090_v49 = vld [vmem:[%s7645_s21 + $0x928] sm:$0xff] }
 0x22f   : > { %v2599_v6 = vadd.f32 %v2598_v1, %v2087_v59  ;;  %v1590_v59 = vsub.f32 %v566_v52, %v1078_v53  ;;  %v2101_v1 = vmul.f32 %v1589_v54, %v1589_v54  ;;  %v579_v53 = vld [vmem:[%s7640_s18 + $0x930] sm:$0xff] }
 0x230   : > { %v1091_v54 = vld [vmem:[%s7645_s21 + $0x930] sm:$0xff] }
 0x231   : > { %v2600_v11 = vadd.f32 %v2599_v6, %v2088_v0  ;;  %v1591_v0 = vsub.f32 %v567_v57, %v1079_v58  ;;  %v2102_v6 = vmul.f32 %v1590_v59, %v1590_v59  ;;  %v580_v58 = vld [vmem:[%s7640_s18 + $0x938] sm:$0xff] }
 0x232   : > { %v1092_v59 = vld [vmem:[%s7645_s21 + $0x938] sm:$0xff] }
 0x233   : > { %v2601_v16 = vadd.f32 %v2600_v11, %v2089_v5  ;;  %v1592_v5 = vsub.f32 %v568_v62, %v1080_v63  ;;  %v2103_v11 = vmul.f32 %v1591_v0, %v1591_v0  ;;  %v581_v63 = vld [vmem:[%s7640_s18 + $0x940] sm:$0xff] }
 0x234   : > { %v1093_v0 = vld [vmem:[%s7645_s21 + $0x940] sm:$0xff] }
 0x235   : > { %v2602_v21 = vadd.f32 %v2601_v16, %v2090_v10  ;;  %v1593_v10 = vsub.f32 %v569_v3, %v1081_v4  ;;  %v2104_v16 = vmul.f32 %v1592_v5, %v1592_v5  ;;  %v582_v4 = vld [vmem:[%s7640_s18 + $0x948] sm:$0xff] }
 0x236   : > { %v1094_v5 = vld [vmem:[%s7645_s21 + $0x948] sm:$0xff] }
 0x237   : > { %v2603_v26 = vadd.f32 %v2602_v21, %v2091_v15  ;;  %v1594_v15 = vsub.f32 %v570_v8, %v1082_v9  ;;  %v2105_v21 = vmul.f32 %v1593_v10, %v1593_v10  ;;  %v583_v9 = vld [vmem:[%s7640_s18 + $0x950] sm:$0xff] }
 0x238   : > { %v1095_v10 = vld [vmem:[%s7645_s21 + $0x950] sm:$0xff] }
 0x239   : > { %v2604_v31 = vadd.f32 %v2603_v26, %v2092_v20  ;;  %v1595_v20 = vsub.f32 %v571_v13, %v1083_v14  ;;  %v2106_v26 = vmul.f32 %v1594_v15, %v1594_v15  ;;  %v584_v14 = vld [vmem:[%s7640_s18 + $0x958] sm:$0xff] }
 0x23a   : > { %v1096_v15 = vld [vmem:[%s7645_s21 + $0x958] sm:$0xff] }
 0x23b   : > { %v2605_v36 = vadd.f32 %v2604_v31, %v2093_v25  ;;  %v1596_v25 = vsub.f32 %v572_v18, %v1084_v19  ;;  %v2107_v31 = vmul.f32 %v1595_v20, %v1595_v20  ;;  %v585_v19 = vld [vmem:[%s7640_s18 + $0x960] sm:$0xff] }
 0x23c   : > { %v1097_v20 = vld [vmem:[%s7645_s21 + $0x960] sm:$0xff] }
 0x23d   : > { %v2606_v41 = vadd.f32 %v2605_v36, %v2094_v30  ;;  %v1597_v30 = vsub.f32 %v573_v23, %v1085_v24  ;;  %v2108_v36 = vmul.f32 %v1596_v25, %v1596_v25  ;;  %v586_v24 = vld [vmem:[%s7640_s18 + $0x968] sm:$0xff] }
 0x23e   : > { %v1098_v25 = vld [vmem:[%s7645_s21 + $0x968] sm:$0xff] }
 0x23f   : > { %v2607_v46 = vadd.f32 %v2606_v41, %v2095_v35  ;;  %v1598_v35 = vsub.f32 %v574_v28, %v1086_v29  ;;  %v2109_v41 = vmul.f32 %v1597_v30, %v1597_v30  ;;  %v587_v29 = vld [vmem:[%s7640_s18 + $0x970] sm:$0xff] }
 0x240   : > { %v1099_v30 = vld [vmem:[%s7645_s21 + $0x970] sm:$0xff] }
 0x241   : > { %v2608_v51 = vadd.f32 %v2607_v46, %v2096_v40  ;;  %v1599_v40 = vsub.f32 %v575_v33, %v1087_v34  ;;  %v2110_v46 = vmul.f32 %v1598_v35, %v1598_v35  ;;  %v588_v34 = vld [vmem:[%s7640_s18 + $0x978] sm:$0xff] }
 0x242   : > { %v1100_v35 = vld [vmem:[%s7645_s21 + $0x978] sm:$0xff] }
 0x243   : > { %v2609_v56 = vadd.f32 %v2608_v51, %v2097_v45  ;;  %v1600_v45 = vsub.f32 %v576_v38, %v1088_v39  ;;  %v2111_v51 = vmul.f32 %v1599_v40, %v1599_v40  ;;  %v589_v39 = vld [vmem:[%s7640_s18 + $0x980] sm:$0xff] }
 0x244   : > { %v1101_v40 = vld [vmem:[%s7645_s21 + $0x980] sm:$0xff] }
 0x245   : > { %v2610_v61 = vadd.f32 %v2609_v56, %v2098_v50  ;;  %v1601_v50 = vsub.f32 %v577_v43, %v1089_v44  ;;  %v2112_v56 = vmul.f32 %v1600_v45, %v1600_v45  ;;  %v590_v44 = vld [vmem:[%s7640_s18 + $0x988] sm:$0xff] }
 0x246   : > { %v1102_v45 = vld [vmem:[%s7645_s21 + $0x988] sm:$0xff] }
 0x247   : > { %v2611_v2 = vadd.f32 %v2610_v61, %v2099_v55  ;;  %v1602_v55 = vsub.f32 %v578_v48, %v1090_v49  ;;  %v2113_v61 = vmul.f32 %v1601_v50, %v1601_v50  ;;  %v591_v49 = vld [vmem:[%s7640_s18 + $0x990] sm:$0xff] }
 0x248   : > { %v1103_v50 = vld [vmem:[%s7645_s21 + $0x990] sm:$0xff] }
 0x249   : > { %v2612_v7 = vadd.f32 %v2611_v2, %v2100_v60  ;;  %v1603_v60 = vsub.f32 %v579_v53, %v1091_v54  ;;  %v2114_v2 = vmul.f32 %v1602_v55, %v1602_v55  ;;  %v592_v54 = vld [vmem:[%s7640_s18 + $0x998] sm:$0xff] }
 0x24a   : > { %v1104_v55 = vld [vmem:[%s7645_s21 + $0x998] sm:$0xff] }
 0x24b   : > { %v2613_v12 = vadd.f32 %v2612_v7, %v2101_v1  ;;  %v1604_v1 = vsub.f32 %v580_v58, %v1092_v59  ;;  %v2115_v7 = vmul.f32 %v1603_v60, %v1603_v60  ;;  %v593_v59 = vld [vmem:[%s7640_s18 + $0x9a0] sm:$0xff] }
 0x24c   : > { %v1105_v60 = vld [vmem:[%s7645_s21 + $0x9a0] sm:$0xff] }
 0x24d   : > { %v2614_v17 = vadd.f32 %v2613_v12, %v2102_v6  ;;  %v1605_v6 = vsub.f32 %v581_v63, %v1093_v0  ;;  %v2116_v12 = vmul.f32 %v1604_v1, %v1604_v1  ;;  %v594_v0 = vld [vmem:[%s7640_s18 + $0x9a8] sm:$0xff] }
 0x24e   : > { %v1106_v1 = vld [vmem:[%s7645_s21 + $0x9a8] sm:$0xff] }
 0x24f   : > { %v2615_v22 = vadd.f32 %v2614_v17, %v2103_v11  ;;  %v1606_v11 = vsub.f32 %v582_v4, %v1094_v5  ;;  %v2117_v17 = vmul.f32 %v1605_v6, %v1605_v6  ;;  %v595_v5 = vld [vmem:[%s7640_s18 + $0x9b0] sm:$0xff] }
 0x250   : > { %v1107_v6 = vld [vmem:[%s7645_s21 + $0x9b0] sm:$0xff] }
 0x251   : > { %v2616_v27 = vadd.f32 %v2615_v22, %v2104_v16  ;;  %v1607_v16 = vsub.f32 %v583_v9, %v1095_v10  ;;  %v2118_v22 = vmul.f32 %v1606_v11, %v1606_v11  ;;  %v596_v10 = vld [vmem:[%s7640_s18 + $0x9b8] sm:$0xff] }
 0x252   : > { %v1108_v11 = vld [vmem:[%s7645_s21 + $0x9b8] sm:$0xff] }
 0x253   : > { %v2617_v32 = vadd.f32 %v2616_v27, %v2105_v21  ;;  %v1608_v21 = vsub.f32 %v584_v14, %v1096_v15  ;;  %v2119_v27 = vmul.f32 %v1607_v16, %v1607_v16  ;;  %v597_v15 = vld [vmem:[%s7640_s18 + $0x9c0] sm:$0xff] }
 0x254   : > { %v1109_v16 = vld [vmem:[%s7645_s21 + $0x9c0] sm:$0xff] }
 0x255   : > { %v2618_v37 = vadd.f32 %v2617_v32, %v2106_v26  ;;  %v1609_v26 = vsub.f32 %v585_v19, %v1097_v20  ;;  %v2120_v32 = vmul.f32 %v1608_v21, %v1608_v21  ;;  %v598_v20 = vld [vmem:[%s7640_s18 + $0x9c8] sm:$0xff] }
 0x256   : > { %v1110_v21 = vld [vmem:[%s7645_s21 + $0x9c8] sm:$0xff] }
 0x257   : > { %v2619_v42 = vadd.f32 %v2618_v37, %v2107_v31  ;;  %v1610_v31 = vsub.f32 %v586_v24, %v1098_v25  ;;  %v2121_v37 = vmul.f32 %v1609_v26, %v1609_v26  ;;  %v599_v25 = vld [vmem:[%s7640_s18 + $0x9d0] sm:$0xff] }
 0x258   : > { %v1111_v26 = vld [vmem:[%s7645_s21 + $0x9d0] sm:$0xff] }
 0x259   : > { %v2620_v47 = vadd.f32 %v2619_v42, %v2108_v36  ;;  %v1611_v36 = vsub.f32 %v587_v29, %v1099_v30  ;;  %v2122_v42 = vmul.f32 %v1610_v31, %v1610_v31  ;;  %v600_v30 = vld [vmem:[%s7640_s18 + $0x9d8] sm:$0xff] }
 0x25a   : > { %v1112_v31 = vld [vmem:[%s7645_s21 + $0x9d8] sm:$0xff] }
 0x25b   : > { %v2621_v52 = vadd.f32 %v2620_v47, %v2109_v41  ;;  %v1612_v41 = vsub.f32 %v588_v34, %v1100_v35  ;;  %v2123_v47 = vmul.f32 %v1611_v36, %v1611_v36  ;;  %v601_v35 = vld [vmem:[%s7640_s18 + $0x9e0] sm:$0xff] }
 0x25c   : > { %v1113_v36 = vld [vmem:[%s7645_s21 + $0x9e0] sm:$0xff] }
 0x25d   : > { %v2622_v57 = vadd.f32 %v2621_v52, %v2110_v46  ;;  %v1613_v46 = vsub.f32 %v589_v39, %v1101_v40  ;;  %v2124_v52 = vmul.f32 %v1612_v41, %v1612_v41  ;;  %v602_v40 = vld [vmem:[%s7640_s18 + $0x9e8] sm:$0xff] }
 0x25e   : > { %v1114_v41 = vld [vmem:[%s7645_s21 + $0x9e8] sm:$0xff] }
 0x25f   : > { %v2623_v62 = vadd.f32 %v2622_v57, %v2111_v51  ;;  %v1614_v51 = vsub.f32 %v590_v44, %v1102_v45  ;;  %v2125_v57 = vmul.f32 %v1613_v46, %v1613_v46  ;;  %v603_v45 = vld [vmem:[%s7640_s18 + $0x9f0] sm:$0xff] }
 0x260   : > { %v1115_v46 = vld [vmem:[%s7645_s21 + $0x9f0] sm:$0xff] }
 0x261   : > { %v2624_v3 = vadd.f32 %v2623_v62, %v2112_v56  ;;  %v1615_v56 = vsub.f32 %v591_v49, %v1103_v50  ;;  %v2126_v62 = vmul.f32 %v1614_v51, %v1614_v51  ;;  %v604_v50 = vld [vmem:[%s7640_s18 + $0x9f8] sm:$0xff] }
 0x262   : > { %v1116_v51 = vld [vmem:[%s7645_s21 + $0x9f8] sm:$0xff] }
 0x263   : > { %v2625_v8 = vadd.f32 %v2624_v3, %v2113_v61  ;;  %v1616_v61 = vsub.f32 %v592_v54, %v1104_v55  ;;  %v2127_v3 = vmul.f32 %v1615_v56, %v1615_v56  ;;  %v605_v55 = vld [vmem:[%s7640_s18 + $0xa00] sm:$0xff] }
 0x264   : > { %v1117_v56 = vld [vmem:[%s7645_s21 + $0xa00] sm:$0xff] }
 0x265   : > { %v2626_v13 = vadd.f32 %v2625_v8, %v2114_v2  ;;  %v1617_v2 = vsub.f32 %v593_v59, %v1105_v60  ;;  %v2128_v8 = vmul.f32 %v1616_v61, %v1616_v61  ;;  %v606_v60 = vld [vmem:[%s7640_s18 + $0xa08] sm:$0xff] }
 0x266   : > { %v1118_v61 = vld [vmem:[%s7645_s21 + $0xa08] sm:$0xff] }
 0x267   : > { %v2627_v18 = vadd.f32 %v2626_v13, %v2115_v7  ;;  %v1618_v7 = vsub.f32 %v594_v0, %v1106_v1  ;;  %v2129_v13 = vmul.f32 %v1617_v2, %v1617_v2  ;;  %v607_v1 = vld [vmem:[%s7640_s18 + $0xa10] sm:$0xff] }
 0x268   : > { %v1119_v2 = vld [vmem:[%s7645_s21 + $0xa10] sm:$0xff] }
 0x269   : > { %v2628_v23 = vadd.f32 %v2627_v18, %v2116_v12  ;;  %v1619_v12 = vsub.f32 %v595_v5, %v1107_v6  ;;  %v2130_v18 = vmul.f32 %v1618_v7, %v1618_v7  ;;  %v608_v6 = vld [vmem:[%s7640_s18 + $0xa18] sm:$0xff] }
 0x26a   : > { %v1120_v7 = vld [vmem:[%s7645_s21 + $0xa18] sm:$0xff] }
 0x26b   : > { %v2629_v28 = vadd.f32 %v2628_v23, %v2117_v17  ;;  %v1620_v17 = vsub.f32 %v596_v10, %v1108_v11  ;;  %v2131_v23 = vmul.f32 %v1619_v12, %v1619_v12  ;;  %v609_v11 = vld [vmem:[%s7640_s18 + $0xa20] sm:$0xff] }
 0x26c   : > { %v1121_v12 = vld [vmem:[%s7645_s21 + $0xa20] sm:$0xff] }
 0x26d   : > { %v2630_v33 = vadd.f32 %v2629_v28, %v2118_v22  ;;  %v1621_v22 = vsub.f32 %v597_v15, %v1109_v16  ;;  %v2132_v28 = vmul.f32 %v1620_v17, %v1620_v17  ;;  %v610_v16 = vld [vmem:[%s7640_s18 + $0xa28] sm:$0xff] }
 0x26e   : > { %v1122_v17 = vld [vmem:[%s7645_s21 + $0xa28] sm:$0xff] }
 0x26f   : > { %v2631_v38 = vadd.f32 %v2630_v33, %v2119_v27  ;;  %v1622_v27 = vsub.f32 %v598_v20, %v1110_v21  ;;  %v2133_v33 = vmul.f32 %v1621_v22, %v1621_v22  ;;  %v611_v21 = vld [vmem:[%s7640_s18 + $0xa30] sm:$0xff] }
 0x270   : > { %v1123_v22 = vld [vmem:[%s7645_s21 + $0xa30] sm:$0xff] }
 0x271   : > { %v2632_v43 = vadd.f32 %v2631_v38, %v2120_v32  ;;  %v1623_v32 = vsub.f32 %v599_v25, %v1111_v26  ;;  %v2134_v38 = vmul.f32 %v1622_v27, %v1622_v27  ;;  %v612_v26 = vld [vmem:[%s7640_s18 + $0xa38] sm:$0xff] }
 0x272   : > { %v1124_v27 = vld [vmem:[%s7645_s21 + $0xa38] sm:$0xff] }
 0x273   : > { %v2633_v48 = vadd.f32 %v2632_v43, %v2121_v37  ;;  %v1624_v37 = vsub.f32 %v600_v30, %v1112_v31  ;;  %v2135_v43 = vmul.f32 %v1623_v32, %v1623_v32  ;;  %v613_v31 = vld [vmem:[%s7640_s18 + $0xa40] sm:$0xff] }
 0x274   : > { %v1125_v32 = vld [vmem:[%s7645_s21 + $0xa40] sm:$0xff] }
 0x275   : > { %v2634_v53 = vadd.f32 %v2633_v48, %v2122_v42  ;;  %v1625_v42 = vsub.f32 %v601_v35, %v1113_v36  ;;  %v2136_v48 = vmul.f32 %v1624_v37, %v1624_v37  ;;  %v614_v36 = vld [vmem:[%s7640_s18 + $0xa48] sm:$0xff] }
 0x276   : > { %v1126_v37 = vld [vmem:[%s7645_s21 + $0xa48] sm:$0xff] }
 0x277   : > { %v2635_v58 = vadd.f32 %v2634_v53, %v2123_v47  ;;  %v1626_v47 = vsub.f32 %v602_v40, %v1114_v41  ;;  %v2137_v53 = vmul.f32 %v1625_v42, %v1625_v42  ;;  %v615_v41 = vld [vmem:[%s7640_s18 + $0xa50] sm:$0xff] }
 0x278   : > { %v1127_v42 = vld [vmem:[%s7645_s21 + $0xa50] sm:$0xff] }
 0x279   : > { %v2636_v63 = vadd.f32 %v2635_v58, %v2124_v52  ;;  %v1627_v52 = vsub.f32 %v603_v45, %v1115_v46  ;;  %v2138_v58 = vmul.f32 %v1626_v47, %v1626_v47  ;;  %v616_v46 = vld [vmem:[%s7640_s18 + $0xa58] sm:$0xff] }
 0x27a   : > { %v1128_v47 = vld [vmem:[%s7645_s21 + $0xa58] sm:$0xff] }
 0x27b   : > { %v2637_v4 = vadd.f32 %v2636_v63, %v2125_v57  ;;  %v1628_v57 = vsub.f32 %v604_v50, %v1116_v51  ;;  %v2139_v63 = vmul.f32 %v1627_v52, %v1627_v52  ;;  %v617_v51 = vld [vmem:[%s7640_s18 + $0xa60] sm:$0xff] }
 0x27c   : > { %v1129_v52 = vld [vmem:[%s7645_s21 + $0xa60] sm:$0xff] }
 0x27d   : > { %v2638_v9 = vadd.f32 %v2637_v4, %v2126_v62  ;;  %v1629_v62 = vsub.f32 %v605_v55, %v1117_v56  ;;  %v2140_v4 = vmul.f32 %v1628_v57, %v1628_v57  ;;  %v618_v56 = vld [vmem:[%s7640_s18 + $0xa68] sm:$0xff] }
 0x27e   : > { %v1130_v57 = vld [vmem:[%s7645_s21 + $0xa68] sm:$0xff] }
 0x27f   : > { %v2639_v14 = vadd.f32 %v2638_v9, %v2127_v3  ;;  %v1630_v3 = vsub.f32 %v606_v60, %v1118_v61  ;;  %v2141_v9 = vmul.f32 %v1629_v62, %v1629_v62  ;;  %v619_v61 = vld [vmem:[%s7640_s18 + $0xa70] sm:$0xff] }
 0x280   : > { %v1131_v62 = vld [vmem:[%s7645_s21 + $0xa70] sm:$0xff] }
 0x281   : > { %v2640_v19 = vadd.f32 %v2639_v14, %v2128_v8  ;;  %v1631_v8 = vsub.f32 %v607_v1, %v1119_v2  ;;  %v2142_v14 = vmul.f32 %v1630_v3, %v1630_v3  ;;  %v620_v2 = vld [vmem:[%s7640_s18 + $0xa78] sm:$0xff] }
 0x282   : > { %v1132_v3 = vld [vmem:[%s7645_s21 + $0xa78] sm:$0xff] }
 0x283   : > { %v2641_v24 = vadd.f32 %v2640_v19, %v2129_v13  ;;  %v1632_v13 = vsub.f32 %v608_v6, %v1120_v7  ;;  %v2143_v19 = vmul.f32 %v1631_v8, %v1631_v8  ;;  %v621_v7 = vld [vmem:[%s7640_s18 + $0xa80] sm:$0xff] }
 0x284   : > { %v1133_v8 = vld [vmem:[%s7645_s21 + $0xa80] sm:$0xff] }
 0x285   : > { %v2642_v29 = vadd.f32 %v2641_v24, %v2130_v18  ;;  %v1633_v18 = vsub.f32 %v609_v11, %v1121_v12  ;;  %v2144_v24 = vmul.f32 %v1632_v13, %v1632_v13  ;;  %v622_v12 = vld [vmem:[%s7640_s18 + $0xa88] sm:$0xff] }
 0x286   : > { %v1134_v13 = vld [vmem:[%s7645_s21 + $0xa88] sm:$0xff] }
 0x287   : > { %v2643_v34 = vadd.f32 %v2642_v29, %v2131_v23  ;;  %v1634_v23 = vsub.f32 %v610_v16, %v1122_v17  ;;  %v2145_v29 = vmul.f32 %v1633_v18, %v1633_v18  ;;  %v623_v17 = vld [vmem:[%s7640_s18 + $0xa90] sm:$0xff] }
 0x288   : > { %v1135_v18 = vld [vmem:[%s7645_s21 + $0xa90] sm:$0xff] }
 0x289   : > { %v2644_v39 = vadd.f32 %v2643_v34, %v2132_v28  ;;  %v1635_v28 = vsub.f32 %v611_v21, %v1123_v22  ;;  %v2146_v34 = vmul.f32 %v1634_v23, %v1634_v23  ;;  %v624_v22 = vld [vmem:[%s7640_s18 + $0xa98] sm:$0xff] }
 0x28a   : > { %v1136_v23 = vld [vmem:[%s7645_s21 + $0xa98] sm:$0xff] }
 0x28b   : > { %v2645_v44 = vadd.f32 %v2644_v39, %v2133_v33  ;;  %v1636_v33 = vsub.f32 %v612_v26, %v1124_v27  ;;  %v2147_v39 = vmul.f32 %v1635_v28, %v1635_v28  ;;  %v625_v27 = vld [vmem:[%s7640_s18 + $0xaa0] sm:$0xff] }
 0x28c   : > { %v1137_v28 = vld [vmem:[%s7645_s21 + $0xaa0] sm:$0xff] }
 0x28d   : > { %v2646_v49 = vadd.f32 %v2645_v44, %v2134_v38  ;;  %v1637_v38 = vsub.f32 %v613_v31, %v1125_v32  ;;  %v2148_v44 = vmul.f32 %v1636_v33, %v1636_v33  ;;  %v626_v32 = vld [vmem:[%s7640_s18 + $0xaa8] sm:$0xff] }
 0x28e   : > { %v1138_v33 = vld [vmem:[%s7645_s21 + $0xaa8] sm:$0xff] }
 0x28f   : > { %v2647_v54 = vadd.f32 %v2646_v49, %v2135_v43  ;;  %v1638_v43 = vsub.f32 %v614_v36, %v1126_v37  ;;  %v2149_v49 = vmul.f32 %v1637_v38, %v1637_v38  ;;  %v627_v37 = vld [vmem:[%s7640_s18 + $0xab0] sm:$0xff] }
 0x290   : > { %v1139_v38 = vld [vmem:[%s7645_s21 + $0xab0] sm:$0xff] }
 0x291   : > { %v2648_v59 = vadd.f32 %v2647_v54, %v2136_v48  ;;  %v1639_v48 = vsub.f32 %v615_v41, %v1127_v42  ;;  %v2150_v54 = vmul.f32 %v1638_v43, %v1638_v43  ;;  %v628_v42 = vld [vmem:[%s7640_s18 + $0xab8] sm:$0xff] }
 0x292   : > { %v1140_v43 = vld [vmem:[%s7645_s21 + $0xab8] sm:$0xff] }
 0x293   : > { %v2649_v0 = vadd.f32 %v2648_v59, %v2137_v53  ;;  %v1640_v53 = vsub.f32 %v616_v46, %v1128_v47  ;;  %v2151_v59 = vmul.f32 %v1639_v48, %v1639_v48  ;;  %v629_v47 = vld [vmem:[%s7640_s18 + $0xac0] sm:$0xff] }
 0x294   : > { %v1141_v48 = vld [vmem:[%s7645_s21 + $0xac0] sm:$0xff] }
 0x295   : > { %v2650_v5 = vadd.f32 %v2649_v0, %v2138_v58  ;;  %v1641_v58 = vsub.f32 %v617_v51, %v1129_v52  ;;  %v2152_v0 = vmul.f32 %v1640_v53, %v1640_v53  ;;  %v630_v52 = vld [vmem:[%s7640_s18 + $0xac8] sm:$0xff] }
 0x296   : > { %v1142_v53 = vld [vmem:[%s7645_s21 + $0xac8] sm:$0xff] }
 0x297   : > { %v2651_v10 = vadd.f32 %v2650_v5, %v2139_v63  ;;  %v1642_v63 = vsub.f32 %v618_v56, %v1130_v57  ;;  %v2153_v5 = vmul.f32 %v1641_v58, %v1641_v58  ;;  %v631_v57 = vld [vmem:[%s7640_s18 + $0xad0] sm:$0xff] }
 0x298   : > { %v1143_v58 = vld [vmem:[%s7645_s21 + $0xad0] sm:$0xff] }
 0x299   : > { %v2652_v15 = vadd.f32 %v2651_v10, %v2140_v4  ;;  %v1643_v4 = vsub.f32 %v619_v61, %v1131_v62  ;;  %v2154_v10 = vmul.f32 %v1642_v63, %v1642_v63  ;;  %v632_v62 = vld [vmem:[%s7640_s18 + $0xad8] sm:$0xff] }
 0x29a   : > { %v1144_v63 = vld [vmem:[%s7645_s21 + $0xad8] sm:$0xff] }
 0x29b   : > { %v2653_v20 = vadd.f32 %v2652_v15, %v2141_v9  ;;  %v1644_v9 = vsub.f32 %v620_v2, %v1132_v3  ;;  %v2155_v15 = vmul.f32 %v1643_v4, %v1643_v4  ;;  %v633_v3 = vld [vmem:[%s7640_s18 + $0xae0] sm:$0xff] }
 0x29c   : > { %v1145_v4 = vld [vmem:[%s7645_s21 + $0xae0] sm:$0xff] }
 0x29d   : > { %v2654_v25 = vadd.f32 %v2653_v20, %v2142_v14  ;;  %v1645_v14 = vsub.f32 %v621_v7, %v1133_v8  ;;  %v2156_v20 = vmul.f32 %v1644_v9, %v1644_v9  ;;  %v634_v8 = vld [vmem:[%s7640_s18 + $0xae8] sm:$0xff] }
 0x29e   : > { %v1146_v9 = vld [vmem:[%s7645_s21 + $0xae8] sm:$0xff] }
 0x29f   : > { %v2655_v30 = vadd.f32 %v2654_v25, %v2143_v19  ;;  %v1646_v19 = vsub.f32 %v622_v12, %v1134_v13  ;;  %v2157_v25 = vmul.f32 %v1645_v14, %v1645_v14  ;;  %v635_v13 = vld [vmem:[%s7640_s18 + $0xaf0] sm:$0xff] }
 0x2a0   : > { %v1147_v14 = vld [vmem:[%s7645_s21 + $0xaf0] sm:$0xff] }
 0x2a1   : > { %v2656_v35 = vadd.f32 %v2655_v30, %v2144_v24  ;;  %v1647_v24 = vsub.f32 %v623_v17, %v1135_v18  ;;  %v2158_v30 = vmul.f32 %v1646_v19, %v1646_v19  ;;  %v636_v18 = vld [vmem:[%s7640_s18 + $0xaf8] sm:$0xff] }
 0x2a2   : > { %v1148_v19 = vld [vmem:[%s7645_s21 + $0xaf8] sm:$0xff] }
 0x2a3   : > { %v2657_v40 = vadd.f32 %v2656_v35, %v2145_v29  ;;  %v1648_v29 = vsub.f32 %v624_v22, %v1136_v23  ;;  %v2159_v35 = vmul.f32 %v1647_v24, %v1647_v24  ;;  %v637_v23 = vld [vmem:[%s7640_s18 + $0xb00] sm:$0xff] }
 0x2a4   : > { %v1149_v24 = vld [vmem:[%s7645_s21 + $0xb00] sm:$0xff] }
 0x2a5   : > { %v2658_v45 = vadd.f32 %v2657_v40, %v2146_v34  ;;  %v1649_v34 = vsub.f32 %v625_v27, %v1137_v28  ;;  %v2160_v40 = vmul.f32 %v1648_v29, %v1648_v29  ;;  %v638_v28 = vld [vmem:[%s7640_s18 + $0xb08] sm:$0xff] }
 0x2a6   : > { %v1150_v29 = vld [vmem:[%s7645_s21 + $0xb08] sm:$0xff] }
 0x2a7   : > { %v2659_v50 = vadd.f32 %v2658_v45, %v2147_v39  ;;  %v1650_v39 = vsub.f32 %v626_v32, %v1138_v33  ;;  %v2161_v45 = vmul.f32 %v1649_v34, %v1649_v34  ;;  %v639_v33 = vld [vmem:[%s7640_s18 + $0xb10] sm:$0xff] }
 0x2a8   : > { %v1151_v34 = vld [vmem:[%s7645_s21 + $0xb10] sm:$0xff] }
 0x2a9   : > { %v2660_v55 = vadd.f32 %v2659_v50, %v2148_v44  ;;  %v1651_v44 = vsub.f32 %v627_v37, %v1139_v38  ;;  %v2162_v50 = vmul.f32 %v1650_v39, %v1650_v39  ;;  %v640_v38 = vld [vmem:[%s7640_s18 + $0xb18] sm:$0xff] }
 0x2aa   : > { %v1152_v39 = vld [vmem:[%s7645_s21 + $0xb18] sm:$0xff] }
 0x2ab   : > { %v2661_v60 = vadd.f32 %v2660_v55, %v2149_v49  ;;  %v1652_v49 = vsub.f32 %v628_v42, %v1140_v43  ;;  %v2163_v55 = vmul.f32 %v1651_v44, %v1651_v44  ;;  %v641_v43 = vld [vmem:[%s7640_s18 + $0xb20] sm:$0xff] }
 0x2ac   : > { %v1153_v44 = vld [vmem:[%s7645_s21 + $0xb20] sm:$0xff] }
 0x2ad   : > { %v2662_v1 = vadd.f32 %v2661_v60, %v2150_v54  ;;  %v1653_v54 = vsub.f32 %v629_v47, %v1141_v48  ;;  %v2164_v60 = vmul.f32 %v1652_v49, %v1652_v49  ;;  %v642_v48 = vld [vmem:[%s7640_s18 + $0xb28] sm:$0xff] }
 0x2ae   : > { %v1154_v49 = vld [vmem:[%s7645_s21 + $0xb28] sm:$0xff] }
 0x2af   : > { %v2663_v6 = vadd.f32 %v2662_v1, %v2151_v59  ;;  %v1654_v59 = vsub.f32 %v630_v52, %v1142_v53  ;;  %v2165_v1 = vmul.f32 %v1653_v54, %v1653_v54  ;;  %v643_v53 = vld [vmem:[%s7640_s18 + $0xb30] sm:$0xff] }
 0x2b0   : > { %v1155_v54 = vld [vmem:[%s7645_s21 + $0xb30] sm:$0xff] }
 0x2b1   : > { %v2664_v11 = vadd.f32 %v2663_v6, %v2152_v0  ;;  %v1655_v0 = vsub.f32 %v631_v57, %v1143_v58  ;;  %v2166_v6 = vmul.f32 %v1654_v59, %v1654_v59  ;;  %v644_v58 = vld [vmem:[%s7640_s18 + $0xb38] sm:$0xff] }
 0x2b2   : > { %v1156_v59 = vld [vmem:[%s7645_s21 + $0xb38] sm:$0xff] }
 0x2b3   : > { %v2665_v16 = vadd.f32 %v2664_v11, %v2153_v5  ;;  %v1656_v5 = vsub.f32 %v632_v62, %v1144_v63  ;;  %v2167_v11 = vmul.f32 %v1655_v0, %v1655_v0  ;;  %v645_v63 = vld [vmem:[%s7640_s18 + $0xb40] sm:$0xff] }
 0x2b4   : > { %v1157_v0 = vld [vmem:[%s7645_s21 + $0xb40] sm:$0xff] }
 0x2b5   : > { %v2666_v21 = vadd.f32 %v2665_v16, %v2154_v10  ;;  %v1657_v10 = vsub.f32 %v633_v3, %v1145_v4  ;;  %v2168_v16 = vmul.f32 %v1656_v5, %v1656_v5  ;;  %v646_v4 = vld [vmem:[%s7640_s18 + $0xb48] sm:$0xff] }
 0x2b6   : > { %v1158_v5 = vld [vmem:[%s7645_s21 + $0xb48] sm:$0xff] }
 0x2b7   : > { %v2667_v26 = vadd.f32 %v2666_v21, %v2155_v15  ;;  %v1658_v15 = vsub.f32 %v634_v8, %v1146_v9  ;;  %v2169_v21 = vmul.f32 %v1657_v10, %v1657_v10  ;;  %v647_v9 = vld [vmem:[%s7640_s18 + $0xb50] sm:$0xff] }
 0x2b8   : > { %v1159_v10 = vld [vmem:[%s7645_s21 + $0xb50] sm:$0xff] }
 0x2b9   : > { %v2668_v31 = vadd.f32 %v2667_v26, %v2156_v20  ;;  %v1659_v20 = vsub.f32 %v635_v13, %v1147_v14  ;;  %v2170_v26 = vmul.f32 %v1658_v15, %v1658_v15  ;;  %v648_v14 = vld [vmem:[%s7640_s18 + $0xb58] sm:$0xff] }
 0x2ba   : > { %v1160_v15 = vld [vmem:[%s7645_s21 + $0xb58] sm:$0xff] }
 0x2bb   : > { %v2669_v36 = vadd.f32 %v2668_v31, %v2157_v25  ;;  %v1660_v25 = vsub.f32 %v636_v18, %v1148_v19  ;;  %v2171_v31 = vmul.f32 %v1659_v20, %v1659_v20  ;;  %v649_v19 = vld [vmem:[%s7640_s18 + $0xb60] sm:$0xff] }
 0x2bc   : > { %v1161_v20 = vld [vmem:[%s7645_s21 + $0xb60] sm:$0xff] }
 0x2bd   : > { %v2670_v41 = vadd.f32 %v2669_v36, %v2158_v30  ;;  %v1661_v30 = vsub.f32 %v637_v23, %v1149_v24  ;;  %v2172_v36 = vmul.f32 %v1660_v25, %v1660_v25  ;;  %v650_v24 = vld [vmem:[%s7640_s18 + $0xb68] sm:$0xff] }
 0x2be   : > { %v1162_v25 = vld [vmem:[%s7645_s21 + $0xb68] sm:$0xff] }
 0x2bf   : > { %v2671_v46 = vadd.f32 %v2670_v41, %v2159_v35  ;;  %v1662_v35 = vsub.f32 %v638_v28, %v1150_v29  ;;  %v2173_v41 = vmul.f32 %v1661_v30, %v1661_v30  ;;  %v651_v29 = vld [vmem:[%s7640_s18 + $0xb70] sm:$0xff] }
 0x2c0   : > { %v1163_v30 = vld [vmem:[%s7645_s21 + $0xb70] sm:$0xff] }
 0x2c1   : > { %v2672_v51 = vadd.f32 %v2671_v46, %v2160_v40  ;;  %v1663_v40 = vsub.f32 %v639_v33, %v1151_v34  ;;  %v2174_v46 = vmul.f32 %v1662_v35, %v1662_v35  ;;  %v652_v34 = vld [vmem:[%s7640_s18 + $0xb78] sm:$0xff] }
 0x2c2   : > { %v1164_v35 = vld [vmem:[%s7645_s21 + $0xb78] sm:$0xff] }
 0x2c3   : > { %v2673_v56 = vadd.f32 %v2672_v51, %v2161_v45  ;;  %v1664_v45 = vsub.f32 %v640_v38, %v1152_v39  ;;  %v2175_v51 = vmul.f32 %v1663_v40, %v1663_v40  ;;  %v653_v39 = vld [vmem:[%s7640_s18 + $0xb80] sm:$0xff] }
 0x2c4   : > { %v1165_v40 = vld [vmem:[%s7645_s21 + $0xb80] sm:$0xff] }
 0x2c5   : > { %v2674_v61 = vadd.f32 %v2673_v56, %v2162_v50  ;;  %v1665_v50 = vsub.f32 %v641_v43, %v1153_v44  ;;  %v2176_v56 = vmul.f32 %v1664_v45, %v1664_v45  ;;  %v654_v44 = vld [vmem:[%s7640_s18 + $0xb88] sm:$0xff] }
 0x2c6   : > { %v1166_v45 = vld [vmem:[%s7645_s21 + $0xb88] sm:$0xff] }
 0x2c7   : > { %v2675_v2 = vadd.f32 %v2674_v61, %v2163_v55  ;;  %v1666_v55 = vsub.f32 %v642_v48, %v1154_v49  ;;  %v2177_v61 = vmul.f32 %v1665_v50, %v1665_v50  ;;  %v655_v49 = vld [vmem:[%s7640_s18 + $0xb90] sm:$0xff] }
 0x2c8   : > { %v1167_v50 = vld [vmem:[%s7645_s21 + $0xb90] sm:$0xff] }
 0x2c9   : > { %v2676_v7 = vadd.f32 %v2675_v2, %v2164_v60  ;;  %v1667_v60 = vsub.f32 %v643_v53, %v1155_v54  ;;  %v2178_v2 = vmul.f32 %v1666_v55, %v1666_v55  ;;  %v656_v54 = vld [vmem:[%s7640_s18 + $0xb98] sm:$0xff] }
 0x2ca   : > { %v1168_v55 = vld [vmem:[%s7645_s21 + $0xb98] sm:$0xff] }
 0x2cb   : > { %v2677_v12 = vadd.f32 %v2676_v7, %v2165_v1  ;;  %v1668_v1 = vsub.f32 %v644_v58, %v1156_v59  ;;  %v2179_v7 = vmul.f32 %v1667_v60, %v1667_v60  ;;  %v657_v59 = vld [vmem:[%s7640_s18 + $0xba0] sm:$0xff] }
 0x2cc   : > { %v1169_v60 = vld [vmem:[%s7645_s21 + $0xba0] sm:$0xff] }
 0x2cd   : > { %v2678_v17 = vadd.f32 %v2677_v12, %v2166_v6  ;;  %v1669_v6 = vsub.f32 %v645_v63, %v1157_v0  ;;  %v2180_v12 = vmul.f32 %v1668_v1, %v1668_v1  ;;  %v658_v0 = vld [vmem:[%s7640_s18 + $0xba8] sm:$0xff] }
 0x2ce   : > { %v1170_v1 = vld [vmem:[%s7645_s21 + $0xba8] sm:$0xff] }
 0x2cf   : > { %v2679_v22 = vadd.f32 %v2678_v17, %v2167_v11  ;;  %v1670_v11 = vsub.f32 %v646_v4, %v1158_v5  ;;  %v2181_v17 = vmul.f32 %v1669_v6, %v1669_v6  ;;  %v659_v5 = vld [vmem:[%s7640_s18 + $0xbb0] sm:$0xff] }
 0x2d0   : > { %v1171_v6 = vld [vmem:[%s7645_s21 + $0xbb0] sm:$0xff] }
 0x2d1   : > { %v2680_v27 = vadd.f32 %v2679_v22, %v2168_v16  ;;  %v1671_v16 = vsub.f32 %v647_v9, %v1159_v10  ;;  %v2182_v22 = vmul.f32 %v1670_v11, %v1670_v11  ;;  %v660_v10 = vld [vmem:[%s7640_s18 + $0xbb8] sm:$0xff] }
 0x2d2   : > { %v1172_v11 = vld [vmem:[%s7645_s21 + $0xbb8] sm:$0xff] }
 0x2d3   : > { %v2681_v32 = vadd.f32 %v2680_v27, %v2169_v21  ;;  %v1672_v21 = vsub.f32 %v648_v14, %v1160_v15  ;;  %v2183_v27 = vmul.f32 %v1671_v16, %v1671_v16  ;;  %v661_v15 = vld [vmem:[%s7640_s18 + $0xbc0] sm:$0xff] }
 0x2d4   : > { %v1173_v16 = vld [vmem:[%s7645_s21 + $0xbc0] sm:$0xff] }
 0x2d5   : > { %v2682_v37 = vadd.f32 %v2681_v32, %v2170_v26  ;;  %v1673_v26 = vsub.f32 %v649_v19, %v1161_v20  ;;  %v2184_v32 = vmul.f32 %v1672_v21, %v1672_v21  ;;  %v662_v20 = vld [vmem:[%s7640_s18 + $0xbc8] sm:$0xff] }
 0x2d6   : > { %v1174_v21 = vld [vmem:[%s7645_s21 + $0xbc8] sm:$0xff] }
 0x2d7   : > { %v2683_v42 = vadd.f32 %v2682_v37, %v2171_v31  ;;  %v1674_v31 = vsub.f32 %v650_v24, %v1162_v25  ;;  %v2185_v37 = vmul.f32 %v1673_v26, %v1673_v26  ;;  %v663_v25 = vld [vmem:[%s7640_s18 + $0xbd0] sm:$0xff] }
 0x2d8   : > { %v1175_v26 = vld [vmem:[%s7645_s21 + $0xbd0] sm:$0xff] }
 0x2d9   : > { %v2684_v47 = vadd.f32 %v2683_v42, %v2172_v36  ;;  %v1675_v36 = vsub.f32 %v651_v29, %v1163_v30  ;;  %v2186_v42 = vmul.f32 %v1674_v31, %v1674_v31  ;;  %v664_v30 = vld [vmem:[%s7640_s18 + $0xbd8] sm:$0xff] }
 0x2da   : > { %v1176_v31 = vld [vmem:[%s7645_s21 + $0xbd8] sm:$0xff] }
 0x2db   : > { %v2685_v52 = vadd.f32 %v2684_v47, %v2173_v41  ;;  %v1676_v41 = vsub.f32 %v652_v34, %v1164_v35  ;;  %v2187_v47 = vmul.f32 %v1675_v36, %v1675_v36  ;;  %v665_v35 = vld [vmem:[%s7640_s18 + $0xbe0] sm:$0xff] }
 0x2dc   : > { %v1177_v36 = vld [vmem:[%s7645_s21 + $0xbe0] sm:$0xff] }
 0x2dd   : > { %v2686_v57 = vadd.f32 %v2685_v52, %v2174_v46  ;;  %v1677_v46 = vsub.f32 %v653_v39, %v1165_v40  ;;  %v2188_v52 = vmul.f32 %v1676_v41, %v1676_v41  ;;  %v666_v40 = vld [vmem:[%s7640_s18 + $0xbe8] sm:$0xff] }
 0x2de   : > { %v1178_v41 = vld [vmem:[%s7645_s21 + $0xbe8] sm:$0xff] }
 0x2df   : > { %v2687_v62 = vadd.f32 %v2686_v57, %v2175_v51  ;;  %v1678_v51 = vsub.f32 %v654_v44, %v1166_v45  ;;  %v2189_v57 = vmul.f32 %v1677_v46, %v1677_v46  ;;  %v667_v45 = vld [vmem:[%s7640_s18 + $0xbf0] sm:$0xff] }
 0x2e0   : > { %v1179_v46 = vld [vmem:[%s7645_s21 + $0xbf0] sm:$0xff] }
 0x2e1   : > { %v2688_v3 = vadd.f32 %v2687_v62, %v2176_v56  ;;  %v1679_v56 = vsub.f32 %v655_v49, %v1167_v50  ;;  %v2190_v62 = vmul.f32 %v1678_v51, %v1678_v51  ;;  %v668_v50 = vld [vmem:[%s7640_s18 + $0xbf8] sm:$0xff] }
 0x2e2   : > { %v1180_v51 = vld [vmem:[%s7645_s21 + $0xbf8] sm:$0xff] }
 0x2e3   : > { %v2689_v8 = vadd.f32 %v2688_v3, %v2177_v61  ;;  %v1680_v61 = vsub.f32 %v656_v54, %v1168_v55  ;;  %v2191_v3 = vmul.f32 %v1679_v56, %v1679_v56  ;;  %v669_v55 = vld [vmem:[%s7640_s18 + $0xc00] sm:$0xff] }
 0x2e4   : > { %v1181_v56 = vld [vmem:[%s7645_s21 + $0xc00] sm:$0xff] }
 0x2e5   : > { %v2690_v13 = vadd.f32 %v2689_v8, %v2178_v2  ;;  %v1681_v2 = vsub.f32 %v657_v59, %v1169_v60  ;;  %v2192_v8 = vmul.f32 %v1680_v61, %v1680_v61  ;;  %v670_v60 = vld [vmem:[%s7640_s18 + $0xc08] sm:$0xff] }
 0x2e6   : > { %v1182_v61 = vld [vmem:[%s7645_s21 + $0xc08] sm:$0xff] }
 0x2e7   : > { %v2691_v18 = vadd.f32 %v2690_v13, %v2179_v7  ;;  %v1682_v7 = vsub.f32 %v658_v0, %v1170_v1  ;;  %v2193_v13 = vmul.f32 %v1681_v2, %v1681_v2  ;;  %v671_v1 = vld [vmem:[%s7640_s18 + $0xc10] sm:$0xff] }
 0x2e8   : > { %v1183_v2 = vld [vmem:[%s7645_s21 + $0xc10] sm:$0xff] }
 0x2e9   : > { %v2692_v23 = vadd.f32 %v2691_v18, %v2180_v12  ;;  %v1683_v12 = vsub.f32 %v659_v5, %v1171_v6  ;;  %v2194_v18 = vmul.f32 %v1682_v7, %v1682_v7  ;;  %v672_v6 = vld [vmem:[%s7640_s18 + $0xc18] sm:$0xff] }
 0x2ea   : > { %v1184_v7 = vld [vmem:[%s7645_s21 + $0xc18] sm:$0xff] }
 0x2eb   : > { %v2693_v28 = vadd.f32 %v2692_v23, %v2181_v17  ;;  %v1684_v17 = vsub.f32 %v660_v10, %v1172_v11  ;;  %v2195_v23 = vmul.f32 %v1683_v12, %v1683_v12  ;;  %v673_v11 = vld [vmem:[%s7640_s18 + $0xc20] sm:$0xff] }
 0x2ec   : > { %v1185_v12 = vld [vmem:[%s7645_s21 + $0xc20] sm:$0xff] }
 0x2ed   : > { %v2694_v33 = vadd.f32 %v2693_v28, %v2182_v22  ;;  %v1685_v22 = vsub.f32 %v661_v15, %v1173_v16  ;;  %v2196_v28 = vmul.f32 %v1684_v17, %v1684_v17  ;;  %v674_v16 = vld [vmem:[%s7640_s18 + $0xc28] sm:$0xff] }
 0x2ee   : > { %v1186_v17 = vld [vmem:[%s7645_s21 + $0xc28] sm:$0xff] }
 0x2ef   : > { %v2695_v38 = vadd.f32 %v2694_v33, %v2183_v27  ;;  %v1686_v27 = vsub.f32 %v662_v20, %v1174_v21  ;;  %v2197_v33 = vmul.f32 %v1685_v22, %v1685_v22  ;;  %v675_v21 = vld [vmem:[%s7640_s18 + $0xc30] sm:$0xff] }
 0x2f0   : > { %v1187_v22 = vld [vmem:[%s7645_s21 + $0xc30] sm:$0xff] }
 0x2f1   : > { %v2696_v43 = vadd.f32 %v2695_v38, %v2184_v32  ;;  %v1687_v32 = vsub.f32 %v663_v25, %v1175_v26  ;;  %v2198_v38 = vmul.f32 %v1686_v27, %v1686_v27  ;;  %v676_v26 = vld [vmem:[%s7640_s18 + $0xc38] sm:$0xff] }
 0x2f2   : > { %v1188_v27 = vld [vmem:[%s7645_s21 + $0xc38] sm:$0xff] }
 0x2f3   : > { %v2697_v48 = vadd.f32 %v2696_v43, %v2185_v37  ;;  %v1688_v37 = vsub.f32 %v664_v30, %v1176_v31  ;;  %v2199_v43 = vmul.f32 %v1687_v32, %v1687_v32  ;;  %v677_v31 = vld [vmem:[%s7640_s18 + $0xc40] sm:$0xff] }
 0x2f4   : > { %v1189_v32 = vld [vmem:[%s7645_s21 + $0xc40] sm:$0xff] }
 0x2f5   : > { %v2698_v53 = vadd.f32 %v2697_v48, %v2186_v42  ;;  %v1689_v42 = vsub.f32 %v665_v35, %v1177_v36  ;;  %v2200_v48 = vmul.f32 %v1688_v37, %v1688_v37  ;;  %v678_v36 = vld [vmem:[%s7640_s18 + $0xc48] sm:$0xff] }
 0x2f6   : > { %v1190_v37 = vld [vmem:[%s7645_s21 + $0xc48] sm:$0xff] }
 0x2f7   : > { %v2699_v58 = vadd.f32 %v2698_v53, %v2187_v47  ;;  %v1690_v47 = vsub.f32 %v666_v40, %v1178_v41  ;;  %v2201_v53 = vmul.f32 %v1689_v42, %v1689_v42  ;;  %v679_v41 = vld [vmem:[%s7640_s18 + $0xc50] sm:$0xff] }
 0x2f8   : > { %v1191_v42 = vld [vmem:[%s7645_s21 + $0xc50] sm:$0xff] }
 0x2f9   : > { %v2700_v63 = vadd.f32 %v2699_v58, %v2188_v52  ;;  %v1691_v52 = vsub.f32 %v667_v45, %v1179_v46  ;;  %v2202_v58 = vmul.f32 %v1690_v47, %v1690_v47  ;;  %v680_v46 = vld [vmem:[%s7640_s18 + $0xc58] sm:$0xff] }
 0x2fa   : > { %v1192_v47 = vld [vmem:[%s7645_s21 + $0xc58] sm:$0xff] }
 0x2fb   : > { %v2701_v4 = vadd.f32 %v2700_v63, %v2189_v57  ;;  %v1692_v57 = vsub.f32 %v668_v50, %v1180_v51  ;;  %v2203_v63 = vmul.f32 %v1691_v52, %v1691_v52  ;;  %v681_v51 = vld [vmem:[%s7640_s18 + $0xc60] sm:$0xff] }
 0x2fc   : > { %v1193_v52 = vld [vmem:[%s7645_s21 + $0xc60] sm:$0xff] }
 0x2fd   : > { %v2702_v9 = vadd.f32 %v2701_v4, %v2190_v62  ;;  %v1693_v62 = vsub.f32 %v669_v55, %v1181_v56  ;;  %v2204_v4 = vmul.f32 %v1692_v57, %v1692_v57  ;;  %v682_v56 = vld [vmem:[%s7640_s18 + $0xc68] sm:$0xff] }
 0x2fe   : > { %v1194_v57 = vld [vmem:[%s7645_s21 + $0xc68] sm:$0xff] }
 0x2ff   : > { %v2703_v14 = vadd.f32 %v2702_v9, %v2191_v3  ;;  %v1694_v3 = vsub.f32 %v670_v60, %v1182_v61  ;;  %v2205_v9 = vmul.f32 %v1693_v62, %v1693_v62  ;;  %v683_v61 = vld [vmem:[%s7640_s18 + $0xc70] sm:$0xff] }
 0x300   : > { %v1195_v62 = vld [vmem:[%s7645_s21 + $0xc70] sm:$0xff] }
 0x301   : > { %v2704_v19 = vadd.f32 %v2703_v14, %v2192_v8  ;;  %v1695_v8 = vsub.f32 %v671_v1, %v1183_v2  ;;  %v2206_v14 = vmul.f32 %v1694_v3, %v1694_v3  ;;  %v684_v2 = vld [vmem:[%s7640_s18 + $0xc78] sm:$0xff] }
 0x302   : > { %v1196_v3 = vld [vmem:[%s7645_s21 + $0xc78] sm:$0xff] }
 0x303   : > { %v2705_v24 = vadd.f32 %v2704_v19, %v2193_v13  ;;  %v1696_v13 = vsub.f32 %v672_v6, %v1184_v7  ;;  %v2207_v19 = vmul.f32 %v1695_v8, %v1695_v8  ;;  %v685_v7 = vld [vmem:[%s7640_s18 + $0xc80] sm:$0xff] }
 0x304   : > { %v1197_v8 = vld [vmem:[%s7645_s21 + $0xc80] sm:$0xff] }
 0x305   : > { %v2706_v29 = vadd.f32 %v2705_v24, %v2194_v18  ;;  %v1697_v18 = vsub.f32 %v673_v11, %v1185_v12  ;;  %v2208_v24 = vmul.f32 %v1696_v13, %v1696_v13  ;;  %v686_v12 = vld [vmem:[%s7640_s18 + $0xc88] sm:$0xff] }
 0x306   : > { %v1198_v13 = vld [vmem:[%s7645_s21 + $0xc88] sm:$0xff] }
 0x307   : > { %v2707_v34 = vadd.f32 %v2706_v29, %v2195_v23  ;;  %v1698_v23 = vsub.f32 %v674_v16, %v1186_v17  ;;  %v2209_v29 = vmul.f32 %v1697_v18, %v1697_v18  ;;  %v687_v17 = vld [vmem:[%s7640_s18 + $0xc90] sm:$0xff] }
 0x308   : > { %v1199_v18 = vld [vmem:[%s7645_s21 + $0xc90] sm:$0xff] }
 0x309   : > { %v2708_v39 = vadd.f32 %v2707_v34, %v2196_v28  ;;  %v1699_v28 = vsub.f32 %v675_v21, %v1187_v22  ;;  %v2210_v34 = vmul.f32 %v1698_v23, %v1698_v23  ;;  %v688_v22 = vld [vmem:[%s7640_s18 + $0xc98] sm:$0xff] }
 0x30a   : > { %v1200_v23 = vld [vmem:[%s7645_s21 + $0xc98] sm:$0xff] }
 0x30b   : > { %v2709_v44 = vadd.f32 %v2708_v39, %v2197_v33  ;;  %v1700_v33 = vsub.f32 %v676_v26, %v1188_v27  ;;  %v2211_v39 = vmul.f32 %v1699_v28, %v1699_v28  ;;  %v689_v27 = vld [vmem:[%s7640_s18 + $0xca0] sm:$0xff] }
 0x30c   : > { %v1201_v28 = vld [vmem:[%s7645_s21 + $0xca0] sm:$0xff] }
 0x30d   : > { %v2710_v49 = vadd.f32 %v2709_v44, %v2198_v38  ;;  %v1701_v38 = vsub.f32 %v677_v31, %v1189_v32  ;;  %v2212_v44 = vmul.f32 %v1700_v33, %v1700_v33  ;;  %v690_v32 = vld [vmem:[%s7640_s18 + $0xca8] sm:$0xff] }
 0x30e   : > { %v1202_v33 = vld [vmem:[%s7645_s21 + $0xca8] sm:$0xff] }
 0x30f   : > { %v2711_v54 = vadd.f32 %v2710_v49, %v2199_v43  ;;  %v1702_v43 = vsub.f32 %v678_v36, %v1190_v37  ;;  %v2213_v49 = vmul.f32 %v1701_v38, %v1701_v38  ;;  %v691_v37 = vld [vmem:[%s7640_s18 + $0xcb0] sm:$0xff] }
 0x310   : > { %v1203_v38 = vld [vmem:[%s7645_s21 + $0xcb0] sm:$0xff] }
 0x311   : > { %v2712_v59 = vadd.f32 %v2711_v54, %v2200_v48  ;;  %v1703_v48 = vsub.f32 %v679_v41, %v1191_v42  ;;  %v2214_v54 = vmul.f32 %v1702_v43, %v1702_v43  ;;  %v692_v42 = vld [vmem:[%s7640_s18 + $0xcb8] sm:$0xff] }
 0x312   : > { %v1204_v43 = vld [vmem:[%s7645_s21 + $0xcb8] sm:$0xff] }
 0x313   : > { %v2713_v0 = vadd.f32 %v2712_v59, %v2201_v53  ;;  %v1704_v53 = vsub.f32 %v680_v46, %v1192_v47  ;;  %v2215_v59 = vmul.f32 %v1703_v48, %v1703_v48  ;;  %v693_v47 = vld [vmem:[%s7640_s18 + $0xcc0] sm:$0xff] }
 0x314   : > { %v1205_v48 = vld [vmem:[%s7645_s21 + $0xcc0] sm:$0xff] }
 0x315   : > { %v2714_v5 = vadd.f32 %v2713_v0, %v2202_v58  ;;  %v1705_v58 = vsub.f32 %v681_v51, %v1193_v52  ;;  %v2216_v0 = vmul.f32 %v1704_v53, %v1704_v53  ;;  %v694_v52 = vld [vmem:[%s7640_s18 + $0xcc8] sm:$0xff] }
 0x316   : > { %v1206_v53 = vld [vmem:[%s7645_s21 + $0xcc8] sm:$0xff] }
 0x317   : > { %v2715_v10 = vadd.f32 %v2714_v5, %v2203_v63  ;;  %v1706_v63 = vsub.f32 %v682_v56, %v1194_v57  ;;  %v2217_v5 = vmul.f32 %v1705_v58, %v1705_v58  ;;  %v695_v57 = vld [vmem:[%s7640_s18 + $0xcd0] sm:$0xff] }
 0x318   : > { %v1207_v58 = vld [vmem:[%s7645_s21 + $0xcd0] sm:$0xff] }
 0x319   : > { %v2716_v15 = vadd.f32 %v2715_v10, %v2204_v4  ;;  %v1707_v4 = vsub.f32 %v683_v61, %v1195_v62  ;;  %v2218_v10 = vmul.f32 %v1706_v63, %v1706_v63  ;;  %v696_v62 = vld [vmem:[%s7640_s18 + $0xcd8] sm:$0xff] }
 0x31a   : > { %v1208_v63 = vld [vmem:[%s7645_s21 + $0xcd8] sm:$0xff] }
 0x31b   : > { %v2717_v20 = vadd.f32 %v2716_v15, %v2205_v9  ;;  %v1708_v9 = vsub.f32 %v684_v2, %v1196_v3  ;;  %v2219_v15 = vmul.f32 %v1707_v4, %v1707_v4  ;;  %v697_v3 = vld [vmem:[%s7640_s18 + $0xce0] sm:$0xff] }
 0x31c   : > { %v1209_v4 = vld [vmem:[%s7645_s21 + $0xce0] sm:$0xff] }
 0x31d   : > { %v2718_v25 = vadd.f32 %v2717_v20, %v2206_v14  ;;  %v1709_v14 = vsub.f32 %v685_v7, %v1197_v8  ;;  %v2220_v20 = vmul.f32 %v1708_v9, %v1708_v9  ;;  %v698_v8 = vld [vmem:[%s7640_s18 + $0xce8] sm:$0xff] }
 0x31e   : > { %v1210_v9 = vld [vmem:[%s7645_s21 + $0xce8] sm:$0xff] }
 0x31f   : > { %v2719_v30 = vadd.f32 %v2718_v25, %v2207_v19  ;;  %v1710_v19 = vsub.f32 %v686_v12, %v1198_v13  ;;  %v2221_v25 = vmul.f32 %v1709_v14, %v1709_v14  ;;  %v699_v13 = vld [vmem:[%s7640_s18 + $0xcf0] sm:$0xff] }
 0x320   : > { %v1211_v14 = vld [vmem:[%s7645_s21 + $0xcf0] sm:$0xff] }
 0x321   : > { %v2720_v35 = vadd.f32 %v2719_v30, %v2208_v24  ;;  %v1711_v24 = vsub.f32 %v687_v17, %v1199_v18  ;;  %v2222_v30 = vmul.f32 %v1710_v19, %v1710_v19  ;;  %v700_v18 = vld [vmem:[%s7640_s18 + $0xcf8] sm:$0xff] }
 0x322   : > { %v1212_v19 = vld [vmem:[%s7645_s21 + $0xcf8] sm:$0xff] }
 0x323   : > { %v2721_v40 = vadd.f32 %v2720_v35, %v2209_v29  ;;  %v1712_v29 = vsub.f32 %v688_v22, %v1200_v23  ;;  %v2223_v35 = vmul.f32 %v1711_v24, %v1711_v24  ;;  %v701_v23 = vld [vmem:[%s7640_s18 + $0xd00] sm:$0xff] }
 0x324   : > { %v1213_v24 = vld [vmem:[%s7645_s21 + $0xd00] sm:$0xff] }
 0x325   : > { %v2722_v45 = vadd.f32 %v2721_v40, %v2210_v34  ;;  %v1713_v34 = vsub.f32 %v689_v27, %v1201_v28  ;;  %v2224_v40 = vmul.f32 %v1712_v29, %v1712_v29  ;;  %v702_v28 = vld [vmem:[%s7640_s18 + $0xd08] sm:$0xff] }
 0x326   : > { %v1214_v29 = vld [vmem:[%s7645_s21 + $0xd08] sm:$0xff] }
 0x327   : > { %v2723_v50 = vadd.f32 %v2722_v45, %v2211_v39  ;;  %v1714_v39 = vsub.f32 %v690_v32, %v1202_v33  ;;  %v2225_v45 = vmul.f32 %v1713_v34, %v1713_v34  ;;  %v703_v33 = vld [vmem:[%s7640_s18 + $0xd10] sm:$0xff] }
 0x328   : > { %v1215_v34 = vld [vmem:[%s7645_s21 + $0xd10] sm:$0xff] }
 0x329   : > { %v2724_v55 = vadd.f32 %v2723_v50, %v2212_v44  ;;  %v1715_v44 = vsub.f32 %v691_v37, %v1203_v38  ;;  %v2226_v50 = vmul.f32 %v1714_v39, %v1714_v39  ;;  %v704_v38 = vld [vmem:[%s7640_s18 + $0xd18] sm:$0xff] }
 0x32a   : > { %v1216_v39 = vld [vmem:[%s7645_s21 + $0xd18] sm:$0xff] }
 0x32b   : > { %v2725_v60 = vadd.f32 %v2724_v55, %v2213_v49  ;;  %v1716_v49 = vsub.f32 %v692_v42, %v1204_v43  ;;  %v2227_v55 = vmul.f32 %v1715_v44, %v1715_v44  ;;  %v705_v43 = vld [vmem:[%s7640_s18 + $0xd20] sm:$0xff] }
 0x32c   : > { %v1217_v44 = vld [vmem:[%s7645_s21 + $0xd20] sm:$0xff] }
 0x32d   : > { %v2726_v1 = vadd.f32 %v2725_v60, %v2214_v54  ;;  %v1717_v54 = vsub.f32 %v693_v47, %v1205_v48  ;;  %v2228_v60 = vmul.f32 %v1716_v49, %v1716_v49  ;;  %v706_v48 = vld [vmem:[%s7640_s18 + $0xd28] sm:$0xff] }
 0x32e   : > { %v1218_v49 = vld [vmem:[%s7645_s21 + $0xd28] sm:$0xff] }
 0x32f   : > { %v2727_v6 = vadd.f32 %v2726_v1, %v2215_v59  ;;  %v1718_v59 = vsub.f32 %v694_v52, %v1206_v53  ;;  %v2229_v1 = vmul.f32 %v1717_v54, %v1717_v54  ;;  %v707_v53 = vld [vmem:[%s7640_s18 + $0xd30] sm:$0xff] }
 0x330   : > { %v1219_v54 = vld [vmem:[%s7645_s21 + $0xd30] sm:$0xff] }
 0x331   : > { %v2728_v11 = vadd.f32 %v2727_v6, %v2216_v0  ;;  %v1719_v0 = vsub.f32 %v695_v57, %v1207_v58  ;;  %v2230_v6 = vmul.f32 %v1718_v59, %v1718_v59  ;;  %v708_v58 = vld [vmem:[%s7640_s18 + $0xd38] sm:$0xff] }
 0x332   : > { %v1220_v59 = vld [vmem:[%s7645_s21 + $0xd38] sm:$0xff] }
 0x333   : > { %v2729_v16 = vadd.f32 %v2728_v11, %v2217_v5  ;;  %v1720_v5 = vsub.f32 %v696_v62, %v1208_v63  ;;  %v2231_v11 = vmul.f32 %v1719_v0, %v1719_v0  ;;  %v709_v63 = vld [vmem:[%s7640_s18 + $0xd40] sm:$0xff] }
 0x334   : > { %v1221_v0 = vld [vmem:[%s7645_s21 + $0xd40] sm:$0xff] }
 0x335   : > { %v2730_v21 = vadd.f32 %v2729_v16, %v2218_v10  ;;  %v1721_v10 = vsub.f32 %v697_v3, %v1209_v4  ;;  %v2232_v16 = vmul.f32 %v1720_v5, %v1720_v5  ;;  %v710_v4 = vld [vmem:[%s7640_s18 + $0xd48] sm:$0xff] }
 0x336   : > { %v1222_v5 = vld [vmem:[%s7645_s21 + $0xd48] sm:$0xff] }
 0x337   : > { %v2731_v26 = vadd.f32 %v2730_v21, %v2219_v15  ;;  %v1722_v15 = vsub.f32 %v698_v8, %v1210_v9  ;;  %v2233_v21 = vmul.f32 %v1721_v10, %v1721_v10  ;;  %v711_v9 = vld [vmem:[%s7640_s18 + $0xd50] sm:$0xff] }
 0x338   : > { %v1223_v10 = vld [vmem:[%s7645_s21 + $0xd50] sm:$0xff] }
 0x339   : > { %v2732_v31 = vadd.f32 %v2731_v26, %v2220_v20  ;;  %v1723_v20 = vsub.f32 %v699_v13, %v1211_v14  ;;  %v2234_v26 = vmul.f32 %v1722_v15, %v1722_v15  ;;  %v712_v14 = vld [vmem:[%s7640_s18 + $0xd58] sm:$0xff] }
 0x33a   : > { %v1224_v15 = vld [vmem:[%s7645_s21 + $0xd58] sm:$0xff] }
 0x33b   : > { %v2733_v36 = vadd.f32 %v2732_v31, %v2221_v25  ;;  %v1724_v25 = vsub.f32 %v700_v18, %v1212_v19  ;;  %v2235_v31 = vmul.f32 %v1723_v20, %v1723_v20  ;;  %v713_v19 = vld [vmem:[%s7640_s18 + $0xd60] sm:$0xff] }
 0x33c   : > { %v1225_v20 = vld [vmem:[%s7645_s21 + $0xd60] sm:$0xff] }
 0x33d   : > { %v2734_v41 = vadd.f32 %v2733_v36, %v2222_v30  ;;  %v1725_v30 = vsub.f32 %v701_v23, %v1213_v24  ;;  %v2236_v36 = vmul.f32 %v1724_v25, %v1724_v25  ;;  %v714_v24 = vld [vmem:[%s7640_s18 + $0xd68] sm:$0xff] }
 0x33e   : > { %v1226_v25 = vld [vmem:[%s7645_s21 + $0xd68] sm:$0xff] }
 0x33f   : > { %v2735_v46 = vadd.f32 %v2734_v41, %v2223_v35  ;;  %v1726_v35 = vsub.f32 %v702_v28, %v1214_v29  ;;  %v2237_v41 = vmul.f32 %v1725_v30, %v1725_v30  ;;  %v715_v29 = vld [vmem:[%s7640_s18 + $0xd70] sm:$0xff] }
 0x340   : > { %v1227_v30 = vld [vmem:[%s7645_s21 + $0xd70] sm:$0xff] }
 0x341   : > { %v2736_v51 = vadd.f32 %v2735_v46, %v2224_v40  ;;  %v1727_v40 = vsub.f32 %v703_v33, %v1215_v34  ;;  %v2238_v46 = vmul.f32 %v1726_v35, %v1726_v35  ;;  %v716_v34 = vld [vmem:[%s7640_s18 + $0xd78] sm:$0xff] }
 0x342   : > { %v1228_v35 = vld [vmem:[%s7645_s21 + $0xd78] sm:$0xff] }
 0x343   : > { %v2737_v56 = vadd.f32 %v2736_v51, %v2225_v45  ;;  %v1728_v45 = vsub.f32 %v704_v38, %v1216_v39  ;;  %v2239_v51 = vmul.f32 %v1727_v40, %v1727_v40  ;;  %v717_v39 = vld [vmem:[%s7640_s18 + $0xd80] sm:$0xff] }
 0x344   : > { %v1229_v40 = vld [vmem:[%s7645_s21 + $0xd80] sm:$0xff] }
 0x345   : > { %v2738_v61 = vadd.f32 %v2737_v56, %v2226_v50  ;;  %v1729_v50 = vsub.f32 %v705_v43, %v1217_v44  ;;  %v2240_v56 = vmul.f32 %v1728_v45, %v1728_v45  ;;  %v718_v44 = vld [vmem:[%s7640_s18 + $0xd88] sm:$0xff] }
 0x346   : > { %v1230_v45 = vld [vmem:[%s7645_s21 + $0xd88] sm:$0xff] }
 0x347   : > { %v2739_v2 = vadd.f32 %v2738_v61, %v2227_v55  ;;  %v1730_v55 = vsub.f32 %v706_v48, %v1218_v49  ;;  %v2241_v61 = vmul.f32 %v1729_v50, %v1729_v50  ;;  %v719_v49 = vld [vmem:[%s7640_s18 + $0xd90] sm:$0xff] }
 0x348   : > { %v1231_v50 = vld [vmem:[%s7645_s21 + $0xd90] sm:$0xff] }
 0x349   : > { %v2740_v7 = vadd.f32 %v2739_v2, %v2228_v60  ;;  %v1731_v60 = vsub.f32 %v707_v53, %v1219_v54  ;;  %v2242_v2 = vmul.f32 %v1730_v55, %v1730_v55  ;;  %v720_v54 = vld [vmem:[%s7640_s18 + $0xd98] sm:$0xff] }
 0x34a   : > { %v1232_v55 = vld [vmem:[%s7645_s21 + $0xd98] sm:$0xff] }
 0x34b   : > { %v2741_v12 = vadd.f32 %v2740_v7, %v2229_v1  ;;  %v1732_v1 = vsub.f32 %v708_v58, %v1220_v59  ;;  %v2243_v7 = vmul.f32 %v1731_v60, %v1731_v60  ;;  %v721_v59 = vld [vmem:[%s7640_s18 + $0xda0] sm:$0xff] }
 0x34c   : > { %v1233_v60 = vld [vmem:[%s7645_s21 + $0xda0] sm:$0xff] }
 0x34d   : > { %v2742_v17 = vadd.f32 %v2741_v12, %v2230_v6  ;;  %v1733_v6 = vsub.f32 %v709_v63, %v1221_v0  ;;  %v2244_v12 = vmul.f32 %v1732_v1, %v1732_v1  ;;  %v722_v0 = vld [vmem:[%s7640_s18 + $0xda8] sm:$0xff] }
 0x34e   : > { %v1234_v1 = vld [vmem:[%s7645_s21 + $0xda8] sm:$0xff] }
 0x34f   : > { %v2743_v22 = vadd.f32 %v2742_v17, %v2231_v11  ;;  %v1734_v11 = vsub.f32 %v710_v4, %v1222_v5  ;;  %v2245_v17 = vmul.f32 %v1733_v6, %v1733_v6  ;;  %v723_v5 = vld [vmem:[%s7640_s18 + $0xdb0] sm:$0xff] }
 0x350   : > { %v1235_v6 = vld [vmem:[%s7645_s21 + $0xdb0] sm:$0xff] }
 0x351   : > { %v2744_v27 = vadd.f32 %v2743_v22, %v2232_v16  ;;  %v1735_v16 = vsub.f32 %v711_v9, %v1223_v10  ;;  %v2246_v22 = vmul.f32 %v1734_v11, %v1734_v11  ;;  %v724_v10 = vld [vmem:[%s7640_s18 + $0xdb8] sm:$0xff] }
 0x352   : > { %v1236_v11 = vld [vmem:[%s7645_s21 + $0xdb8] sm:$0xff] }
 0x353   : > { %v2745_v32 = vadd.f32 %v2744_v27, %v2233_v21  ;;  %v1736_v21 = vsub.f32 %v712_v14, %v1224_v15  ;;  %v2247_v27 = vmul.f32 %v1735_v16, %v1735_v16  ;;  %v725_v15 = vld [vmem:[%s7640_s18 + $0xdc0] sm:$0xff] }
 0x354   : > { %v1237_v16 = vld [vmem:[%s7645_s21 + $0xdc0] sm:$0xff] }
 0x355   : > { %v2746_v37 = vadd.f32 %v2745_v32, %v2234_v26  ;;  %v1737_v26 = vsub.f32 %v713_v19, %v1225_v20  ;;  %v2248_v32 = vmul.f32 %v1736_v21, %v1736_v21  ;;  %v726_v20 = vld [vmem:[%s7640_s18 + $0xdc8] sm:$0xff] }
 0x356   : > { %v1238_v21 = vld [vmem:[%s7645_s21 + $0xdc8] sm:$0xff] }
 0x357   : > { %v2747_v42 = vadd.f32 %v2746_v37, %v2235_v31  ;;  %v1738_v31 = vsub.f32 %v714_v24, %v1226_v25  ;;  %v2249_v37 = vmul.f32 %v1737_v26, %v1737_v26  ;;  %v727_v25 = vld [vmem:[%s7640_s18 + $0xdd0] sm:$0xff] }
 0x358   : > { %v1239_v26 = vld [vmem:[%s7645_s21 + $0xdd0] sm:$0xff] }
 0x359   : > { %v2748_v47 = vadd.f32 %v2747_v42, %v2236_v36  ;;  %v1739_v36 = vsub.f32 %v715_v29, %v1227_v30  ;;  %v2250_v42 = vmul.f32 %v1738_v31, %v1738_v31  ;;  %v728_v30 = vld [vmem:[%s7640_s18 + $0xdd8] sm:$0xff] }
 0x35a   : > { %v1240_v31 = vld [vmem:[%s7645_s21 + $0xdd8] sm:$0xff] }
 0x35b   : > { %v2749_v52 = vadd.f32 %v2748_v47, %v2237_v41  ;;  %v1740_v41 = vsub.f32 %v716_v34, %v1228_v35  ;;  %v2251_v47 = vmul.f32 %v1739_v36, %v1739_v36  ;;  %v729_v35 = vld [vmem:[%s7640_s18 + $0xde0] sm:$0xff] }
 0x35c   : > { %v1241_v36 = vld [vmem:[%s7645_s21 + $0xde0] sm:$0xff] }
 0x35d   : > { %v2750_v57 = vadd.f32 %v2749_v52, %v2238_v46  ;;  %v1741_v46 = vsub.f32 %v717_v39, %v1229_v40  ;;  %v2252_v52 = vmul.f32 %v1740_v41, %v1740_v41  ;;  %v730_v40 = vld [vmem:[%s7640_s18 + $0xde8] sm:$0xff] }
 0x35e   : > { %v1242_v41 = vld [vmem:[%s7645_s21 + $0xde8] sm:$0xff] }
 0x35f   : > { %v2751_v62 = vadd.f32 %v2750_v57, %v2239_v51  ;;  %v1742_v51 = vsub.f32 %v718_v44, %v1230_v45  ;;  %v2253_v57 = vmul.f32 %v1741_v46, %v1741_v46  ;;  %v731_v45 = vld [vmem:[%s7640_s18 + $0xdf0] sm:$0xff] }
 0x360   : > { %v1243_v46 = vld [vmem:[%s7645_s21 + $0xdf0] sm:$0xff] }
 0x361   : > { %v2752_v3 = vadd.f32 %v2751_v62, %v2240_v56  ;;  %v1743_v56 = vsub.f32 %v719_v49, %v1231_v50  ;;  %v2254_v62 = vmul.f32 %v1742_v51, %v1742_v51  ;;  %v732_v50 = vld [vmem:[%s7640_s18 + $0xdf8] sm:$0xff] }
 0x362   : > { %v1244_v51 = vld [vmem:[%s7645_s21 + $0xdf8] sm:$0xff] }
 0x363   : > { %v2753_v8 = vadd.f32 %v2752_v3, %v2241_v61  ;;  %v1744_v61 = vsub.f32 %v720_v54, %v1232_v55  ;;  %v2255_v3 = vmul.f32 %v1743_v56, %v1743_v56  ;;  %v733_v55 = vld [vmem:[%s7640_s18 + $0xe00] sm:$0xff] }
 0x364   : > { %v1245_v56 = vld [vmem:[%s7645_s21 + $0xe00] sm:$0xff] }
 0x365   : > { %v2754_v13 = vadd.f32 %v2753_v8, %v2242_v2  ;;  %v1745_v2 = vsub.f32 %v721_v59, %v1233_v60  ;;  %v2256_v8 = vmul.f32 %v1744_v61, %v1744_v61  ;;  %v734_v60 = vld [vmem:[%s7640_s18 + $0xe08] sm:$0xff] }
 0x366   : > { %v1246_v61 = vld [vmem:[%s7645_s21 + $0xe08] sm:$0xff] }
 0x367   : > { %v2755_v18 = vadd.f32 %v2754_v13, %v2243_v7  ;;  %v1746_v7 = vsub.f32 %v722_v0, %v1234_v1  ;;  %v2257_v13 = vmul.f32 %v1745_v2, %v1745_v2  ;;  %v735_v1 = vld [vmem:[%s7640_s18 + $0xe10] sm:$0xff] }
 0x368   : > { %v1247_v2 = vld [vmem:[%s7645_s21 + $0xe10] sm:$0xff] }
 0x369   : > { %v2756_v23 = vadd.f32 %v2755_v18, %v2244_v12  ;;  %v1747_v12 = vsub.f32 %v723_v5, %v1235_v6  ;;  %v2258_v18 = vmul.f32 %v1746_v7, %v1746_v7  ;;  %v736_v6 = vld [vmem:[%s7640_s18 + $0xe18] sm:$0xff] }
 0x36a   : > { %v1248_v7 = vld [vmem:[%s7645_s21 + $0xe18] sm:$0xff] }
 0x36b   : > { %v2757_v28 = vadd.f32 %v2756_v23, %v2245_v17  ;;  %v1748_v17 = vsub.f32 %v724_v10, %v1236_v11  ;;  %v2259_v23 = vmul.f32 %v1747_v12, %v1747_v12  ;;  %v737_v11 = vld [vmem:[%s7640_s18 + $0xe20] sm:$0xff] }
 0x36c   : > { %v1249_v12 = vld [vmem:[%s7645_s21 + $0xe20] sm:$0xff] }
 0x36d   : > { %v2758_v33 = vadd.f32 %v2757_v28, %v2246_v22  ;;  %v1749_v22 = vsub.f32 %v725_v15, %v1237_v16  ;;  %v2260_v28 = vmul.f32 %v1748_v17, %v1748_v17  ;;  %v738_v16 = vld [vmem:[%s7640_s18 + $0xe28] sm:$0xff] }
 0x36e   : > { %v1250_v17 = vld [vmem:[%s7645_s21 + $0xe28] sm:$0xff] }
 0x36f   : > { %v2759_v38 = vadd.f32 %v2758_v33, %v2247_v27  ;;  %v1750_v27 = vsub.f32 %v726_v20, %v1238_v21  ;;  %v2261_v33 = vmul.f32 %v1749_v22, %v1749_v22  ;;  %v739_v21 = vld [vmem:[%s7640_s18 + $0xe30] sm:$0xff] }
 0x370   : > { %v1251_v22 = vld [vmem:[%s7645_s21 + $0xe30] sm:$0xff] }
 0x371   : > { %v2760_v43 = vadd.f32 %v2759_v38, %v2248_v32  ;;  %v1751_v32 = vsub.f32 %v727_v25, %v1239_v26  ;;  %v2262_v38 = vmul.f32 %v1750_v27, %v1750_v27  ;;  %v740_v26 = vld [vmem:[%s7640_s18 + $0xe38] sm:$0xff] }
 0x372   : > { %v1252_v27 = vld [vmem:[%s7645_s21 + $0xe38] sm:$0xff] }
 0x373   : > { %v2761_v48 = vadd.f32 %v2760_v43, %v2249_v37  ;;  %v1752_v37 = vsub.f32 %v728_v30, %v1240_v31  ;;  %v2263_v43 = vmul.f32 %v1751_v32, %v1751_v32  ;;  %v741_v31 = vld [vmem:[%s7640_s18 + $0xe40] sm:$0xff] }
 0x374   : > { %v1253_v32 = vld [vmem:[%s7645_s21 + $0xe40] sm:$0xff] }
 0x375   : > { %v2762_v53 = vadd.f32 %v2761_v48, %v2250_v42  ;;  %v1753_v42 = vsub.f32 %v729_v35, %v1241_v36  ;;  %v2264_v48 = vmul.f32 %v1752_v37, %v1752_v37  ;;  %v742_v36 = vld [vmem:[%s7640_s18 + $0xe48] sm:$0xff] }
 0x376   : > { %v1254_v37 = vld [vmem:[%s7645_s21 + $0xe48] sm:$0xff] }
 0x377   : > { %v2763_v58 = vadd.f32 %v2762_v53, %v2251_v47  ;;  %v1754_v47 = vsub.f32 %v730_v40, %v1242_v41  ;;  %v2265_v53 = vmul.f32 %v1753_v42, %v1753_v42  ;;  %v743_v41 = vld [vmem:[%s7640_s18 + $0xe50] sm:$0xff] }
 0x378   : > { %v1255_v42 = vld [vmem:[%s7645_s21 + $0xe50] sm:$0xff] }
 0x379   : > { %v2764_v63 = vadd.f32 %v2763_v58, %v2252_v52  ;;  %v1755_v52 = vsub.f32 %v731_v45, %v1243_v46  ;;  %v2266_v58 = vmul.f32 %v1754_v47, %v1754_v47  ;;  %v744_v46 = vld [vmem:[%s7640_s18 + $0xe58] sm:$0xff] }
 0x37a   : > { %v1256_v47 = vld [vmem:[%s7645_s21 + $0xe58] sm:$0xff] }
 0x37b   : > { %v2765_v4 = vadd.f32 %v2764_v63, %v2253_v57  ;;  %v1756_v57 = vsub.f32 %v732_v50, %v1244_v51  ;;  %v2267_v63 = vmul.f32 %v1755_v52, %v1755_v52  ;;  %v745_v51 = vld [vmem:[%s7640_s18 + $0xe60] sm:$0xff] }
 0x37c   : > { %v1257_v52 = vld [vmem:[%s7645_s21 + $0xe60] sm:$0xff] }
 0x37d   : > { %v2766_v9 = vadd.f32 %v2765_v4, %v2254_v62  ;;  %v1757_v62 = vsub.f32 %v733_v55, %v1245_v56  ;;  %v2268_v4 = vmul.f32 %v1756_v57, %v1756_v57  ;;  %v746_v56 = vld [vmem:[%s7640_s18 + $0xe68] sm:$0xff] }
 0x37e   : > { %v1258_v57 = vld [vmem:[%s7645_s21 + $0xe68] sm:$0xff] }
 0x37f   : > { %v2767_v14 = vadd.f32 %v2766_v9, %v2255_v3  ;;  %v1758_v3 = vsub.f32 %v734_v60, %v1246_v61  ;;  %v2269_v9 = vmul.f32 %v1757_v62, %v1757_v62  ;;  %v747_v61 = vld [vmem:[%s7640_s18 + $0xe70] sm:$0xff] }
 0x380   : > { %v1259_v62 = vld [vmem:[%s7645_s21 + $0xe70] sm:$0xff] }
 0x381   : > { %v2768_v19 = vadd.f32 %v2767_v14, %v2256_v8  ;;  %v1759_v8 = vsub.f32 %v735_v1, %v1247_v2  ;;  %v2270_v14 = vmul.f32 %v1758_v3, %v1758_v3  ;;  %v748_v2 = vld [vmem:[%s7640_s18 + $0xe78] sm:$0xff] }
 0x382   : > { %v1260_v3 = vld [vmem:[%s7645_s21 + $0xe78] sm:$0xff] }
 0x383   : > { %v2769_v24 = vadd.f32 %v2768_v19, %v2257_v13  ;;  %v1760_v13 = vsub.f32 %v736_v6, %v1248_v7  ;;  %v2271_v19 = vmul.f32 %v1759_v8, %v1759_v8  ;;  %v749_v7 = vld [vmem:[%s7640_s18 + $0xe80] sm:$0xff] }
 0x384   : > { %v1261_v8 = vld [vmem:[%s7645_s21 + $0xe80] sm:$0xff] }
 0x385   : > { %v2770_v29 = vadd.f32 %v2769_v24, %v2258_v18  ;;  %v1761_v18 = vsub.f32 %v737_v11, %v1249_v12  ;;  %v2272_v24 = vmul.f32 %v1760_v13, %v1760_v13  ;;  %v750_v12 = vld [vmem:[%s7640_s18 + $0xe88] sm:$0xff] }
 0x386   : > { %v1262_v13 = vld [vmem:[%s7645_s21 + $0xe88] sm:$0xff] }
 0x387   : > { %v2771_v34 = vadd.f32 %v2770_v29, %v2259_v23  ;;  %v1762_v23 = vsub.f32 %v738_v16, %v1250_v17  ;;  %v2273_v29 = vmul.f32 %v1761_v18, %v1761_v18  ;;  %v751_v17 = vld [vmem:[%s7640_s18 + $0xe90] sm:$0xff] }
 0x388   : > { %v1263_v18 = vld [vmem:[%s7645_s21 + $0xe90] sm:$0xff] }
 0x389   : > { %v2772_v39 = vadd.f32 %v2771_v34, %v2260_v28  ;;  %v1763_v28 = vsub.f32 %v739_v21, %v1251_v22  ;;  %v2274_v34 = vmul.f32 %v1762_v23, %v1762_v23  ;;  %v752_v22 = vld [vmem:[%s7640_s18 + $0xe98] sm:$0xff] }
 0x38a   : > { %v1264_v23 = vld [vmem:[%s7645_s21 + $0xe98] sm:$0xff] }
 0x38b   : > { %v2773_v44 = vadd.f32 %v2772_v39, %v2261_v33  ;;  %v1764_v33 = vsub.f32 %v740_v26, %v1252_v27  ;;  %v2275_v39 = vmul.f32 %v1763_v28, %v1763_v28  ;;  %v753_v27 = vld [vmem:[%s7640_s18 + $0xea0] sm:$0xff] }
 0x38c   : > { %v1265_v28 = vld [vmem:[%s7645_s21 + $0xea0] sm:$0xff] }
 0x38d   : > { %v2774_v49 = vadd.f32 %v2773_v44, %v2262_v38  ;;  %v1765_v38 = vsub.f32 %v741_v31, %v1253_v32  ;;  %v2276_v44 = vmul.f32 %v1764_v33, %v1764_v33  ;;  %v754_v32 = vld [vmem:[%s7640_s18 + $0xea8] sm:$0xff] }
 0x38e   : > { %v1266_v33 = vld [vmem:[%s7645_s21 + $0xea8] sm:$0xff] }
 0x38f   : > { %v2775_v54 = vadd.f32 %v2774_v49, %v2263_v43  ;;  %v1766_v43 = vsub.f32 %v742_v36, %v1254_v37  ;;  %v2277_v49 = vmul.f32 %v1765_v38, %v1765_v38  ;;  %v755_v37 = vld [vmem:[%s7640_s18 + $0xeb0] sm:$0xff] }
 0x390   : > { %v1267_v38 = vld [vmem:[%s7645_s21 + $0xeb0] sm:$0xff] }
 0x391   : > { %v2776_v59 = vadd.f32 %v2775_v54, %v2264_v48  ;;  %v1767_v48 = vsub.f32 %v743_v41, %v1255_v42  ;;  %v2278_v54 = vmul.f32 %v1766_v43, %v1766_v43  ;;  %v756_v42 = vld [vmem:[%s7640_s18 + $0xeb8] sm:$0xff] }
 0x392   : > { %v1268_v43 = vld [vmem:[%s7645_s21 + $0xeb8] sm:$0xff] }
 0x393   : > { %v2777_v0 = vadd.f32 %v2776_v59, %v2265_v53  ;;  %v1768_v53 = vsub.f32 %v744_v46, %v1256_v47  ;;  %v2279_v59 = vmul.f32 %v1767_v48, %v1767_v48  ;;  %v757_v47 = vld [vmem:[%s7640_s18 + $0xec0] sm:$0xff] }
 0x394   : > { %v1269_v48 = vld [vmem:[%s7645_s21 + $0xec0] sm:$0xff] }
 0x395   : > { %v2778_v5 = vadd.f32 %v2777_v0, %v2266_v58  ;;  %v1769_v58 = vsub.f32 %v745_v51, %v1257_v52  ;;  %v2280_v0 = vmul.f32 %v1768_v53, %v1768_v53  ;;  %v758_v52 = vld [vmem:[%s7640_s18 + $0xec8] sm:$0xff] }
 0x396   : > { %v1270_v53 = vld [vmem:[%s7645_s21 + $0xec8] sm:$0xff] }
 0x397   : > { %v2779_v10 = vadd.f32 %v2778_v5, %v2267_v63  ;;  %v1770_v63 = vsub.f32 %v746_v56, %v1258_v57  ;;  %v2281_v5 = vmul.f32 %v1769_v58, %v1769_v58  ;;  %v759_v57 = vld [vmem:[%s7640_s18 + $0xed0] sm:$0xff] }
 0x398   : > { %v1271_v58 = vld [vmem:[%s7645_s21 + $0xed0] sm:$0xff] }
 0x399   : > { %v2780_v15 = vadd.f32 %v2779_v10, %v2268_v4  ;;  %v1771_v4 = vsub.f32 %v747_v61, %v1259_v62  ;;  %v2282_v10 = vmul.f32 %v1770_v63, %v1770_v63  ;;  %v760_v62 = vld [vmem:[%s7640_s18 + $0xed8] sm:$0xff] }
 0x39a   : > { %v1272_v63 = vld [vmem:[%s7645_s21 + $0xed8] sm:$0xff] }
 0x39b   : > { %v2781_v20 = vadd.f32 %v2780_v15, %v2269_v9  ;;  %v1772_v9 = vsub.f32 %v748_v2, %v1260_v3  ;;  %v2283_v15 = vmul.f32 %v1771_v4, %v1771_v4  ;;  %v761_v3 = vld [vmem:[%s7640_s18 + $0xee0] sm:$0xff] }
 0x39c   : > { %v1273_v4 = vld [vmem:[%s7645_s21 + $0xee0] sm:$0xff] }
 0x39d   : > { %v2782_v25 = vadd.f32 %v2781_v20, %v2270_v14  ;;  %v1773_v14 = vsub.f32 %v749_v7, %v1261_v8  ;;  %v2284_v20 = vmul.f32 %v1772_v9, %v1772_v9  ;;  %v762_v8 = vld [vmem:[%s7640_s18 + $0xee8] sm:$0xff] }
 0x39e   : > { %v1274_v9 = vld [vmem:[%s7645_s21 + $0xee8] sm:$0xff] }
 0x39f   : > { %v2783_v30 = vadd.f32 %v2782_v25, %v2271_v19  ;;  %v1774_v19 = vsub.f32 %v750_v12, %v1262_v13  ;;  %v2285_v25 = vmul.f32 %v1773_v14, %v1773_v14  ;;  %v763_v13 = vld [vmem:[%s7640_s18 + $0xef0] sm:$0xff] }
 0x3a0   : > { %v1275_v14 = vld [vmem:[%s7645_s21 + $0xef0] sm:$0xff] }
 0x3a1   : > { %v2784_v35 = vadd.f32 %v2783_v30, %v2272_v24  ;;  %v1775_v24 = vsub.f32 %v751_v17, %v1263_v18  ;;  %v2286_v30 = vmul.f32 %v1774_v19, %v1774_v19  ;;  %v764_v18 = vld [vmem:[%s7640_s18 + $0xef8] sm:$0xff] }
 0x3a2   : > { %v1276_v19 = vld [vmem:[%s7645_s21 + $0xef8] sm:$0xff] }
 0x3a3   : > { %v2785_v40 = vadd.f32 %v2784_v35, %v2273_v29  ;;  %v1776_v29 = vsub.f32 %v752_v22, %v1264_v23  ;;  %v2287_v35 = vmul.f32 %v1775_v24, %v1775_v24  ;;  %v765_v23 = vld [vmem:[%s7640_s18 + $0xf00] sm:$0xff] }
 0x3a4   : > { %v1277_v24 = vld [vmem:[%s7645_s21 + $0xf00] sm:$0xff] }
 0x3a5   : > { %v2786_v45 = vadd.f32 %v2785_v40, %v2274_v34  ;;  %v1777_v34 = vsub.f32 %v753_v27, %v1265_v28  ;;  %v2288_v40 = vmul.f32 %v1776_v29, %v1776_v29  ;;  %v766_v28 = vld [vmem:[%s7640_s18 + $0xf08] sm:$0xff] }
 0x3a6   : > { %v1278_v29 = vld [vmem:[%s7645_s21 + $0xf08] sm:$0xff] }
 0x3a7   : > { %v2787_v50 = vadd.f32 %v2786_v45, %v2275_v39  ;;  %v1778_v39 = vsub.f32 %v754_v32, %v1266_v33  ;;  %v2289_v45 = vmul.f32 %v1777_v34, %v1777_v34  ;;  %v767_v33 = vld [vmem:[%s7640_s18 + $0xf10] sm:$0xff] }
 0x3a8   : > { %v1279_v34 = vld [vmem:[%s7645_s21 + $0xf10] sm:$0xff] }
 0x3a9   : > { %v2788_v55 = vadd.f32 %v2787_v50, %v2276_v44  ;;  %v1779_v44 = vsub.f32 %v755_v37, %v1267_v38  ;;  %v2290_v50 = vmul.f32 %v1778_v39, %v1778_v39  ;;  %v768_v38 = vld [vmem:[%s7640_s18 + $0xf18] sm:$0xff] }
 0x3aa   : > { %v1280_v39 = vld [vmem:[%s7645_s21 + $0xf18] sm:$0xff] }
 0x3ab   : > { %v2789_v60 = vadd.f32 %v2788_v55, %v2277_v49  ;;  %v1780_v49 = vsub.f32 %v756_v42, %v1268_v43  ;;  %v2291_v55 = vmul.f32 %v1779_v44, %v1779_v44  ;;  %v769_v43 = vld [vmem:[%s7640_s18 + $0xf20] sm:$0xff] }
 0x3ac   : > { %v1281_v44 = vld [vmem:[%s7645_s21 + $0xf20] sm:$0xff] }
 0x3ad   : > { %v2790_v1 = vadd.f32 %v2789_v60, %v2278_v54  ;;  %v1781_v54 = vsub.f32 %v757_v47, %v1269_v48  ;;  %v2292_v60 = vmul.f32 %v1780_v49, %v1780_v49  ;;  %v770_v48 = vld [vmem:[%s7640_s18 + $0xf28] sm:$0xff] }
 0x3ae   : > { %v1282_v49 = vld [vmem:[%s7645_s21 + $0xf28] sm:$0xff] }
 0x3af   : > { %v2791_v6 = vadd.f32 %v2790_v1, %v2279_v59  ;;  %v1782_v59 = vsub.f32 %v758_v52, %v1270_v53  ;;  %v2293_v1 = vmul.f32 %v1781_v54, %v1781_v54  ;;  %v771_v53 = vld [vmem:[%s7640_s18 + $0xf30] sm:$0xff] }
 0x3b0   : > { %v1283_v54 = vld [vmem:[%s7645_s21 + $0xf30] sm:$0xff] }
 0x3b1   : > { %v2792_v11 = vadd.f32 %v2791_v6, %v2280_v0  ;;  %v1783_v0 = vsub.f32 %v759_v57, %v1271_v58  ;;  %v2294_v6 = vmul.f32 %v1782_v59, %v1782_v59  ;;  %v772_v58 = vld [vmem:[%s7640_s18 + $0xf38] sm:$0xff] }
 0x3b2   : > { %v1284_v59 = vld [vmem:[%s7645_s21 + $0xf38] sm:$0xff] }
 0x3b3   : > { %v2793_v16 = vadd.f32 %v2792_v11, %v2281_v5  ;;  %v1784_v5 = vsub.f32 %v760_v62, %v1272_v63  ;;  %v2295_v11 = vmul.f32 %v1783_v0, %v1783_v0  ;;  %v773_v63 = vld [vmem:[%s7640_s18 + $0xf40] sm:$0xff] }
 0x3b4   : > { %v1285_v0 = vld [vmem:[%s7645_s21 + $0xf40] sm:$0xff] }
 0x3b5   : > { %v2794_v21 = vadd.f32 %v2793_v16, %v2282_v10  ;;  %v1785_v10 = vsub.f32 %v761_v3, %v1273_v4  ;;  %v2296_v16 = vmul.f32 %v1784_v5, %v1784_v5  ;;  %v774_v4 = vld [vmem:[%s7640_s18 + $0xf48] sm:$0xff] }
 0x3b6   : > { %v1286_v5 = vld [vmem:[%s7645_s21 + $0xf48] sm:$0xff] }
 0x3b7   : > { %v2795_v26 = vadd.f32 %v2794_v21, %v2283_v15  ;;  %v1786_v15 = vsub.f32 %v762_v8, %v1274_v9  ;;  %v2297_v21 = vmul.f32 %v1785_v10, %v1785_v10  ;;  %v775_v9 = vld [vmem:[%s7640_s18 + $0xf50] sm:$0xff] }
 0x3b8   : > { %v1287_v10 = vld [vmem:[%s7645_s21 + $0xf50] sm:$0xff] }
 0x3b9   : > { %v2796_v31 = vadd.f32 %v2795_v26, %v2284_v20  ;;  %v1787_v20 = vsub.f32 %v763_v13, %v1275_v14  ;;  %v2298_v26 = vmul.f32 %v1786_v15, %v1786_v15  ;;  %v776_v14 = vld [vmem:[%s7640_s18 + $0xf58] sm:$0xff] }
 0x3ba   : > { %v1288_v15 = vld [vmem:[%s7645_s21 + $0xf58] sm:$0xff] }
 0x3bb   : > { %v2797_v36 = vadd.f32 %v2796_v31, %v2285_v25  ;;  %v1788_v25 = vsub.f32 %v764_v18, %v1276_v19  ;;  %v2299_v31 = vmul.f32 %v1787_v20, %v1787_v20  ;;  %v777_v19 = vld [vmem:[%s7640_s18 + $0xf60] sm:$0xff] }
 0x3bc   : > { %v1289_v20 = vld [vmem:[%s7645_s21 + $0xf60] sm:$0xff] }
 0x3bd   : > { %v2798_v41 = vadd.f32 %v2797_v36, %v2286_v30  ;;  %v1789_v30 = vsub.f32 %v765_v23, %v1277_v24  ;;  %v2300_v36 = vmul.f32 %v1788_v25, %v1788_v25  ;;  %v778_v24 = vld [vmem:[%s7640_s18 + $0xf68] sm:$0xff] }
 0x3be   : > { %v1290_v25 = vld [vmem:[%s7645_s21 + $0xf68] sm:$0xff] }
 0x3bf   : > { %v2799_v46 = vadd.f32 %v2798_v41, %v2287_v35  ;;  %v1790_v35 = vsub.f32 %v766_v28, %v1278_v29  ;;  %v2301_v41 = vmul.f32 %v1789_v30, %v1789_v30  ;;  %v779_v29 = vld [vmem:[%s7640_s18 + $0xf70] sm:$0xff] }
 0x3c0   : > { %v1291_v30 = vld [vmem:[%s7645_s21 + $0xf70] sm:$0xff] }
 0x3c1   : > { %v2800_v51 = vadd.f32 %v2799_v46, %v2288_v40  ;;  %v1791_v40 = vsub.f32 %v767_v33, %v1279_v34  ;;  %v2302_v46 = vmul.f32 %v1790_v35, %v1790_v35  ;;  %v780_v34 = vld [vmem:[%s7640_s18 + $0xf78] sm:$0xff] }
 0x3c2   : > { %v1292_v35 = vld [vmem:[%s7645_s21 + $0xf78] sm:$0xff] }
 0x3c3   : > { %v2801_v56 = vadd.f32 %v2800_v51, %v2289_v45  ;;  %v1792_v45 = vsub.f32 %v768_v38, %v1280_v39  ;;  %v2303_v51 = vmul.f32 %v1791_v40, %v1791_v40  ;;  %v781_v39 = vld [vmem:[%s7640_s18 + $0xf80] sm:$0xff] }
 0x3c4   : > { %v1293_v40 = vld [vmem:[%s7645_s21 + $0xf80] sm:$0xff] }
 0x3c5   : > { %v2802_v61 = vadd.f32 %v2801_v56, %v2290_v50  ;;  %v1793_v50 = vsub.f32 %v769_v43, %v1281_v44  ;;  %v2304_v56 = vmul.f32 %v1792_v45, %v1792_v45  ;;  %v782_v44 = vld [vmem:[%s7640_s18 + $0xf88] sm:$0xff] }
 0x3c6   : > { %v1294_v45 = vld [vmem:[%s7645_s21 + $0xf88] sm:$0xff] }
 0x3c7   : > { %v2803_v2 = vadd.f32 %v2802_v61, %v2291_v55  ;;  %v1794_v55 = vsub.f32 %v770_v48, %v1282_v49  ;;  %v2305_v61 = vmul.f32 %v1793_v50, %v1793_v50  ;;  %v783_v49 = vld [vmem:[%s7640_s18 + $0xf90] sm:$0xff] }
 0x3c8   : > { %v1295_v50 = vld [vmem:[%s7645_s21 + $0xf90] sm:$0xff] }
 0x3c9   : > { %v2804_v7 = vadd.f32 %v2803_v2, %v2292_v60  ;;  %v1795_v60 = vsub.f32 %v771_v53, %v1283_v54  ;;  %v2306_v2 = vmul.f32 %v1794_v55, %v1794_v55  ;;  %v784_v54 = vld [vmem:[%s7640_s18 + $0xf98] sm:$0xff] }
 0x3ca   : > { %v1296_v55 = vld [vmem:[%s7645_s21 + $0xf98] sm:$0xff] }
 0x3cb   : > { %v2805_v12 = vadd.f32 %v2804_v7, %v2293_v1  ;;  %v1796_v1 = vsub.f32 %v772_v58, %v1284_v59  ;;  %v2307_v7 = vmul.f32 %v1795_v60, %v1795_v60  ;;  %v785_v59 = vld [vmem:[%s7640_s18 + $0xfa0] sm:$0xff] }
 0x3cc   : > { %v1297_v60 = vld [vmem:[%s7645_s21 + $0xfa0] sm:$0xff] }
 0x3cd   : > { %v2806_v17 = vadd.f32 %v2805_v12, %v2294_v6  ;;  %v1797_v6 = vsub.f32 %v773_v63, %v1285_v0  ;;  %v2308_v12 = vmul.f32 %v1796_v1, %v1796_v1  ;;  %v786_v0 = vld [vmem:[%s7640_s18 + $0xfa8] sm:$0xff] }
 0x3ce   : > { %v1298_v1 = vld [vmem:[%s7645_s21 + $0xfa8] sm:$0xff] }
 0x3cf   : > { %v2807_v22 = vadd.f32 %v2806_v17, %v2295_v11  ;;  %v1798_v11 = vsub.f32 %v774_v4, %v1286_v5  ;;  %v2309_v17 = vmul.f32 %v1797_v6, %v1797_v6  ;;  %v787_v5 = vld [vmem:[%s7640_s18 + $0xfb0] sm:$0xff] }
 0x3d0   : > { %v1299_v6 = vld [vmem:[%s7645_s21 + $0xfb0] sm:$0xff] }
 0x3d1   : > { %v2808_v27 = vadd.f32 %v2807_v22, %v2296_v16  ;;  %v1799_v16 = vsub.f32 %v775_v9, %v1287_v10  ;;  %v2310_v22 = vmul.f32 %v1798_v11, %v1798_v11  ;;  %v788_v10 = vld [vmem:[%s7640_s18 + $0xfb8] sm:$0xff] }
 0x3d2   : > { %v1300_v11 = vld [vmem:[%s7645_s21 + $0xfb8] sm:$0xff] }
 0x3d3   : > { %v2809_v32 = vadd.f32 %v2808_v27, %v2297_v21  ;;  %v1800_v21 = vsub.f32 %v776_v14, %v1288_v15  ;;  %v2311_v27 = vmul.f32 %v1799_v16, %v1799_v16  ;;  %v789_v15 = vld [vmem:[%s7640_s18 + $0xfc0] sm:$0xff] }
 0x3d4   : > { %v1301_v16 = vld [vmem:[%s7645_s21 + $0xfc0] sm:$0xff] }
 0x3d5   : > { %v2810_v37 = vadd.f32 %v2809_v32, %v2298_v26  ;;  %v1801_v26 = vsub.f32 %v777_v19, %v1289_v20  ;;  %v2312_v32 = vmul.f32 %v1800_v21, %v1800_v21  ;;  %v790_v20 = vld [vmem:[%s7640_s18 + $0xfc8] sm:$0xff] }
 0x3d6   : > { %v1302_v21 = vld [vmem:[%s7645_s21 + $0xfc8] sm:$0xff] }
 0x3d7   : > { %v2811_v42 = vadd.f32 %v2810_v37, %v2299_v31  ;;  %v1802_v31 = vsub.f32 %v778_v24, %v1290_v25  ;;  %v2313_v37 = vmul.f32 %v1801_v26, %v1801_v26  ;;  %v791_v25 = vld [vmem:[%s7640_s18 + $0xfd0] sm:$0xff] }
 0x3d8   : > { %v1303_v26 = vld [vmem:[%s7645_s21 + $0xfd0] sm:$0xff] }
 0x3d9   : > { %v2812_v47 = vadd.f32 %v2811_v42, %v2300_v36  ;;  %v1803_v36 = vsub.f32 %v779_v29, %v1291_v30  ;;  %v2314_v42 = vmul.f32 %v1802_v31, %v1802_v31  ;;  %v792_v30 = vld [vmem:[%s7640_s18 + $0xfd8] sm:$0xff] }
 0x3da   : > { %v1304_v31 = vld [vmem:[%s7645_s21 + $0xfd8] sm:$0xff] }
 0x3db   : > { %v2813_v52 = vadd.f32 %v2812_v47, %v2301_v41  ;;  %v1804_v41 = vsub.f32 %v780_v34, %v1292_v35  ;;  %v2315_v47 = vmul.f32 %v1803_v36, %v1803_v36  ;;  %v793_v35 = vld [vmem:[%s7640_s18 + $0xfe0] sm:$0xff] }
 0x3dc   : > { %v1305_v36 = vld [vmem:[%s7645_s21 + $0xfe0] sm:$0xff] }
 0x3dd   : > { %v2814_v57 = vadd.f32 %v2813_v52, %v2302_v46  ;;  %v1805_v46 = vsub.f32 %v781_v39, %v1293_v40  ;;  %v2316_v52 = vmul.f32 %v1804_v41, %v1804_v41  ;;  %v794_v40 = vld [vmem:[%s7640_s18 + $0xfe8] sm:$0xff] }
 0x3de   : > { %v1306_v41 = vld [vmem:[%s7645_s21 + $0xfe8] sm:$0xff] }
 0x3df   : > { %v2815_v62 = vadd.f32 %v2814_v57, %v2303_v51  ;;  %v1806_v51 = vsub.f32 %v782_v44, %v1294_v45  ;;  %v2317_v57 = vmul.f32 %v1805_v46, %v1805_v46  ;;  %v795_v45 = vld [vmem:[%s7640_s18 + $0xff0] sm:$0xff] }
 0x3e0   : > { %v1307_v46 = vld [vmem:[%s7645_s21 + $0xff0] sm:$0xff] }
 0x3e1   : > { %v2816_v3 = vadd.f32 %v2815_v62, %v2304_v56  ;;  %v1807_v56 = vsub.f32 %v783_v49, %v1295_v50  ;;  %v2318_v62 = vmul.f32 %v1806_v51, %v1806_v51  ;;  %v796_v50 = vld [vmem:[%s7640_s18 + $0xff8] sm:$0xff] }
 0x3e2   : > { %v1308_v51 = vld [vmem:[%s7645_s21 + $0xff8] sm:$0xff] }
 0x3e3   : > { %v2817_v8 = vadd.f32 %v2816_v3, %v2305_v61  ;;  %v1808_v61 = vsub.f32 %v784_v54, %v1296_v55  ;;  %v2319_v3 = vmul.f32 %v1807_v56, %v1807_v56  ;;  %v1820_v55 = vsub.f32 %v796_v50, %v1308_v51 }
 0x3e5   : > { %v2818_v13 = vadd.f32 %v2817_v8, %v2306_v2  ;;  %v1809_v2 = vsub.f32 %v785_v59, %v1297_v60  ;;  %v2320_v8 = vmul.f32 %v1808_v61, %v1808_v61  ;;  %v2332_v60 = vmul.f32 %v1820_v55, %v1820_v55 }
 0x3e7   : > { %v2819_v18 = vadd.f32 %v2818_v13, %v2307_v7  ;;  %v1810_v7 = vsub.f32 %v786_v0, %v1298_v1  ;;  %v2321_v13 = vmul.f32 %v1809_v2, %v1809_v2 }
 0x3e9   : > { %v2820_v23 = vadd.f32 %v2819_v18, %v2308_v12  ;;  %v1811_v12 = vsub.f32 %v787_v5, %v1299_v6  ;;  %v2322_v18 = vmul.f32 %v1810_v7, %v1810_v7 }
 0x3eb   : > { %v2821_v28 = vadd.f32 %v2820_v23, %v2309_v17  ;;  %v1812_v17 = vsub.f32 %v788_v10, %v1300_v11  ;;  %v2323_v23 = vmul.f32 %v1811_v12, %v1811_v12 }
 0x3ed   : > { %v2822_v33 = vadd.f32 %v2821_v28, %v2310_v22  ;;  %v1813_v22 = vsub.f32 %v789_v15, %v1301_v16  ;;  %v2324_v28 = vmul.f32 %v1812_v17, %v1812_v17 }
 0x3ef   : > { %v2823_v38 = vadd.f32 %v2822_v33, %v2311_v27  ;;  %v1814_v27 = vsub.f32 %v790_v20, %v1302_v21  ;;  %v2325_v33 = vmul.f32 %v1813_v22, %v1813_v22 }
 0x3f1   : > { %v2824_v43 = vadd.f32 %v2823_v38, %v2312_v32  ;;  %v1815_v32 = vsub.f32 %v791_v25, %v1303_v26  ;;  %v2326_v38 = vmul.f32 %v1814_v27, %v1814_v27 }
 0x3f3   : > { %v2825_v48 = vadd.f32 %v2824_v43, %v2313_v37  ;;  %v1816_v37 = vsub.f32 %v792_v30, %v1304_v31  ;;  %v2327_v43 = vmul.f32 %v1815_v32, %v1815_v32 }
 0x3f5   : > { %v2826_v53 = vadd.f32 %v2825_v48, %v2314_v42  ;;  %v1817_v42 = vsub.f32 %v793_v35, %v1305_v36  ;;  %v2328_v48 = vmul.f32 %v1816_v37, %v1816_v37 }
 0x3f7   : > { %v2827_v58 = vadd.f32 %v2826_v53, %v2315_v47  ;;  %v1818_v47 = vsub.f32 %v794_v40, %v1306_v41  ;;  %v2329_v53 = vmul.f32 %v1817_v42, %v1817_v42 }
 0x3f9   : > { %v2828_v63 = vadd.f32 %v2827_v58, %v2316_v52  ;;  %v1819_v52 = vsub.f32 %v795_v45, %v1307_v46  ;;  %v2330_v56 = vmul.f32 %v1818_v47, %v1818_v47 }
 0x3fb   : > { %v2829_v4 = vadd.f32 %v2828_v63, %v2317_v57  ;;  %v2331_v58 = vmul.f32 %v1819_v52, %v1819_v52  ;;  %v2333_v63 = vld [vmem:[%s10753_s2] sm:$0xff] }
 0x3fd   : > { %v2830_v9 = vadd.f32 %v2829_v4, %v2318_v62 }
 0x3ff   : > { %v2831_v14 = vadd.f32 %v2830_v9, %v2319_v3 }
 0x401   : > { %v2832_v19 = vadd.f32 %v2831_v14, %v2320_v8 }
 0x403   : > { %v2833_v24 = vadd.f32 %v2832_v19, %v2321_v13 }
 0x405   : > { %v2834_v29 = vadd.f32 %v2833_v24, %v2322_v18 }
 0x407   : > { %v2835_v34 = vadd.f32 %v2834_v29, %v2323_v23 }
 0x409   : > { %v2836_v39 = vadd.f32 %v2835_v34, %v2324_v28 }
 0x40b   : > { %v2837_v44 = vadd.f32 %v2836_v39, %v2325_v33 }
 0x40d   : > { %v2838_v49 = vadd.f32 %v2837_v44, %v2326_v38 }
 0x40f   : > { %v2839_v54 = vadd.f32 %v2838_v49, %v2327_v43 }
 0x411   : > { %v2840_v57 = vadd.f32 %v2839_v54, %v2328_v48 }
 0x413   : > { %v2841_v59 = vadd.f32 %v2840_v57, %v2329_v53 }
 0x415   : > { %v2842_v61 = vadd.f32 %v2841_v59, %v2330_v56 }
 0x417   : > { %v2843_v62 = vadd.f32 %v2842_v61, %v2331_v58 }
 0x419   : > { %v2844_v0 = vadd.f32 %v2843_v62, %v2332_v60 }
 0x41b   : > { %v2845_v1 = vadd.f32 %v2844_v0, %v2333_v63 }
 0x41d   : > { %2846 = vst [vmem:[%s10753_s2] sm:$0xff] %v2845_v1 }
 0x41e PF: > { %p7545_p8 = scmp.ne.s32.totalorder %s7589_s9, 2 }
 0x41f   : > { %v4388_v2 = vlaneseq (!%p7545_p8)  ;;  %s7546_s28 = sshll.u32 (!%p7545_p8), %s7589_s9, 12  ;;  %v2851_v7 = vld [vmem:[%s7640_s18] sm:$0xff] (!%p7545_p8)  ;;  %v2852_v8 = vld [vmem:[%s7640_s18 + $0x8] sm:$0xff] (!%p7545_p8)  ;;  %v2853_v14 = vld [vmem:[%s7640_s18 + $0x10] sm:$0xff] (!%p7545_p8) }
 0x420   : > { %2850 = sbr.rel (%p7545_p8) target bundleno = 2093 (0x82d), region = 40  ;;  %v8687_v5 = vstv (!%p7545_p8), %s7546_s28  ;;  %v3363_v9 = vld [vmem:[%s7645_s21] sm:$0xff] (!%p7545_p8)  ;;  %v3364_v10 = vld [vmem:[%s7645_s21 + $0x8] sm:$0xff] (!%p7545_p8)  ;;  %v3365_v15 = vld [vmem:[%s7645_s21 + $0x10] sm:$0xff] (!%p7545_p8) }
 0x421   : > { %v8683_v3 = vshrl.u32 (!%p7545_p8), %v4388_v2, 7  ;;  %v3875_v18 = vsub.f32 (!%p7545_p8), %v2851_v7, %v3363_v9  ;;  %v3876_v19 = vsub.f32 (!%p7545_p8), %v2852_v8, %v3364_v10  ;;  %v2854_v20 = vld [vmem:[%s7640_s18 + $0x18] sm:$0xff] (!%p7545_p8)  ;;  %v3877_v24 = vsub.f32 (!%p7545_p8), %v2853_v14, %v3365_v15  ;;  %v2855_v25 = vld [vmem:[%s7640_s18 + $0x20] sm:$0xff] (!%p7545_p8)  ;;  %v2856_v32 = vld [vmem:[%s7640_s18 + $0x28] sm:$0xff] (!%p7545_p8) }
 0x422   : > { %v3366_v21 = vld [vmem:[%s7645_s21 + $0x18] sm:$0xff] (!%p7545_p8)  ;;  %v3367_v26 = vld [vmem:[%s7645_s21 + $0x20] sm:$0xff] (!%p7545_p8)  ;;  %v3368_v33 = vld [vmem:[%s7645_s21 + $0x28] sm:$0xff] (!%p7545_p8) }
 0x423   : > { %v4390_v4 = vadd.s32 (!%p7545_p8), 8, %v8683_v3  ;;  %v4391_v6 = vadd.s32 (!%p7545_p8), 16, %v8683_v3  ;;  %v4392_v11 = vadd.s32 (!%p7545_p8), 24, %v8683_v3  ;;  %v4902_v12 = vadd.s32 (!%p7545_p8), %v8687_v5, %v8683_v3  ;;  %v2857_v39 = vld [vmem:[%s7640_s18 + $0x30] sm:$0xff] (!%p7545_p8)  ;;  %v2858_v47 = vld [vmem:[%s7640_s18 + $0x38] sm:$0xff] (!%p7545_p8)  ;;  %v2859_v54 = vld [vmem:[%s7640_s18 + $0x40] sm:$0xff] (!%p7545_p8) }
 0x424   : > { %v4393_v16 = vadd.s32 (!%p7545_p8), 32, %v8683_v3  ;;  %v4394_v22 = vadd.s32 (!%p7545_p8), 40, %v8683_v3  ;;  %v4395_v27 = vadd.s32 (!%p7545_p8), 48, %v8683_v3  ;;  %v3878_v29 = vsub.f32 (!%p7545_p8), %v2854_v20, %v3366_v21  ;;  %v3369_v40 = vld [vmem:[%s7645_s21 + $0x30] sm:$0xff] (!%p7545_p8)  ;;  %v3370_v48 = vld [vmem:[%s7645_s21 + $0x38] sm:$0xff] (!%p7545_p8)  ;;  %v3371_v55 = vld [vmem:[%s7645_s21 + $0x40] sm:$0xff] (!%p7545_p8) }
 0x425   : > { %v4903_v13 = vadd.s32 (!%p7545_p8), %v8687_v5, %v4390_v4  ;;  %v4904_v17 = vadd.s32 (!%p7545_p8), %v8687_v5, %v4391_v6  ;;  %v4905_v23 = vadd.s32 (!%p7545_p8), %v8687_v5, %v4392_v11  ;;  %vm5414_vm0 = vcmp.lt.s32.totalorder (!%p7545_p8), %v4902_v12, 9216  ;;  %v2860_v62 = vld [vmem:[%s7640_s18 + $0x48] sm:$0xff] (!%p7545_p8)  ;;  %v2861_v8 = vld [vmem:[%s7640_s18 + $0x50] sm:$0xff] (!%p7545_p8) }
 0x426   : > { %v4906_v28 = vadd.s32 (!%p7545_p8), %v8687_v5, %v4393_v16  ;;  %v5926_v30 = vsel (!%p7545_p8), %vm5414_vm0, %v3875_v18, 0.0  ;;  %v4396_v34 = vadd.s32 (!%p7545_p8), 56, %v8683_v3  ;;  %v4907_v35 = vadd.s32 (!%p7545_p8), %v8687_v5, %v4394_v22  ;;  %v3372_v63 = vld [vmem:[%s7645_s21 + $0x48] sm:$0xff] (!%p7545_p8)  ;;  %v3373_v9 = vld [vmem:[%s7645_s21 + $0x50] sm:$0xff] (!%p7545_p8)  ;;  %v2862_v16 = vld [vmem:[%s7640_s18 + $0x58] sm:$0xff] (!%p7545_p8) }
 0x427   : > { %vm5415_vm1 = vcmp.lt.s32.totalorder %v4903_v13, 9216  ;;  %vm5416_vm2 = vcmp.lt.s32.totalorder %v4904_v17, 9216  ;;  %vm5417_vm3 = vcmp.lt.s32.totalorder %v4905_v23, 9216  ;;  %v3879_v36 = vsub.f32 %v2855_v25, %v3367_v26  ;;  %v3374_v17 = vld [vmem:[%s7645_s21 + $0x58] sm:$0xff]  ;;  %v3375_v25 = vld [vmem:[%s7645_s21 + $0x60] sm:$0xff] }
 0x428   : > { %v5927_v31 = vsel %vm5415_vm1, %v3876_v19, 0.0  ;;  %v4397_v37 = vadd.s32 64, %v8683_v3  ;;  %v5928_v38 = vsel %vm5416_vm2, %v3877_v24, 0.0  ;;  %v4908_v41 = vadd.s32 %v8687_v5, %v4395_v27  ;;  %v2863_v24 = vld [vmem:[%s7640_s18 + $0x60] sm:$0xff] }
 0x429   : > { %vm5418_vm4 = vcmp.lt.s32.totalorder %v4906_v28, 9216  ;;  %v6438_v42 = vmul.f32 %v5926_v30, %v5926_v30  ;;  %v6439_v43 = vmul.f32 %v5927_v31, %v5927_v31  ;;  %v3880_v44 = vsub.f32 %v2856_v32, %v3368_v33  ;;  %v2864_v32 = vld [vmem:[%s7640_s18 + $0x68] sm:$0xff] }
 0x42a   : > { %v4398_v45 = vadd.s32 72, %v8683_v3  ;;  %v5929_v46 = vsel %vm5417_vm3, %v3878_v29, 0.0  ;;  %v4909_v49 = vadd.s32 %v8687_v5, %v4396_v34  ;;  %vm5419_vm5 = vcmp.lt.s32.totalorder %v4907_v35, 9216  ;;  %v3376_v33 = vld [vmem:[%s7645_s21 + $0x68] sm:$0xff] }
 0x42b   : > { %v6440_v50 = vmul.f32 %v5928_v38, %v5928_v38  ;;  %v3881_v51 = vsub.f32 %v2857_v39, %v3369_v40  ;;  %v4910_v52 = vadd.s32 %v8687_v5, %v4397_v37  ;;  %v5930_v53 = vsel %vm5418_vm4, %v3879_v36, 0.0  ;;  %v2865_v40 = vld [vmem:[%s7640_s18 + $0x70] sm:$0xff] }
 0x42c   : > { %v4399_v56 = vadd.s32 80, %v8683_v3  ;;  %vm5420_vm6 = vcmp.lt.s32.totalorder %v4908_v41, 9216  ;;  %v6441_v57 = vmul.f32 %v5929_v46, %v5929_v46  ;;  %v6951_v58 = vadd.f32 %v6439_v43, %v6438_v42  ;;  %v3377_v41 = vld [vmem:[%s7645_s21 + $0x70] sm:$0xff] }
 0x42d   : > { %v3882_v59 = vsub.f32 %v2858_v47, %v3370_v48  ;;  %v4911_v60 = vadd.s32 %v8687_v5, %v4398_v45  ;;  %v5931_v61 = vsel %vm5419_vm5, %v3880_v44, 0.0  ;;  %v4400_v0 = vadd.s32 88, %v8683_v3  ;;  %v2866_v48 = vld [vmem:[%s7640_s18 + $0x78] sm:$0xff] }
 0x42e   : > { %vm5421_vm7 = vcmp.lt.s32.totalorder %v4909_v49, 9216  ;;  %v6442_v1 = vmul.f32 %v5930_v53, %v5930_v53  ;;  %v6952_v2 = vadd.f32 %v6951_v58, %v6440_v50  ;;  %v3883_v4 = vsub.f32 %v2859_v54, %v3371_v55  ;;  %v3378_v49 = vld [vmem:[%s7645_s21 + $0x78] sm:$0xff] }
 0x42f   : > { %v4401_v6 = vadd.s32 96, %v8683_v3  ;;  %v5932_v7 = vsel %vm5420_vm6, %v3881_v51, 0.0  ;;  %v4912_v10 = vadd.s32 %v8687_v5, %v4399_v56  ;;  %vm5422_vm8 = vcmp.lt.s32.totalorder %v4910_v52, 9216  ;;  %v2867_v56 = vld [vmem:[%s7640_s18 + $0x80] sm:$0xff] }
 0x430   : > { %v6443_v11 = vmul.f32 %v5931_v61, %v5931_v61  ;;  %v6953_v12 = vadd.f32 %v6952_v2, %v6441_v57  ;;  %v3884_v13 = vsub.f32 %v2860_v62, %v3372_v63  ;;  %v4402_v14 = vadd.s32 104, %v8683_v3  ;;  %v3379_v57 = vld [vmem:[%s7645_s21 + $0x80] sm:$0xff] }
 0x431   : > { %v5933_v15 = vsel %vm5421_vm7, %v3882_v59, 0.0  ;;  %v4913_v18 = vadd.s32 %v8687_v5, %v4400_v0  ;;  %vm5423_vm9 = vcmp.lt.s32.totalorder %v4911_v60, 9216  ;;  %v6444_v19 = vmul.f32 %v5932_v7, %v5932_v7  ;;  %v2868_v0 = vld [vmem:[%s7640_s18 + $0x88] sm:$0xff] }
 0x432   : > { %v6954_v20 = vadd.f32 %v6953_v12, %v6442_v1  ;;  %v3885_v21 = vsub.f32 %v2861_v8, %v3373_v9  ;;  %v4914_v22 = vadd.s32 %v8687_v5, %v4401_v6  ;;  %v5934_v23 = vsel %vm5422_vm8, %v3883_v4, 0.0  ;;  %v3380_v1 = vld [vmem:[%s7645_s21 + $0x88] sm:$0xff] }
 0x433   : > { %v4403_v26 = vadd.s32 112, %v8683_v3  ;;  %vm5424_vm10 = vcmp.lt.s32.totalorder %v4912_v10, 9216  ;;  %v6445_v27 = vmul.f32 %v5933_v15, %v5933_v15  ;;  %v3886_v29 = vsub.f32 %v2862_v16, %v3374_v17  ;;  %v2869_v10 = vld [vmem:[%s7640_s18 + $0x90] sm:$0xff] }
 0x434   : > { %v6955_v28 = vadd.f32 %v6954_v20, %v6443_v11  ;;  %v4915_v30 = vadd.s32 %v8687_v5, %v4402_v14  ;;  %v5935_v31 = vsel %vm5423_vm9, %v3884_v13, 0.0  ;;  %v4404_v34 = vadd.s32 120, %v8683_v3  ;;  %v3381_v11 = vld [vmem:[%s7645_s21 + $0x90] sm:$0xff] }
 0x435   : > { %vm5425_vm11 = vcmp.lt.s32.totalorder %v4913_v18, 9216  ;;  %v6446_v35 = vmul.f32 %v5934_v23, %v5934_v23  ;;  %v3887_v37 = vsub.f32 %v2863_v24, %v3375_v25  ;;  %v4405_v38 = vadd.s32 128, %v8683_v3  ;;  %v2870_v18 = vld [vmem:[%s7640_s18 + $0x98] sm:$0xff] }
 0x436   : > { %v6956_v36 = vadd.f32 %v6955_v28, %v6444_v19  ;;  %v5936_v39 = vsel %vm5424_vm10, %v3885_v21, 0.0  ;;  %v4916_v42 = vadd.s32 %v8687_v5, %v4403_v26  ;;  %vm5426_vm12 = vcmp.lt.s32.totalorder %v4914_v22, 9216  ;;  %v3382_v19 = vld [vmem:[%s7645_s21 + $0x98] sm:$0xff]  ;;  %v2871_v26 = vld [vmem:[%s7640_s18 + $0xa0] sm:$0xff] }
 0x437   : > { %v6447_v43 = vmul.f32 %v5935_v31, %v5935_v31  ;;  %v3888_v45 = vsub.f32 %v2864_v32, %v3376_v33  ;;  %v4406_v46 = vadd.s32 136, %v8683_v3  ;;  %v5937_v47 = vsel %vm5425_vm11, %v3886_v29, 0.0 }
 0x438   : > { %v6957_v44 = vadd.f32 %v6956_v36, %v6445_v27  ;;  %v4917_v50 = vadd.s32 %v8687_v5, %v4404_v34  ;;  %vm5427_vm13 = vcmp.lt.s32.totalorder %v4915_v30, 9216  ;;  %v6448_v51 = vmul.f32 %v5936_v39, %v5936_v39  ;;  %v3383_v27 = vld [vmem:[%s7645_s21 + $0xa0] sm:$0xff]  ;;  %v2872_v34 = vld [vmem:[%s7640_s18 + $0xa8] sm:$0xff] }
 0x439   : > { %v3889_v53 = vsub.f32 %v2865_v40, %v3377_v41  ;;  %v4918_v54 = vadd.s32 %v8687_v5, %v4405_v38  ;;  %v5938_v55 = vsel %vm5426_vm12, %v3887_v37, 0.0  ;;  %v4407_v58 = vadd.s32 144, %v8683_v3 }
 0x43a   : > { %v6958_v52 = vadd.f32 %v6957_v44, %v6446_v35  ;;  %vm5428_vm14 = vcmp.lt.s32.totalorder %v4916_v42, 9216  ;;  %v6449_v59 = vmul.f32 %v5937_v47, %v5937_v47  ;;  %v3890_v61 = vsub.f32 %v2866_v48, %v3378_v49  ;;  %v3384_v35 = vld [vmem:[%s7645_s21 + $0xa8] sm:$0xff]  ;;  %v2873_v42 = vld [vmem:[%s7640_s18 + $0xb0] sm:$0xff] }
 0x43b   : > { %v4919_v62 = vadd.s32 %v8687_v5, %v4406_v46  ;;  %v5939_v63 = vsel %vm5427_vm13, %v3888_v45, 0.0  ;;  %v4408_v2 = vadd.s32 152, %v8683_v3  ;;  %vm5429_vm15 = vcmp.lt.s32.totalorder %v4917_v50, 9216  ;;  %v2874_v50 = vld [vmem:[%s7640_s18 + $0xb8] sm:$0xff] }
 0x43c   : > { %v6959_v60 = vadd.f32 %v6958_v52, %v6447_v43  ;;  %v6450_v4 = vmul.f32 %v5938_v55, %v5938_v55  ;;  %v3891_v7 = vsub.f32 %v2867_v56, %v3379_v57  ;;  %v4409_v8 = vadd.s32 160, %v8683_v3  ;;  %v3385_v43 = vld [vmem:[%s7645_s21 + $0xb0] sm:$0xff] }
 0x43d   : > { %v5940_v9 = vsel %vm5428_vm14, %v3889_v53, 0.0  ;;  %v4920_v12 = vadd.s32 %v8687_v5, %v4407_v58  ;;  %vm5430_vm0 = vcmp.lt.s32.totalorder %v4918_v54, 9216  ;;  %v6451_v13 = vmul.f32 %v5939_v63, %v5939_v63  ;;  %v2875_v58 = vld [vmem:[%s7640_s18 + $0xc0] sm:$0xff] }
 0x43e   : > { %v6960_v6 = vadd.f32 %v6959_v60, %v6448_v51  ;;  %v3892_v15 = vsub.f32 %v2868_v0, %v3380_v1  ;;  %v4410_v16 = vadd.s32 168, %v8683_v3  ;;  %v5941_v17 = vsel %vm5429_vm15, %v3890_v61, 0.0  ;;  %v3386_v51 = vld [vmem:[%s7645_s21 + $0xb8] sm:$0xff] }
 0x43f   : > { %v4921_v20 = vadd.s32 %v8687_v5, %v4408_v2  ;;  %vm5431_vm1 = vcmp.lt.s32.totalorder %v4919_v62, 9216  ;;  %v6452_v21 = vmul.f32 %v5940_v9, %v5940_v9  ;;  %v3893_v23 = vsub.f32 %v2869_v10, %v3381_v11  ;;  %v2876_v2 = vld [vmem:[%s7640_s18 + $0xc8] sm:$0xff] }
 0x440   : > { %v6961_v14 = vadd.f32 %v6960_v6, %v6449_v59  ;;  %v4922_v24 = vadd.s32 %v8687_v5, %v4409_v8  ;;  %v5942_v25 = vsel %vm5430_vm0, %v3891_v7, 0.0  ;;  %v4411_v28 = vadd.s32 176, %v8683_v3  ;;  %v3387_v59 = vld [vmem:[%s7645_s21 + $0xc0] sm:$0xff] }
 0x441   : > { %vm5432_vm2 = vcmp.lt.s32.totalorder %v4920_v12, 9216  ;;  %v6453_v29 = vmul.f32 %v5941_v17, %v5941_v17  ;;  %v3894_v31 = vsub.f32 %v2870_v18, %v3382_v19  ;;  %v4923_v32 = vadd.s32 %v8687_v5, %v4410_v16  ;;  %v2877_v12 = vld [vmem:[%s7640_s18 + $0xd0] sm:$0xff] }
 0x442   : > { %v6962_v22 = vadd.f32 %v6961_v14, %v6450_v4  ;;  %v5943_v33 = vsel %vm5431_vm1, %v3892_v15, 0.0  ;;  %v4412_v36 = vadd.s32 184, %v8683_v3  ;;  %vm5433_vm3 = vcmp.lt.s32.totalorder %v4921_v20, 9216  ;;  %v3388_v4 = vld [vmem:[%s7645_s21 + $0xc8] sm:$0xff]  ;;  %v2878_v20 = vld [vmem:[%s7640_s18 + $0xd8] sm:$0xff] }
 0x443   : > { %v6454_v37 = vmul.f32 %v5942_v25, %v5942_v25  ;;  %v3895_v39 = vsub.f32 %v2871_v26, %v3383_v27  ;;  %v4413_v40 = vadd.s32 192, %v8683_v3  ;;  %v5944_v41 = vsel %vm5432_vm2, %v3893_v23, 0.0 }
 0x444   : > { %v6963_v30 = vadd.f32 %v6962_v22, %v6451_v13  ;;  %v4924_v44 = vadd.s32 %v8687_v5, %v4411_v28  ;;  %vm5434_vm4 = vcmp.lt.s32.totalorder %v4922_v24, 9216  ;;  %v6455_v45 = vmul.f32 %v5943_v33, %v5943_v33  ;;  %v3389_v13 = vld [vmem:[%s7645_s21 + $0xd0] sm:$0xff]  ;;  %v2879_v28 = vld [vmem:[%s7640_s18 + $0xe0] sm:$0xff] }
 0x445   : > { %v3896_v47 = vsub.f32 %v2872_v34, %v3384_v35  ;;  %v4414_v48 = vadd.s32 200, %v8683_v3  ;;  %v5945_v49 = vsel %vm5433_vm3, %v3894_v31, 0.0  ;;  %v4925_v52 = vadd.s32 %v8687_v5, %v4412_v36  ;;  %v2880_v36 = vld [vmem:[%s7640_s18 + $0xe8] sm:$0xff] }
 0x446   : > { %v6964_v38 = vadd.f32 %v6963_v30, %v6452_v21  ;;  %vm5435_vm5 = vcmp.lt.s32.totalorder %v4923_v32, 9216  ;;  %v6456_v53 = vmul.f32 %v5944_v41, %v5944_v41  ;;  %v3897_v55 = vsub.f32 %v2873_v42, %v3385_v43  ;;  %v3390_v21 = vld [vmem:[%s7645_s21 + $0xd8] sm:$0xff] }
 0x447   : > { %v4926_v56 = vadd.s32 %v8687_v5, %v4413_v40  ;;  %v5946_v57 = vsel %vm5434_vm4, %v3895_v39, 0.0  ;;  %v4415_v60 = vadd.s32 208, %v8683_v3  ;;  %vm5436_vm6 = vcmp.lt.s32.totalorder %v4924_v44, 9216  ;;  %v2881_v44 = vld [vmem:[%s7640_s18 + $0xf0] sm:$0xff] }
 0x448   : > { %v6965_v46 = vadd.f32 %v6964_v38, %v6453_v29  ;;  %v6457_v61 = vmul.f32 %v5945_v49, %v5945_v49  ;;  %v3898_v63 = vsub.f32 %v2874_v50, %v3386_v51  ;;  %v4927_v0 = vadd.s32 %v8687_v5, %v4414_v48  ;;  %v3391_v29 = vld [vmem:[%s7645_s21 + $0xe0] sm:$0xff] }
 0x449   : > { %v5947_v1 = vsel %vm5435_vm5, %v3896_v47, 0.0  ;;  %v4416_v6 = vadd.s32 216, %v8683_v3  ;;  %vm5437_vm7 = vcmp.lt.s32.totalorder %v4925_v52, 9216  ;;  %v6458_v7 = vmul.f32 %v5946_v57, %v5946_v57  ;;  %v2882_v52 = vld [vmem:[%s7640_s18 + $0xf8] sm:$0xff] }
 0x44a   : > { %v6966_v54 = vadd.f32 %v6965_v46, %v6454_v37  ;;  %v3899_v9 = vsub.f32 %v2875_v58, %v3387_v59  ;;  %v4417_v10 = vadd.s32 224, %v8683_v3  ;;  %v5948_v11 = vsel %vm5436_vm6, %v3897_v55, 0.0  ;;  %v3392_v37 = vld [vmem:[%s7645_s21 + $0xe8] sm:$0xff] }
 0x44b   : > { %v4928_v14 = vadd.s32 %v8687_v5, %v4415_v60  ;;  %vm5438_vm8 = vcmp.lt.s32.totalorder %v4926_v56, 9216  ;;  %v6459_v15 = vmul.f32 %v5947_v1, %v5947_v1  ;;  %v3900_v17 = vsub.f32 %v2876_v2, %v3388_v4  ;;  %v2883_v60 = vld [vmem:[%s7640_s18 + $0x100] sm:$0xff] }
 0x44c   : > { %v6967_v62 = vadd.f32 %v6966_v54, %v6455_v45  ;;  %v4418_v18 = vadd.s32 232, %v8683_v3  ;;  %v5949_v19 = vsel %vm5437_vm7, %v3898_v63, 0.0  ;;  %v4929_v22 = vadd.s32 %v8687_v5, %v4416_v6  ;;  %v3393_v45 = vld [vmem:[%s7645_s21 + $0xf0] sm:$0xff]  ;;  %v2884_v6 = vld [vmem:[%s7640_s18 + $0x108] sm:$0xff] }
 0x44d   : > { %vm5439_vm9 = vcmp.lt.s32.totalorder %v4927_v0, 9216  ;;  %v6460_v23 = vmul.f32 %v5948_v11, %v5948_v11  ;;  %v3901_v25 = vsub.f32 %v2877_v12, %v3389_v13  ;;  %v4930_v26 = vadd.s32 %v8687_v5, %v4417_v10 }
 0x44e   : > { %v6968_v8 = vadd.f32 %v6967_v62, %v6456_v53  ;;  %v5950_v27 = vsel %vm5438_vm8, %v3899_v9, 0.0  ;;  %v4419_v30 = vadd.s32 240, %v8683_v3  ;;  %vm5440_vm10 = vcmp.lt.s32.totalorder %v4928_v14, 9216  ;;  %v3394_v53 = vld [vmem:[%s7645_s21 + $0xf8] sm:$0xff]  ;;  %v2885_v14 = vld [vmem:[%s7640_s18 + $0x110] sm:$0xff] }
 0x44f   : > { %v6461_v31 = vmul.f32 %v5949_v19, %v5949_v19  ;;  %v3902_v33 = vsub.f32 %v2878_v20, %v3390_v21  ;;  %v4931_v34 = vadd.s32 %v8687_v5, %v4418_v18  ;;  %v5951_v35 = vsel %vm5439_vm9, %v3900_v17, 0.0 }
 0x450   : > { %v6969_v16 = vadd.f32 %v6968_v8, %v6457_v61  ;;  %v4420_v38 = vadd.s32 248, %v8683_v3  ;;  %vm5441_vm11 = vcmp.lt.s32.totalorder %v4929_v22, 9216  ;;  %v6462_v39 = vmul.f32 %v5950_v27, %v5950_v27  ;;  %v3395_v61 = vld [vmem:[%s7645_s21 + $0x100] sm:$0xff]  ;;  %v2886_v22 = vld [vmem:[%s7640_s18 + $0x118] sm:$0xff] }
 0x451   : > { %v3903_v41 = vsub.f32 %v2879_v28, %v3391_v29  ;;  %v4421_v42 = vadd.s32 256, %v8683_v3  ;;  %v5952_v43 = vsel %vm5440_vm10, %v3901_v25, 0.0  ;;  %v4932_v46 = vadd.s32 %v8687_v5, %v4419_v30  ;;  %v2887_v30 = vld [vmem:[%s7640_s18 + $0x120] sm:$0xff] }
 0x452   : > { %v6970_v24 = vadd.f32 %v6969_v16, %v6458_v7  ;;  %vm5442_vm12 = vcmp.lt.s32.totalorder %v4930_v26, 9216  ;;  %v6463_v47 = vmul.f32 %v5951_v35, %v5951_v35  ;;  %v3904_v49 = vsub.f32 %v2880_v36, %v3392_v37  ;;  %v3396_v7 = vld [vmem:[%s7645_s21 + $0x108] sm:$0xff] }
 0x453   : > { %v4422_v50 = vadd.s32 264, %v8683_v3  ;;  %v5953_v51 = vsel %vm5441_vm11, %v3902_v33, 0.0  ;;  %v4933_v54 = vadd.s32 %v8687_v5, %v4420_v38  ;;  %vm5443_vm13 = vcmp.lt.s32.totalorder %v4931_v34, 9216  ;;  %v2888_v38 = vld [vmem:[%s7640_s18 + $0x128] sm:$0xff] }
 0x454   : > { %v6971_v32 = vadd.f32 %v6970_v24, %v6459_v15  ;;  %v6464_v55 = vmul.f32 %v5952_v43, %v5952_v43  ;;  %v3905_v57 = vsub.f32 %v2881_v44, %v3393_v45  ;;  %v4934_v58 = vadd.s32 %v8687_v5, %v4421_v42  ;;  %v3397_v15 = vld [vmem:[%s7645_s21 + $0x110] sm:$0xff] }
 0x455   : > { %v5954_v59 = vsel %vm5442_vm12, %v3903_v41, 0.0  ;;  %v4423_v62 = vadd.s32 272, %v8683_v3  ;;  %vm5444_vm14 = vcmp.lt.s32.totalorder %v4932_v46, 9216  ;;  %v6465_v63 = vmul.f32 %v5953_v51, %v5953_v51  ;;  %v2889_v46 = vld [vmem:[%s7640_s18 + $0x130] sm:$0xff] }
 0x456   : > { %v6972_v40 = vadd.f32 %v6971_v32, %v6460_v23  ;;  %v3906_v1 = vsub.f32 %v2882_v52, %v3394_v53  ;;  %v4935_v2 = vadd.s32 %v8687_v5, %v4422_v50  ;;  %v5955_v4 = vsel %vm5443_vm13, %v3904_v49, 0.0  ;;  %v3398_v23 = vld [vmem:[%s7645_s21 + $0x118] sm:$0xff] }
 0x457   : > { %v4424_v8 = vadd.s32 280, %v8683_v3  ;;  %vm5445_vm15 = vcmp.lt.s32.totalorder %v4933_v54, 9216  ;;  %v6466_v9 = vmul.f32 %v5954_v59, %v5954_v59  ;;  %v3907_v11 = vsub.f32 %v2883_v60, %v3395_v61  ;;  %v2890_v54 = vld [vmem:[%s7640_s18 + $0x138] sm:$0xff] }
 0x458   : > { %v6973_v48 = vadd.f32 %v6972_v40, %v6461_v31  ;;  %v4425_v12 = vadd.s32 288, %v8683_v3  ;;  %v5956_v13 = vsel %vm5444_vm14, %v3905_v57, 0.0  ;;  %v4936_v16 = vadd.s32 %v8687_v5, %v4423_v62  ;;  %v3399_v31 = vld [vmem:[%s7645_s21 + $0x120] sm:$0xff] }
 0x459   : > { %vm5446_vm0 = vcmp.lt.s32.totalorder %v4934_v58, 9216  ;;  %v6467_v17 = vmul.f32 %v5955_v4, %v5955_v4  ;;  %v3908_v19 = vsub.f32 %v2884_v6, %v3396_v7  ;;  %v4426_v20 = vadd.s32 296, %v8683_v3  ;;  %v2891_v62 = vld [vmem:[%s7640_s18 + $0x140] sm:$0xff] }
 0x45a   : > { %v6974_v56 = vadd.f32 %v6973_v48, %v6462_v39  ;;  %v5957_v21 = vsel %vm5445_vm15, %v3906_v1, 0.0  ;;  %v4937_v24 = vadd.s32 %v8687_v5, %v4424_v8  ;;  %vm5447_vm1 = vcmp.lt.s32.totalorder %v4935_v2, 9216  ;;  %v3400_v39 = vld [vmem:[%s7645_s21 + $0x128] sm:$0xff] }
 0x45b   : > { %v6468_v25 = vmul.f32 %v5956_v13, %v5956_v13  ;;  %v3909_v27 = vsub.f32 %v2885_v14, %v3397_v15  ;;  %v4938_v28 = vadd.s32 %v8687_v5, %v4425_v12  ;;  %v5958_v29 = vsel %vm5446_vm0, %v3907_v11, 0.0  ;;  %v2892_v8 = vld [vmem:[%s7640_s18 + $0x148] sm:$0xff] }
 0x45c   : > { %v6975_v0 = vadd.f32 %v6974_v56, %v6463_v47  ;;  %v4427_v32 = vadd.s32 304, %v8683_v3  ;;  %vm5448_vm2 = vcmp.lt.s32.totalorder %v4936_v16, 9216  ;;  %v6469_v33 = vmul.f32 %v5957_v21, %v5957_v21  ;;  %v3401_v47 = vld [vmem:[%s7645_s21 + $0x130] sm:$0xff] }
 0x45d   : > { %v3910_v35 = vsub.f32 %v2886_v22, %v3398_v23  ;;  %v4939_v36 = vadd.s32 %v8687_v5, %v4426_v20  ;;  %v5959_v37 = vsel %vm5447_vm1, %v3908_v19, 0.0  ;;  %v4428_v40 = vadd.s32 312, %v8683_v3  ;;  %v2893_v16 = vld [vmem:[%s7640_s18 + $0x150] sm:$0xff] }
 0x45e   : > { %v6976_v10 = vadd.f32 %v6975_v0, %v6464_v55  ;;  %vm5449_vm3 = vcmp.lt.s32.totalorder %v4937_v24, 9216  ;;  %v6470_v41 = vmul.f32 %v5958_v29, %v5958_v29  ;;  %v3911_v43 = vsub.f32 %v2887_v30, %v3399_v31  ;;  %v3402_v55 = vld [vmem:[%s7645_s21 + $0x138] sm:$0xff] }
 0x45f   : > { %v4429_v44 = vadd.s32 320, %v8683_v3  ;;  %v5960_v45 = vsel %vm5448_vm2, %v3909_v27, 0.0  ;;  %v4940_v48 = vadd.s32 %v8687_v5, %v4427_v32  ;;  %vm5450_vm4 = vcmp.lt.s32.totalorder %v4938_v28, 9216  ;;  %v2894_v24 = vld [vmem:[%s7640_s18 + $0x158] sm:$0xff]  ;;  %v2895_v32 = vld [vmem:[%s7640_s18 + $0x160] sm:$0xff] }
 0x460   : > { %v6977_v18 = vadd.f32 %v6976_v10, %v6465_v63  ;;  %v6471_v49 = vmul.f32 %v5959_v37, %v5959_v37  ;;  %v3912_v51 = vsub.f32 %v2888_v38, %v3400_v39  ;;  %v4430_v52 = vadd.s32 328, %v8683_v3  ;;  %v3403_v63 = vld [vmem:[%s7645_s21 + $0x140] sm:$0xff] }
 0x461   : > { %v5961_v53 = vsel %vm5449_vm3, %v3910_v35, 0.0  ;;  %v4941_v56 = vadd.s32 %v8687_v5, %v4428_v40  ;;  %vm5451_vm5 = vcmp.lt.s32.totalorder %v4939_v36, 9216  ;;  %v6472_v57 = vmul.f32 %v5960_v45, %v5960_v45  ;;  %v2896_v40 = vld [vmem:[%s7640_s18 + $0x168] sm:$0xff] }
 0x462   : > { %v6978_v26 = vadd.f32 %v6977_v18, %v6466_v9  ;;  %v3913_v59 = vsub.f32 %v2889_v46, %v3401_v47  ;;  %v4942_v60 = vadd.s32 %v8687_v5, %v4429_v44  ;;  %v5962_v61 = vsel %vm5450_vm4, %v3911_v43, 0.0  ;;  %v3404_v9 = vld [vmem:[%s7645_s21 + $0x148] sm:$0xff] }
 0x463   : > { %v4431_v0 = vadd.s32 336, %v8683_v3  ;;  %vm5452_vm6 = vcmp.lt.s32.totalorder %v4940_v48, 9216  ;;  %v6473_v1 = vmul.f32 %v5961_v53, %v5961_v53  ;;  %v3914_v4 = vsub.f32 %v2890_v54, %v3402_v55  ;;  %v2897_v48 = vld [vmem:[%s7640_s18 + $0x170] sm:$0xff] }
 0x464   : > { %v6979_v34 = vadd.f32 %v6978_v26, %v6467_v17  ;;  %v4943_v6 = vadd.s32 %v8687_v5, %v4430_v52  ;;  %v5963_v7 = vsel %vm5451_vm5, %v3912_v51, 0.0  ;;  %v4432_v10 = vadd.s32 344, %v8683_v3  ;;  %v3405_v17 = vld [vmem:[%s7645_s21 + $0x150] sm:$0xff] }
 0x465   : > { %vm5453_vm7 = vcmp.lt.s32.totalorder %v4941_v56, 9216  ;;  %v6474_v11 = vmul.f32 %v5962_v61, %v5962_v61  ;;  %v3915_v13 = vsub.f32 %v2891_v62, %v3403_v63  ;;  %v4433_v14 = vadd.s32 352, %v8683_v3  ;;  %v2898_v56 = vld [vmem:[%s7640_s18 + $0x178] sm:$0xff] }
 0x466   : > { %v6980_v42 = vadd.f32 %v6979_v34, %v6468_v25  ;;  %v5964_v15 = vsel %vm5452_vm6, %v3913_v59, 0.0  ;;  %v4944_v18 = vadd.s32 %v8687_v5, %v4431_v0  ;;  %vm5454_vm8 = vcmp.lt.s32.totalorder %v4942_v60, 9216  ;;  %v3406_v25 = vld [vmem:[%s7645_s21 + $0x158] sm:$0xff]  ;;  %v2899_v0 = vld [vmem:[%s7640_s18 + $0x180] sm:$0xff] }
 0x467   : > { %v6475_v19 = vmul.f32 %v5963_v7, %v5963_v7  ;;  %v3916_v21 = vsub.f32 %v2892_v8, %v3404_v9  ;;  %v4434_v22 = vadd.s32 360, %v8683_v3  ;;  %v5965_v23 = vsel %vm5453_vm7, %v3914_v4, 0.0 }
 0x468   : > { %v6981_v50 = vadd.f32 %v6980_v42, %v6469_v33  ;;  %v4945_v26 = vadd.s32 %v8687_v5, %v4432_v10  ;;  %vm5455_vm9 = vcmp.lt.s32.totalorder %v4943_v6, 9216  ;;  %v6476_v27 = vmul.f32 %v5964_v15, %v5964_v15  ;;  %v3407_v33 = vld [vmem:[%s7645_s21 + $0x160] sm:$0xff]  ;;  %v2900_v10 = vld [vmem:[%s7640_s18 + $0x188] sm:$0xff] }
 0x469   : > { %v3917_v29 = vsub.f32 %v2893_v16, %v3405_v17  ;;  %v4946_v30 = vadd.s32 %v8687_v5, %v4433_v14  ;;  %v5966_v31 = vsel %vm5454_vm8, %v3915_v13, 0.0  ;;  %v4435_v34 = vadd.s32 368, %v8683_v3 }
 0x46a   : > { %v6982_v58 = vadd.f32 %v6981_v50, %v6470_v41  ;;  %vm5456_vm10 = vcmp.lt.s32.totalorder %v4944_v18, 9216  ;;  %v6477_v35 = vmul.f32 %v5965_v23, %v5965_v23  ;;  %v3918_v37 = vsub.f32 %v2894_v24, %v3406_v25  ;;  %v3408_v41 = vld [vmem:[%s7645_s21 + $0x168] sm:$0xff]  ;;  %v2901_v18 = vld [vmem:[%s7640_s18 + $0x190] sm:$0xff] }
 0x46b   : > { %v4947_v38 = vadd.s32 %v8687_v5, %v4434_v22  ;;  %v5967_v39 = vsel %vm5455_vm9, %v3916_v21, 0.0  ;;  %v4436_v42 = vadd.s32 376, %v8683_v3  ;;  %vm5457_vm11 = vcmp.lt.s32.totalorder %v4945_v26, 9216  ;;  %v2902_v26 = vld [vmem:[%s7640_s18 + $0x198] sm:$0xff] }
 0x46c   : > { %v6983_v2 = vadd.f32 %v6982_v58, %v6471_v49  ;;  %v6478_v43 = vmul.f32 %v5966_v31, %v5966_v31  ;;  %v3919_v45 = vsub.f32 %v2895_v32, %v3407_v33  ;;  %v4437_v46 = vadd.s32 384, %v8683_v3  ;;  %v3409_v49 = vld [vmem:[%s7645_s21 + $0x170] sm:$0xff] }
 0x46d   : > { %v5968_v47 = vsel %vm5456_vm10, %v3917_v29, 0.0  ;;  %v4948_v50 = vadd.s32 %v8687_v5, %v4435_v34  ;;  %vm5458_vm12 = vcmp.lt.s32.totalorder %v4946_v30, 9216  ;;  %v6479_v51 = vmul.f32 %v5967_v39, %v5967_v39  ;;  %v2903_v34 = vld [vmem:[%s7640_s18 + $0x1a0] sm:$0xff] }
 0x46e   : > { %v6984_v12 = vadd.f32 %v6983_v2, %v6472_v57  ;;  %v3920_v53 = vsub.f32 %v2896_v40, %v3408_v41  ;;  %v4438_v54 = vadd.s32 392, %v8683_v3  ;;  %v5969_v55 = vsel %vm5457_vm11, %v3918_v37, 0.0  ;;  %v3410_v57 = vld [vmem:[%s7645_s21 + $0x178] sm:$0xff] }
 0x46f   : > { %v4949_v58 = vadd.s32 %v8687_v5, %v4436_v42  ;;  %vm5459_vm13 = vcmp.lt.s32.totalorder %v4947_v38, 9216  ;;  %v6480_v59 = vmul.f32 %v5968_v47, %v5968_v47  ;;  %v3921_v61 = vsub.f32 %v2897_v48, %v3409_v49  ;;  %v2904_v42 = vld [vmem:[%s7640_s18 + $0x1a8] sm:$0xff] }
 0x470   : > { %v6985_v20 = vadd.f32 %v6984_v12, %v6473_v1  ;;  %v4950_v62 = vadd.s32 %v8687_v5, %v4437_v46  ;;  %v5970_v63 = vsel %vm5458_vm12, %v3919_v45, 0.0  ;;  %v3411_v1 = vld [vmem:[%s7645_s21 + $0x180] sm:$0xff]  ;;  %v4439_v2 = vadd.s32 400, %v8683_v3 }
 0x471   : > { %vm5460_vm14 = vcmp.lt.s32.totalorder %v4948_v50, 9216  ;;  %v6481_v4 = vmul.f32 %v5969_v55, %v5969_v55  ;;  %v3922_v7 = vsub.f32 %v2898_v56, %v3410_v57  ;;  %v4951_v8 = vadd.s32 %v8687_v5, %v4438_v54  ;;  %v2905_v50 = vld [vmem:[%s7640_s18 + $0x1b0] sm:$0xff] }
 0x472   : > { %v6986_v28 = vadd.f32 %v6985_v20, %v6474_v11  ;;  %v5971_v9 = vsel %vm5459_vm13, %v3920_v53, 0.0  ;;  %v3412_v11 = vld [vmem:[%s7645_s21 + $0x188] sm:$0xff]  ;;  %v4440_v12 = vadd.s32 408, %v8683_v3  ;;  %vm5461_vm15 = vcmp.lt.s32.totalorder %v4949_v58, 9216  ;;  %v2906_v58 = vld [vmem:[%s7640_s18 + $0x1b8] sm:$0xff] }
 0x473   : > { %v6482_v13 = vmul.f32 %v5970_v63, %v5970_v63  ;;  %v3923_v15 = vsub.f32 %v2899_v0, %v3411_v1  ;;  %v4441_v16 = vadd.s32 416, %v8683_v3  ;;  %v5972_v17 = vsel %vm5460_vm14, %v3921_v61, 0.0 }
 0x474   : > { %v6987_v36 = vadd.f32 %v6986_v28, %v6475_v19  ;;  %v3413_v19 = vld [vmem:[%s7645_s21 + $0x190] sm:$0xff]  ;;  %v4952_v20 = vadd.s32 %v8687_v5, %v4439_v2  ;;  %vm5462_vm0 = vcmp.lt.s32.totalorder %v4950_v62, 9216  ;;  %v6483_v21 = vmul.f32 %v5971_v9, %v5971_v9  ;;  %v2907_v2 = vld [vmem:[%s7640_s18 + $0x1c0] sm:$0xff] }
 0x475   : > { %v3924_v23 = vsub.f32 %v2900_v10, %v3412_v11  ;;  %v4442_v24 = vadd.s32 424, %v8683_v3  ;;  %v5973_v25 = vsel %vm5461_vm15, %v3922_v7, 0.0  ;;  %v4953_v28 = vadd.s32 %v8687_v5, %v4440_v12  ;;  %v2908_v12 = vld [vmem:[%s7640_s18 + $0x1c8] sm:$0xff] }
 0x476   : > { %v6988_v44 = vadd.f32 %v6987_v36, %v6476_v27  ;;  %v3414_v27 = vld [vmem:[%s7645_s21 + $0x198] sm:$0xff]  ;;  %vm5463_vm1 = vcmp.lt.s32.totalorder %v4951_v8, 9216  ;;  %v6484_v29 = vmul.f32 %v5972_v17, %v5972_v17  ;;  %v3925_v31 = vsub.f32 %v2901_v18, %v3413_v19 }
 0x477   : > { %v4954_v32 = vadd.s32 %v8687_v5, %v4441_v16  ;;  %v5974_v33 = vsel %vm5462_vm0, %v3923_v15, 0.0  ;;  %v4443_v36 = vadd.s32 432, %v8683_v3  ;;  %vm5464_vm2 = vcmp.lt.s32.totalorder %v4952_v20, 9216  ;;  %v2909_v20 = vld [vmem:[%s7640_s18 + $0x1d0] sm:$0xff] }
 0x478   : > { %v6989_v52 = vadd.f32 %v6988_v44, %v6477_v35  ;;  %v3415_v35 = vld [vmem:[%s7645_s21 + $0x1a0] sm:$0xff]  ;;  %v6485_v37 = vmul.f32 %v5973_v25, %v5973_v25  ;;  %v3926_v39 = vsub.f32 %v2902_v26, %v3414_v27  ;;  %v4955_v40 = vadd.s32 %v8687_v5, %v4442_v24 }
 0x479   : > { %v5975_v41 = vsel %vm5463_vm1, %v3924_v23, 0.0  ;;  %v4444_v44 = vadd.s32 440, %v8683_v3  ;;  %vm5465_vm3 = vcmp.lt.s32.totalorder %v4953_v28, 9216  ;;  %v6486_v45 = vmul.f32 %v5974_v33, %v5974_v33  ;;  %v2910_v28 = vld [vmem:[%s7640_s18 + $0x1d8] sm:$0xff] }
 0x47a   : > { %v6990_v60 = vadd.f32 %v6989_v52, %v6478_v43  ;;  %v3416_v43 = vld [vmem:[%s7645_s21 + $0x1a8] sm:$0xff]  ;;  %v3927_v47 = vsub.f32 %v2903_v34, %v3415_v35  ;;  %v4445_v48 = vadd.s32 448, %v8683_v3  ;;  %v5976_v49 = vsel %vm5464_vm2, %v3925_v31, 0.0 }
 0x47b   : > { %v4956_v52 = vadd.s32 %v8687_v5, %v4443_v36  ;;  %vm5466_vm4 = vcmp.lt.s32.totalorder %v4954_v32, 9216  ;;  %v6487_v53 = vmul.f32 %v5975_v41, %v5975_v41  ;;  %v3928_v55 = vsub.f32 %v2904_v42, %v3416_v43  ;;  %v2911_v36 = vld [vmem:[%s7640_s18 + $0x1e0] sm:$0xff] }
 0x47c   : > { %v6991_v6 = vadd.f32 %v6990_v60, %v6479_v51  ;;  %v3417_v51 = vld [vmem:[%s7645_s21 + $0x1b0] sm:$0xff]  ;;  %v4446_v56 = vadd.s32 456, %v8683_v3  ;;  %v5977_v57 = vsel %vm5465_vm3, %v3926_v39, 0.0  ;;  %v4957_v60 = vadd.s32 %v8687_v5, %v4444_v44  ;;  %v2912_v44 = vld [vmem:[%s7640_s18 + $0x1e8] sm:$0xff] }
 0x47d   : > { %vm5467_vm5 = vcmp.lt.s32.totalorder %v4955_v40, 9216  ;;  %v6488_v61 = vmul.f32 %v5976_v49, %v5976_v49  ;;  %v3929_v63 = vsub.f32 %v2905_v50, %v3417_v51  ;;  %v4958_v0 = vadd.s32 %v8687_v5, %v4445_v48 }
 0x47e   : > { %v6992_v14 = vadd.f32 %v6991_v6, %v6480_v59  ;;  %v3418_v59 = vld [vmem:[%s7645_s21 + $0x1b8] sm:$0xff]  ;;  %v5978_v1 = vsel %vm5466_vm4, %v3927_v47, 0.0  ;;  %v4447_v6 = vadd.s32 464, %v8683_v3  ;;  %vm5468_vm6 = vcmp.lt.s32.totalorder %v4956_v52, 9216  ;;  %v2913_v52 = vld [vmem:[%s7640_s18 + $0x1f0] sm:$0xff] }
 0x47f   : > { %v6489_v7 = vmul.f32 %v5977_v57, %v5977_v57  ;;  %v3930_v9 = vsub.f32 %v2906_v58, %v3418_v59  ;;  %v4959_v10 = vadd.s32 %v8687_v5, %v4446_v56  ;;  %v5979_v11 = vsel %vm5467_vm5, %v3928_v55, 0.0 }
 0x480   : > { %v6993_v22 = vadd.f32 %v6992_v14, %v6481_v4  ;;  %v3419_v4 = vld [vmem:[%s7645_s21 + $0x1c0] sm:$0xff]  ;;  %v4448_v14 = vadd.s32 472, %v8683_v3  ;;  %vm5469_vm7 = vcmp.lt.s32.totalorder %v4957_v60, 9216  ;;  %v6490_v15 = vmul.f32 %v5978_v1, %v5978_v1  ;;  %v2914_v60 = vld [vmem:[%s7640_s18 + $0x1f8] sm:$0xff] }
 0x481   : > { %v3931_v17 = vsub.f32 %v2907_v2, %v3419_v4  ;;  %v4449_v18 = vadd.s32 480, %v8683_v3  ;;  %v5980_v19 = vsel %vm5468_vm6, %v3929_v63, 0.0  ;;  %vm5470_vm8 = vcmp.lt.s32.totalorder %v4958_v0, 9216 }
 0x482   : > { %v6994_v30 = vadd.f32 %v6993_v22, %v6482_v13  ;;  %v3420_v13 = vld [vmem:[%s7645_s21 + $0x1c8] sm:$0xff]  ;;  %v4960_v22 = vadd.s32 %v8687_v5, %v4447_v6  ;;  %v6491_v23 = vmul.f32 %v5979_v11, %v5979_v11  ;;  %v4450_v26 = vadd.s32 488, %v8683_v3  ;;  %v2915_v6 = vld [vmem:[%s7640_s18 + $0x200] sm:$0xff] }
 0x483   : > { %v3932_v25 = vsub.f32 %v2908_v12, %v3420_v13  ;;  %v5981_v27 = vsel %vm5469_vm7, %v3930_v9, 0.0  ;;  %vm5471_vm9 = vcmp.lt.s32.totalorder %v4959_v10, 9216  ;;  %v6492_v31 = vmul.f32 %v5980_v19, %v5980_v19 }
 0x484   : > { %v6995_v38 = vadd.f32 %v6994_v30, %v6483_v21  ;;  %v3421_v21 = vld [vmem:[%s7645_s21 + $0x1d0] sm:$0xff]  ;;  %v4961_v30 = vadd.s32 %v8687_v5, %v4448_v14  ;;  %v4962_v34 = vadd.s32 %v8687_v5, %v4449_v18  ;;  %v5982_v35 = vsel %vm5470_vm8, %v3931_v17, 0.0  ;;  %v2916_v14 = vld [vmem:[%s7640_s18 + $0x208] sm:$0xff] }
 0x485   : > { %v3933_v33 = vsub.f32 %v2909_v20, %v3421_v21  ;;  %vm5472_vm10 = vcmp.lt.s32.totalorder %v4960_v22, 9216  ;;  %v6493_v39 = vmul.f32 %v5981_v27, %v5981_v27  ;;  %v4963_v42 = vadd.s32 %v8687_v5, %v4450_v26  ;;  %v2917_v22 = vld [vmem:[%s7640_s18 + $0x210] sm:$0xff] }
 0x486   : > { %v6996_v46 = vadd.f32 %v6995_v38, %v6484_v29  ;;  %v3422_v29 = vld [vmem:[%s7645_s21 + $0x1d8] sm:$0xff]  ;;  %v4451_v38 = vadd.s32 496, %v8683_v3  ;;  %v5983_v43 = vsel %vm5471_vm9, %v3932_v25, 0.0  ;;  %vm5473_vm11 = vcmp.lt.s32.totalorder %v4961_v30, 9216 }
 0x487   : > { %v3934_v41 = vsub.f32 %v2910_v28, %v3422_v29  ;;  %v6494_v47 = vmul.f32 %v5982_v35, %v5982_v35  ;;  %v4453_v50 = vadd.s32 512, %v8683_v3  ;;  %v5984_v51 = vsel %vm5472_vm10, %v3933_v33, 0.0  ;;  %v2918_v30 = vld [vmem:[%s7640_s18 + $0x218] sm:$0xff] }
 0x488   : > { %v6997_v54 = vadd.f32 %v6996_v46, %v6485_v37  ;;  %v3423_v37 = vld [vmem:[%s7645_s21 + $0x1e0] sm:$0xff]  ;;  %v4452_v46 = vadd.s32 504, %v8683_v3  ;;  %vm5474_vm12 = vcmp.lt.s32.totalorder %v4962_v34, 9216  ;;  %v6495_v55 = vmul.f32 %v5983_v43, %v5983_v43 }
 0x489   : > { %v3935_v49 = vsub.f32 %v2911_v36, %v3423_v37  ;;  %v4454_v58 = vadd.s32 520, %v8683_v3  ;;  %v5985_v59 = vsel %vm5473_vm11, %v3934_v41, 0.0  ;;  %vm5475_vm13 = vcmp.lt.s32.totalorder %v4963_v42, 9216 }
 0x48a   : > { %v6998_v62 = vadd.f32 %v6997_v54, %v6486_v45  ;;  %v3424_v45 = vld [vmem:[%s7645_s21 + $0x1e8] sm:$0xff]  ;;  %v4964_v54 = vadd.s32 %v8687_v5, %v4451_v38  ;;  %v6496_v63 = vmul.f32 %v5984_v51, %v5984_v51  ;;  %v4966_v2 = vadd.s32 %v8687_v5, %v4453_v50  ;;  %v2919_v38 = vld [vmem:[%s7640_s18 + $0x220] sm:$0xff] }
 0x48b   : > { %v3936_v57 = vsub.f32 %v2912_v44, %v3424_v45  ;;  %v5986_v4 = vsel %vm5474_vm12, %v3935_v49, 0.0  ;;  %v6497_v9 = vmul.f32 %v5985_v59, %v5985_v59  ;;  %v4967_v12 = vadd.s32 %v8687_v5, %v4454_v58 }
 0x48c   : > { %v6999_v8 = vadd.f32 %v6998_v62, %v6487_v53  ;;  %v3425_v53 = vld [vmem:[%s7645_s21 + $0x1f0] sm:$0xff]  ;;  %v4965_v62 = vadd.s32 %v8687_v5, %v4452_v46  ;;  %vm5476_vm14 = vcmp.lt.s32.totalorder %v4964_v54, 9216  ;;  %v6498_v17 = vmul.f32 %v5986_v4, %v5986_v4  ;;  %v2920_v46 = vld [vmem:[%s7640_s18 + $0x228] sm:$0xff] }
 0x48d   : > { %v3937_v1 = vsub.f32 %v2913_v52, %v3425_v53  ;;  %v5987_v13 = vsel %vm5475_vm13, %v3936_v57, 0.0  ;;  %v4457_v20 = vadd.s32 544, %v8683_v3  ;;  %vm5478_vm0 = vcmp.lt.s32.totalorder %v4966_v2, 9216  ;;  %v2921_v54 = vld [vmem:[%s7640_s18 + $0x230] sm:$0xff] }
 0x48e   : > { %v7000_v16 = vadd.f32 %v6999_v8, %v6488_v61  ;;  %v3426_v61 = vld [vmem:[%s7645_s21 + $0x1f8] sm:$0xff]  ;;  %v4455_v8 = vadd.s32 528, %v8683_v3  ;;  %vm5477_vm15 = vcmp.lt.s32.totalorder %v4965_v62, 9216  ;;  %v6499_v25 = vmul.f32 %v5987_v13, %v5987_v13 }
 0x48f   : > { %v3938_v11 = vsub.f32 %v2914_v60, %v3426_v61  ;;  %v5988_v21 = vsel %vm5476_vm14, %v3937_v1, 0.0  ;;  %v4458_v28 = vadd.s32 552, %v8683_v3  ;;  %vm5479_vm1 = vcmp.lt.s32.totalorder %v4967_v12, 9216  ;;  %v2922_v62 = vld [vmem:[%s7640_s18 + $0x238] sm:$0xff] }
 0x490   : > { %v7001_v24 = vadd.f32 %v7000_v16, %v6489_v7  ;;  %v3427_v7 = vld [vmem:[%s7645_s21 + $0x200] sm:$0xff]  ;;  %v4456_v16 = vadd.s32 536, %v8683_v3  ;;  %v6500_v33 = vmul.f32 %v5988_v21, %v5988_v21  ;;  %v4970_v36 = vadd.s32 %v8687_v5, %v4457_v20 }
 0x491   : > { %v3939_v19 = vsub.f32 %v2915_v6, %v3427_v7  ;;  %v5989_v29 = vsel %vm5477_vm15, %v3938_v11, 0.0  ;;  %v4971_v44 = vadd.s32 %v8687_v5, %v4458_v28  ;;  %v4461_v52 = vadd.s32 576, %v8683_v3 }
 0x492   : > { %v7002_v32 = vadd.f32 %v7001_v24, %v6490_v15  ;;  %v3428_v15 = vld [vmem:[%s7645_s21 + $0x208] sm:$0xff]  ;;  %v4968_v24 = vadd.s32 %v8687_v5, %v4455_v8  ;;  %v6501_v41 = vmul.f32 %v5989_v29, %v5989_v29  ;;  %vm5482_vm4 = vcmp.lt.s32.totalorder %v4970_v36, 9216  ;;  %v2923_v8 = vld [vmem:[%s7640_s18 + $0x240] sm:$0xff] }
 0x493   : > { %v3940_v27 = vsub.f32 %v2916_v14, %v3428_v15  ;;  %v5990_v37 = vsel %vm5478_vm0, %v3939_v19, 0.0  ;;  %v4462_v60 = vadd.s32 584, %v8683_v3  ;;  %vm5483_vm5 = vcmp.lt.s32.totalorder %v4971_v44, 9216 }
 0x494   : > { %v7003_v40 = vadd.f32 %v7002_v32, %v6491_v23  ;;  %v3429_v23 = vld [vmem:[%s7645_s21 + $0x210] sm:$0xff]  ;;  %v4969_v32 = vadd.s32 %v8687_v5, %v4456_v16  ;;  %vm5480_vm2 = vcmp.lt.s32.totalorder %v4968_v24, 9216  ;;  %v6502_v49 = vmul.f32 %v5990_v37, %v5990_v37  ;;  %v2924_v16 = vld [vmem:[%s7640_s18 + $0x248] sm:$0xff] }
 0x495   : > { %v3941_v35 = vsub.f32 %v2917_v22, %v3429_v23  ;;  %v5991_v45 = vsel %vm5479_vm1, %v3940_v27, 0.0  ;;  %v4974_v6 = vadd.s32 %v8687_v5, %v4461_v52  ;;  %v4975_v14 = vadd.s32 %v8687_v5, %v4462_v60  ;;  %v2925_v24 = vld [vmem:[%s7640_s18 + $0x250] sm:$0xff] }
 0x496   : > { %v7004_v48 = vadd.f32 %v7003_v40, %v6492_v31  ;;  %v3430_v31 = vld [vmem:[%s7645_s21 + $0x218] sm:$0xff]  ;;  %v4459_v40 = vadd.s32 560, %v8683_v3  ;;  %vm5481_vm3 = vcmp.lt.s32.totalorder %v4969_v32, 9216  ;;  %v6503_v57 = vmul.f32 %v5991_v45, %v5991_v45 }
 0x497   : > { %v3942_v43 = vsub.f32 %v2918_v30, %v3430_v31  ;;  %v5992_v53 = vsel %vm5480_vm2, %v3941_v35, 0.0  ;;  %v4465_v22 = vadd.s32 608, %v8683_v3  ;;  %vm5486_vm8 = vcmp.lt.s32.totalorder %v4974_v6, 9216  ;;  %v2926_v32 = vld [vmem:[%s7640_s18 + $0x258] sm:$0xff] }
 0x498   : > { %v7005_v56 = vadd.f32 %v7004_v48, %v6493_v39  ;;  %v3431_v39 = vld [vmem:[%s7645_s21 + $0x220] sm:$0xff]  ;;  %v4460_v48 = vadd.s32 568, %v8683_v3  ;;  %v6504_v1 = vmul.f32 %v5992_v53, %v5992_v53  ;;  %v4466_v30 = vadd.s32 616, %v8683_v3 }
 0x499   : > { %v3943_v51 = vsub.f32 %v2919_v38, %v3431_v39  ;;  %v5993_v61 = vsel %vm5481_vm3, %v3942_v43, 0.0  ;;  %vm5487_vm9 = vcmp.lt.s32.totalorder %v4975_v14, 9216  ;;  %v4978_v38 = vadd.s32 %v8687_v5, %v4465_v22 }
 0x49a   : > { %v7006_v0 = vadd.f32 %v7005_v56, %v6494_v47  ;;  %v3432_v47 = vld [vmem:[%s7645_s21 + $0x228] sm:$0xff]  ;;  %v4972_v56 = vadd.s32 %v8687_v5, %v4459_v40  ;;  %v6505_v11 = vmul.f32 %v5993_v61, %v5993_v61  ;;  %v2927_v40 = vld [vmem:[%s7640_s18 + $0x260] sm:$0xff] }
 0x49b   : > { %v3944_v59 = vsub.f32 %v2920_v46, %v3432_v47  ;;  %v5994_v7 = vsel %vm5482_vm4, %v3943_v51, 0.0  ;;  %v4979_v46 = vadd.s32 %v8687_v5, %v4466_v30  ;;  %vm5490_vm12 = vcmp.lt.s32.totalorder %v4978_v38, 9216 }
 0x49c   : > { %v7007_v10 = vadd.f32 %v7006_v0, %v6495_v55  ;;  %v3433_v55 = vld [vmem:[%s7645_s21 + $0x230] sm:$0xff]  ;;  %v4973_v0 = vadd.s32 %v8687_v5, %v4460_v48  ;;  %vm5484_vm6 = vcmp.lt.s32.totalorder %v4972_v56, 9216  ;;  %v6506_v19 = vmul.f32 %v5994_v7, %v5994_v7  ;;  %v2928_v48 = vld [vmem:[%s7640_s18 + $0x268] sm:$0xff] }
 0x49d   : > { %v3945_v4 = vsub.f32 %v2921_v54, %v3433_v55  ;;  %v5995_v15 = vsel %vm5483_vm5, %v3944_v59, 0.0  ;;  %v4469_v54 = vadd.s32 640, %v8683_v3  ;;  %v2929_v56 = vld [vmem:[%s7640_s18 + $0x270] sm:$0xff]  ;;  %vm5491_vm13 = vcmp.lt.s32.totalorder %v4979_v46, 9216 }
 0x49e   : > { %v7008_v18 = vadd.f32 %v7007_v10, %v6496_v63  ;;  %v3434_v63 = vld [vmem:[%s7645_s21 + $0x238] sm:$0xff]  ;;  %v4463_v10 = vadd.s32 592, %v8683_v3  ;;  %vm5485_vm7 = vcmp.lt.s32.totalorder %v4973_v0, 9216  ;;  %v6507_v27 = vmul.f32 %v5995_v15, %v5995_v15 }
 0x49f   : > { %v3946_v13 = vsub.f32 %v2922_v62, %v3434_v63  ;;  %v5996_v23 = vsel %vm5484_vm6, %v3945_v4, 0.0  ;;  %v4470_v62 = vadd.s32 648, %v8683_v3  ;;  %v2930_v0 = vld [vmem:[%s7640_s18 + $0x278] sm:$0xff] }
 0x4a0   : > { %v7009_v26 = vadd.f32 %v7008_v18, %v6497_v9  ;;  %v3435_v9 = vld [vmem:[%s7645_s21 + $0x240] sm:$0xff]  ;;  %v4464_v18 = vadd.s32 600, %v8683_v3  ;;  %v6508_v35 = vmul.f32 %v5996_v23, %v5996_v23 }
 0x4a1   : > { %v3947_v21 = vsub.f32 %v2923_v8, %v3435_v9  ;;  %v5997_v31 = vsel %vm5485_vm7, %v3946_v13, 0.0  ;;  %v4982_v8 = vadd.s32 %v8687_v5, %v4469_v54 }
 0x4a2   : > { %v7010_v34 = vadd.f32 %v7009_v26, %v6498_v17  ;;  %v3436_v17 = vld [vmem:[%s7645_s21 + $0x248] sm:$0xff]  ;;  %v4976_v26 = vadd.s32 %v8687_v5, %v4463_v10  ;;  %v6509_v43 = vmul.f32 %v5997_v31, %v5997_v31  ;;  %v2931_v10 = vld [vmem:[%s7640_s18 + $0x280] sm:$0xff] }
 0x4a3   : > { %v3948_v29 = vsub.f32 %v2924_v16, %v3436_v17  ;;  %v5998_v39 = vsel %vm5486_vm8, %v3947_v21, 0.0  ;;  %v4983_v16 = vadd.s32 %v8687_v5, %v4470_v62  ;;  %vm5494_vm0 = vcmp.lt.s32.totalorder %v4982_v8, 9216 }
 0x4a4   : > { %v7011_v42 = vadd.f32 %v7010_v34, %v6499_v25  ;;  %v3437_v25 = vld [vmem:[%s7645_s21 + $0x250] sm:$0xff]  ;;  %v4977_v34 = vadd.s32 %v8687_v5, %v4464_v18  ;;  %vm5488_vm10 = vcmp.lt.s32.totalorder %v4976_v26, 9216  ;;  %v6510_v51 = vmul.f32 %v5998_v39, %v5998_v39  ;;  %v2932_v18 = vld [vmem:[%s7640_s18 + $0x288] sm:$0xff] }
 0x4a5   : > { %v3949_v37 = vsub.f32 %v2925_v24, %v3437_v25  ;;  %v5999_v47 = vsel %vm5487_vm9, %v3948_v29, 0.0  ;;  %v4473_v24 = vadd.s32 672, %v8683_v3  ;;  %v2933_v26 = vld [vmem:[%s7640_s18 + $0x290] sm:$0xff]  ;;  %vm5495_vm1 = vcmp.lt.s32.totalorder %v4983_v16, 9216 }
 0x4a6   : > { %v7012_v50 = vadd.f32 %v7011_v42, %v6500_v33  ;;  %v3438_v33 = vld [vmem:[%s7645_s21 + $0x258] sm:$0xff]  ;;  %v4467_v42 = vadd.s32 624, %v8683_v3  ;;  %vm5489_vm11 = vcmp.lt.s32.totalorder %v4977_v34, 9216  ;;  %v6511_v59 = vmul.f32 %v5999_v47, %v5999_v47 }
 0x4a7   : > { %v3950_v45 = vsub.f32 %v2926_v32, %v3438_v33  ;;  %v6000_v55 = vsel %vm5488_vm10, %v3949_v37, 0.0  ;;  %v4474_v32 = vadd.s32 680, %v8683_v3  ;;  %v2934_v34 = vld [vmem:[%s7640_s18 + $0x298] sm:$0xff] }
 0x4a8   : > { %v7013_v58 = vadd.f32 %v7012_v50, %v6501_v41  ;;  %v3439_v41 = vld [vmem:[%s7645_s21 + $0x260] sm:$0xff]  ;;  %v4468_v50 = vadd.s32 632, %v8683_v3  ;;  %v6512_v4 = vmul.f32 %v6000_v55, %v6000_v55 }
 0x4a9   : > { %v3951_v53 = vsub.f32 %v2927_v40, %v3439_v41  ;;  %v6001_v63 = vsel %vm5489_vm11, %v3950_v45, 0.0  ;;  %v4986_v40 = vadd.s32 %v8687_v5, %v4473_v24 }
 0x4aa   : > { %v7014_v2 = vadd.f32 %v7013_v58, %v6502_v49  ;;  %v3440_v49 = vld [vmem:[%s7645_s21 + $0x268] sm:$0xff]  ;;  %v4980_v58 = vadd.s32 %v8687_v5, %v4467_v42  ;;  %v6513_v13 = vmul.f32 %v6001_v63, %v6001_v63  ;;  %v2935_v42 = vld [vmem:[%s7640_s18 + $0x2a0] sm:$0xff] }
 0x4ab   : > { %v3952_v61 = vsub.f32 %v2928_v48, %v3440_v49  ;;  %v6002_v9 = vsel %vm5490_vm12, %v3951_v53, 0.0  ;;  %v4987_v48 = vadd.s32 %v8687_v5, %v4474_v32  ;;  %vm5498_vm4 = vcmp.lt.s32.totalorder %v4986_v40, 9216 }
 0x4ac   : > { %v7015_v12 = vadd.f32 %v7014_v2, %v6503_v57  ;;  %v3441_v57 = vld [vmem:[%s7645_s21 + $0x270] sm:$0xff]  ;;  %v4981_v2 = vadd.s32 %v8687_v5, %v4468_v50  ;;  %vm5492_vm14 = vcmp.lt.s32.totalorder %v4980_v58, 9216  ;;  %v6514_v21 = vmul.f32 %v6002_v9, %v6002_v9  ;;  %v2936_v50 = vld [vmem:[%s7640_s18 + $0x2a8] sm:$0xff] }
 0x4ad   : > { %v3953_v7 = vsub.f32 %v2929_v56, %v3441_v57  ;;  %v6003_v17 = vsel %vm5491_vm13, %v3952_v61, 0.0  ;;  %v4477_v56 = vadd.s32 704, %v8683_v3  ;;  %v2937_v58 = vld [vmem:[%s7640_s18 + $0x2b0] sm:$0xff]  ;;  %vm5499_vm5 = vcmp.lt.s32.totalorder %v4987_v48, 9216 }
 0x4ae   : > { %v7016_v20 = vadd.f32 %v7015_v12, %v6504_v1  ;;  %v3442_v1 = vld [vmem:[%s7645_s21 + $0x278] sm:$0xff]  ;;  %v4471_v12 = vadd.s32 656, %v8683_v3  ;;  %vm5493_vm15 = vcmp.lt.s32.totalorder %v4981_v2, 9216  ;;  %v6515_v29 = vmul.f32 %v6003_v17, %v6003_v17 }
 0x4af   : > { %v3954_v15 = vsub.f32 %v2930_v0, %v3442_v1  ;;  %v6004_v25 = vsel %vm5492_vm14, %v3953_v7, 0.0  ;;  %v4478_v0 = vadd.s32 712, %v8683_v3  ;;  %v2938_v2 = vld [vmem:[%s7640_s18 + $0x2b8] sm:$0xff] }
 0x4b0   : > { %v7017_v28 = vadd.f32 %v7016_v20, %v6505_v11  ;;  %v3443_v11 = vld [vmem:[%s7645_s21 + $0x280] sm:$0xff]  ;;  %v4472_v20 = vadd.s32 664, %v8683_v3  ;;  %v6516_v37 = vmul.f32 %v6004_v25, %v6004_v25 }
 0x4b1   : > { %v3955_v23 = vsub.f32 %v2931_v10, %v3443_v11  ;;  %v6005_v33 = vsel %vm5493_vm15, %v3954_v15, 0.0  ;;  %v4479_v10 = vadd.s32 720, %v8683_v3 }
 0x4b2   : > { %v7018_v36 = vadd.f32 %v7017_v28, %v6506_v19  ;;  %v3444_v19 = vld [vmem:[%s7645_s21 + $0x288] sm:$0xff]  ;;  %v4984_v28 = vadd.s32 %v8687_v5, %v4471_v12  ;;  %v6517_v45 = vmul.f32 %v6005_v33, %v6005_v33  ;;  %v2939_v12 = vld [vmem:[%s7640_s18 + $0x2c0] sm:$0xff] }
 0x4b3   : > { %v3956_v31 = vsub.f32 %v2932_v18, %v3444_v19  ;;  %v6006_v41 = vsel %vm5494_vm0, %v3955_v23, 0.0  ;;  %v4480_v18 = vadd.s32 728, %v8683_v3 }
 0x4b4   : > { %v7019_v44 = vadd.f32 %v7018_v36, %v6507_v27  ;;  %v3445_v27 = vld [vmem:[%s7645_s21 + $0x290] sm:$0xff]  ;;  %v4985_v36 = vadd.s32 %v8687_v5, %v4472_v20  ;;  %vm5496_vm2 = vcmp.lt.s32.totalorder %v4984_v28, 9216  ;;  %v6518_v53 = vmul.f32 %v6006_v41, %v6006_v41  ;;  %v2940_v20 = vld [vmem:[%s7640_s18 + $0x2c8] sm:$0xff] }
 0x4b5   : > { %v3957_v39 = vsub.f32 %v2933_v26, %v3445_v27  ;;  %v6007_v49 = vsel %vm5495_vm1, %v3956_v31, 0.0  ;;  %v4481_v26 = vadd.s32 736, %v8683_v3  ;;  %v2941_v28 = vld [vmem:[%s7640_s18 + $0x2d0] sm:$0xff] }
 0x4b6   : > { %v7020_v52 = vadd.f32 %v7019_v44, %v6508_v35  ;;  %v3446_v35 = vld [vmem:[%s7645_s21 + $0x298] sm:$0xff]  ;;  %v4475_v44 = vadd.s32 688, %v8683_v3  ;;  %vm5497_vm3 = vcmp.lt.s32.totalorder %v4985_v36, 9216  ;;  %v6519_v61 = vmul.f32 %v6007_v49, %v6007_v49 }
 0x4b7   : > { %v3958_v47 = vsub.f32 %v2934_v34, %v3446_v35  ;;  %v6008_v57 = vsel %vm5496_vm2, %v3957_v39, 0.0  ;;  %v4482_v34 = vadd.s32 744, %v8683_v3  ;;  %v2942_v36 = vld [vmem:[%s7640_s18 + $0x2d8] sm:$0xff] }
 0x4b8   : > { %v7021_v60 = vadd.f32 %v7020_v52, %v6509_v43  ;;  %v3447_v43 = vld [vmem:[%s7645_s21 + $0x2a0] sm:$0xff]  ;;  %v4476_v52 = vadd.s32 696, %v8683_v3  ;;  %v6520_v7 = vmul.f32 %v6008_v57, %v6008_v57 }
 0x4b9   : > { %v3959_v55 = vsub.f32 %v2935_v42, %v3447_v43  ;;  %v6009_v1 = vsel %vm5497_vm3, %v3958_v47, 0.0  ;;  %v4483_v42 = vadd.s32 752, %v8683_v3 }
 0x4ba   : > { %v7022_v6 = vadd.f32 %v7021_v60, %v6510_v51  ;;  %v3448_v51 = vld [vmem:[%s7645_s21 + $0x2a8] sm:$0xff]  ;;  %v4988_v60 = vadd.s32 %v8687_v5, %v4475_v44  ;;  %v6521_v15 = vmul.f32 %v6009_v1, %v6009_v1  ;;  %v2943_v44 = vld [vmem:[%s7640_s18 + $0x2e0] sm:$0xff] }
 0x4bb   : > { %v3960_v63 = vsub.f32 %v2936_v50, %v3448_v51  ;;  %v6010_v11 = vsel %vm5498_vm4, %v3959_v55, 0.0  ;;  %v4484_v50 = vadd.s32 760, %v8683_v3 }
 0x4bc   : > { %v7023_v14 = vadd.f32 %v7022_v6, %v6511_v59  ;;  %v3449_v59 = vld [vmem:[%s7645_s21 + $0x2b0] sm:$0xff]  ;;  %v4989_v6 = vadd.s32 %v8687_v5, %v4476_v52  ;;  %vm5500_vm6 = vcmp.lt.s32.totalorder %v4988_v60, 9216  ;;  %v6522_v23 = vmul.f32 %v6010_v11, %v6010_v11  ;;  %v2944_v52 = vld [vmem:[%s7640_s18 + $0x2e8] sm:$0xff] }
 0x4bd   : > { %v3961_v9 = vsub.f32 %v2937_v58, %v3449_v59  ;;  %v6011_v19 = vsel %vm5499_vm5, %v3960_v63, 0.0  ;;  %v4485_v58 = vadd.s32 768, %v8683_v3  ;;  %v2945_v60 = vld [vmem:[%s7640_s18 + $0x2f0] sm:$0xff] }
 0x4be   : > { %v7024_v22 = vadd.f32 %v7023_v14, %v6512_v4  ;;  %v3450_v4 = vld [vmem:[%s7645_s21 + $0x2b8] sm:$0xff]  ;;  %v4990_v14 = vadd.s32 %v8687_v5, %v4477_v56  ;;  %vm5501_vm7 = vcmp.lt.s32.totalorder %v4989_v6, 9216  ;;  %v6523_v31 = vmul.f32 %v6011_v19, %v6011_v19 }
 0x4bf   : > { %v3962_v17 = vsub.f32 %v2938_v2, %v3450_v4  ;;  %v6012_v27 = vsel %vm5500_vm6, %v3961_v9, 0.0  ;;  %v4486_v2 = vadd.s32 776, %v8683_v3  ;;  %v2946_v6 = vld [vmem:[%s7640_s18 + $0x2f8] sm:$0xff] }
 0x4c0   : > { %v7025_v30 = vadd.f32 %v7024_v22, %v6513_v13  ;;  %v3451_v13 = vld [vmem:[%s7645_s21 + $0x2c0] sm:$0xff]  ;;  %v4991_v22 = vadd.s32 %v8687_v5, %v4478_v0  ;;  %vm5502_vm8 = vcmp.lt.s32.totalorder %v4990_v14, 9216  ;;  %v6524_v39 = vmul.f32 %v6012_v27, %v6012_v27 }
 0x4c1   : > { %v3963_v25 = vsub.f32 %v2939_v12, %v3451_v13  ;;  %v6013_v35 = vsel %vm5501_vm7, %v3962_v17, 0.0  ;;  %v4487_v12 = vadd.s32 784, %v8683_v3  ;;  %v2947_v14 = vld [vmem:[%s7640_s18 + $0x300] sm:$0xff] }
 0x4c2   : > { %v7026_v38 = vadd.f32 %v7025_v30, %v6514_v21  ;;  %v3452_v21 = vld [vmem:[%s7645_s21 + $0x2c8] sm:$0xff]  ;;  %v4992_v30 = vadd.s32 %v8687_v5, %v4479_v10  ;;  %vm5503_vm9 = vcmp.lt.s32.totalorder %v4991_v22, 9216  ;;  %v6525_v47 = vmul.f32 %v6013_v35, %v6013_v35 }
 0x4c3   : > { %v3964_v33 = vsub.f32 %v2940_v20, %v3452_v21  ;;  %v6014_v43 = vsel %vm5502_vm8, %v3963_v25, 0.0  ;;  %v4488_v20 = vadd.s32 792, %v8683_v3  ;;  %v2948_v22 = vld [vmem:[%s7640_s18 + $0x308] sm:$0xff] }
 0x4c4   : > { %v7027_v46 = vadd.f32 %v7026_v38, %v6515_v29  ;;  %v3453_v29 = vld [vmem:[%s7645_s21 + $0x2d0] sm:$0xff]  ;;  %v4993_v38 = vadd.s32 %v8687_v5, %v4480_v18  ;;  %vm5504_vm10 = vcmp.lt.s32.totalorder %v4992_v30, 9216  ;;  %v6526_v55 = vmul.f32 %v6014_v43, %v6014_v43 }
 0x4c5   : > { %v3965_v41 = vsub.f32 %v2941_v28, %v3453_v29  ;;  %v6015_v51 = vsel %vm5503_vm9, %v3964_v33, 0.0  ;;  %v4489_v28 = vadd.s32 800, %v8683_v3  ;;  %v2949_v30 = vld [vmem:[%s7640_s18 + $0x310] sm:$0xff] }
 0x4c6   : > { %v7028_v54 = vadd.f32 %v7027_v46, %v6516_v37  ;;  %v3454_v37 = vld [vmem:[%s7645_s21 + $0x2d8] sm:$0xff]  ;;  %v4994_v46 = vadd.s32 %v8687_v5, %v4481_v26  ;;  %vm5505_vm11 = vcmp.lt.s32.totalorder %v4993_v38, 9216  ;;  %v6527_v63 = vmul.f32 %v6015_v51, %v6015_v51 }
 0x4c7   : > { %v3966_v49 = vsub.f32 %v2942_v36, %v3454_v37  ;;  %v6016_v59 = vsel %vm5504_vm10, %v3965_v41, 0.0  ;;  %v4490_v36 = vadd.s32 808, %v8683_v3  ;;  %v2950_v38 = vld [vmem:[%s7640_s18 + $0x318] sm:$0xff] }
 0x4c8   : > { %v7029_v62 = vadd.f32 %v7028_v54, %v6517_v45  ;;  %v3455_v45 = vld [vmem:[%s7645_s21 + $0x2e0] sm:$0xff]  ;;  %v4995_v54 = vadd.s32 %v8687_v5, %v4482_v34  ;;  %vm5506_vm12 = vcmp.lt.s32.totalorder %v4994_v46, 9216  ;;  %v6528_v9 = vmul.f32 %v6016_v59, %v6016_v59 }
 0x4c9   : > { %v3967_v57 = vsub.f32 %v2943_v44, %v3455_v45  ;;  %v6017_v4 = vsel %vm5505_vm11, %v3966_v49, 0.0  ;;  %v4491_v44 = vadd.s32 816, %v8683_v3  ;;  %v2951_v46 = vld [vmem:[%s7640_s18 + $0x320] sm:$0xff] }
 0x4ca   : > { %v7030_v8 = vadd.f32 %v7029_v62, %v6518_v53  ;;  %v3456_v53 = vld [vmem:[%s7645_s21 + $0x2e8] sm:$0xff]  ;;  %v4996_v62 = vadd.s32 %v8687_v5, %v4483_v42  ;;  %vm5507_vm13 = vcmp.lt.s32.totalorder %v4995_v54, 9216  ;;  %v6529_v17 = vmul.f32 %v6017_v4, %v6017_v4 }
 0x4cb   : > { %v3968_v1 = vsub.f32 %v2944_v52, %v3456_v53  ;;  %v6018_v13 = vsel %vm5506_vm12, %v3967_v57, 0.0  ;;  %v4492_v52 = vadd.s32 824, %v8683_v3  ;;  %v2952_v54 = vld [vmem:[%s7640_s18 + $0x328] sm:$0xff] }
 0x4cc   : > { %v7031_v16 = vadd.f32 %v7030_v8, %v6519_v61  ;;  %v3457_v61 = vld [vmem:[%s7645_s21 + $0x2f0] sm:$0xff]  ;;  %v4997_v8 = vadd.s32 %v8687_v5, %v4484_v50  ;;  %vm5508_vm14 = vcmp.lt.s32.totalorder %v4996_v62, 9216  ;;  %v6530_v25 = vmul.f32 %v6018_v13, %v6018_v13 }
 0x4cd   : > { %v3969_v11 = vsub.f32 %v2945_v60, %v3457_v61  ;;  %v6019_v21 = vsel %vm5507_vm13, %v3968_v1, 0.0  ;;  %v4493_v60 = vadd.s32 832, %v8683_v3  ;;  %v2953_v62 = vld [vmem:[%s7640_s18 + $0x330] sm:$0xff] }
 0x4ce   : > { %v7032_v24 = vadd.f32 %v7031_v16, %v6520_v7  ;;  %v3458_v7 = vld [vmem:[%s7645_s21 + $0x2f8] sm:$0xff]  ;;  %v4998_v16 = vadd.s32 %v8687_v5, %v4485_v58  ;;  %vm5509_vm15 = vcmp.lt.s32.totalorder %v4997_v8, 9216  ;;  %v6531_v33 = vmul.f32 %v6019_v21, %v6019_v21 }
 0x4cf   : > { %v3970_v19 = vsub.f32 %v2946_v6, %v3458_v7  ;;  %v6020_v29 = vsel %vm5508_vm14, %v3969_v11, 0.0  ;;  %v4494_v6 = vadd.s32 840, %v8683_v3  ;;  %v2954_v8 = vld [vmem:[%s7640_s18 + $0x338] sm:$0xff] }
 0x4d0   : > { %v7033_v32 = vadd.f32 %v7032_v24, %v6521_v15  ;;  %v3459_v15 = vld [vmem:[%s7645_s21 + $0x300] sm:$0xff]  ;;  %v4999_v24 = vadd.s32 %v8687_v5, %v4486_v2  ;;  %vm5510_vm0 = vcmp.lt.s32.totalorder %v4998_v16, 9216  ;;  %v6532_v41 = vmul.f32 %v6020_v29, %v6020_v29 }
 0x4d1   : > { %v3971_v27 = vsub.f32 %v2947_v14, %v3459_v15  ;;  %v6021_v37 = vsel %vm5509_vm15, %v3970_v19, 0.0  ;;  %v4495_v14 = vadd.s32 848, %v8683_v3  ;;  %v2955_v16 = vld [vmem:[%s7640_s18 + $0x340] sm:$0xff] }
 0x4d2   : > { %v7034_v40 = vadd.f32 %v7033_v32, %v6522_v23  ;;  %v3460_v23 = vld [vmem:[%s7645_s21 + $0x308] sm:$0xff]  ;;  %v5000_v32 = vadd.s32 %v8687_v5, %v4487_v12  ;;  %vm5511_vm1 = vcmp.lt.s32.totalorder %v4999_v24, 9216  ;;  %v6533_v49 = vmul.f32 %v6021_v37, %v6021_v37 }
 0x4d3   : > { %v3972_v35 = vsub.f32 %v2948_v22, %v3460_v23  ;;  %v6022_v45 = vsel %vm5510_vm0, %v3971_v27, 0.0  ;;  %v4496_v22 = vadd.s32 856, %v8683_v3  ;;  %v2956_v24 = vld [vmem:[%s7640_s18 + $0x348] sm:$0xff] }
 0x4d4   : > { %v7035_v48 = vadd.f32 %v7034_v40, %v6523_v31  ;;  %v3461_v31 = vld [vmem:[%s7645_s21 + $0x310] sm:$0xff]  ;;  %v5001_v40 = vadd.s32 %v8687_v5, %v4488_v20  ;;  %vm5512_vm2 = vcmp.lt.s32.totalorder %v5000_v32, 9216  ;;  %v6534_v57 = vmul.f32 %v6022_v45, %v6022_v45 }
 0x4d5   : > { %v3973_v43 = vsub.f32 %v2949_v30, %v3461_v31  ;;  %v6023_v53 = vsel %vm5511_vm1, %v3972_v35, 0.0  ;;  %v4497_v30 = vadd.s32 864, %v8683_v3  ;;  %v2957_v32 = vld [vmem:[%s7640_s18 + $0x350] sm:$0xff] }
 0x4d6   : > { %v7036_v56 = vadd.f32 %v7035_v48, %v6524_v39  ;;  %v3462_v39 = vld [vmem:[%s7645_s21 + $0x318] sm:$0xff]  ;;  %v5002_v48 = vadd.s32 %v8687_v5, %v4489_v28  ;;  %vm5513_vm3 = vcmp.lt.s32.totalorder %v5001_v40, 9216  ;;  %v6535_v1 = vmul.f32 %v6023_v53, %v6023_v53 }
 0x4d7   : > { %v3974_v51 = vsub.f32 %v2950_v38, %v3462_v39  ;;  %v6024_v61 = vsel %vm5512_vm2, %v3973_v43, 0.0  ;;  %v4498_v38 = vadd.s32 872, %v8683_v3  ;;  %v2958_v40 = vld [vmem:[%s7640_s18 + $0x358] sm:$0xff] }
 0x4d8   : > { %v7037_v0 = vadd.f32 %v7036_v56, %v6525_v47  ;;  %v3463_v47 = vld [vmem:[%s7645_s21 + $0x320] sm:$0xff]  ;;  %v5003_v56 = vadd.s32 %v8687_v5, %v4490_v36  ;;  %vm5514_vm4 = vcmp.lt.s32.totalorder %v5002_v48, 9216  ;;  %v6536_v11 = vmul.f32 %v6024_v61, %v6024_v61 }
 0x4d9   : > { %v3975_v59 = vsub.f32 %v2951_v46, %v3463_v47  ;;  %v6025_v7 = vsel %vm5513_vm3, %v3974_v51, 0.0  ;;  %v4499_v46 = vadd.s32 880, %v8683_v3  ;;  %v2959_v48 = vld [vmem:[%s7640_s18 + $0x360] sm:$0xff] }
 0x4da   : > { %v7038_v10 = vadd.f32 %v7037_v0, %v6526_v55  ;;  %v3464_v55 = vld [vmem:[%s7645_s21 + $0x328] sm:$0xff]  ;;  %v5004_v0 = vadd.s32 %v8687_v5, %v4491_v44  ;;  %vm5515_vm5 = vcmp.lt.s32.totalorder %v5003_v56, 9216  ;;  %v6537_v19 = vmul.f32 %v6025_v7, %v6025_v7 }
 0x4db   : > { %v3976_v4 = vsub.f32 %v2952_v54, %v3464_v55  ;;  %v6026_v15 = vsel %vm5514_vm4, %v3975_v59, 0.0  ;;  %v4500_v54 = vadd.s32 888, %v8683_v3  ;;  %v2960_v56 = vld [vmem:[%s7640_s18 + $0x368] sm:$0xff] }
 0x4dc   : > { %v7039_v18 = vadd.f32 %v7038_v10, %v6527_v63  ;;  %v3465_v63 = vld [vmem:[%s7645_s21 + $0x330] sm:$0xff]  ;;  %v5005_v10 = vadd.s32 %v8687_v5, %v4492_v52  ;;  %vm5516_vm6 = vcmp.lt.s32.totalorder %v5004_v0, 9216  ;;  %v6538_v27 = vmul.f32 %v6026_v15, %v6026_v15 }
 0x4dd   : > { %v3977_v13 = vsub.f32 %v2953_v62, %v3465_v63  ;;  %v6027_v23 = vsel %vm5515_vm5, %v3976_v4, 0.0  ;;  %v4501_v62 = vadd.s32 896, %v8683_v3  ;;  %v2961_v0 = vld [vmem:[%s7640_s18 + $0x370] sm:$0xff] }
 0x4de   : > { %v7040_v26 = vadd.f32 %v7039_v18, %v6528_v9  ;;  %v3466_v9 = vld [vmem:[%s7645_s21 + $0x338] sm:$0xff]  ;;  %v5006_v18 = vadd.s32 %v8687_v5, %v4493_v60  ;;  %vm5517_vm7 = vcmp.lt.s32.totalorder %v5005_v10, 9216  ;;  %v6539_v35 = vmul.f32 %v6027_v23, %v6027_v23 }
 0x4df   : > { %v3978_v21 = vsub.f32 %v2954_v8, %v3466_v9  ;;  %v6028_v31 = vsel %vm5516_vm6, %v3977_v13, 0.0  ;;  %v4502_v8 = vadd.s32 904, %v8683_v3  ;;  %v2962_v10 = vld [vmem:[%s7640_s18 + $0x378] sm:$0xff] }
 0x4e0   : > { %v7041_v34 = vadd.f32 %v7040_v26, %v6529_v17  ;;  %v3467_v17 = vld [vmem:[%s7645_s21 + $0x340] sm:$0xff]  ;;  %v5007_v26 = vadd.s32 %v8687_v5, %v4494_v6  ;;  %vm5518_vm8 = vcmp.lt.s32.totalorder %v5006_v18, 9216  ;;  %v6540_v43 = vmul.f32 %v6028_v31, %v6028_v31 }
 0x4e1   : > { %v3979_v29 = vsub.f32 %v2955_v16, %v3467_v17  ;;  %v6029_v39 = vsel %vm5517_vm7, %v3978_v21, 0.0  ;;  %v4503_v16 = vadd.s32 912, %v8683_v3  ;;  %v2963_v18 = vld [vmem:[%s7640_s18 + $0x380] sm:$0xff] }
 0x4e2   : > { %v7042_v42 = vadd.f32 %v7041_v34, %v6530_v25  ;;  %v3468_v25 = vld [vmem:[%s7645_s21 + $0x348] sm:$0xff]  ;;  %v5008_v34 = vadd.s32 %v8687_v5, %v4495_v14  ;;  %vm5519_vm9 = vcmp.lt.s32.totalorder %v5007_v26, 9216  ;;  %v6541_v51 = vmul.f32 %v6029_v39, %v6029_v39 }
 0x4e3   : > { %v3980_v37 = vsub.f32 %v2956_v24, %v3468_v25  ;;  %v6030_v47 = vsel %vm5518_vm8, %v3979_v29, 0.0  ;;  %v4504_v24 = vadd.s32 920, %v8683_v3  ;;  %v2964_v26 = vld [vmem:[%s7640_s18 + $0x388] sm:$0xff] }
 0x4e4   : > { %v7043_v50 = vadd.f32 %v7042_v42, %v6531_v33  ;;  %v3469_v33 = vld [vmem:[%s7645_s21 + $0x350] sm:$0xff]  ;;  %v5009_v42 = vadd.s32 %v8687_v5, %v4496_v22  ;;  %vm5520_vm10 = vcmp.lt.s32.totalorder %v5008_v34, 9216  ;;  %v6542_v59 = vmul.f32 %v6030_v47, %v6030_v47 }
 0x4e5   : > { %v3981_v45 = vsub.f32 %v2957_v32, %v3469_v33  ;;  %v6031_v55 = vsel %vm5519_vm9, %v3980_v37, 0.0  ;;  %v4505_v32 = vadd.s32 928, %v8683_v3  ;;  %v2965_v34 = vld [vmem:[%s7640_s18 + $0x390] sm:$0xff] }
 0x4e6   : > { %v7044_v58 = vadd.f32 %v7043_v50, %v6532_v41  ;;  %v3470_v41 = vld [vmem:[%s7645_s21 + $0x358] sm:$0xff]  ;;  %v5010_v50 = vadd.s32 %v8687_v5, %v4497_v30  ;;  %vm5521_vm11 = vcmp.lt.s32.totalorder %v5009_v42, 9216  ;;  %v6543_v4 = vmul.f32 %v6031_v55, %v6031_v55 }
 0x4e7   : > { %v3982_v53 = vsub.f32 %v2958_v40, %v3470_v41  ;;  %v6032_v63 = vsel %vm5520_vm10, %v3981_v45, 0.0  ;;  %v4506_v40 = vadd.s32 936, %v8683_v3  ;;  %v2966_v42 = vld [vmem:[%s7640_s18 + $0x398] sm:$0xff] }
 0x4e8   : > { %v7045_v2 = vadd.f32 %v7044_v58, %v6533_v49  ;;  %v3471_v49 = vld [vmem:[%s7645_s21 + $0x360] sm:$0xff]  ;;  %v5011_v58 = vadd.s32 %v8687_v5, %v4498_v38  ;;  %vm5522_vm12 = vcmp.lt.s32.totalorder %v5010_v50, 9216  ;;  %v6544_v13 = vmul.f32 %v6032_v63, %v6032_v63 }
 0x4e9   : > { %v3983_v61 = vsub.f32 %v2959_v48, %v3471_v49  ;;  %v6033_v9 = vsel %vm5521_vm11, %v3982_v53, 0.0  ;;  %v4507_v48 = vadd.s32 944, %v8683_v3  ;;  %v2967_v50 = vld [vmem:[%s7640_s18 + $0x3a0] sm:$0xff] }
 0x4ea   : > { %v7046_v12 = vadd.f32 %v7045_v2, %v6534_v57  ;;  %v3472_v57 = vld [vmem:[%s7645_s21 + $0x368] sm:$0xff]  ;;  %v5012_v2 = vadd.s32 %v8687_v5, %v4499_v46  ;;  %vm5523_vm13 = vcmp.lt.s32.totalorder %v5011_v58, 9216  ;;  %v6545_v21 = vmul.f32 %v6033_v9, %v6033_v9 }
 0x4eb   : > { %v3984_v7 = vsub.f32 %v2960_v56, %v3472_v57  ;;  %v6034_v17 = vsel %vm5522_vm12, %v3983_v61, 0.0  ;;  %v4508_v56 = vadd.s32 952, %v8683_v3  ;;  %v2968_v58 = vld [vmem:[%s7640_s18 + $0x3a8] sm:$0xff] }
 0x4ec   : > { %v7047_v20 = vadd.f32 %v7046_v12, %v6535_v1  ;;  %v3473_v1 = vld [vmem:[%s7645_s21 + $0x370] sm:$0xff]  ;;  %v5013_v12 = vadd.s32 %v8687_v5, %v4500_v54  ;;  %vm5524_vm14 = vcmp.lt.s32.totalorder %v5012_v2, 9216  ;;  %v6546_v29 = vmul.f32 %v6034_v17, %v6034_v17 }
 0x4ed   : > { %v3985_v15 = vsub.f32 %v2961_v0, %v3473_v1  ;;  %v6035_v25 = vsel %vm5523_vm13, %v3984_v7, 0.0  ;;  %v4509_v0 = vadd.s32 960, %v8683_v3  ;;  %v2969_v2 = vld [vmem:[%s7640_s18 + $0x3b0] sm:$0xff] }
 0x4ee   : > { %v7048_v28 = vadd.f32 %v7047_v20, %v6536_v11  ;;  %v3474_v11 = vld [vmem:[%s7645_s21 + $0x378] sm:$0xff]  ;;  %v5014_v20 = vadd.s32 %v8687_v5, %v4501_v62  ;;  %vm5525_vm15 = vcmp.lt.s32.totalorder %v5013_v12, 9216  ;;  %v6547_v37 = vmul.f32 %v6035_v25, %v6035_v25 }
 0x4ef   : > { %v3986_v23 = vsub.f32 %v2962_v10, %v3474_v11  ;;  %v6036_v33 = vsel %vm5524_vm14, %v3985_v15, 0.0  ;;  %v4510_v10 = vadd.s32 968, %v8683_v3  ;;  %v2970_v12 = vld [vmem:[%s7640_s18 + $0x3b8] sm:$0xff] }
 0x4f0   : > { %v7049_v36 = vadd.f32 %v7048_v28, %v6537_v19  ;;  %v3475_v19 = vld [vmem:[%s7645_s21 + $0x380] sm:$0xff]  ;;  %v5015_v28 = vadd.s32 %v8687_v5, %v4502_v8  ;;  %vm5526_vm0 = vcmp.lt.s32.totalorder %v5014_v20, 9216  ;;  %v6548_v45 = vmul.f32 %v6036_v33, %v6036_v33 }
 0x4f1   : > { %v3987_v31 = vsub.f32 %v2963_v18, %v3475_v19  ;;  %v6037_v41 = vsel %vm5525_vm15, %v3986_v23, 0.0  ;;  %v4511_v18 = vadd.s32 976, %v8683_v3  ;;  %v2971_v20 = vld [vmem:[%s7640_s18 + $0x3c0] sm:$0xff] }
 0x4f2   : > { %v7050_v44 = vadd.f32 %v7049_v36, %v6538_v27  ;;  %v3476_v27 = vld [vmem:[%s7645_s21 + $0x388] sm:$0xff]  ;;  %v5016_v36 = vadd.s32 %v8687_v5, %v4503_v16  ;;  %vm5527_vm1 = vcmp.lt.s32.totalorder %v5015_v28, 9216  ;;  %v6549_v53 = vmul.f32 %v6037_v41, %v6037_v41 }
 0x4f3   : > { %v3988_v39 = vsub.f32 %v2964_v26, %v3476_v27  ;;  %v6038_v49 = vsel %vm5526_vm0, %v3987_v31, 0.0  ;;  %v4512_v26 = vadd.s32 984, %v8683_v3  ;;  %v2972_v28 = vld [vmem:[%s7640_s18 + $0x3c8] sm:$0xff] }
 0x4f4   : > { %v7051_v52 = vadd.f32 %v7050_v44, %v6539_v35  ;;  %v3477_v35 = vld [vmem:[%s7645_s21 + $0x390] sm:$0xff]  ;;  %v5017_v44 = vadd.s32 %v8687_v5, %v4504_v24  ;;  %vm5528_vm2 = vcmp.lt.s32.totalorder %v5016_v36, 9216  ;;  %v6550_v61 = vmul.f32 %v6038_v49, %v6038_v49 }
 0x4f5   : > { %v3989_v47 = vsub.f32 %v2965_v34, %v3477_v35  ;;  %v6039_v57 = vsel %vm5527_vm1, %v3988_v39, 0.0  ;;  %v4513_v34 = vadd.s32 992, %v8683_v3  ;;  %v2973_v36 = vld [vmem:[%s7640_s18 + $0x3d0] sm:$0xff] }
 0x4f6   : > { %v7052_v60 = vadd.f32 %v7051_v52, %v6540_v43  ;;  %v3478_v43 = vld [vmem:[%s7645_s21 + $0x398] sm:$0xff]  ;;  %v5018_v52 = vadd.s32 %v8687_v5, %v4505_v32  ;;  %vm5529_vm3 = vcmp.lt.s32.totalorder %v5017_v44, 9216  ;;  %v6551_v7 = vmul.f32 %v6039_v57, %v6039_v57 }
 0x4f7   : > { %v3990_v55 = vsub.f32 %v2966_v42, %v3478_v43  ;;  %v6040_v1 = vsel %vm5528_vm2, %v3989_v47, 0.0  ;;  %v4514_v42 = vadd.s32 1000, %v8683_v3  ;;  %v2974_v44 = vld [vmem:[%s7640_s18 + $0x3d8] sm:$0xff] }
 0x4f8   : > { %v7053_v6 = vadd.f32 %v7052_v60, %v6541_v51  ;;  %v3479_v51 = vld [vmem:[%s7645_s21 + $0x3a0] sm:$0xff]  ;;  %v5019_v60 = vadd.s32 %v8687_v5, %v4506_v40  ;;  %vm5530_vm4 = vcmp.lt.s32.totalorder %v5018_v52, 9216  ;;  %v6552_v15 = vmul.f32 %v6040_v1, %v6040_v1 }
 0x4f9   : > { %v3991_v63 = vsub.f32 %v2967_v50, %v3479_v51  ;;  %v6041_v11 = vsel %vm5529_vm3, %v3990_v55, 0.0  ;;  %v4515_v50 = vadd.s32 1008, %v8683_v3  ;;  %v2975_v52 = vld [vmem:[%s7640_s18 + $0x3e0] sm:$0xff] }
 0x4fa   : > { %v7054_v14 = vadd.f32 %v7053_v6, %v6542_v59  ;;  %v3480_v59 = vld [vmem:[%s7645_s21 + $0x3a8] sm:$0xff]  ;;  %v5020_v6 = vadd.s32 %v8687_v5, %v4507_v48  ;;  %vm5531_vm5 = vcmp.lt.s32.totalorder %v5019_v60, 9216  ;;  %v6553_v23 = vmul.f32 %v6041_v11, %v6041_v11 }
 0x4fb   : > { %v3992_v9 = vsub.f32 %v2968_v58, %v3480_v59  ;;  %v6042_v19 = vsel %vm5530_vm4, %v3991_v63, 0.0  ;;  %v4516_v58 = vadd.s32 1016, %v8683_v3  ;;  %v2976_v60 = vld [vmem:[%s7640_s18 + $0x3e8] sm:$0xff] }
 0x4fc   : > { %v7055_v22 = vadd.f32 %v7054_v14, %v6543_v4  ;;  %v3481_v4 = vld [vmem:[%s7645_s21 + $0x3b0] sm:$0xff]  ;;  %v5021_v14 = vadd.s32 %v8687_v5, %v4508_v56  ;;  %vm5532_vm6 = vcmp.lt.s32.totalorder %v5020_v6, 9216  ;;  %v6554_v31 = vmul.f32 %v6042_v19, %v6042_v19 }
 0x4fd   : > { %v3993_v17 = vsub.f32 %v2969_v2, %v3481_v4  ;;  %v6043_v27 = vsel %vm5531_vm5, %v3992_v9, 0.0  ;;  %v4517_v2 = vadd.s32 1024, %v8683_v3  ;;  %v2977_v6 = vld [vmem:[%s7640_s18 + $0x3f0] sm:$0xff] }
 0x4fe   : > { %v7056_v30 = vadd.f32 %v7055_v22, %v6544_v13  ;;  %v3482_v13 = vld [vmem:[%s7645_s21 + $0x3b8] sm:$0xff]  ;;  %v5022_v22 = vadd.s32 %v8687_v5, %v4509_v0  ;;  %vm5533_vm7 = vcmp.lt.s32.totalorder %v5021_v14, 9216  ;;  %v6555_v39 = vmul.f32 %v6043_v27, %v6043_v27 }
 0x4ff   : > { %v3994_v25 = vsub.f32 %v2970_v12, %v3482_v13  ;;  %v6044_v35 = vsel %vm5532_vm6, %v3993_v17, 0.0  ;;  %v4518_v12 = vadd.s32 1032, %v8683_v3  ;;  %v2978_v14 = vld [vmem:[%s7640_s18 + $0x3f8] sm:$0xff] }
 0x500   : > { %v7057_v38 = vadd.f32 %v7056_v30, %v6545_v21  ;;  %v3483_v21 = vld [vmem:[%s7645_s21 + $0x3c0] sm:$0xff]  ;;  %v5023_v30 = vadd.s32 %v8687_v5, %v4510_v10  ;;  %vm5534_vm8 = vcmp.lt.s32.totalorder %v5022_v22, 9216  ;;  %v6556_v47 = vmul.f32 %v6044_v35, %v6044_v35 }
 0x501   : > { %v3995_v33 = vsub.f32 %v2971_v20, %v3483_v21  ;;  %v6045_v43 = vsel %vm5533_vm7, %v3994_v25, 0.0  ;;  %v4519_v20 = vadd.s32 1040, %v8683_v3  ;;  %v2979_v22 = vld [vmem:[%s7640_s18 + $0x400] sm:$0xff] }
 0x502   : > { %v7058_v46 = vadd.f32 %v7057_v38, %v6546_v29  ;;  %v3484_v29 = vld [vmem:[%s7645_s21 + $0x3c8] sm:$0xff]  ;;  %v5024_v38 = vadd.s32 %v8687_v5, %v4511_v18  ;;  %vm5535_vm9 = vcmp.lt.s32.totalorder %v5023_v30, 9216  ;;  %v6557_v55 = vmul.f32 %v6045_v43, %v6045_v43 }
 0x503   : > { %v3996_v41 = vsub.f32 %v2972_v28, %v3484_v29  ;;  %v6046_v51 = vsel %vm5534_vm8, %v3995_v33, 0.0  ;;  %v4520_v28 = vadd.s32 1048, %v8683_v3  ;;  %v2980_v30 = vld [vmem:[%s7640_s18 + $0x408] sm:$0xff] }
 0x504   : > { %v7059_v54 = vadd.f32 %v7058_v46, %v6547_v37  ;;  %v3485_v37 = vld [vmem:[%s7645_s21 + $0x3d0] sm:$0xff]  ;;  %v5025_v46 = vadd.s32 %v8687_v5, %v4512_v26  ;;  %vm5536_vm10 = vcmp.lt.s32.totalorder %v5024_v38, 9216  ;;  %v6558_v63 = vmul.f32 %v6046_v51, %v6046_v51 }
 0x505   : > { %v3997_v49 = vsub.f32 %v2973_v36, %v3485_v37  ;;  %v6047_v59 = vsel %vm5535_vm9, %v3996_v41, 0.0  ;;  %v4521_v36 = vadd.s32 1056, %v8683_v3  ;;  %v2981_v38 = vld [vmem:[%s7640_s18 + $0x410] sm:$0xff] }
 0x506   : > { %v7060_v62 = vadd.f32 %v7059_v54, %v6548_v45  ;;  %v3486_v45 = vld [vmem:[%s7645_s21 + $0x3d8] sm:$0xff]  ;;  %v5026_v54 = vadd.s32 %v8687_v5, %v4513_v34  ;;  %vm5537_vm11 = vcmp.lt.s32.totalorder %v5025_v46, 9216  ;;  %v6559_v9 = vmul.f32 %v6047_v59, %v6047_v59 }
 0x507   : > { %v3998_v57 = vsub.f32 %v2974_v44, %v3486_v45  ;;  %v6048_v4 = vsel %vm5536_vm10, %v3997_v49, 0.0  ;;  %v4522_v44 = vadd.s32 1064, %v8683_v3  ;;  %v2982_v46 = vld [vmem:[%s7640_s18 + $0x418] sm:$0xff] }
 0x508   : > { %v7061_v8 = vadd.f32 %v7060_v62, %v6549_v53  ;;  %v3487_v53 = vld [vmem:[%s7645_s21 + $0x3e0] sm:$0xff]  ;;  %v5027_v62 = vadd.s32 %v8687_v5, %v4514_v42  ;;  %vm5538_vm12 = vcmp.lt.s32.totalorder %v5026_v54, 9216  ;;  %v6560_v17 = vmul.f32 %v6048_v4, %v6048_v4 }
 0x509   : > { %v3999_v1 = vsub.f32 %v2975_v52, %v3487_v53  ;;  %v6049_v13 = vsel %vm5537_vm11, %v3998_v57, 0.0  ;;  %v4523_v52 = vadd.s32 1072, %v8683_v3  ;;  %v2983_v54 = vld [vmem:[%s7640_s18 + $0x420] sm:$0xff] }
 0x50a   : > { %v7062_v16 = vadd.f32 %v7061_v8, %v6550_v61  ;;  %v3488_v61 = vld [vmem:[%s7645_s21 + $0x3e8] sm:$0xff]  ;;  %v5028_v8 = vadd.s32 %v8687_v5, %v4515_v50  ;;  %vm5539_vm13 = vcmp.lt.s32.totalorder %v5027_v62, 9216  ;;  %v6561_v25 = vmul.f32 %v6049_v13, %v6049_v13 }
 0x50b   : > { %v4000_v11 = vsub.f32 %v2976_v60, %v3488_v61  ;;  %v6050_v21 = vsel %vm5538_vm12, %v3999_v1, 0.0  ;;  %v4524_v60 = vadd.s32 1080, %v8683_v3  ;;  %v2984_v62 = vld [vmem:[%s7640_s18 + $0x428] sm:$0xff] }
 0x50c   : > { %v7063_v24 = vadd.f32 %v7062_v16, %v6551_v7  ;;  %v3489_v7 = vld [vmem:[%s7645_s21 + $0x3f0] sm:$0xff]  ;;  %v5029_v16 = vadd.s32 %v8687_v5, %v4516_v58  ;;  %vm5540_vm14 = vcmp.lt.s32.totalorder %v5028_v8, 9216  ;;  %v6562_v33 = vmul.f32 %v6050_v21, %v6050_v21 }
 0x50d   : > { %v4001_v19 = vsub.f32 %v2977_v6, %v3489_v7  ;;  %v6051_v29 = vsel %vm5539_vm13, %v4000_v11, 0.0  ;;  %v4525_v6 = vadd.s32 1088, %v8683_v3  ;;  %v2985_v8 = vld [vmem:[%s7640_s18 + $0x430] sm:$0xff] }
 0x50e   : > { %v7064_v32 = vadd.f32 %v7063_v24, %v6552_v15  ;;  %v3490_v15 = vld [vmem:[%s7645_s21 + $0x3f8] sm:$0xff]  ;;  %v5030_v24 = vadd.s32 %v8687_v5, %v4517_v2  ;;  %vm5541_vm15 = vcmp.lt.s32.totalorder %v5029_v16, 9216  ;;  %v6563_v41 = vmul.f32 %v6051_v29, %v6051_v29 }
 0x50f   : > { %v4002_v27 = vsub.f32 %v2978_v14, %v3490_v15  ;;  %v6052_v37 = vsel %vm5540_vm14, %v4001_v19, 0.0  ;;  %v4526_v14 = vadd.s32 1096, %v8683_v3  ;;  %v2986_v16 = vld [vmem:[%s7640_s18 + $0x438] sm:$0xff] }
 0x510   : > { %v7065_v40 = vadd.f32 %v7064_v32, %v6553_v23  ;;  %v3491_v23 = vld [vmem:[%s7645_s21 + $0x400] sm:$0xff]  ;;  %v5031_v32 = vadd.s32 %v8687_v5, %v4518_v12  ;;  %vm5542_vm0 = vcmp.lt.s32.totalorder %v5030_v24, 9216  ;;  %v6564_v49 = vmul.f32 %v6052_v37, %v6052_v37 }
 0x511   : > { %v4003_v35 = vsub.f32 %v2979_v22, %v3491_v23  ;;  %v6053_v45 = vsel %vm5541_vm15, %v4002_v27, 0.0  ;;  %v4527_v22 = vadd.s32 1104, %v8683_v3  ;;  %v2987_v24 = vld [vmem:[%s7640_s18 + $0x440] sm:$0xff] }
 0x512   : > { %v7066_v48 = vadd.f32 %v7065_v40, %v6554_v31  ;;  %v3492_v31 = vld [vmem:[%s7645_s21 + $0x408] sm:$0xff]  ;;  %v5032_v40 = vadd.s32 %v8687_v5, %v4519_v20  ;;  %vm5543_vm1 = vcmp.lt.s32.totalorder %v5031_v32, 9216  ;;  %v6565_v57 = vmul.f32 %v6053_v45, %v6053_v45 }
 0x513   : > { %v4004_v43 = vsub.f32 %v2980_v30, %v3492_v31  ;;  %v6054_v53 = vsel %vm5542_vm0, %v4003_v35, 0.0  ;;  %v4528_v30 = vadd.s32 1112, %v8683_v3  ;;  %v2988_v32 = vld [vmem:[%s7640_s18 + $0x448] sm:$0xff] }
 0x514   : > { %v7067_v56 = vadd.f32 %v7066_v48, %v6555_v39  ;;  %v3493_v39 = vld [vmem:[%s7645_s21 + $0x410] sm:$0xff]  ;;  %v5033_v48 = vadd.s32 %v8687_v5, %v4520_v28  ;;  %vm5544_vm2 = vcmp.lt.s32.totalorder %v5032_v40, 9216  ;;  %v6566_v1 = vmul.f32 %v6054_v53, %v6054_v53 }
 0x515   : > { %v4005_v51 = vsub.f32 %v2981_v38, %v3493_v39  ;;  %v6055_v61 = vsel %vm5543_vm1, %v4004_v43, 0.0  ;;  %v4529_v38 = vadd.s32 1120, %v8683_v3  ;;  %v2989_v40 = vld [vmem:[%s7640_s18 + $0x450] sm:$0xff] }
 0x516   : > { %v7068_v0 = vadd.f32 %v7067_v56, %v6556_v47  ;;  %v3494_v47 = vld [vmem:[%s7645_s21 + $0x418] sm:$0xff]  ;;  %v5034_v56 = vadd.s32 %v8687_v5, %v4521_v36  ;;  %vm5545_vm3 = vcmp.lt.s32.totalorder %v5033_v48, 9216  ;;  %v6567_v11 = vmul.f32 %v6055_v61, %v6055_v61 }
 0x517   : > { %v4006_v59 = vsub.f32 %v2982_v46, %v3494_v47  ;;  %v6056_v7 = vsel %vm5544_vm2, %v4005_v51, 0.0  ;;  %v4530_v46 = vadd.s32 1128, %v8683_v3  ;;  %v2990_v48 = vld [vmem:[%s7640_s18 + $0x458] sm:$0xff] }
 0x518   : > { %v7069_v10 = vadd.f32 %v7068_v0, %v6557_v55  ;;  %v3495_v55 = vld [vmem:[%s7645_s21 + $0x420] sm:$0xff]  ;;  %v5035_v0 = vadd.s32 %v8687_v5, %v4522_v44  ;;  %vm5546_vm4 = vcmp.lt.s32.totalorder %v5034_v56, 9216  ;;  %v6568_v19 = vmul.f32 %v6056_v7, %v6056_v7 }
 0x519   : > { %v4007_v4 = vsub.f32 %v2983_v54, %v3495_v55  ;;  %v6057_v15 = vsel %vm5545_vm3, %v4006_v59, 0.0  ;;  %v4531_v54 = vadd.s32 1136, %v8683_v3  ;;  %v2991_v56 = vld [vmem:[%s7640_s18 + $0x460] sm:$0xff] }
 0x51a   : > { %v7070_v18 = vadd.f32 %v7069_v10, %v6558_v63  ;;  %v3496_v63 = vld [vmem:[%s7645_s21 + $0x428] sm:$0xff]  ;;  %v5036_v10 = vadd.s32 %v8687_v5, %v4523_v52  ;;  %vm5547_vm5 = vcmp.lt.s32.totalorder %v5035_v0, 9216  ;;  %v6569_v27 = vmul.f32 %v6057_v15, %v6057_v15 }
 0x51b   : > { %v4008_v13 = vsub.f32 %v2984_v62, %v3496_v63  ;;  %v6058_v23 = vsel %vm5546_vm4, %v4007_v4, 0.0  ;;  %v4532_v62 = vadd.s32 1144, %v8683_v3  ;;  %v2992_v0 = vld [vmem:[%s7640_s18 + $0x468] sm:$0xff] }
 0x51c   : > { %v7071_v26 = vadd.f32 %v7070_v18, %v6559_v9  ;;  %v3497_v9 = vld [vmem:[%s7645_s21 + $0x430] sm:$0xff]  ;;  %v5037_v18 = vadd.s32 %v8687_v5, %v4524_v60  ;;  %vm5548_vm6 = vcmp.lt.s32.totalorder %v5036_v10, 9216  ;;  %v6570_v35 = vmul.f32 %v6058_v23, %v6058_v23 }
 0x51d   : > { %v4009_v21 = vsub.f32 %v2985_v8, %v3497_v9  ;;  %v6059_v31 = vsel %vm5547_vm5, %v4008_v13, 0.0  ;;  %v4533_v8 = vadd.s32 1152, %v8683_v3  ;;  %v2993_v10 = vld [vmem:[%s7640_s18 + $0x470] sm:$0xff] }
 0x51e   : > { %v7072_v34 = vadd.f32 %v7071_v26, %v6560_v17  ;;  %v3498_v17 = vld [vmem:[%s7645_s21 + $0x438] sm:$0xff]  ;;  %v5038_v26 = vadd.s32 %v8687_v5, %v4525_v6  ;;  %vm5549_vm7 = vcmp.lt.s32.totalorder %v5037_v18, 9216  ;;  %v6571_v43 = vmul.f32 %v6059_v31, %v6059_v31 }
 0x51f   : > { %v4010_v29 = vsub.f32 %v2986_v16, %v3498_v17  ;;  %v6060_v39 = vsel %vm5548_vm6, %v4009_v21, 0.0  ;;  %v4534_v16 = vadd.s32 1160, %v8683_v3  ;;  %v2994_v18 = vld [vmem:[%s7640_s18 + $0x478] sm:$0xff] }
 0x520   : > { %v7073_v42 = vadd.f32 %v7072_v34, %v6561_v25  ;;  %v3499_v25 = vld [vmem:[%s7645_s21 + $0x440] sm:$0xff]  ;;  %v5039_v34 = vadd.s32 %v8687_v5, %v4526_v14  ;;  %vm5550_vm8 = vcmp.lt.s32.totalorder %v5038_v26, 9216  ;;  %v6572_v51 = vmul.f32 %v6060_v39, %v6060_v39 }
 0x521   : > { %v4011_v37 = vsub.f32 %v2987_v24, %v3499_v25  ;;  %v6061_v47 = vsel %vm5549_vm7, %v4010_v29, 0.0  ;;  %v4535_v24 = vadd.s32 1168, %v8683_v3  ;;  %v2995_v26 = vld [vmem:[%s7640_s18 + $0x480] sm:$0xff] }
 0x522   : > { %v7074_v50 = vadd.f32 %v7073_v42, %v6562_v33  ;;  %v3500_v33 = vld [vmem:[%s7645_s21 + $0x448] sm:$0xff]  ;;  %v5040_v42 = vadd.s32 %v8687_v5, %v4527_v22  ;;  %vm5551_vm9 = vcmp.lt.s32.totalorder %v5039_v34, 9216  ;;  %v6573_v59 = vmul.f32 %v6061_v47, %v6061_v47 }
 0x523   : > { %v4012_v45 = vsub.f32 %v2988_v32, %v3500_v33  ;;  %v6062_v55 = vsel %vm5550_vm8, %v4011_v37, 0.0  ;;  %v4536_v32 = vadd.s32 1176, %v8683_v3  ;;  %v2996_v34 = vld [vmem:[%s7640_s18 + $0x488] sm:$0xff] }
 0x524   : > { %v7075_v58 = vadd.f32 %v7074_v50, %v6563_v41  ;;  %v3501_v41 = vld [vmem:[%s7645_s21 + $0x450] sm:$0xff]  ;;  %v5041_v50 = vadd.s32 %v8687_v5, %v4528_v30  ;;  %vm5552_vm10 = vcmp.lt.s32.totalorder %v5040_v42, 9216  ;;  %v6574_v4 = vmul.f32 %v6062_v55, %v6062_v55 }
 0x525   : > { %v4013_v53 = vsub.f32 %v2989_v40, %v3501_v41  ;;  %v6063_v63 = vsel %vm5551_vm9, %v4012_v45, 0.0  ;;  %v4537_v40 = vadd.s32 1184, %v8683_v3  ;;  %v2997_v42 = vld [vmem:[%s7640_s18 + $0x490] sm:$0xff] }
 0x526   : > { %v7076_v2 = vadd.f32 %v7075_v58, %v6564_v49  ;;  %v3502_v49 = vld [vmem:[%s7645_s21 + $0x458] sm:$0xff]  ;;  %v5042_v58 = vadd.s32 %v8687_v5, %v4529_v38  ;;  %vm5553_vm11 = vcmp.lt.s32.totalorder %v5041_v50, 9216  ;;  %v6575_v13 = vmul.f32 %v6063_v63, %v6063_v63 }
 0x527   : > { %v4014_v61 = vsub.f32 %v2990_v48, %v3502_v49  ;;  %v6064_v9 = vsel %vm5552_vm10, %v4013_v53, 0.0  ;;  %v4538_v48 = vadd.s32 1192, %v8683_v3  ;;  %v2998_v50 = vld [vmem:[%s7640_s18 + $0x498] sm:$0xff] }
 0x528   : > { %v7077_v12 = vadd.f32 %v7076_v2, %v6565_v57  ;;  %v3503_v57 = vld [vmem:[%s7645_s21 + $0x460] sm:$0xff]  ;;  %v5043_v2 = vadd.s32 %v8687_v5, %v4530_v46  ;;  %vm5554_vm12 = vcmp.lt.s32.totalorder %v5042_v58, 9216  ;;  %v6576_v21 = vmul.f32 %v6064_v9, %v6064_v9 }
 0x529   : > { %v4015_v7 = vsub.f32 %v2991_v56, %v3503_v57  ;;  %v6065_v17 = vsel %vm5553_vm11, %v4014_v61, 0.0  ;;  %v4539_v56 = vadd.s32 1200, %v8683_v3  ;;  %v2999_v58 = vld [vmem:[%s7640_s18 + $0x4a0] sm:$0xff] }
 0x52a   : > { %v7078_v20 = vadd.f32 %v7077_v12, %v6566_v1  ;;  %v3504_v1 = vld [vmem:[%s7645_s21 + $0x468] sm:$0xff]  ;;  %v5044_v12 = vadd.s32 %v8687_v5, %v4531_v54  ;;  %vm5555_vm13 = vcmp.lt.s32.totalorder %v5043_v2, 9216  ;;  %v6577_v29 = vmul.f32 %v6065_v17, %v6065_v17 }
 0x52b   : > { %v4016_v15 = vsub.f32 %v2992_v0, %v3504_v1  ;;  %v6066_v25 = vsel %vm5554_vm12, %v4015_v7, 0.0  ;;  %v4540_v0 = vadd.s32 1208, %v8683_v3  ;;  %v3000_v2 = vld [vmem:[%s7640_s18 + $0x4a8] sm:$0xff] }
 0x52c   : > { %v7079_v28 = vadd.f32 %v7078_v20, %v6567_v11  ;;  %v3505_v11 = vld [vmem:[%s7645_s21 + $0x470] sm:$0xff]  ;;  %v5045_v20 = vadd.s32 %v8687_v5, %v4532_v62  ;;  %vm5556_vm14 = vcmp.lt.s32.totalorder %v5044_v12, 9216  ;;  %v6578_v37 = vmul.f32 %v6066_v25, %v6066_v25 }
 0x52d   : > { %v4017_v23 = vsub.f32 %v2993_v10, %v3505_v11  ;;  %v6067_v33 = vsel %vm5555_vm13, %v4016_v15, 0.0  ;;  %v4541_v10 = vadd.s32 1216, %v8683_v3  ;;  %v3001_v12 = vld [vmem:[%s7640_s18 + $0x4b0] sm:$0xff] }
 0x52e   : > { %v7080_v36 = vadd.f32 %v7079_v28, %v6568_v19  ;;  %v3506_v19 = vld [vmem:[%s7645_s21 + $0x478] sm:$0xff]  ;;  %v5046_v28 = vadd.s32 %v8687_v5, %v4533_v8  ;;  %vm5557_vm15 = vcmp.lt.s32.totalorder %v5045_v20, 9216  ;;  %v6579_v45 = vmul.f32 %v6067_v33, %v6067_v33 }
 0x52f   : > { %v4018_v31 = vsub.f32 %v2994_v18, %v3506_v19  ;;  %v6068_v41 = vsel %vm5556_vm14, %v4017_v23, 0.0  ;;  %v4542_v18 = vadd.s32 1224, %v8683_v3  ;;  %v3002_v20 = vld [vmem:[%s7640_s18 + $0x4b8] sm:$0xff] }
 0x530   : > { %v7081_v44 = vadd.f32 %v7080_v36, %v6569_v27  ;;  %v3507_v27 = vld [vmem:[%s7645_s21 + $0x480] sm:$0xff]  ;;  %v5047_v36 = vadd.s32 %v8687_v5, %v4534_v16  ;;  %vm5558_vm0 = vcmp.lt.s32.totalorder %v5046_v28, 9216  ;;  %v6580_v53 = vmul.f32 %v6068_v41, %v6068_v41 }
 0x531   : > { %v4019_v39 = vsub.f32 %v2995_v26, %v3507_v27  ;;  %v6069_v49 = vsel %vm5557_vm15, %v4018_v31, 0.0  ;;  %v4543_v26 = vadd.s32 1232, %v8683_v3  ;;  %v3003_v28 = vld [vmem:[%s7640_s18 + $0x4c0] sm:$0xff] }
 0x532   : > { %v7082_v52 = vadd.f32 %v7081_v44, %v6570_v35  ;;  %v3508_v35 = vld [vmem:[%s7645_s21 + $0x488] sm:$0xff]  ;;  %v5048_v44 = vadd.s32 %v8687_v5, %v4535_v24  ;;  %vm5559_vm1 = vcmp.lt.s32.totalorder %v5047_v36, 9216  ;;  %v6581_v61 = vmul.f32 %v6069_v49, %v6069_v49 }
 0x533   : > { %v4020_v47 = vsub.f32 %v2996_v34, %v3508_v35  ;;  %v6070_v57 = vsel %vm5558_vm0, %v4019_v39, 0.0  ;;  %v4544_v34 = vadd.s32 1240, %v8683_v3  ;;  %v3004_v36 = vld [vmem:[%s7640_s18 + $0x4c8] sm:$0xff] }
 0x534   : > { %v7083_v60 = vadd.f32 %v7082_v52, %v6571_v43  ;;  %v3509_v43 = vld [vmem:[%s7645_s21 + $0x490] sm:$0xff]  ;;  %v5049_v52 = vadd.s32 %v8687_v5, %v4536_v32  ;;  %vm5560_vm2 = vcmp.lt.s32.totalorder %v5048_v44, 9216  ;;  %v6582_v7 = vmul.f32 %v6070_v57, %v6070_v57 }
 0x535   : > { %v4021_v55 = vsub.f32 %v2997_v42, %v3509_v43  ;;  %v6071_v1 = vsel %vm5559_vm1, %v4020_v47, 0.0  ;;  %v4545_v42 = vadd.s32 1248, %v8683_v3  ;;  %v3005_v44 = vld [vmem:[%s7640_s18 + $0x4d0] sm:$0xff] }
 0x536   : > { %v7084_v6 = vadd.f32 %v7083_v60, %v6572_v51  ;;  %v3510_v51 = vld [vmem:[%s7645_s21 + $0x498] sm:$0xff]  ;;  %v5050_v60 = vadd.s32 %v8687_v5, %v4537_v40  ;;  %vm5561_vm3 = vcmp.lt.s32.totalorder %v5049_v52, 9216  ;;  %v6583_v15 = vmul.f32 %v6071_v1, %v6071_v1 }
 0x537   : > { %v4022_v63 = vsub.f32 %v2998_v50, %v3510_v51  ;;  %v6072_v11 = vsel %vm5560_vm2, %v4021_v55, 0.0  ;;  %v4546_v50 = vadd.s32 1256, %v8683_v3  ;;  %v3006_v52 = vld [vmem:[%s7640_s18 + $0x4d8] sm:$0xff] }
 0x538   : > { %v7085_v14 = vadd.f32 %v7084_v6, %v6573_v59  ;;  %v3511_v59 = vld [vmem:[%s7645_s21 + $0x4a0] sm:$0xff]  ;;  %v5051_v6 = vadd.s32 %v8687_v5, %v4538_v48  ;;  %vm5562_vm4 = vcmp.lt.s32.totalorder %v5050_v60, 9216  ;;  %v6584_v23 = vmul.f32 %v6072_v11, %v6072_v11 }
 0x539   : > { %v4023_v9 = vsub.f32 %v2999_v58, %v3511_v59  ;;  %v6073_v19 = vsel %vm5561_vm3, %v4022_v63, 0.0  ;;  %v4547_v58 = vadd.s32 1264, %v8683_v3  ;;  %v3007_v60 = vld [vmem:[%s7640_s18 + $0x4e0] sm:$0xff] }
 0x53a   : > { %v7086_v22 = vadd.f32 %v7085_v14, %v6574_v4  ;;  %v3512_v4 = vld [vmem:[%s7645_s21 + $0x4a8] sm:$0xff]  ;;  %v5052_v14 = vadd.s32 %v8687_v5, %v4539_v56  ;;  %vm5563_vm5 = vcmp.lt.s32.totalorder %v5051_v6, 9216  ;;  %v6585_v31 = vmul.f32 %v6073_v19, %v6073_v19 }
 0x53b   : > { %v4024_v17 = vsub.f32 %v3000_v2, %v3512_v4  ;;  %v6074_v27 = vsel %vm5562_vm4, %v4023_v9, 0.0  ;;  %v4548_v2 = vadd.s32 1272, %v8683_v3  ;;  %v3008_v6 = vld [vmem:[%s7640_s18 + $0x4e8] sm:$0xff] }
 0x53c   : > { %v7087_v30 = vadd.f32 %v7086_v22, %v6575_v13  ;;  %v3513_v13 = vld [vmem:[%s7645_s21 + $0x4b0] sm:$0xff]  ;;  %v5053_v22 = vadd.s32 %v8687_v5, %v4540_v0  ;;  %vm5564_vm6 = vcmp.lt.s32.totalorder %v5052_v14, 9216  ;;  %v6586_v39 = vmul.f32 %v6074_v27, %v6074_v27 }
 0x53d   : > { %v4025_v25 = vsub.f32 %v3001_v12, %v3513_v13  ;;  %v6075_v35 = vsel %vm5563_vm5, %v4024_v17, 0.0  ;;  %v4549_v12 = vadd.s32 1280, %v8683_v3  ;;  %v3009_v14 = vld [vmem:[%s7640_s18 + $0x4f0] sm:$0xff] }
 0x53e   : > { %v7088_v38 = vadd.f32 %v7087_v30, %v6576_v21  ;;  %v3514_v21 = vld [vmem:[%s7645_s21 + $0x4b8] sm:$0xff]  ;;  %v5054_v30 = vadd.s32 %v8687_v5, %v4541_v10  ;;  %vm5565_vm7 = vcmp.lt.s32.totalorder %v5053_v22, 9216  ;;  %v6587_v47 = vmul.f32 %v6075_v35, %v6075_v35 }
 0x53f   : > { %v4026_v33 = vsub.f32 %v3002_v20, %v3514_v21  ;;  %v6076_v43 = vsel %vm5564_vm6, %v4025_v25, 0.0  ;;  %v4550_v20 = vadd.s32 1288, %v8683_v3  ;;  %v3010_v22 = vld [vmem:[%s7640_s18 + $0x4f8] sm:$0xff] }
 0x540   : > { %v7089_v46 = vadd.f32 %v7088_v38, %v6577_v29  ;;  %v3515_v29 = vld [vmem:[%s7645_s21 + $0x4c0] sm:$0xff]  ;;  %v5055_v38 = vadd.s32 %v8687_v5, %v4542_v18  ;;  %vm5566_vm8 = vcmp.lt.s32.totalorder %v5054_v30, 9216  ;;  %v6588_v55 = vmul.f32 %v6076_v43, %v6076_v43 }
 0x541   : > { %v4027_v41 = vsub.f32 %v3003_v28, %v3515_v29  ;;  %v6077_v51 = vsel %vm5565_vm7, %v4026_v33, 0.0  ;;  %v4551_v28 = vadd.s32 1296, %v8683_v3  ;;  %v3011_v30 = vld [vmem:[%s7640_s18 + $0x500] sm:$0xff] }
 0x542   : > { %v7090_v54 = vadd.f32 %v7089_v46, %v6578_v37  ;;  %v3516_v37 = vld [vmem:[%s7645_s21 + $0x4c8] sm:$0xff]  ;;  %v5056_v46 = vadd.s32 %v8687_v5, %v4543_v26  ;;  %vm5567_vm9 = vcmp.lt.s32.totalorder %v5055_v38, 9216  ;;  %v6589_v63 = vmul.f32 %v6077_v51, %v6077_v51 }
 0x543   : > { %v4028_v49 = vsub.f32 %v3004_v36, %v3516_v37  ;;  %v6078_v59 = vsel %vm5566_vm8, %v4027_v41, 0.0  ;;  %v4552_v36 = vadd.s32 1304, %v8683_v3  ;;  %v3012_v38 = vld [vmem:[%s7640_s18 + $0x508] sm:$0xff] }
 0x544   : > { %v7091_v62 = vadd.f32 %v7090_v54, %v6579_v45  ;;  %v3517_v45 = vld [vmem:[%s7645_s21 + $0x4d0] sm:$0xff]  ;;  %v5057_v54 = vadd.s32 %v8687_v5, %v4544_v34  ;;  %vm5568_vm10 = vcmp.lt.s32.totalorder %v5056_v46, 9216  ;;  %v6590_v9 = vmul.f32 %v6078_v59, %v6078_v59 }
 0x545   : > { %v4029_v57 = vsub.f32 %v3005_v44, %v3517_v45  ;;  %v6079_v4 = vsel %vm5567_vm9, %v4028_v49, 0.0  ;;  %v4553_v44 = vadd.s32 1312, %v8683_v3  ;;  %v3013_v46 = vld [vmem:[%s7640_s18 + $0x510] sm:$0xff] }
 0x546   : > { %v7092_v8 = vadd.f32 %v7091_v62, %v6580_v53  ;;  %v3518_v53 = vld [vmem:[%s7645_s21 + $0x4d8] sm:$0xff]  ;;  %v5058_v62 = vadd.s32 %v8687_v5, %v4545_v42  ;;  %vm5569_vm11 = vcmp.lt.s32.totalorder %v5057_v54, 9216  ;;  %v6591_v17 = vmul.f32 %v6079_v4, %v6079_v4 }
 0x547   : > { %v4030_v1 = vsub.f32 %v3006_v52, %v3518_v53  ;;  %v6080_v13 = vsel %vm5568_vm10, %v4029_v57, 0.0  ;;  %v4554_v52 = vadd.s32 1320, %v8683_v3  ;;  %v3014_v54 = vld [vmem:[%s7640_s18 + $0x518] sm:$0xff] }
 0x548   : > { %v7093_v16 = vadd.f32 %v7092_v8, %v6581_v61  ;;  %v3519_v61 = vld [vmem:[%s7645_s21 + $0x4e0] sm:$0xff]  ;;  %v5059_v8 = vadd.s32 %v8687_v5, %v4546_v50  ;;  %vm5570_vm12 = vcmp.lt.s32.totalorder %v5058_v62, 9216  ;;  %v6592_v25 = vmul.f32 %v6080_v13, %v6080_v13 }
 0x549   : > { %v4031_v11 = vsub.f32 %v3007_v60, %v3519_v61  ;;  %v6081_v21 = vsel %vm5569_vm11, %v4030_v1, 0.0  ;;  %v4555_v60 = vadd.s32 1328, %v8683_v3  ;;  %v3015_v62 = vld [vmem:[%s7640_s18 + $0x520] sm:$0xff] }
 0x54a   : > { %v7094_v24 = vadd.f32 %v7093_v16, %v6582_v7  ;;  %v3520_v7 = vld [vmem:[%s7645_s21 + $0x4e8] sm:$0xff]  ;;  %v5060_v16 = vadd.s32 %v8687_v5, %v4547_v58  ;;  %vm5571_vm13 = vcmp.lt.s32.totalorder %v5059_v8, 9216  ;;  %v6593_v33 = vmul.f32 %v6081_v21, %v6081_v21 }
 0x54b   : > { %v4032_v19 = vsub.f32 %v3008_v6, %v3520_v7  ;;  %v6082_v29 = vsel %vm5570_vm12, %v4031_v11, 0.0  ;;  %v4556_v6 = vadd.s32 1336, %v8683_v3  ;;  %v3016_v8 = vld [vmem:[%s7640_s18 + $0x528] sm:$0xff] }
 0x54c   : > { %v7095_v32 = vadd.f32 %v7094_v24, %v6583_v15  ;;  %v3521_v15 = vld [vmem:[%s7645_s21 + $0x4f0] sm:$0xff]  ;;  %v5061_v24 = vadd.s32 %v8687_v5, %v4548_v2  ;;  %vm5572_vm14 = vcmp.lt.s32.totalorder %v5060_v16, 9216  ;;  %v6594_v41 = vmul.f32 %v6082_v29, %v6082_v29 }
 0x54d   : > { %v4033_v27 = vsub.f32 %v3009_v14, %v3521_v15  ;;  %v6083_v37 = vsel %vm5571_vm13, %v4032_v19, 0.0  ;;  %v4557_v14 = vadd.s32 1344, %v8683_v3  ;;  %v3017_v16 = vld [vmem:[%s7640_s18 + $0x530] sm:$0xff] }
 0x54e   : > { %v7096_v40 = vadd.f32 %v7095_v32, %v6584_v23  ;;  %v3522_v23 = vld [vmem:[%s7645_s21 + $0x4f8] sm:$0xff]  ;;  %v5062_v32 = vadd.s32 %v8687_v5, %v4549_v12  ;;  %vm5573_vm15 = vcmp.lt.s32.totalorder %v5061_v24, 9216  ;;  %v6595_v49 = vmul.f32 %v6083_v37, %v6083_v37 }
 0x54f   : > { %v4034_v35 = vsub.f32 %v3010_v22, %v3522_v23  ;;  %v6084_v45 = vsel %vm5572_vm14, %v4033_v27, 0.0  ;;  %v4558_v22 = vadd.s32 1352, %v8683_v3  ;;  %v3018_v24 = vld [vmem:[%s7640_s18 + $0x538] sm:$0xff] }
 0x550   : > { %v7097_v48 = vadd.f32 %v7096_v40, %v6585_v31  ;;  %v3523_v31 = vld [vmem:[%s7645_s21 + $0x500] sm:$0xff]  ;;  %v5063_v40 = vadd.s32 %v8687_v5, %v4550_v20  ;;  %vm5574_vm0 = vcmp.lt.s32.totalorder %v5062_v32, 9216  ;;  %v6596_v57 = vmul.f32 %v6084_v45, %v6084_v45 }
 0x551   : > { %v4035_v43 = vsub.f32 %v3011_v30, %v3523_v31  ;;  %v6085_v53 = vsel %vm5573_vm15, %v4034_v35, 0.0  ;;  %v4559_v30 = vadd.s32 1360, %v8683_v3  ;;  %v3019_v32 = vld [vmem:[%s7640_s18 + $0x540] sm:$0xff] }
 0x552   : > { %v7098_v56 = vadd.f32 %v7097_v48, %v6586_v39  ;;  %v3524_v39 = vld [vmem:[%s7645_s21 + $0x508] sm:$0xff]  ;;  %v5064_v48 = vadd.s32 %v8687_v5, %v4551_v28  ;;  %vm5575_vm1 = vcmp.lt.s32.totalorder %v5063_v40, 9216  ;;  %v6597_v1 = vmul.f32 %v6085_v53, %v6085_v53 }
 0x553   : > { %v4036_v51 = vsub.f32 %v3012_v38, %v3524_v39  ;;  %v6086_v61 = vsel %vm5574_vm0, %v4035_v43, 0.0  ;;  %v4560_v38 = vadd.s32 1368, %v8683_v3  ;;  %v3020_v40 = vld [vmem:[%s7640_s18 + $0x548] sm:$0xff] }
 0x554   : > { %v7099_v0 = vadd.f32 %v7098_v56, %v6587_v47  ;;  %v3525_v47 = vld [vmem:[%s7645_s21 + $0x510] sm:$0xff]  ;;  %v5065_v56 = vadd.s32 %v8687_v5, %v4552_v36  ;;  %vm5576_vm2 = vcmp.lt.s32.totalorder %v5064_v48, 9216  ;;  %v6598_v11 = vmul.f32 %v6086_v61, %v6086_v61 }
 0x555   : > { %v4037_v59 = vsub.f32 %v3013_v46, %v3525_v47  ;;  %v6087_v7 = vsel %vm5575_vm1, %v4036_v51, 0.0  ;;  %v4561_v46 = vadd.s32 1376, %v8683_v3  ;;  %v3021_v48 = vld [vmem:[%s7640_s18 + $0x550] sm:$0xff] }
 0x556   : > { %v7100_v10 = vadd.f32 %v7099_v0, %v6588_v55  ;;  %v3526_v55 = vld [vmem:[%s7645_s21 + $0x518] sm:$0xff]  ;;  %v5066_v0 = vadd.s32 %v8687_v5, %v4553_v44  ;;  %vm5577_vm3 = vcmp.lt.s32.totalorder %v5065_v56, 9216  ;;  %v6599_v19 = vmul.f32 %v6087_v7, %v6087_v7 }
 0x557   : > { %v4038_v4 = vsub.f32 %v3014_v54, %v3526_v55  ;;  %v6088_v15 = vsel %vm5576_vm2, %v4037_v59, 0.0  ;;  %v4562_v54 = vadd.s32 1384, %v8683_v3  ;;  %v3022_v56 = vld [vmem:[%s7640_s18 + $0x558] sm:$0xff] }
 0x558   : > { %v7101_v18 = vadd.f32 %v7100_v10, %v6589_v63  ;;  %v3527_v63 = vld [vmem:[%s7645_s21 + $0x520] sm:$0xff]  ;;  %v5067_v10 = vadd.s32 %v8687_v5, %v4554_v52  ;;  %vm5578_vm4 = vcmp.lt.s32.totalorder %v5066_v0, 9216  ;;  %v6600_v27 = vmul.f32 %v6088_v15, %v6088_v15 }
 0x559   : > { %v4039_v13 = vsub.f32 %v3015_v62, %v3527_v63  ;;  %v6089_v23 = vsel %vm5577_vm3, %v4038_v4, 0.0  ;;  %v4563_v62 = vadd.s32 1392, %v8683_v3  ;;  %v3023_v0 = vld [vmem:[%s7640_s18 + $0x560] sm:$0xff] }
 0x55a   : > { %v7102_v26 = vadd.f32 %v7101_v18, %v6590_v9  ;;  %v3528_v9 = vld [vmem:[%s7645_s21 + $0x528] sm:$0xff]  ;;  %v5068_v18 = vadd.s32 %v8687_v5, %v4555_v60  ;;  %vm5579_vm5 = vcmp.lt.s32.totalorder %v5067_v10, 9216  ;;  %v6601_v35 = vmul.f32 %v6089_v23, %v6089_v23 }
 0x55b   : > { %v4040_v21 = vsub.f32 %v3016_v8, %v3528_v9  ;;  %v6090_v31 = vsel %vm5578_vm4, %v4039_v13, 0.0  ;;  %v4564_v8 = vadd.s32 1400, %v8683_v3  ;;  %v3024_v10 = vld [vmem:[%s7640_s18 + $0x568] sm:$0xff] }
 0x55c   : > { %v7103_v34 = vadd.f32 %v7102_v26, %v6591_v17  ;;  %v3529_v17 = vld [vmem:[%s7645_s21 + $0x530] sm:$0xff]  ;;  %v5069_v26 = vadd.s32 %v8687_v5, %v4556_v6  ;;  %vm5580_vm6 = vcmp.lt.s32.totalorder %v5068_v18, 9216  ;;  %v6602_v43 = vmul.f32 %v6090_v31, %v6090_v31 }
 0x55d   : > { %v4041_v29 = vsub.f32 %v3017_v16, %v3529_v17  ;;  %v6091_v39 = vsel %vm5579_vm5, %v4040_v21, 0.0  ;;  %v4565_v16 = vadd.s32 1408, %v8683_v3  ;;  %v3025_v18 = vld [vmem:[%s7640_s18 + $0x570] sm:$0xff] }
 0x55e   : > { %v7104_v42 = vadd.f32 %v7103_v34, %v6592_v25  ;;  %v3530_v25 = vld [vmem:[%s7645_s21 + $0x538] sm:$0xff]  ;;  %v5070_v34 = vadd.s32 %v8687_v5, %v4557_v14  ;;  %vm5581_vm7 = vcmp.lt.s32.totalorder %v5069_v26, 9216  ;;  %v6603_v51 = vmul.f32 %v6091_v39, %v6091_v39 }
 0x55f   : > { %v4042_v37 = vsub.f32 %v3018_v24, %v3530_v25  ;;  %v6092_v47 = vsel %vm5580_vm6, %v4041_v29, 0.0  ;;  %v4566_v24 = vadd.s32 1416, %v8683_v3  ;;  %v3026_v26 = vld [vmem:[%s7640_s18 + $0x578] sm:$0xff] }
 0x560   : > { %v7105_v50 = vadd.f32 %v7104_v42, %v6593_v33  ;;  %v3531_v33 = vld [vmem:[%s7645_s21 + $0x540] sm:$0xff]  ;;  %v5071_v42 = vadd.s32 %v8687_v5, %v4558_v22  ;;  %vm5582_vm8 = vcmp.lt.s32.totalorder %v5070_v34, 9216  ;;  %v6604_v59 = vmul.f32 %v6092_v47, %v6092_v47 }
 0x561   : > { %v4043_v45 = vsub.f32 %v3019_v32, %v3531_v33  ;;  %v6093_v55 = vsel %vm5581_vm7, %v4042_v37, 0.0  ;;  %v4567_v32 = vadd.s32 1424, %v8683_v3  ;;  %v3027_v34 = vld [vmem:[%s7640_s18 + $0x580] sm:$0xff] }
 0x562   : > { %v7106_v58 = vadd.f32 %v7105_v50, %v6594_v41  ;;  %v3532_v41 = vld [vmem:[%s7645_s21 + $0x548] sm:$0xff]  ;;  %v5072_v50 = vadd.s32 %v8687_v5, %v4559_v30  ;;  %vm5583_vm9 = vcmp.lt.s32.totalorder %v5071_v42, 9216  ;;  %v6605_v4 = vmul.f32 %v6093_v55, %v6093_v55 }
 0x563   : > { %v4044_v53 = vsub.f32 %v3020_v40, %v3532_v41  ;;  %v6094_v63 = vsel %vm5582_vm8, %v4043_v45, 0.0  ;;  %v4568_v40 = vadd.s32 1432, %v8683_v3  ;;  %v3028_v42 = vld [vmem:[%s7640_s18 + $0x588] sm:$0xff] }
 0x564   : > { %v7107_v2 = vadd.f32 %v7106_v58, %v6595_v49  ;;  %v3533_v49 = vld [vmem:[%s7645_s21 + $0x550] sm:$0xff]  ;;  %v5073_v58 = vadd.s32 %v8687_v5, %v4560_v38  ;;  %vm5584_vm10 = vcmp.lt.s32.totalorder %v5072_v50, 9216  ;;  %v6606_v13 = vmul.f32 %v6094_v63, %v6094_v63 }
 0x565   : > { %v4045_v61 = vsub.f32 %v3021_v48, %v3533_v49  ;;  %v6095_v9 = vsel %vm5583_vm9, %v4044_v53, 0.0  ;;  %v4569_v48 = vadd.s32 1440, %v8683_v3  ;;  %v3029_v50 = vld [vmem:[%s7640_s18 + $0x590] sm:$0xff] }
 0x566   : > { %v7108_v12 = vadd.f32 %v7107_v2, %v6596_v57  ;;  %v3534_v57 = vld [vmem:[%s7645_s21 + $0x558] sm:$0xff]  ;;  %v5074_v2 = vadd.s32 %v8687_v5, %v4561_v46  ;;  %vm5585_vm11 = vcmp.lt.s32.totalorder %v5073_v58, 9216  ;;  %v6607_v21 = vmul.f32 %v6095_v9, %v6095_v9 }
 0x567   : > { %v4046_v7 = vsub.f32 %v3022_v56, %v3534_v57  ;;  %v6096_v17 = vsel %vm5584_vm10, %v4045_v61, 0.0  ;;  %v4570_v56 = vadd.s32 1448, %v8683_v3  ;;  %v3030_v58 = vld [vmem:[%s7640_s18 + $0x598] sm:$0xff] }
 0x568   : > { %v7109_v20 = vadd.f32 %v7108_v12, %v6597_v1  ;;  %v3535_v1 = vld [vmem:[%s7645_s21 + $0x560] sm:$0xff]  ;;  %v5075_v12 = vadd.s32 %v8687_v5, %v4562_v54  ;;  %vm5586_vm12 = vcmp.lt.s32.totalorder %v5074_v2, 9216  ;;  %v6608_v29 = vmul.f32 %v6096_v17, %v6096_v17 }
 0x569   : > { %v4047_v15 = vsub.f32 %v3023_v0, %v3535_v1  ;;  %v6097_v25 = vsel %vm5585_vm11, %v4046_v7, 0.0  ;;  %v4571_v0 = vadd.s32 1456, %v8683_v3  ;;  %v3031_v2 = vld [vmem:[%s7640_s18 + $0x5a0] sm:$0xff] }
 0x56a   : > { %v7110_v28 = vadd.f32 %v7109_v20, %v6598_v11  ;;  %v3536_v11 = vld [vmem:[%s7645_s21 + $0x568] sm:$0xff]  ;;  %v5076_v20 = vadd.s32 %v8687_v5, %v4563_v62  ;;  %vm5587_vm13 = vcmp.lt.s32.totalorder %v5075_v12, 9216  ;;  %v6609_v37 = vmul.f32 %v6097_v25, %v6097_v25 }
 0x56b   : > { %v4048_v23 = vsub.f32 %v3024_v10, %v3536_v11  ;;  %v6098_v33 = vsel %vm5586_vm12, %v4047_v15, 0.0  ;;  %v4572_v10 = vadd.s32 1464, %v8683_v3  ;;  %v3032_v12 = vld [vmem:[%s7640_s18 + $0x5a8] sm:$0xff] }
 0x56c   : > { %v7111_v36 = vadd.f32 %v7110_v28, %v6599_v19  ;;  %v3537_v19 = vld [vmem:[%s7645_s21 + $0x570] sm:$0xff]  ;;  %v5077_v28 = vadd.s32 %v8687_v5, %v4564_v8  ;;  %vm5588_vm14 = vcmp.lt.s32.totalorder %v5076_v20, 9216  ;;  %v6610_v45 = vmul.f32 %v6098_v33, %v6098_v33 }
 0x56d   : > { %v4049_v31 = vsub.f32 %v3025_v18, %v3537_v19  ;;  %v6099_v41 = vsel %vm5587_vm13, %v4048_v23, 0.0  ;;  %v4573_v18 = vadd.s32 1472, %v8683_v3  ;;  %v3033_v20 = vld [vmem:[%s7640_s18 + $0x5b0] sm:$0xff] }
 0x56e   : > { %v7112_v44 = vadd.f32 %v7111_v36, %v6600_v27  ;;  %v3538_v27 = vld [vmem:[%s7645_s21 + $0x578] sm:$0xff]  ;;  %v5078_v36 = vadd.s32 %v8687_v5, %v4565_v16  ;;  %vm5589_vm15 = vcmp.lt.s32.totalorder %v5077_v28, 9216  ;;  %v6611_v53 = vmul.f32 %v6099_v41, %v6099_v41 }
 0x56f   : > { %v4050_v39 = vsub.f32 %v3026_v26, %v3538_v27  ;;  %v6100_v49 = vsel %vm5588_vm14, %v4049_v31, 0.0  ;;  %v4574_v26 = vadd.s32 1480, %v8683_v3  ;;  %v3034_v28 = vld [vmem:[%s7640_s18 + $0x5b8] sm:$0xff] }
 0x570   : > { %v7113_v52 = vadd.f32 %v7112_v44, %v6601_v35  ;;  %v3539_v35 = vld [vmem:[%s7645_s21 + $0x580] sm:$0xff]  ;;  %v5079_v44 = vadd.s32 %v8687_v5, %v4566_v24  ;;  %vm5590_vm0 = vcmp.lt.s32.totalorder %v5078_v36, 9216  ;;  %v6612_v61 = vmul.f32 %v6100_v49, %v6100_v49 }
 0x571   : > { %v4051_v47 = vsub.f32 %v3027_v34, %v3539_v35  ;;  %v6101_v57 = vsel %vm5589_vm15, %v4050_v39, 0.0  ;;  %v4575_v34 = vadd.s32 1488, %v8683_v3  ;;  %v3035_v36 = vld [vmem:[%s7640_s18 + $0x5c0] sm:$0xff] }
 0x572   : > { %v7114_v60 = vadd.f32 %v7113_v52, %v6602_v43  ;;  %v3540_v43 = vld [vmem:[%s7645_s21 + $0x588] sm:$0xff]  ;;  %v5080_v52 = vadd.s32 %v8687_v5, %v4567_v32  ;;  %vm5591_vm1 = vcmp.lt.s32.totalorder %v5079_v44, 9216  ;;  %v6613_v7 = vmul.f32 %v6101_v57, %v6101_v57 }
 0x573   : > { %v4052_v55 = vsub.f32 %v3028_v42, %v3540_v43  ;;  %v6102_v1 = vsel %vm5590_vm0, %v4051_v47, 0.0  ;;  %v4576_v42 = vadd.s32 1496, %v8683_v3  ;;  %v3036_v44 = vld [vmem:[%s7640_s18 + $0x5c8] sm:$0xff] }
 0x574   : > { %v7115_v6 = vadd.f32 %v7114_v60, %v6603_v51  ;;  %v3541_v51 = vld [vmem:[%s7645_s21 + $0x590] sm:$0xff]  ;;  %v5081_v60 = vadd.s32 %v8687_v5, %v4568_v40  ;;  %vm5592_vm2 = vcmp.lt.s32.totalorder %v5080_v52, 9216  ;;  %v6614_v15 = vmul.f32 %v6102_v1, %v6102_v1 }
 0x575   : > { %v4053_v63 = vsub.f32 %v3029_v50, %v3541_v51  ;;  %v6103_v11 = vsel %vm5591_vm1, %v4052_v55, 0.0  ;;  %v4577_v50 = vadd.s32 1504, %v8683_v3  ;;  %v3037_v52 = vld [vmem:[%s7640_s18 + $0x5d0] sm:$0xff] }
 0x576   : > { %v7116_v14 = vadd.f32 %v7115_v6, %v6604_v59  ;;  %v3542_v59 = vld [vmem:[%s7645_s21 + $0x598] sm:$0xff]  ;;  %v5082_v6 = vadd.s32 %v8687_v5, %v4569_v48  ;;  %vm5593_vm3 = vcmp.lt.s32.totalorder %v5081_v60, 9216  ;;  %v6615_v23 = vmul.f32 %v6103_v11, %v6103_v11 }
 0x577   : > { %v4054_v9 = vsub.f32 %v3030_v58, %v3542_v59  ;;  %v6104_v19 = vsel %vm5592_vm2, %v4053_v63, 0.0  ;;  %v4578_v58 = vadd.s32 1512, %v8683_v3  ;;  %v3038_v60 = vld [vmem:[%s7640_s18 + $0x5d8] sm:$0xff] }
 0x578   : > { %v7117_v22 = vadd.f32 %v7116_v14, %v6605_v4  ;;  %v3543_v4 = vld [vmem:[%s7645_s21 + $0x5a0] sm:$0xff]  ;;  %v5083_v14 = vadd.s32 %v8687_v5, %v4570_v56  ;;  %vm5594_vm4 = vcmp.lt.s32.totalorder %v5082_v6, 9216  ;;  %v6616_v31 = vmul.f32 %v6104_v19, %v6104_v19 }
 0x579   : > { %v4055_v17 = vsub.f32 %v3031_v2, %v3543_v4  ;;  %v6105_v27 = vsel %vm5593_vm3, %v4054_v9, 0.0  ;;  %v4579_v2 = vadd.s32 1520, %v8683_v3  ;;  %v3039_v6 = vld [vmem:[%s7640_s18 + $0x5e0] sm:$0xff] }
 0x57a   : > { %v7118_v30 = vadd.f32 %v7117_v22, %v6606_v13  ;;  %v3544_v13 = vld [vmem:[%s7645_s21 + $0x5a8] sm:$0xff]  ;;  %v5084_v22 = vadd.s32 %v8687_v5, %v4571_v0  ;;  %vm5595_vm5 = vcmp.lt.s32.totalorder %v5083_v14, 9216  ;;  %v6617_v39 = vmul.f32 %v6105_v27, %v6105_v27 }
 0x57b   : > { %v4056_v25 = vsub.f32 %v3032_v12, %v3544_v13  ;;  %v6106_v35 = vsel %vm5594_vm4, %v4055_v17, 0.0  ;;  %v4580_v12 = vadd.s32 1528, %v8683_v3  ;;  %v3040_v14 = vld [vmem:[%s7640_s18 + $0x5e8] sm:$0xff] }
 0x57c   : > { %v7119_v38 = vadd.f32 %v7118_v30, %v6607_v21  ;;  %v3545_v21 = vld [vmem:[%s7645_s21 + $0x5b0] sm:$0xff]  ;;  %v5085_v30 = vadd.s32 %v8687_v5, %v4572_v10  ;;  %vm5596_vm6 = vcmp.lt.s32.totalorder %v5084_v22, 9216  ;;  %v6618_v47 = vmul.f32 %v6106_v35, %v6106_v35 }
 0x57d   : > { %v4057_v33 = vsub.f32 %v3033_v20, %v3545_v21  ;;  %v6107_v43 = vsel %vm5595_vm5, %v4056_v25, 0.0  ;;  %v4581_v20 = vadd.s32 1536, %v8683_v3  ;;  %v3041_v22 = vld [vmem:[%s7640_s18 + $0x5f0] sm:$0xff] }
 0x57e   : > { %v7120_v46 = vadd.f32 %v7119_v38, %v6608_v29  ;;  %v3546_v29 = vld [vmem:[%s7645_s21 + $0x5b8] sm:$0xff]  ;;  %v5086_v38 = vadd.s32 %v8687_v5, %v4573_v18  ;;  %vm5597_vm7 = vcmp.lt.s32.totalorder %v5085_v30, 9216  ;;  %v6619_v55 = vmul.f32 %v6107_v43, %v6107_v43 }
 0x57f   : > { %v4058_v41 = vsub.f32 %v3034_v28, %v3546_v29  ;;  %v6108_v51 = vsel %vm5596_vm6, %v4057_v33, 0.0  ;;  %v4582_v28 = vadd.s32 1544, %v8683_v3  ;;  %v3042_v30 = vld [vmem:[%s7640_s18 + $0x5f8] sm:$0xff] }
 0x580   : > { %v7121_v54 = vadd.f32 %v7120_v46, %v6609_v37  ;;  %v3547_v37 = vld [vmem:[%s7645_s21 + $0x5c0] sm:$0xff]  ;;  %v5087_v46 = vadd.s32 %v8687_v5, %v4574_v26  ;;  %vm5598_vm8 = vcmp.lt.s32.totalorder %v5086_v38, 9216  ;;  %v6620_v63 = vmul.f32 %v6108_v51, %v6108_v51 }
 0x581   : > { %v4059_v49 = vsub.f32 %v3035_v36, %v3547_v37  ;;  %v6109_v59 = vsel %vm5597_vm7, %v4058_v41, 0.0  ;;  %v4583_v36 = vadd.s32 1552, %v8683_v3  ;;  %v3043_v38 = vld [vmem:[%s7640_s18 + $0x600] sm:$0xff] }
 0x582   : > { %v7122_v62 = vadd.f32 %v7121_v54, %v6610_v45  ;;  %v3548_v45 = vld [vmem:[%s7645_s21 + $0x5c8] sm:$0xff]  ;;  %v5088_v54 = vadd.s32 %v8687_v5, %v4575_v34  ;;  %vm5599_vm9 = vcmp.lt.s32.totalorder %v5087_v46, 9216  ;;  %v6621_v9 = vmul.f32 %v6109_v59, %v6109_v59 }
 0x583   : > { %v4060_v57 = vsub.f32 %v3036_v44, %v3548_v45  ;;  %v6110_v4 = vsel %vm5598_vm8, %v4059_v49, 0.0  ;;  %v4584_v44 = vadd.s32 1560, %v8683_v3  ;;  %v3044_v46 = vld [vmem:[%s7640_s18 + $0x608] sm:$0xff] }
 0x584   : > { %v7123_v8 = vadd.f32 %v7122_v62, %v6611_v53  ;;  %v3549_v53 = vld [vmem:[%s7645_s21 + $0x5d0] sm:$0xff]  ;;  %v5089_v62 = vadd.s32 %v8687_v5, %v4576_v42  ;;  %vm5600_vm10 = vcmp.lt.s32.totalorder %v5088_v54, 9216  ;;  %v6622_v17 = vmul.f32 %v6110_v4, %v6110_v4 }
 0x585   : > { %v4061_v1 = vsub.f32 %v3037_v52, %v3549_v53  ;;  %v6111_v13 = vsel %vm5599_vm9, %v4060_v57, 0.0  ;;  %v4585_v52 = vadd.s32 1568, %v8683_v3  ;;  %v3045_v54 = vld [vmem:[%s7640_s18 + $0x610] sm:$0xff] }
 0x586   : > { %v7124_v16 = vadd.f32 %v7123_v8, %v6612_v61  ;;  %v3550_v61 = vld [vmem:[%s7645_s21 + $0x5d8] sm:$0xff]  ;;  %v5090_v8 = vadd.s32 %v8687_v5, %v4577_v50  ;;  %vm5601_vm11 = vcmp.lt.s32.totalorder %v5089_v62, 9216  ;;  %v6623_v25 = vmul.f32 %v6111_v13, %v6111_v13 }
 0x587   : > { %v4062_v11 = vsub.f32 %v3038_v60, %v3550_v61  ;;  %v6112_v21 = vsel %vm5600_vm10, %v4061_v1, 0.0  ;;  %v4586_v60 = vadd.s32 1576, %v8683_v3  ;;  %v3046_v62 = vld [vmem:[%s7640_s18 + $0x618] sm:$0xff] }
 0x588   : > { %v7125_v24 = vadd.f32 %v7124_v16, %v6613_v7  ;;  %v3551_v7 = vld [vmem:[%s7645_s21 + $0x5e0] sm:$0xff]  ;;  %v5091_v16 = vadd.s32 %v8687_v5, %v4578_v58  ;;  %vm5602_vm12 = vcmp.lt.s32.totalorder %v5090_v8, 9216  ;;  %v6624_v33 = vmul.f32 %v6112_v21, %v6112_v21 }
 0x589   : > { %v4063_v19 = vsub.f32 %v3039_v6, %v3551_v7  ;;  %v6113_v29 = vsel %vm5601_vm11, %v4062_v11, 0.0  ;;  %v4587_v6 = vadd.s32 1584, %v8683_v3  ;;  %v3047_v8 = vld [vmem:[%s7640_s18 + $0x620] sm:$0xff] }
 0x58a   : > { %v7126_v32 = vadd.f32 %v7125_v24, %v6614_v15  ;;  %v3552_v15 = vld [vmem:[%s7645_s21 + $0x5e8] sm:$0xff]  ;;  %v5092_v24 = vadd.s32 %v8687_v5, %v4579_v2  ;;  %vm5603_vm13 = vcmp.lt.s32.totalorder %v5091_v16, 9216  ;;  %v6625_v41 = vmul.f32 %v6113_v29, %v6113_v29 }
 0x58b   : > { %v4064_v27 = vsub.f32 %v3040_v14, %v3552_v15  ;;  %v6114_v37 = vsel %vm5602_vm12, %v4063_v19, 0.0  ;;  %v4588_v14 = vadd.s32 1592, %v8683_v3  ;;  %v3048_v16 = vld [vmem:[%s7640_s18 + $0x628] sm:$0xff] }
 0x58c   : > { %v7127_v40 = vadd.f32 %v7126_v32, %v6615_v23  ;;  %v3553_v23 = vld [vmem:[%s7645_s21 + $0x5f0] sm:$0xff]  ;;  %v5093_v32 = vadd.s32 %v8687_v5, %v4580_v12  ;;  %vm5604_vm14 = vcmp.lt.s32.totalorder %v5092_v24, 9216  ;;  %v6626_v49 = vmul.f32 %v6114_v37, %v6114_v37 }
 0x58d   : > { %v4065_v35 = vsub.f32 %v3041_v22, %v3553_v23  ;;  %v6115_v45 = vsel %vm5603_vm13, %v4064_v27, 0.0  ;;  %v4589_v22 = vadd.s32 1600, %v8683_v3  ;;  %v3049_v24 = vld [vmem:[%s7640_s18 + $0x630] sm:$0xff] }
 0x58e   : > { %v7128_v48 = vadd.f32 %v7127_v40, %v6616_v31  ;;  %v3554_v31 = vld [vmem:[%s7645_s21 + $0x5f8] sm:$0xff]  ;;  %v5094_v40 = vadd.s32 %v8687_v5, %v4581_v20  ;;  %vm5605_vm15 = vcmp.lt.s32.totalorder %v5093_v32, 9216  ;;  %v6627_v57 = vmul.f32 %v6115_v45, %v6115_v45 }
 0x58f   : > { %v4066_v43 = vsub.f32 %v3042_v30, %v3554_v31  ;;  %v6116_v53 = vsel %vm5604_vm14, %v4065_v35, 0.0  ;;  %v4590_v30 = vadd.s32 1608, %v8683_v3  ;;  %v3050_v32 = vld [vmem:[%s7640_s18 + $0x638] sm:$0xff] }
 0x590   : > { %v7129_v56 = vadd.f32 %v7128_v48, %v6617_v39  ;;  %v3555_v39 = vld [vmem:[%s7645_s21 + $0x600] sm:$0xff]  ;;  %v5095_v48 = vadd.s32 %v8687_v5, %v4582_v28  ;;  %vm5606_vm0 = vcmp.lt.s32.totalorder %v5094_v40, 9216  ;;  %v6628_v1 = vmul.f32 %v6116_v53, %v6116_v53 }
 0x591   : > { %v4067_v51 = vsub.f32 %v3043_v38, %v3555_v39  ;;  %v6117_v61 = vsel %vm5605_vm15, %v4066_v43, 0.0  ;;  %v4591_v38 = vadd.s32 1616, %v8683_v3  ;;  %v3051_v40 = vld [vmem:[%s7640_s18 + $0x640] sm:$0xff] }
 0x592   : > { %v7130_v0 = vadd.f32 %v7129_v56, %v6618_v47  ;;  %v3556_v47 = vld [vmem:[%s7645_s21 + $0x608] sm:$0xff]  ;;  %v5096_v56 = vadd.s32 %v8687_v5, %v4583_v36  ;;  %vm5607_vm1 = vcmp.lt.s32.totalorder %v5095_v48, 9216  ;;  %v6629_v11 = vmul.f32 %v6117_v61, %v6117_v61 }
 0x593   : > { %v4068_v59 = vsub.f32 %v3044_v46, %v3556_v47  ;;  %v6118_v7 = vsel %vm5606_vm0, %v4067_v51, 0.0  ;;  %v4592_v46 = vadd.s32 1624, %v8683_v3  ;;  %v3052_v48 = vld [vmem:[%s7640_s18 + $0x648] sm:$0xff] }
 0x594   : > { %v7131_v10 = vadd.f32 %v7130_v0, %v6619_v55  ;;  %v3557_v55 = vld [vmem:[%s7645_s21 + $0x610] sm:$0xff]  ;;  %v5097_v0 = vadd.s32 %v8687_v5, %v4584_v44  ;;  %vm5608_vm2 = vcmp.lt.s32.totalorder %v5096_v56, 9216  ;;  %v6630_v19 = vmul.f32 %v6118_v7, %v6118_v7 }
 0x595   : > { %v4069_v4 = vsub.f32 %v3045_v54, %v3557_v55  ;;  %v6119_v15 = vsel %vm5607_vm1, %v4068_v59, 0.0  ;;  %v4593_v54 = vadd.s32 1632, %v8683_v3  ;;  %v3053_v56 = vld [vmem:[%s7640_s18 + $0x650] sm:$0xff] }
 0x596   : > { %v7132_v18 = vadd.f32 %v7131_v10, %v6620_v63  ;;  %v3558_v63 = vld [vmem:[%s7645_s21 + $0x618] sm:$0xff]  ;;  %v5098_v10 = vadd.s32 %v8687_v5, %v4585_v52  ;;  %vm5609_vm3 = vcmp.lt.s32.totalorder %v5097_v0, 9216  ;;  %v6631_v27 = vmul.f32 %v6119_v15, %v6119_v15 }
 0x597   : > { %v4070_v13 = vsub.f32 %v3046_v62, %v3558_v63  ;;  %v6120_v23 = vsel %vm5608_vm2, %v4069_v4, 0.0  ;;  %v4594_v62 = vadd.s32 1640, %v8683_v3  ;;  %v3054_v0 = vld [vmem:[%s7640_s18 + $0x658] sm:$0xff] }
 0x598   : > { %v7133_v26 = vadd.f32 %v7132_v18, %v6621_v9  ;;  %v3559_v9 = vld [vmem:[%s7645_s21 + $0x620] sm:$0xff]  ;;  %v5099_v18 = vadd.s32 %v8687_v5, %v4586_v60  ;;  %vm5610_vm4 = vcmp.lt.s32.totalorder %v5098_v10, 9216  ;;  %v6632_v35 = vmul.f32 %v6120_v23, %v6120_v23 }
 0x599   : > { %v4071_v21 = vsub.f32 %v3047_v8, %v3559_v9  ;;  %v6121_v31 = vsel %vm5609_vm3, %v4070_v13, 0.0  ;;  %v4595_v8 = vadd.s32 1648, %v8683_v3  ;;  %v3055_v10 = vld [vmem:[%s7640_s18 + $0x660] sm:$0xff] }
 0x59a   : > { %v7134_v34 = vadd.f32 %v7133_v26, %v6622_v17  ;;  %v3560_v17 = vld [vmem:[%s7645_s21 + $0x628] sm:$0xff]  ;;  %v5100_v26 = vadd.s32 %v8687_v5, %v4587_v6  ;;  %vm5611_vm5 = vcmp.lt.s32.totalorder %v5099_v18, 9216  ;;  %v6633_v43 = vmul.f32 %v6121_v31, %v6121_v31 }
 0x59b   : > { %v4072_v29 = vsub.f32 %v3048_v16, %v3560_v17  ;;  %v6122_v39 = vsel %vm5610_vm4, %v4071_v21, 0.0  ;;  %v4596_v16 = vadd.s32 1656, %v8683_v3  ;;  %v3056_v18 = vld [vmem:[%s7640_s18 + $0x668] sm:$0xff] }
 0x59c   : > { %v7135_v42 = vadd.f32 %v7134_v34, %v6623_v25  ;;  %v3561_v25 = vld [vmem:[%s7645_s21 + $0x630] sm:$0xff]  ;;  %v5101_v34 = vadd.s32 %v8687_v5, %v4588_v14  ;;  %vm5612_vm6 = vcmp.lt.s32.totalorder %v5100_v26, 9216  ;;  %v6634_v51 = vmul.f32 %v6122_v39, %v6122_v39 }
 0x59d   : > { %v4073_v37 = vsub.f32 %v3049_v24, %v3561_v25  ;;  %v6123_v47 = vsel %vm5611_vm5, %v4072_v29, 0.0  ;;  %v4597_v24 = vadd.s32 1664, %v8683_v3  ;;  %v3057_v26 = vld [vmem:[%s7640_s18 + $0x670] sm:$0xff] }
 0x59e   : > { %v7136_v50 = vadd.f32 %v7135_v42, %v6624_v33  ;;  %v3562_v33 = vld [vmem:[%s7645_s21 + $0x638] sm:$0xff]  ;;  %v5102_v42 = vadd.s32 %v8687_v5, %v4589_v22  ;;  %vm5613_vm7 = vcmp.lt.s32.totalorder %v5101_v34, 9216  ;;  %v6635_v59 = vmul.f32 %v6123_v47, %v6123_v47 }
 0x59f   : > { %v4074_v45 = vsub.f32 %v3050_v32, %v3562_v33  ;;  %v6124_v55 = vsel %vm5612_vm6, %v4073_v37, 0.0  ;;  %v4598_v32 = vadd.s32 1672, %v8683_v3  ;;  %v3058_v34 = vld [vmem:[%s7640_s18 + $0x678] sm:$0xff] }
 0x5a0   : > { %v7137_v58 = vadd.f32 %v7136_v50, %v6625_v41  ;;  %v3563_v41 = vld [vmem:[%s7645_s21 + $0x640] sm:$0xff]  ;;  %v5103_v50 = vadd.s32 %v8687_v5, %v4590_v30  ;;  %vm5614_vm8 = vcmp.lt.s32.totalorder %v5102_v42, 9216  ;;  %v6636_v4 = vmul.f32 %v6124_v55, %v6124_v55 }
 0x5a1   : > { %v4075_v53 = vsub.f32 %v3051_v40, %v3563_v41  ;;  %v6125_v63 = vsel %vm5613_vm7, %v4074_v45, 0.0  ;;  %v4599_v40 = vadd.s32 1680, %v8683_v3  ;;  %v3059_v42 = vld [vmem:[%s7640_s18 + $0x680] sm:$0xff] }
 0x5a2   : > { %v7138_v2 = vadd.f32 %v7137_v58, %v6626_v49  ;;  %v3564_v49 = vld [vmem:[%s7645_s21 + $0x648] sm:$0xff]  ;;  %v5104_v58 = vadd.s32 %v8687_v5, %v4591_v38  ;;  %vm5615_vm9 = vcmp.lt.s32.totalorder %v5103_v50, 9216  ;;  %v6637_v13 = vmul.f32 %v6125_v63, %v6125_v63 }
 0x5a3   : > { %v4076_v61 = vsub.f32 %v3052_v48, %v3564_v49  ;;  %v6126_v9 = vsel %vm5614_vm8, %v4075_v53, 0.0  ;;  %v4600_v48 = vadd.s32 1688, %v8683_v3  ;;  %v3060_v50 = vld [vmem:[%s7640_s18 + $0x688] sm:$0xff] }
 0x5a4   : > { %v7139_v12 = vadd.f32 %v7138_v2, %v6627_v57  ;;  %v3565_v57 = vld [vmem:[%s7645_s21 + $0x650] sm:$0xff]  ;;  %v5105_v2 = vadd.s32 %v8687_v5, %v4592_v46  ;;  %vm5616_vm10 = vcmp.lt.s32.totalorder %v5104_v58, 9216  ;;  %v6638_v21 = vmul.f32 %v6126_v9, %v6126_v9 }
 0x5a5   : > { %v4077_v7 = vsub.f32 %v3053_v56, %v3565_v57  ;;  %v6127_v17 = vsel %vm5615_vm9, %v4076_v61, 0.0  ;;  %v4601_v56 = vadd.s32 1696, %v8683_v3  ;;  %v3061_v58 = vld [vmem:[%s7640_s18 + $0x690] sm:$0xff] }
 0x5a6   : > { %v7140_v20 = vadd.f32 %v7139_v12, %v6628_v1  ;;  %v3566_v1 = vld [vmem:[%s7645_s21 + $0x658] sm:$0xff]  ;;  %v5106_v12 = vadd.s32 %v8687_v5, %v4593_v54  ;;  %vm5617_vm11 = vcmp.lt.s32.totalorder %v5105_v2, 9216  ;;  %v6639_v29 = vmul.f32 %v6127_v17, %v6127_v17 }
 0x5a7   : > { %v4078_v15 = vsub.f32 %v3054_v0, %v3566_v1  ;;  %v6128_v25 = vsel %vm5616_vm10, %v4077_v7, 0.0  ;;  %v4602_v0 = vadd.s32 1704, %v8683_v3  ;;  %v3062_v2 = vld [vmem:[%s7640_s18 + $0x698] sm:$0xff] }
 0x5a8   : > { %v7141_v28 = vadd.f32 %v7140_v20, %v6629_v11  ;;  %v3567_v11 = vld [vmem:[%s7645_s21 + $0x660] sm:$0xff]  ;;  %v5107_v20 = vadd.s32 %v8687_v5, %v4594_v62  ;;  %vm5618_vm12 = vcmp.lt.s32.totalorder %v5106_v12, 9216  ;;  %v6640_v37 = vmul.f32 %v6128_v25, %v6128_v25 }
 0x5a9   : > { %v4079_v23 = vsub.f32 %v3055_v10, %v3567_v11  ;;  %v6129_v33 = vsel %vm5617_vm11, %v4078_v15, 0.0  ;;  %v4603_v10 = vadd.s32 1712, %v8683_v3  ;;  %v3063_v12 = vld [vmem:[%s7640_s18 + $0x6a0] sm:$0xff] }
 0x5aa   : > { %v7142_v36 = vadd.f32 %v7141_v28, %v6630_v19  ;;  %v3568_v19 = vld [vmem:[%s7645_s21 + $0x668] sm:$0xff]  ;;  %v5108_v28 = vadd.s32 %v8687_v5, %v4595_v8  ;;  %vm5619_vm13 = vcmp.lt.s32.totalorder %v5107_v20, 9216  ;;  %v6641_v45 = vmul.f32 %v6129_v33, %v6129_v33 }
 0x5ab   : > { %v4080_v31 = vsub.f32 %v3056_v18, %v3568_v19  ;;  %v6130_v41 = vsel %vm5618_vm12, %v4079_v23, 0.0  ;;  %v4604_v18 = vadd.s32 1720, %v8683_v3  ;;  %v3064_v20 = vld [vmem:[%s7640_s18 + $0x6a8] sm:$0xff] }
 0x5ac   : > { %v7143_v44 = vadd.f32 %v7142_v36, %v6631_v27  ;;  %v3569_v27 = vld [vmem:[%s7645_s21 + $0x670] sm:$0xff]  ;;  %v5109_v36 = vadd.s32 %v8687_v5, %v4596_v16  ;;  %vm5620_vm14 = vcmp.lt.s32.totalorder %v5108_v28, 9216  ;;  %v6642_v53 = vmul.f32 %v6130_v41, %v6130_v41 }
 0x5ad   : > { %v4081_v39 = vsub.f32 %v3057_v26, %v3569_v27  ;;  %v6131_v49 = vsel %vm5619_vm13, %v4080_v31, 0.0  ;;  %v4605_v26 = vadd.s32 1728, %v8683_v3  ;;  %v3065_v28 = vld [vmem:[%s7640_s18 + $0x6b0] sm:$0xff] }
 0x5ae   : > { %v7144_v52 = vadd.f32 %v7143_v44, %v6632_v35  ;;  %v3570_v35 = vld [vmem:[%s7645_s21 + $0x678] sm:$0xff]  ;;  %v5110_v44 = vadd.s32 %v8687_v5, %v4597_v24  ;;  %vm5621_vm15 = vcmp.lt.s32.totalorder %v5109_v36, 9216  ;;  %v6643_v61 = vmul.f32 %v6131_v49, %v6131_v49 }
 0x5af   : > { %v4082_v47 = vsub.f32 %v3058_v34, %v3570_v35  ;;  %v6132_v57 = vsel %vm5620_vm14, %v4081_v39, 0.0  ;;  %v4606_v34 = vadd.s32 1736, %v8683_v3  ;;  %v3066_v36 = vld [vmem:[%s7640_s18 + $0x6b8] sm:$0xff] }
 0x5b0   : > { %v7145_v60 = vadd.f32 %v7144_v52, %v6633_v43  ;;  %v3571_v43 = vld [vmem:[%s7645_s21 + $0x680] sm:$0xff]  ;;  %v5111_v52 = vadd.s32 %v8687_v5, %v4598_v32  ;;  %vm5622_vm0 = vcmp.lt.s32.totalorder %v5110_v44, 9216  ;;  %v6644_v7 = vmul.f32 %v6132_v57, %v6132_v57 }
 0x5b1   : > { %v4083_v55 = vsub.f32 %v3059_v42, %v3571_v43  ;;  %v6133_v1 = vsel %vm5621_vm15, %v4082_v47, 0.0  ;;  %v4607_v42 = vadd.s32 1744, %v8683_v3  ;;  %v3067_v44 = vld [vmem:[%s7640_s18 + $0x6c0] sm:$0xff] }
 0x5b2   : > { %v7146_v6 = vadd.f32 %v7145_v60, %v6634_v51  ;;  %v3572_v51 = vld [vmem:[%s7645_s21 + $0x688] sm:$0xff]  ;;  %v5112_v60 = vadd.s32 %v8687_v5, %v4599_v40  ;;  %vm5623_vm1 = vcmp.lt.s32.totalorder %v5111_v52, 9216  ;;  %v6645_v15 = vmul.f32 %v6133_v1, %v6133_v1 }
 0x5b3   : > { %v4084_v63 = vsub.f32 %v3060_v50, %v3572_v51  ;;  %v6134_v11 = vsel %vm5622_vm0, %v4083_v55, 0.0  ;;  %v4608_v50 = vadd.s32 1752, %v8683_v3  ;;  %v3068_v52 = vld [vmem:[%s7640_s18 + $0x6c8] sm:$0xff] }
 0x5b4   : > { %v7147_v14 = vadd.f32 %v7146_v6, %v6635_v59  ;;  %v3573_v59 = vld [vmem:[%s7645_s21 + $0x690] sm:$0xff]  ;;  %v5113_v6 = vadd.s32 %v8687_v5, %v4600_v48  ;;  %vm5624_vm2 = vcmp.lt.s32.totalorder %v5112_v60, 9216  ;;  %v6646_v23 = vmul.f32 %v6134_v11, %v6134_v11 }
 0x5b5   : > { %v4085_v9 = vsub.f32 %v3061_v58, %v3573_v59  ;;  %v6135_v19 = vsel %vm5623_vm1, %v4084_v63, 0.0  ;;  %v4609_v58 = vadd.s32 1760, %v8683_v3  ;;  %v3069_v60 = vld [vmem:[%s7640_s18 + $0x6d0] sm:$0xff] }
 0x5b6   : > { %v7148_v22 = vadd.f32 %v7147_v14, %v6636_v4  ;;  %v3574_v4 = vld [vmem:[%s7645_s21 + $0x698] sm:$0xff]  ;;  %v5114_v14 = vadd.s32 %v8687_v5, %v4601_v56  ;;  %vm5625_vm3 = vcmp.lt.s32.totalorder %v5113_v6, 9216  ;;  %v6647_v31 = vmul.f32 %v6135_v19, %v6135_v19 }
 0x5b7   : > { %v4086_v17 = vsub.f32 %v3062_v2, %v3574_v4  ;;  %v6136_v27 = vsel %vm5624_vm2, %v4085_v9, 0.0  ;;  %v4610_v2 = vadd.s32 1768, %v8683_v3  ;;  %v3070_v6 = vld [vmem:[%s7640_s18 + $0x6d8] sm:$0xff] }
 0x5b8   : > { %v7149_v30 = vadd.f32 %v7148_v22, %v6637_v13  ;;  %v3575_v13 = vld [vmem:[%s7645_s21 + $0x6a0] sm:$0xff]  ;;  %v5115_v22 = vadd.s32 %v8687_v5, %v4602_v0  ;;  %vm5626_vm4 = vcmp.lt.s32.totalorder %v5114_v14, 9216  ;;  %v6648_v39 = vmul.f32 %v6136_v27, %v6136_v27 }
 0x5b9   : > { %v4087_v25 = vsub.f32 %v3063_v12, %v3575_v13  ;;  %v6137_v35 = vsel %vm5625_vm3, %v4086_v17, 0.0  ;;  %v4611_v12 = vadd.s32 1776, %v8683_v3  ;;  %v3071_v14 = vld [vmem:[%s7640_s18 + $0x6e0] sm:$0xff] }
 0x5ba   : > { %v7150_v38 = vadd.f32 %v7149_v30, %v6638_v21  ;;  %v3576_v21 = vld [vmem:[%s7645_s21 + $0x6a8] sm:$0xff]  ;;  %v5116_v30 = vadd.s32 %v8687_v5, %v4603_v10  ;;  %vm5627_vm5 = vcmp.lt.s32.totalorder %v5115_v22, 9216  ;;  %v6649_v47 = vmul.f32 %v6137_v35, %v6137_v35 }
 0x5bb   : > { %v4088_v33 = vsub.f32 %v3064_v20, %v3576_v21  ;;  %v6138_v43 = vsel %vm5626_vm4, %v4087_v25, 0.0  ;;  %v4612_v20 = vadd.s32 1784, %v8683_v3  ;;  %v3072_v22 = vld [vmem:[%s7640_s18 + $0x6e8] sm:$0xff] }
 0x5bc   : > { %v7151_v46 = vadd.f32 %v7150_v38, %v6639_v29  ;;  %v3577_v29 = vld [vmem:[%s7645_s21 + $0x6b0] sm:$0xff]  ;;  %v5117_v38 = vadd.s32 %v8687_v5, %v4604_v18  ;;  %vm5628_vm6 = vcmp.lt.s32.totalorder %v5116_v30, 9216  ;;  %v6650_v55 = vmul.f32 %v6138_v43, %v6138_v43 }
 0x5bd   : > { %v4089_v41 = vsub.f32 %v3065_v28, %v3577_v29  ;;  %v6139_v51 = vsel %vm5627_vm5, %v4088_v33, 0.0  ;;  %v4613_v28 = vadd.s32 1792, %v8683_v3  ;;  %v3073_v30 = vld [vmem:[%s7640_s18 + $0x6f0] sm:$0xff] }
 0x5be   : > { %v7152_v54 = vadd.f32 %v7151_v46, %v6640_v37  ;;  %v3578_v37 = vld [vmem:[%s7645_s21 + $0x6b8] sm:$0xff]  ;;  %v5118_v46 = vadd.s32 %v8687_v5, %v4605_v26  ;;  %vm5629_vm7 = vcmp.lt.s32.totalorder %v5117_v38, 9216  ;;  %v6651_v63 = vmul.f32 %v6139_v51, %v6139_v51 }
 0x5bf   : > { %v4090_v49 = vsub.f32 %v3066_v36, %v3578_v37  ;;  %v6140_v59 = vsel %vm5628_vm6, %v4089_v41, 0.0  ;;  %v4614_v36 = vadd.s32 1800, %v8683_v3  ;;  %v3074_v38 = vld [vmem:[%s7640_s18 + $0x6f8] sm:$0xff] }
 0x5c0   : > { %v7153_v62 = vadd.f32 %v7152_v54, %v6641_v45  ;;  %v3579_v45 = vld [vmem:[%s7645_s21 + $0x6c0] sm:$0xff]  ;;  %v5119_v54 = vadd.s32 %v8687_v5, %v4606_v34  ;;  %vm5630_vm8 = vcmp.lt.s32.totalorder %v5118_v46, 9216  ;;  %v6652_v9 = vmul.f32 %v6140_v59, %v6140_v59 }
 0x5c1   : > { %v4091_v57 = vsub.f32 %v3067_v44, %v3579_v45  ;;  %v6141_v4 = vsel %vm5629_vm7, %v4090_v49, 0.0  ;;  %v4615_v44 = vadd.s32 1808, %v8683_v3  ;;  %v3075_v46 = vld [vmem:[%s7640_s18 + $0x700] sm:$0xff] }
 0x5c2   : > { %v7154_v8 = vadd.f32 %v7153_v62, %v6642_v53  ;;  %v3580_v53 = vld [vmem:[%s7645_s21 + $0x6c8] sm:$0xff]  ;;  %v5120_v62 = vadd.s32 %v8687_v5, %v4607_v42  ;;  %vm5631_vm9 = vcmp.lt.s32.totalorder %v5119_v54, 9216  ;;  %v6653_v17 = vmul.f32 %v6141_v4, %v6141_v4 }
 0x5c3   : > { %v4092_v1 = vsub.f32 %v3068_v52, %v3580_v53  ;;  %v6142_v13 = vsel %vm5630_vm8, %v4091_v57, 0.0  ;;  %v4616_v52 = vadd.s32 1816, %v8683_v3  ;;  %v3076_v54 = vld [vmem:[%s7640_s18 + $0x708] sm:$0xff] }
 0x5c4   : > { %v7155_v16 = vadd.f32 %v7154_v8, %v6643_v61  ;;  %v3581_v61 = vld [vmem:[%s7645_s21 + $0x6d0] sm:$0xff]  ;;  %v5121_v8 = vadd.s32 %v8687_v5, %v4608_v50  ;;  %vm5632_vm10 = vcmp.lt.s32.totalorder %v5120_v62, 9216  ;;  %v6654_v25 = vmul.f32 %v6142_v13, %v6142_v13 }
 0x5c5   : > { %v4093_v11 = vsub.f32 %v3069_v60, %v3581_v61  ;;  %v6143_v21 = vsel %vm5631_vm9, %v4092_v1, 0.0  ;;  %v4617_v60 = vadd.s32 1824, %v8683_v3  ;;  %v3077_v62 = vld [vmem:[%s7640_s18 + $0x710] sm:$0xff] }
 0x5c6   : > { %v7156_v24 = vadd.f32 %v7155_v16, %v6644_v7  ;;  %v3582_v7 = vld [vmem:[%s7645_s21 + $0x6d8] sm:$0xff]  ;;  %v5122_v16 = vadd.s32 %v8687_v5, %v4609_v58  ;;  %vm5633_vm11 = vcmp.lt.s32.totalorder %v5121_v8, 9216  ;;  %v6655_v33 = vmul.f32 %v6143_v21, %v6143_v21 }
 0x5c7   : > { %v4094_v19 = vsub.f32 %v3070_v6, %v3582_v7  ;;  %v6144_v29 = vsel %vm5632_vm10, %v4093_v11, 0.0  ;;  %v4618_v6 = vadd.s32 1832, %v8683_v3  ;;  %v3078_v8 = vld [vmem:[%s7640_s18 + $0x718] sm:$0xff] }
 0x5c8   : > { %v7157_v32 = vadd.f32 %v7156_v24, %v6645_v15  ;;  %v3583_v15 = vld [vmem:[%s7645_s21 + $0x6e0] sm:$0xff]  ;;  %v5123_v24 = vadd.s32 %v8687_v5, %v4610_v2  ;;  %vm5634_vm12 = vcmp.lt.s32.totalorder %v5122_v16, 9216  ;;  %v6656_v41 = vmul.f32 %v6144_v29, %v6144_v29 }
 0x5c9   : > { %v4095_v27 = vsub.f32 %v3071_v14, %v3583_v15  ;;  %v6145_v37 = vsel %vm5633_vm11, %v4094_v19, 0.0  ;;  %v4619_v14 = vadd.s32 1840, %v8683_v3  ;;  %v3079_v16 = vld [vmem:[%s7640_s18 + $0x720] sm:$0xff] }
 0x5ca   : > { %v7158_v40 = vadd.f32 %v7157_v32, %v6646_v23  ;;  %v3584_v23 = vld [vmem:[%s7645_s21 + $0x6e8] sm:$0xff]  ;;  %v5124_v32 = vadd.s32 %v8687_v5, %v4611_v12  ;;  %vm5635_vm13 = vcmp.lt.s32.totalorder %v5123_v24, 9216  ;;  %v6657_v49 = vmul.f32 %v6145_v37, %v6145_v37 }
 0x5cb   : > { %v4096_v35 = vsub.f32 %v3072_v22, %v3584_v23  ;;  %v6146_v45 = vsel %vm5634_vm12, %v4095_v27, 0.0  ;;  %v4620_v22 = vadd.s32 1848, %v8683_v3  ;;  %v3080_v24 = vld [vmem:[%s7640_s18 + $0x728] sm:$0xff] }
 0x5cc   : > { %v7159_v48 = vadd.f32 %v7158_v40, %v6647_v31  ;;  %v3585_v31 = vld [vmem:[%s7645_s21 + $0x6f0] sm:$0xff]  ;;  %v5125_v40 = vadd.s32 %v8687_v5, %v4612_v20  ;;  %vm5636_vm14 = vcmp.lt.s32.totalorder %v5124_v32, 9216  ;;  %v6658_v57 = vmul.f32 %v6146_v45, %v6146_v45 }
 0x5cd   : > { %v4097_v43 = vsub.f32 %v3073_v30, %v3585_v31  ;;  %v6147_v53 = vsel %vm5635_vm13, %v4096_v35, 0.0  ;;  %v4621_v30 = vadd.s32 1856, %v8683_v3  ;;  %v3081_v32 = vld [vmem:[%s7640_s18 + $0x730] sm:$0xff] }
 0x5ce   : > { %v7160_v56 = vadd.f32 %v7159_v48, %v6648_v39  ;;  %v3586_v39 = vld [vmem:[%s7645_s21 + $0x6f8] sm:$0xff]  ;;  %v5126_v48 = vadd.s32 %v8687_v5, %v4613_v28  ;;  %vm5637_vm15 = vcmp.lt.s32.totalorder %v5125_v40, 9216  ;;  %v6659_v1 = vmul.f32 %v6147_v53, %v6147_v53 }
 0x5cf   : > { %v4098_v51 = vsub.f32 %v3074_v38, %v3586_v39  ;;  %v6148_v61 = vsel %vm5636_vm14, %v4097_v43, 0.0  ;;  %v4622_v38 = vadd.s32 1864, %v8683_v3  ;;  %v3082_v40 = vld [vmem:[%s7640_s18 + $0x738] sm:$0xff] }
 0x5d0   : > { %v7161_v0 = vadd.f32 %v7160_v56, %v6649_v47  ;;  %v3587_v47 = vld [vmem:[%s7645_s21 + $0x700] sm:$0xff]  ;;  %v5127_v56 = vadd.s32 %v8687_v5, %v4614_v36  ;;  %vm5638_vm0 = vcmp.lt.s32.totalorder %v5126_v48, 9216  ;;  %v6660_v11 = vmul.f32 %v6148_v61, %v6148_v61 }
 0x5d1   : > { %v4099_v59 = vsub.f32 %v3075_v46, %v3587_v47  ;;  %v6149_v7 = vsel %vm5637_vm15, %v4098_v51, 0.0  ;;  %v4623_v46 = vadd.s32 1872, %v8683_v3  ;;  %v3083_v48 = vld [vmem:[%s7640_s18 + $0x740] sm:$0xff] }
 0x5d2   : > { %v7162_v10 = vadd.f32 %v7161_v0, %v6650_v55  ;;  %v3588_v55 = vld [vmem:[%s7645_s21 + $0x708] sm:$0xff]  ;;  %v5128_v0 = vadd.s32 %v8687_v5, %v4615_v44  ;;  %vm5639_vm1 = vcmp.lt.s32.totalorder %v5127_v56, 9216  ;;  %v6661_v19 = vmul.f32 %v6149_v7, %v6149_v7 }
 0x5d3   : > { %v4100_v4 = vsub.f32 %v3076_v54, %v3588_v55  ;;  %v6150_v15 = vsel %vm5638_vm0, %v4099_v59, 0.0  ;;  %v4624_v54 = vadd.s32 1880, %v8683_v3  ;;  %v3084_v56 = vld [vmem:[%s7640_s18 + $0x748] sm:$0xff] }
 0x5d4   : > { %v7163_v18 = vadd.f32 %v7162_v10, %v6651_v63  ;;  %v3589_v63 = vld [vmem:[%s7645_s21 + $0x710] sm:$0xff]  ;;  %v5129_v10 = vadd.s32 %v8687_v5, %v4616_v52  ;;  %vm5640_vm2 = vcmp.lt.s32.totalorder %v5128_v0, 9216  ;;  %v6662_v27 = vmul.f32 %v6150_v15, %v6150_v15 }
 0x5d5   : > { %v4101_v13 = vsub.f32 %v3077_v62, %v3589_v63  ;;  %v6151_v23 = vsel %vm5639_vm1, %v4100_v4, 0.0  ;;  %v4625_v62 = vadd.s32 1888, %v8683_v3  ;;  %v3085_v0 = vld [vmem:[%s7640_s18 + $0x750] sm:$0xff] }
 0x5d6   : > { %v7164_v26 = vadd.f32 %v7163_v18, %v6652_v9  ;;  %v3590_v9 = vld [vmem:[%s7645_s21 + $0x718] sm:$0xff]  ;;  %v5130_v18 = vadd.s32 %v8687_v5, %v4617_v60  ;;  %vm5641_vm3 = vcmp.lt.s32.totalorder %v5129_v10, 9216  ;;  %v6663_v35 = vmul.f32 %v6151_v23, %v6151_v23 }
 0x5d7   : > { %v4102_v21 = vsub.f32 %v3078_v8, %v3590_v9  ;;  %v6152_v31 = vsel %vm5640_vm2, %v4101_v13, 0.0  ;;  %v4626_v8 = vadd.s32 1896, %v8683_v3  ;;  %v3086_v10 = vld [vmem:[%s7640_s18 + $0x758] sm:$0xff] }
 0x5d8   : > { %v7165_v34 = vadd.f32 %v7164_v26, %v6653_v17  ;;  %v3591_v17 = vld [vmem:[%s7645_s21 + $0x720] sm:$0xff]  ;;  %v5131_v26 = vadd.s32 %v8687_v5, %v4618_v6  ;;  %vm5642_vm4 = vcmp.lt.s32.totalorder %v5130_v18, 9216  ;;  %v6664_v43 = vmul.f32 %v6152_v31, %v6152_v31 }
 0x5d9   : > { %v4103_v29 = vsub.f32 %v3079_v16, %v3591_v17  ;;  %v6153_v39 = vsel %vm5641_vm3, %v4102_v21, 0.0  ;;  %v4627_v16 = vadd.s32 1904, %v8683_v3  ;;  %v3087_v18 = vld [vmem:[%s7640_s18 + $0x760] sm:$0xff] }
 0x5da   : > { %v7166_v42 = vadd.f32 %v7165_v34, %v6654_v25  ;;  %v3592_v25 = vld [vmem:[%s7645_s21 + $0x728] sm:$0xff]  ;;  %v5132_v34 = vadd.s32 %v8687_v5, %v4619_v14  ;;  %vm5643_vm5 = vcmp.lt.s32.totalorder %v5131_v26, 9216  ;;  %v6665_v51 = vmul.f32 %v6153_v39, %v6153_v39 }
 0x5db   : > { %v4104_v37 = vsub.f32 %v3080_v24, %v3592_v25  ;;  %v6154_v47 = vsel %vm5642_vm4, %v4103_v29, 0.0  ;;  %v4628_v24 = vadd.s32 1912, %v8683_v3  ;;  %v3088_v26 = vld [vmem:[%s7640_s18 + $0x768] sm:$0xff] }
 0x5dc   : > { %v7167_v50 = vadd.f32 %v7166_v42, %v6655_v33  ;;  %v3593_v33 = vld [vmem:[%s7645_s21 + $0x730] sm:$0xff]  ;;  %v5133_v42 = vadd.s32 %v8687_v5, %v4620_v22  ;;  %vm5644_vm6 = vcmp.lt.s32.totalorder %v5132_v34, 9216  ;;  %v6666_v59 = vmul.f32 %v6154_v47, %v6154_v47 }
 0x5dd   : > { %v4105_v45 = vsub.f32 %v3081_v32, %v3593_v33  ;;  %v6155_v55 = vsel %vm5643_vm5, %v4104_v37, 0.0  ;;  %v4629_v32 = vadd.s32 1920, %v8683_v3  ;;  %v3089_v34 = vld [vmem:[%s7640_s18 + $0x770] sm:$0xff] }
 0x5de   : > { %v7168_v58 = vadd.f32 %v7167_v50, %v6656_v41  ;;  %v3594_v41 = vld [vmem:[%s7645_s21 + $0x738] sm:$0xff]  ;;  %v5134_v50 = vadd.s32 %v8687_v5, %v4621_v30  ;;  %vm5645_vm7 = vcmp.lt.s32.totalorder %v5133_v42, 9216  ;;  %v6667_v4 = vmul.f32 %v6155_v55, %v6155_v55 }
 0x5df   : > { %v4106_v53 = vsub.f32 %v3082_v40, %v3594_v41  ;;  %v6156_v63 = vsel %vm5644_vm6, %v4105_v45, 0.0  ;;  %v4630_v40 = vadd.s32 1928, %v8683_v3  ;;  %v3090_v42 = vld [vmem:[%s7640_s18 + $0x778] sm:$0xff] }
 0x5e0   : > { %v7169_v2 = vadd.f32 %v7168_v58, %v6657_v49  ;;  %v3595_v49 = vld [vmem:[%s7645_s21 + $0x740] sm:$0xff]  ;;  %v5135_v58 = vadd.s32 %v8687_v5, %v4622_v38  ;;  %vm5646_vm8 = vcmp.lt.s32.totalorder %v5134_v50, 9216  ;;  %v6668_v13 = vmul.f32 %v6156_v63, %v6156_v63 }
 0x5e1   : > { %v4107_v61 = vsub.f32 %v3083_v48, %v3595_v49  ;;  %v6157_v9 = vsel %vm5645_vm7, %v4106_v53, 0.0  ;;  %v4631_v48 = vadd.s32 1936, %v8683_v3  ;;  %v3091_v50 = vld [vmem:[%s7640_s18 + $0x780] sm:$0xff] }
 0x5e2   : > { %v7170_v12 = vadd.f32 %v7169_v2, %v6658_v57  ;;  %v3596_v57 = vld [vmem:[%s7645_s21 + $0x748] sm:$0xff]  ;;  %v5136_v2 = vadd.s32 %v8687_v5, %v4623_v46  ;;  %vm5647_vm9 = vcmp.lt.s32.totalorder %v5135_v58, 9216  ;;  %v6669_v21 = vmul.f32 %v6157_v9, %v6157_v9 }
 0x5e3   : > { %v4108_v7 = vsub.f32 %v3084_v56, %v3596_v57  ;;  %v6158_v17 = vsel %vm5646_vm8, %v4107_v61, 0.0  ;;  %v4632_v56 = vadd.s32 1944, %v8683_v3  ;;  %v3092_v58 = vld [vmem:[%s7640_s18 + $0x788] sm:$0xff] }
 0x5e4   : > { %v7171_v20 = vadd.f32 %v7170_v12, %v6659_v1  ;;  %v3597_v1 = vld [vmem:[%s7645_s21 + $0x750] sm:$0xff]  ;;  %v5137_v12 = vadd.s32 %v8687_v5, %v4624_v54  ;;  %vm5648_vm10 = vcmp.lt.s32.totalorder %v5136_v2, 9216  ;;  %v6670_v29 = vmul.f32 %v6158_v17, %v6158_v17 }
 0x5e5   : > { %v4109_v15 = vsub.f32 %v3085_v0, %v3597_v1  ;;  %v6159_v25 = vsel %vm5647_vm9, %v4108_v7, 0.0  ;;  %v4633_v0 = vadd.s32 1952, %v8683_v3  ;;  %v3093_v2 = vld [vmem:[%s7640_s18 + $0x790] sm:$0xff] }
 0x5e6   : > { %v7172_v28 = vadd.f32 %v7171_v20, %v6660_v11  ;;  %v3598_v11 = vld [vmem:[%s7645_s21 + $0x758] sm:$0xff]  ;;  %v5138_v20 = vadd.s32 %v8687_v5, %v4625_v62  ;;  %vm5649_vm11 = vcmp.lt.s32.totalorder %v5137_v12, 9216  ;;  %v6671_v37 = vmul.f32 %v6159_v25, %v6159_v25 }
 0x5e7   : > { %v4110_v23 = vsub.f32 %v3086_v10, %v3598_v11  ;;  %v6160_v33 = vsel %vm5648_vm10, %v4109_v15, 0.0  ;;  %v4634_v10 = vadd.s32 1960, %v8683_v3  ;;  %v3094_v12 = vld [vmem:[%s7640_s18 + $0x798] sm:$0xff] }
 0x5e8   : > { %v7173_v36 = vadd.f32 %v7172_v28, %v6661_v19  ;;  %v3599_v19 = vld [vmem:[%s7645_s21 + $0x760] sm:$0xff]  ;;  %v5139_v28 = vadd.s32 %v8687_v5, %v4626_v8  ;;  %vm5650_vm12 = vcmp.lt.s32.totalorder %v5138_v20, 9216  ;;  %v6672_v45 = vmul.f32 %v6160_v33, %v6160_v33 }
 0x5e9   : > { %v4111_v31 = vsub.f32 %v3087_v18, %v3599_v19  ;;  %v6161_v41 = vsel %vm5649_vm11, %v4110_v23, 0.0  ;;  %v4635_v18 = vadd.s32 1968, %v8683_v3  ;;  %v3095_v20 = vld [vmem:[%s7640_s18 + $0x7a0] sm:$0xff] }
 0x5ea   : > { %v7174_v44 = vadd.f32 %v7173_v36, %v6662_v27  ;;  %v3600_v27 = vld [vmem:[%s7645_s21 + $0x768] sm:$0xff]  ;;  %v5140_v36 = vadd.s32 %v8687_v5, %v4627_v16  ;;  %vm5651_vm13 = vcmp.lt.s32.totalorder %v5139_v28, 9216  ;;  %v6673_v53 = vmul.f32 %v6161_v41, %v6161_v41 }
 0x5eb   : > { %v4112_v39 = vsub.f32 %v3088_v26, %v3600_v27  ;;  %v6162_v49 = vsel %vm5650_vm12, %v4111_v31, 0.0  ;;  %v4636_v26 = vadd.s32 1976, %v8683_v3  ;;  %v3096_v28 = vld [vmem:[%s7640_s18 + $0x7a8] sm:$0xff] }
 0x5ec   : > { %v7175_v52 = vadd.f32 %v7174_v44, %v6663_v35  ;;  %v3601_v35 = vld [vmem:[%s7645_s21 + $0x770] sm:$0xff]  ;;  %v5141_v44 = vadd.s32 %v8687_v5, %v4628_v24  ;;  %vm5652_vm14 = vcmp.lt.s32.totalorder %v5140_v36, 9216  ;;  %v6674_v61 = vmul.f32 %v6162_v49, %v6162_v49 }
 0x5ed   : > { %v4113_v47 = vsub.f32 %v3089_v34, %v3601_v35  ;;  %v6163_v57 = vsel %vm5651_vm13, %v4112_v39, 0.0  ;;  %v4637_v34 = vadd.s32 1984, %v8683_v3  ;;  %v3097_v36 = vld [vmem:[%s7640_s18 + $0x7b0] sm:$0xff] }
 0x5ee   : > { %v7176_v60 = vadd.f32 %v7175_v52, %v6664_v43  ;;  %v3602_v43 = vld [vmem:[%s7645_s21 + $0x778] sm:$0xff]  ;;  %v5142_v52 = vadd.s32 %v8687_v5, %v4629_v32  ;;  %vm5653_vm15 = vcmp.lt.s32.totalorder %v5141_v44, 9216  ;;  %v6675_v7 = vmul.f32 %v6163_v57, %v6163_v57 }
 0x5ef   : > { %v4114_v55 = vsub.f32 %v3090_v42, %v3602_v43  ;;  %v6164_v1 = vsel %vm5652_vm14, %v4113_v47, 0.0  ;;  %v4638_v42 = vadd.s32 1992, %v8683_v3  ;;  %v3098_v44 = vld [vmem:[%s7640_s18 + $0x7b8] sm:$0xff] }
 0x5f0   : > { %v7177_v6 = vadd.f32 %v7176_v60, %v6665_v51  ;;  %v3603_v51 = vld [vmem:[%s7645_s21 + $0x780] sm:$0xff]  ;;  %v5143_v60 = vadd.s32 %v8687_v5, %v4630_v40  ;;  %vm5654_vm0 = vcmp.lt.s32.totalorder %v5142_v52, 9216  ;;  %v6676_v15 = vmul.f32 %v6164_v1, %v6164_v1 }
 0x5f1   : > { %v4115_v63 = vsub.f32 %v3091_v50, %v3603_v51  ;;  %v6165_v11 = vsel %vm5653_vm15, %v4114_v55, 0.0  ;;  %v4639_v50 = vadd.s32 2000, %v8683_v3  ;;  %v3099_v52 = vld [vmem:[%s7640_s18 + $0x7c0] sm:$0xff] }
 0x5f2   : > { %v7178_v14 = vadd.f32 %v7177_v6, %v6666_v59  ;;  %v3604_v59 = vld [vmem:[%s7645_s21 + $0x788] sm:$0xff]  ;;  %v5144_v6 = vadd.s32 %v8687_v5, %v4631_v48  ;;  %vm5655_vm1 = vcmp.lt.s32.totalorder %v5143_v60, 9216  ;;  %v6677_v23 = vmul.f32 %v6165_v11, %v6165_v11 }
 0x5f3   : > { %v4116_v9 = vsub.f32 %v3092_v58, %v3604_v59  ;;  %v6166_v19 = vsel %vm5654_vm0, %v4115_v63, 0.0  ;;  %v4640_v58 = vadd.s32 2008, %v8683_v3  ;;  %v3100_v60 = vld [vmem:[%s7640_s18 + $0x7c8] sm:$0xff] }
 0x5f4   : > { %v7179_v22 = vadd.f32 %v7178_v14, %v6667_v4  ;;  %v3605_v4 = vld [vmem:[%s7645_s21 + $0x790] sm:$0xff]  ;;  %v5145_v14 = vadd.s32 %v8687_v5, %v4632_v56  ;;  %vm5656_vm2 = vcmp.lt.s32.totalorder %v5144_v6, 9216  ;;  %v6678_v31 = vmul.f32 %v6166_v19, %v6166_v19 }
 0x5f5   : > { %v4117_v17 = vsub.f32 %v3093_v2, %v3605_v4  ;;  %v6167_v27 = vsel %vm5655_vm1, %v4116_v9, 0.0  ;;  %v4641_v2 = vadd.s32 2016, %v8683_v3  ;;  %v3101_v6 = vld [vmem:[%s7640_s18 + $0x7d0] sm:$0xff] }
 0x5f6   : > { %v7180_v30 = vadd.f32 %v7179_v22, %v6668_v13  ;;  %v3606_v13 = vld [vmem:[%s7645_s21 + $0x798] sm:$0xff]  ;;  %v5146_v22 = vadd.s32 %v8687_v5, %v4633_v0  ;;  %vm5657_vm3 = vcmp.lt.s32.totalorder %v5145_v14, 9216  ;;  %v6679_v39 = vmul.f32 %v6167_v27, %v6167_v27 }
 0x5f7   : > { %v4118_v25 = vsub.f32 %v3094_v12, %v3606_v13  ;;  %v6168_v35 = vsel %vm5656_vm2, %v4117_v17, 0.0  ;;  %v4642_v12 = vadd.s32 2024, %v8683_v3  ;;  %v3102_v14 = vld [vmem:[%s7640_s18 + $0x7d8] sm:$0xff] }
 0x5f8   : > { %v7181_v38 = vadd.f32 %v7180_v30, %v6669_v21  ;;  %v3607_v21 = vld [vmem:[%s7645_s21 + $0x7a0] sm:$0xff]  ;;  %v5147_v30 = vadd.s32 %v8687_v5, %v4634_v10  ;;  %vm5658_vm4 = vcmp.lt.s32.totalorder %v5146_v22, 9216  ;;  %v6680_v47 = vmul.f32 %v6168_v35, %v6168_v35 }
 0x5f9   : > { %v4119_v33 = vsub.f32 %v3095_v20, %v3607_v21  ;;  %v6169_v43 = vsel %vm5657_vm3, %v4118_v25, 0.0  ;;  %v4643_v20 = vadd.s32 2032, %v8683_v3  ;;  %v3103_v22 = vld [vmem:[%s7640_s18 + $0x7e0] sm:$0xff] }
 0x5fa   : > { %v7182_v46 = vadd.f32 %v7181_v38, %v6670_v29  ;;  %v3608_v29 = vld [vmem:[%s7645_s21 + $0x7a8] sm:$0xff]  ;;  %v5148_v38 = vadd.s32 %v8687_v5, %v4635_v18  ;;  %vm5659_vm5 = vcmp.lt.s32.totalorder %v5147_v30, 9216  ;;  %v6681_v55 = vmul.f32 %v6169_v43, %v6169_v43 }
 0x5fb   : > { %v4120_v41 = vsub.f32 %v3096_v28, %v3608_v29  ;;  %v6170_v51 = vsel %vm5658_vm4, %v4119_v33, 0.0  ;;  %v4644_v28 = vadd.s32 2040, %v8683_v3  ;;  %v3104_v30 = vld [vmem:[%s7640_s18 + $0x7e8] sm:$0xff] }
 0x5fc   : > { %v7183_v54 = vadd.f32 %v7182_v46, %v6671_v37  ;;  %v3609_v37 = vld [vmem:[%s7645_s21 + $0x7b0] sm:$0xff]  ;;  %v5149_v46 = vadd.s32 %v8687_v5, %v4636_v26  ;;  %vm5660_vm6 = vcmp.lt.s32.totalorder %v5148_v38, 9216  ;;  %v6682_v63 = vmul.f32 %v6170_v51, %v6170_v51 }
 0x5fd   : > { %v4121_v49 = vsub.f32 %v3097_v36, %v3609_v37  ;;  %v6171_v59 = vsel %vm5659_vm5, %v4120_v41, 0.0  ;;  %v4645_v36 = vadd.s32 2048, %v8683_v3  ;;  %v3105_v38 = vld [vmem:[%s7640_s18 + $0x7f0] sm:$0xff] }
 0x5fe   : > { %v7184_v62 = vadd.f32 %v7183_v54, %v6672_v45  ;;  %v3610_v45 = vld [vmem:[%s7645_s21 + $0x7b8] sm:$0xff]  ;;  %v5150_v54 = vadd.s32 %v8687_v5, %v4637_v34  ;;  %vm5661_vm7 = vcmp.lt.s32.totalorder %v5149_v46, 9216  ;;  %v6683_v9 = vmul.f32 %v6171_v59, %v6171_v59 }
 0x5ff   : > { %v4122_v57 = vsub.f32 %v3098_v44, %v3610_v45  ;;  %v6172_v4 = vsel %vm5660_vm6, %v4121_v49, 0.0  ;;  %v4646_v44 = vadd.s32 2056, %v8683_v3  ;;  %v3106_v46 = vld [vmem:[%s7640_s18 + $0x7f8] sm:$0xff] }
 0x600   : > { %v7185_v8 = vadd.f32 %v7184_v62, %v6673_v53  ;;  %v3611_v53 = vld [vmem:[%s7645_s21 + $0x7c0] sm:$0xff]  ;;  %v5151_v62 = vadd.s32 %v8687_v5, %v4638_v42  ;;  %vm5662_vm8 = vcmp.lt.s32.totalorder %v5150_v54, 9216  ;;  %v6684_v17 = vmul.f32 %v6172_v4, %v6172_v4 }
 0x601   : > { %v4123_v1 = vsub.f32 %v3099_v52, %v3611_v53  ;;  %v6173_v13 = vsel %vm5661_vm7, %v4122_v57, 0.0  ;;  %v4647_v52 = vadd.s32 2064, %v8683_v3  ;;  %v3107_v54 = vld [vmem:[%s7640_s18 + $0x800] sm:$0xff] }
 0x602   : > { %v7186_v16 = vadd.f32 %v7185_v8, %v6674_v61  ;;  %v3612_v61 = vld [vmem:[%s7645_s21 + $0x7c8] sm:$0xff]  ;;  %v5152_v8 = vadd.s32 %v8687_v5, %v4639_v50  ;;  %vm5663_vm9 = vcmp.lt.s32.totalorder %v5151_v62, 9216  ;;  %v6685_v25 = vmul.f32 %v6173_v13, %v6173_v13 }
 0x603   : > { %v4124_v11 = vsub.f32 %v3100_v60, %v3612_v61  ;;  %v6174_v21 = vsel %vm5662_vm8, %v4123_v1, 0.0  ;;  %v4648_v60 = vadd.s32 2072, %v8683_v3  ;;  %v3108_v62 = vld [vmem:[%s7640_s18 + $0x808] sm:$0xff] }
 0x604   : > { %v7187_v24 = vadd.f32 %v7186_v16, %v6675_v7  ;;  %v3613_v7 = vld [vmem:[%s7645_s21 + $0x7d0] sm:$0xff]  ;;  %v5153_v16 = vadd.s32 %v8687_v5, %v4640_v58  ;;  %vm5664_vm10 = vcmp.lt.s32.totalorder %v5152_v8, 9216  ;;  %v6686_v33 = vmul.f32 %v6174_v21, %v6174_v21 }
 0x605   : > { %v4125_v19 = vsub.f32 %v3101_v6, %v3613_v7  ;;  %v6175_v29 = vsel %vm5663_vm9, %v4124_v11, 0.0  ;;  %v4649_v6 = vadd.s32 2080, %v8683_v3  ;;  %v3109_v8 = vld [vmem:[%s7640_s18 + $0x810] sm:$0xff] }
 0x606   : > { %v7188_v32 = vadd.f32 %v7187_v24, %v6676_v15  ;;  %v3614_v15 = vld [vmem:[%s7645_s21 + $0x7d8] sm:$0xff]  ;;  %v5154_v24 = vadd.s32 %v8687_v5, %v4641_v2  ;;  %vm5665_vm11 = vcmp.lt.s32.totalorder %v5153_v16, 9216  ;;  %v6687_v41 = vmul.f32 %v6175_v29, %v6175_v29 }
 0x607   : > { %v4126_v27 = vsub.f32 %v3102_v14, %v3614_v15  ;;  %v6176_v37 = vsel %vm5664_vm10, %v4125_v19, 0.0  ;;  %v4650_v14 = vadd.s32 2088, %v8683_v3  ;;  %v3110_v16 = vld [vmem:[%s7640_s18 + $0x818] sm:$0xff] }
 0x608   : > { %v7189_v40 = vadd.f32 %v7188_v32, %v6677_v23  ;;  %v3615_v23 = vld [vmem:[%s7645_s21 + $0x7e0] sm:$0xff]  ;;  %v5155_v32 = vadd.s32 %v8687_v5, %v4642_v12  ;;  %vm5666_vm12 = vcmp.lt.s32.totalorder %v5154_v24, 9216  ;;  %v6688_v49 = vmul.f32 %v6176_v37, %v6176_v37 }
 0x609   : > { %v4127_v35 = vsub.f32 %v3103_v22, %v3615_v23  ;;  %v6177_v45 = vsel %vm5665_vm11, %v4126_v27, 0.0  ;;  %v4651_v22 = vadd.s32 2096, %v8683_v3  ;;  %v3111_v24 = vld [vmem:[%s7640_s18 + $0x820] sm:$0xff] }
 0x60a   : > { %v7190_v48 = vadd.f32 %v7189_v40, %v6678_v31  ;;  %v3616_v31 = vld [vmem:[%s7645_s21 + $0x7e8] sm:$0xff]  ;;  %v5156_v40 = vadd.s32 %v8687_v5, %v4643_v20  ;;  %vm5667_vm13 = vcmp.lt.s32.totalorder %v5155_v32, 9216  ;;  %v6689_v57 = vmul.f32 %v6177_v45, %v6177_v45 }
 0x60b   : > { %v4128_v43 = vsub.f32 %v3104_v30, %v3616_v31  ;;  %v6178_v53 = vsel %vm5666_vm12, %v4127_v35, 0.0  ;;  %v4652_v30 = vadd.s32 2104, %v8683_v3  ;;  %v3112_v32 = vld [vmem:[%s7640_s18 + $0x828] sm:$0xff] }
 0x60c   : > { %v7191_v56 = vadd.f32 %v7190_v48, %v6679_v39  ;;  %v3617_v39 = vld [vmem:[%s7645_s21 + $0x7f0] sm:$0xff]  ;;  %v5157_v48 = vadd.s32 %v8687_v5, %v4644_v28  ;;  %vm5668_vm14 = vcmp.lt.s32.totalorder %v5156_v40, 9216  ;;  %v6690_v1 = vmul.f32 %v6178_v53, %v6178_v53 }
 0x60d   : > { %v4129_v51 = vsub.f32 %v3105_v38, %v3617_v39  ;;  %v6179_v61 = vsel %vm5667_vm13, %v4128_v43, 0.0  ;;  %v4653_v38 = vadd.s32 2112, %v8683_v3  ;;  %v3113_v40 = vld [vmem:[%s7640_s18 + $0x830] sm:$0xff] }
 0x60e   : > { %v7192_v0 = vadd.f32 %v7191_v56, %v6680_v47  ;;  %v3618_v47 = vld [vmem:[%s7645_s21 + $0x7f8] sm:$0xff]  ;;  %v5158_v56 = vadd.s32 %v8687_v5, %v4645_v36  ;;  %vm5669_vm15 = vcmp.lt.s32.totalorder %v5157_v48, 9216  ;;  %v6691_v11 = vmul.f32 %v6179_v61, %v6179_v61 }
 0x60f   : > { %v4130_v59 = vsub.f32 %v3106_v46, %v3618_v47  ;;  %v6180_v7 = vsel %vm5668_vm14, %v4129_v51, 0.0  ;;  %v4654_v46 = vadd.s32 2120, %v8683_v3  ;;  %v3114_v48 = vld [vmem:[%s7640_s18 + $0x838] sm:$0xff] }
 0x610   : > { %v7193_v10 = vadd.f32 %v7192_v0, %v6681_v55  ;;  %v3619_v55 = vld [vmem:[%s7645_s21 + $0x800] sm:$0xff]  ;;  %v5159_v0 = vadd.s32 %v8687_v5, %v4646_v44  ;;  %vm5670_vm0 = vcmp.lt.s32.totalorder %v5158_v56, 9216  ;;  %v6692_v19 = vmul.f32 %v6180_v7, %v6180_v7 }
 0x611   : > { %v4131_v4 = vsub.f32 %v3107_v54, %v3619_v55  ;;  %v6181_v15 = vsel %vm5669_vm15, %v4130_v59, 0.0  ;;  %v4655_v54 = vadd.s32 2128, %v8683_v3  ;;  %v3115_v56 = vld [vmem:[%s7640_s18 + $0x840] sm:$0xff] }
 0x612   : > { %v7194_v18 = vadd.f32 %v7193_v10, %v6682_v63  ;;  %v3620_v63 = vld [vmem:[%s7645_s21 + $0x808] sm:$0xff]  ;;  %v5160_v10 = vadd.s32 %v8687_v5, %v4647_v52  ;;  %vm5671_vm1 = vcmp.lt.s32.totalorder %v5159_v0, 9216  ;;  %v6693_v27 = vmul.f32 %v6181_v15, %v6181_v15 }
 0x613   : > { %v4132_v13 = vsub.f32 %v3108_v62, %v3620_v63  ;;  %v6182_v23 = vsel %vm5670_vm0, %v4131_v4, 0.0  ;;  %v4656_v62 = vadd.s32 2136, %v8683_v3  ;;  %v3116_v0 = vld [vmem:[%s7640_s18 + $0x848] sm:$0xff] }
 0x614   : > { %v7195_v26 = vadd.f32 %v7194_v18, %v6683_v9  ;;  %v3621_v9 = vld [vmem:[%s7645_s21 + $0x810] sm:$0xff]  ;;  %v5161_v18 = vadd.s32 %v8687_v5, %v4648_v60  ;;  %vm5672_vm2 = vcmp.lt.s32.totalorder %v5160_v10, 9216  ;;  %v6694_v35 = vmul.f32 %v6182_v23, %v6182_v23 }
 0x615   : > { %v4133_v21 = vsub.f32 %v3109_v8, %v3621_v9  ;;  %v6183_v31 = vsel %vm5671_vm1, %v4132_v13, 0.0  ;;  %v4657_v8 = vadd.s32 2144, %v8683_v3  ;;  %v3117_v10 = vld [vmem:[%s7640_s18 + $0x850] sm:$0xff] }
 0x616   : > { %v7196_v34 = vadd.f32 %v7195_v26, %v6684_v17  ;;  %v3622_v17 = vld [vmem:[%s7645_s21 + $0x818] sm:$0xff]  ;;  %v5162_v26 = vadd.s32 %v8687_v5, %v4649_v6  ;;  %vm5673_vm3 = vcmp.lt.s32.totalorder %v5161_v18, 9216  ;;  %v6695_v43 = vmul.f32 %v6183_v31, %v6183_v31 }
 0x617   : > { %v4134_v29 = vsub.f32 %v3110_v16, %v3622_v17  ;;  %v6184_v39 = vsel %vm5672_vm2, %v4133_v21, 0.0  ;;  %v4658_v16 = vadd.s32 2152, %v8683_v3  ;;  %v3118_v18 = vld [vmem:[%s7640_s18 + $0x858] sm:$0xff] }
 0x618   : > { %v7197_v42 = vadd.f32 %v7196_v34, %v6685_v25  ;;  %v3623_v25 = vld [vmem:[%s7645_s21 + $0x820] sm:$0xff]  ;;  %v5163_v34 = vadd.s32 %v8687_v5, %v4650_v14  ;;  %vm5674_vm4 = vcmp.lt.s32.totalorder %v5162_v26, 9216  ;;  %v6696_v51 = vmul.f32 %v6184_v39, %v6184_v39 }
 0x619   : > { %v4135_v37 = vsub.f32 %v3111_v24, %v3623_v25  ;;  %v6185_v47 = vsel %vm5673_vm3, %v4134_v29, 0.0  ;;  %v4659_v24 = vadd.s32 2160, %v8683_v3  ;;  %v3119_v26 = vld [vmem:[%s7640_s18 + $0x860] sm:$0xff] }
 0x61a   : > { %v7198_v50 = vadd.f32 %v7197_v42, %v6686_v33  ;;  %v3624_v33 = vld [vmem:[%s7645_s21 + $0x828] sm:$0xff]  ;;  %v5164_v42 = vadd.s32 %v8687_v5, %v4651_v22  ;;  %vm5675_vm5 = vcmp.lt.s32.totalorder %v5163_v34, 9216  ;;  %v6697_v59 = vmul.f32 %v6185_v47, %v6185_v47 }
 0x61b   : > { %v4136_v45 = vsub.f32 %v3112_v32, %v3624_v33  ;;  %v6186_v55 = vsel %vm5674_vm4, %v4135_v37, 0.0  ;;  %v4660_v32 = vadd.s32 2168, %v8683_v3  ;;  %v3120_v34 = vld [vmem:[%s7640_s18 + $0x868] sm:$0xff] }
 0x61c   : > { %v7199_v58 = vadd.f32 %v7198_v50, %v6687_v41  ;;  %v3625_v41 = vld [vmem:[%s7645_s21 + $0x830] sm:$0xff]  ;;  %v5165_v50 = vadd.s32 %v8687_v5, %v4652_v30  ;;  %vm5676_vm6 = vcmp.lt.s32.totalorder %v5164_v42, 9216  ;;  %v6698_v4 = vmul.f32 %v6186_v55, %v6186_v55 }
 0x61d   : > { %v4137_v53 = vsub.f32 %v3113_v40, %v3625_v41  ;;  %v6187_v63 = vsel %vm5675_vm5, %v4136_v45, 0.0  ;;  %v4661_v40 = vadd.s32 2176, %v8683_v3  ;;  %v3121_v42 = vld [vmem:[%s7640_s18 + $0x870] sm:$0xff] }
 0x61e   : > { %v7200_v2 = vadd.f32 %v7199_v58, %v6688_v49  ;;  %v3626_v49 = vld [vmem:[%s7645_s21 + $0x838] sm:$0xff]  ;;  %v5166_v58 = vadd.s32 %v8687_v5, %v4653_v38  ;;  %vm5677_vm7 = vcmp.lt.s32.totalorder %v5165_v50, 9216  ;;  %v6699_v13 = vmul.f32 %v6187_v63, %v6187_v63 }
 0x61f   : > { %v4138_v61 = vsub.f32 %v3114_v48, %v3626_v49  ;;  %v6188_v9 = vsel %vm5676_vm6, %v4137_v53, 0.0  ;;  %v4662_v48 = vadd.s32 2184, %v8683_v3  ;;  %v3122_v50 = vld [vmem:[%s7640_s18 + $0x878] sm:$0xff] }
 0x620   : > { %v7201_v12 = vadd.f32 %v7200_v2, %v6689_v57  ;;  %v3627_v57 = vld [vmem:[%s7645_s21 + $0x840] sm:$0xff]  ;;  %v5167_v2 = vadd.s32 %v8687_v5, %v4654_v46  ;;  %vm5678_vm8 = vcmp.lt.s32.totalorder %v5166_v58, 9216  ;;  %v6700_v21 = vmul.f32 %v6188_v9, %v6188_v9 }
 0x621   : > { %v4139_v7 = vsub.f32 %v3115_v56, %v3627_v57  ;;  %v6189_v17 = vsel %vm5677_vm7, %v4138_v61, 0.0  ;;  %v4663_v56 = vadd.s32 2192, %v8683_v3  ;;  %v3123_v58 = vld [vmem:[%s7640_s18 + $0x880] sm:$0xff] }
 0x622   : > { %v7202_v20 = vadd.f32 %v7201_v12, %v6690_v1  ;;  %v3628_v1 = vld [vmem:[%s7645_s21 + $0x848] sm:$0xff]  ;;  %v5168_v12 = vadd.s32 %v8687_v5, %v4655_v54  ;;  %vm5679_vm9 = vcmp.lt.s32.totalorder %v5167_v2, 9216  ;;  %v6701_v29 = vmul.f32 %v6189_v17, %v6189_v17 }
 0x623   : > { %v4140_v15 = vsub.f32 %v3116_v0, %v3628_v1  ;;  %v6190_v25 = vsel %vm5678_vm8, %v4139_v7, 0.0  ;;  %v4664_v0 = vadd.s32 2200, %v8683_v3  ;;  %v3124_v2 = vld [vmem:[%s7640_s18 + $0x888] sm:$0xff] }
 0x624   : > { %v7203_v28 = vadd.f32 %v7202_v20, %v6691_v11  ;;  %v3629_v11 = vld [vmem:[%s7645_s21 + $0x850] sm:$0xff]  ;;  %v5169_v20 = vadd.s32 %v8687_v5, %v4656_v62  ;;  %vm5680_vm10 = vcmp.lt.s32.totalorder %v5168_v12, 9216  ;;  %v6702_v37 = vmul.f32 %v6190_v25, %v6190_v25 }
 0x625   : > { %v4141_v23 = vsub.f32 %v3117_v10, %v3629_v11  ;;  %v6191_v33 = vsel %vm5679_vm9, %v4140_v15, 0.0  ;;  %v4665_v10 = vadd.s32 2208, %v8683_v3  ;;  %v3125_v12 = vld [vmem:[%s7640_s18 + $0x890] sm:$0xff] }
 0x626   : > { %v7204_v36 = vadd.f32 %v7203_v28, %v6692_v19  ;;  %v3630_v19 = vld [vmem:[%s7645_s21 + $0x858] sm:$0xff]  ;;  %v5170_v28 = vadd.s32 %v8687_v5, %v4657_v8  ;;  %vm5681_vm11 = vcmp.lt.s32.totalorder %v5169_v20, 9216  ;;  %v6703_v45 = vmul.f32 %v6191_v33, %v6191_v33 }
 0x627   : > { %v4142_v31 = vsub.f32 %v3118_v18, %v3630_v19  ;;  %v6192_v41 = vsel %vm5680_vm10, %v4141_v23, 0.0  ;;  %v4666_v18 = vadd.s32 2216, %v8683_v3  ;;  %v3126_v20 = vld [vmem:[%s7640_s18 + $0x898] sm:$0xff] }
 0x628   : > { %v7205_v44 = vadd.f32 %v7204_v36, %v6693_v27  ;;  %v3631_v27 = vld [vmem:[%s7645_s21 + $0x860] sm:$0xff]  ;;  %v5171_v36 = vadd.s32 %v8687_v5, %v4658_v16  ;;  %vm5682_vm12 = vcmp.lt.s32.totalorder %v5170_v28, 9216  ;;  %v6704_v53 = vmul.f32 %v6192_v41, %v6192_v41 }
 0x629   : > { %v4143_v39 = vsub.f32 %v3119_v26, %v3631_v27  ;;  %v6193_v49 = vsel %vm5681_vm11, %v4142_v31, 0.0  ;;  %v4667_v26 = vadd.s32 2224, %v8683_v3  ;;  %v3127_v28 = vld [vmem:[%s7640_s18 + $0x8a0] sm:$0xff] }
 0x62a   : > { %v7206_v52 = vadd.f32 %v7205_v44, %v6694_v35  ;;  %v3632_v35 = vld [vmem:[%s7645_s21 + $0x868] sm:$0xff]  ;;  %v5172_v44 = vadd.s32 %v8687_v5, %v4659_v24  ;;  %vm5683_vm13 = vcmp.lt.s32.totalorder %v5171_v36, 9216  ;;  %v6705_v61 = vmul.f32 %v6193_v49, %v6193_v49 }
 0x62b   : > { %v4144_v47 = vsub.f32 %v3120_v34, %v3632_v35  ;;  %v6194_v57 = vsel %vm5682_vm12, %v4143_v39, 0.0  ;;  %v4668_v34 = vadd.s32 2232, %v8683_v3  ;;  %v3128_v36 = vld [vmem:[%s7640_s18 + $0x8a8] sm:$0xff] }
 0x62c   : > { %v7207_v60 = vadd.f32 %v7206_v52, %v6695_v43  ;;  %v3633_v43 = vld [vmem:[%s7645_s21 + $0x870] sm:$0xff]  ;;  %v5173_v52 = vadd.s32 %v8687_v5, %v4660_v32  ;;  %vm5684_vm14 = vcmp.lt.s32.totalorder %v5172_v44, 9216  ;;  %v6706_v7 = vmul.f32 %v6194_v57, %v6194_v57 }
 0x62d   : > { %v4145_v55 = vsub.f32 %v3121_v42, %v3633_v43  ;;  %v6195_v1 = vsel %vm5683_vm13, %v4144_v47, 0.0  ;;  %v4669_v42 = vadd.s32 2240, %v8683_v3  ;;  %v3129_v44 = vld [vmem:[%s7640_s18 + $0x8b0] sm:$0xff] }
 0x62e   : > { %v7208_v6 = vadd.f32 %v7207_v60, %v6696_v51  ;;  %v3634_v51 = vld [vmem:[%s7645_s21 + $0x878] sm:$0xff]  ;;  %v5174_v60 = vadd.s32 %v8687_v5, %v4661_v40  ;;  %vm5685_vm15 = vcmp.lt.s32.totalorder %v5173_v52, 9216  ;;  %v6707_v15 = vmul.f32 %v6195_v1, %v6195_v1 }
 0x62f   : > { %v4146_v63 = vsub.f32 %v3122_v50, %v3634_v51  ;;  %v6196_v11 = vsel %vm5684_vm14, %v4145_v55, 0.0  ;;  %v4670_v50 = vadd.s32 2248, %v8683_v3  ;;  %v3130_v52 = vld [vmem:[%s7640_s18 + $0x8b8] sm:$0xff] }
 0x630   : > { %v7209_v14 = vadd.f32 %v7208_v6, %v6697_v59  ;;  %v3635_v59 = vld [vmem:[%s7645_s21 + $0x880] sm:$0xff]  ;;  %v5175_v6 = vadd.s32 %v8687_v5, %v4662_v48  ;;  %vm5686_vm0 = vcmp.lt.s32.totalorder %v5174_v60, 9216  ;;  %v6708_v23 = vmul.f32 %v6196_v11, %v6196_v11 }
 0x631   : > { %v4147_v9 = vsub.f32 %v3123_v58, %v3635_v59  ;;  %v6197_v19 = vsel %vm5685_vm15, %v4146_v63, 0.0  ;;  %v4671_v58 = vadd.s32 2256, %v8683_v3  ;;  %v3131_v60 = vld [vmem:[%s7640_s18 + $0x8c0] sm:$0xff] }
 0x632   : > { %v7210_v22 = vadd.f32 %v7209_v14, %v6698_v4  ;;  %v3636_v4 = vld [vmem:[%s7645_s21 + $0x888] sm:$0xff]  ;;  %v5176_v14 = vadd.s32 %v8687_v5, %v4663_v56  ;;  %vm5687_vm1 = vcmp.lt.s32.totalorder %v5175_v6, 9216  ;;  %v6709_v31 = vmul.f32 %v6197_v19, %v6197_v19 }
 0x633   : > { %v4148_v17 = vsub.f32 %v3124_v2, %v3636_v4  ;;  %v6198_v27 = vsel %vm5686_vm0, %v4147_v9, 0.0  ;;  %v4672_v2 = vadd.s32 2264, %v8683_v3  ;;  %v3132_v6 = vld [vmem:[%s7640_s18 + $0x8c8] sm:$0xff] }
 0x634   : > { %v7211_v30 = vadd.f32 %v7210_v22, %v6699_v13  ;;  %v3637_v13 = vld [vmem:[%s7645_s21 + $0x890] sm:$0xff]  ;;  %v5177_v22 = vadd.s32 %v8687_v5, %v4664_v0  ;;  %vm5688_vm2 = vcmp.lt.s32.totalorder %v5176_v14, 9216  ;;  %v6710_v39 = vmul.f32 %v6198_v27, %v6198_v27 }
 0x635   : > { %v4149_v25 = vsub.f32 %v3125_v12, %v3637_v13  ;;  %v6199_v35 = vsel %vm5687_vm1, %v4148_v17, 0.0  ;;  %v4673_v12 = vadd.s32 2272, %v8683_v3  ;;  %v3133_v14 = vld [vmem:[%s7640_s18 + $0x8d0] sm:$0xff] }
 0x636   : > { %v7212_v38 = vadd.f32 %v7211_v30, %v6700_v21  ;;  %v3638_v21 = vld [vmem:[%s7645_s21 + $0x898] sm:$0xff]  ;;  %v5178_v30 = vadd.s32 %v8687_v5, %v4665_v10  ;;  %vm5689_vm3 = vcmp.lt.s32.totalorder %v5177_v22, 9216  ;;  %v6711_v47 = vmul.f32 %v6199_v35, %v6199_v35 }
 0x637   : > { %v4150_v33 = vsub.f32 %v3126_v20, %v3638_v21  ;;  %v6200_v43 = vsel %vm5688_vm2, %v4149_v25, 0.0  ;;  %v4674_v20 = vadd.s32 2280, %v8683_v3  ;;  %v3134_v22 = vld [vmem:[%s7640_s18 + $0x8d8] sm:$0xff] }
 0x638   : > { %v7213_v46 = vadd.f32 %v7212_v38, %v6701_v29  ;;  %v3639_v29 = vld [vmem:[%s7645_s21 + $0x8a0] sm:$0xff]  ;;  %v5179_v38 = vadd.s32 %v8687_v5, %v4666_v18  ;;  %vm5690_vm4 = vcmp.lt.s32.totalorder %v5178_v30, 9216  ;;  %v6712_v55 = vmul.f32 %v6200_v43, %v6200_v43 }
 0x639   : > { %v4151_v41 = vsub.f32 %v3127_v28, %v3639_v29  ;;  %v6201_v51 = vsel %vm5689_vm3, %v4150_v33, 0.0  ;;  %v4675_v28 = vadd.s32 2288, %v8683_v3  ;;  %v3135_v30 = vld [vmem:[%s7640_s18 + $0x8e0] sm:$0xff] }
 0x63a   : > { %v7214_v54 = vadd.f32 %v7213_v46, %v6702_v37  ;;  %v3640_v37 = vld [vmem:[%s7645_s21 + $0x8a8] sm:$0xff]  ;;  %v5180_v46 = vadd.s32 %v8687_v5, %v4667_v26  ;;  %vm5691_vm5 = vcmp.lt.s32.totalorder %v5179_v38, 9216  ;;  %v6713_v63 = vmul.f32 %v6201_v51, %v6201_v51 }
 0x63b   : > { %v4152_v49 = vsub.f32 %v3128_v36, %v3640_v37  ;;  %v6202_v59 = vsel %vm5690_vm4, %v4151_v41, 0.0  ;;  %v4676_v36 = vadd.s32 2296, %v8683_v3  ;;  %v3136_v38 = vld [vmem:[%s7640_s18 + $0x8e8] sm:$0xff] }
 0x63c   : > { %v7215_v62 = vadd.f32 %v7214_v54, %v6703_v45  ;;  %v3641_v45 = vld [vmem:[%s7645_s21 + $0x8b0] sm:$0xff]  ;;  %v5181_v54 = vadd.s32 %v8687_v5, %v4668_v34  ;;  %vm5692_vm6 = vcmp.lt.s32.totalorder %v5180_v46, 9216  ;;  %v6714_v9 = vmul.f32 %v6202_v59, %v6202_v59 }
 0x63d   : > { %v4153_v57 = vsub.f32 %v3129_v44, %v3641_v45  ;;  %v6203_v4 = vsel %vm5691_vm5, %v4152_v49, 0.0  ;;  %v4677_v44 = vadd.s32 2304, %v8683_v3  ;;  %v3137_v46 = vld [vmem:[%s7640_s18 + $0x8f0] sm:$0xff] }
 0x63e   : > { %v7216_v8 = vadd.f32 %v7215_v62, %v6704_v53  ;;  %v3642_v53 = vld [vmem:[%s7645_s21 + $0x8b8] sm:$0xff]  ;;  %v5182_v62 = vadd.s32 %v8687_v5, %v4669_v42  ;;  %vm5693_vm7 = vcmp.lt.s32.totalorder %v5181_v54, 9216  ;;  %v6715_v17 = vmul.f32 %v6203_v4, %v6203_v4 }
 0x63f   : > { %v4154_v1 = vsub.f32 %v3130_v52, %v3642_v53  ;;  %v6204_v13 = vsel %vm5692_vm6, %v4153_v57, 0.0  ;;  %v4678_v52 = vadd.s32 2312, %v8683_v3  ;;  %v3138_v54 = vld [vmem:[%s7640_s18 + $0x8f8] sm:$0xff] }
 0x640   : > { %v7217_v16 = vadd.f32 %v7216_v8, %v6705_v61  ;;  %v3643_v61 = vld [vmem:[%s7645_s21 + $0x8c0] sm:$0xff]  ;;  %v5183_v8 = vadd.s32 %v8687_v5, %v4670_v50  ;;  %vm5694_vm8 = vcmp.lt.s32.totalorder %v5182_v62, 9216  ;;  %v6716_v25 = vmul.f32 %v6204_v13, %v6204_v13 }
 0x641   : > { %v4155_v11 = vsub.f32 %v3131_v60, %v3643_v61  ;;  %v6205_v21 = vsel %vm5693_vm7, %v4154_v1, 0.0  ;;  %v4679_v60 = vadd.s32 2320, %v8683_v3  ;;  %v3139_v62 = vld [vmem:[%s7640_s18 + $0x900] sm:$0xff] }
 0x642   : > { %v7218_v24 = vadd.f32 %v7217_v16, %v6706_v7  ;;  %v3644_v7 = vld [vmem:[%s7645_s21 + $0x8c8] sm:$0xff]  ;;  %v5184_v16 = vadd.s32 %v8687_v5, %v4671_v58  ;;  %vm5695_vm9 = vcmp.lt.s32.totalorder %v5183_v8, 9216  ;;  %v6717_v33 = vmul.f32 %v6205_v21, %v6205_v21 }
 0x643   : > { %v4156_v19 = vsub.f32 %v3132_v6, %v3644_v7  ;;  %v6206_v29 = vsel %vm5694_vm8, %v4155_v11, 0.0  ;;  %v4680_v6 = vadd.s32 2328, %v8683_v3  ;;  %v3140_v8 = vld [vmem:[%s7640_s18 + $0x908] sm:$0xff] }
 0x644   : > { %v7219_v32 = vadd.f32 %v7218_v24, %v6707_v15  ;;  %v3645_v15 = vld [vmem:[%s7645_s21 + $0x8d0] sm:$0xff]  ;;  %v5185_v24 = vadd.s32 %v8687_v5, %v4672_v2  ;;  %vm5696_vm10 = vcmp.lt.s32.totalorder %v5184_v16, 9216  ;;  %v6718_v41 = vmul.f32 %v6206_v29, %v6206_v29 }
 0x645   : > { %v4157_v27 = vsub.f32 %v3133_v14, %v3645_v15  ;;  %v6207_v37 = vsel %vm5695_vm9, %v4156_v19, 0.0  ;;  %v4681_v14 = vadd.s32 2336, %v8683_v3  ;;  %v3141_v16 = vld [vmem:[%s7640_s18 + $0x910] sm:$0xff] }
 0x646   : > { %v7220_v40 = vadd.f32 %v7219_v32, %v6708_v23  ;;  %v3646_v23 = vld [vmem:[%s7645_s21 + $0x8d8] sm:$0xff]  ;;  %v5186_v32 = vadd.s32 %v8687_v5, %v4673_v12  ;;  %vm5697_vm11 = vcmp.lt.s32.totalorder %v5185_v24, 9216  ;;  %v6719_v49 = vmul.f32 %v6207_v37, %v6207_v37 }
 0x647   : > { %v4158_v35 = vsub.f32 %v3134_v22, %v3646_v23  ;;  %v6208_v45 = vsel %vm5696_vm10, %v4157_v27, 0.0  ;;  %v4682_v22 = vadd.s32 2344, %v8683_v3  ;;  %v3142_v24 = vld [vmem:[%s7640_s18 + $0x918] sm:$0xff] }
 0x648   : > { %v7221_v48 = vadd.f32 %v7220_v40, %v6709_v31  ;;  %v3647_v31 = vld [vmem:[%s7645_s21 + $0x8e0] sm:$0xff]  ;;  %v5187_v40 = vadd.s32 %v8687_v5, %v4674_v20  ;;  %vm5698_vm12 = vcmp.lt.s32.totalorder %v5186_v32, 9216  ;;  %v6720_v57 = vmul.f32 %v6208_v45, %v6208_v45 }
 0x649   : > { %v4159_v43 = vsub.f32 %v3135_v30, %v3647_v31  ;;  %v6209_v53 = vsel %vm5697_vm11, %v4158_v35, 0.0  ;;  %v4683_v30 = vadd.s32 2352, %v8683_v3  ;;  %v3143_v32 = vld [vmem:[%s7640_s18 + $0x920] sm:$0xff] }
 0x64a   : > { %v7222_v56 = vadd.f32 %v7221_v48, %v6710_v39  ;;  %v3648_v39 = vld [vmem:[%s7645_s21 + $0x8e8] sm:$0xff]  ;;  %v5188_v48 = vadd.s32 %v8687_v5, %v4675_v28  ;;  %vm5699_vm13 = vcmp.lt.s32.totalorder %v5187_v40, 9216  ;;  %v6721_v1 = vmul.f32 %v6209_v53, %v6209_v53 }
 0x64b   : > { %v4160_v51 = vsub.f32 %v3136_v38, %v3648_v39  ;;  %v6210_v61 = vsel %vm5698_vm12, %v4159_v43, 0.0  ;;  %v4684_v38 = vadd.s32 2360, %v8683_v3  ;;  %v3144_v40 = vld [vmem:[%s7640_s18 + $0x928] sm:$0xff] }
 0x64c   : > { %v7223_v0 = vadd.f32 %v7222_v56, %v6711_v47  ;;  %v3649_v47 = vld [vmem:[%s7645_s21 + $0x8f0] sm:$0xff]  ;;  %v5189_v56 = vadd.s32 %v8687_v5, %v4676_v36  ;;  %vm5700_vm14 = vcmp.lt.s32.totalorder %v5188_v48, 9216  ;;  %v6722_v11 = vmul.f32 %v6210_v61, %v6210_v61 }
 0x64d   : > { %v4161_v59 = vsub.f32 %v3137_v46, %v3649_v47  ;;  %v6211_v7 = vsel %vm5699_vm13, %v4160_v51, 0.0  ;;  %v4685_v46 = vadd.s32 2368, %v8683_v3  ;;  %v3145_v48 = vld [vmem:[%s7640_s18 + $0x930] sm:$0xff] }
 0x64e   : > { %v7224_v10 = vadd.f32 %v7223_v0, %v6712_v55  ;;  %v3650_v55 = vld [vmem:[%s7645_s21 + $0x8f8] sm:$0xff]  ;;  %v5190_v0 = vadd.s32 %v8687_v5, %v4677_v44  ;;  %vm5701_vm15 = vcmp.lt.s32.totalorder %v5189_v56, 9216  ;;  %v6723_v19 = vmul.f32 %v6211_v7, %v6211_v7 }
 0x64f   : > { %v4162_v4 = vsub.f32 %v3138_v54, %v3650_v55  ;;  %v6212_v15 = vsel %vm5700_vm14, %v4161_v59, 0.0  ;;  %v4686_v54 = vadd.s32 2376, %v8683_v3  ;;  %v3146_v56 = vld [vmem:[%s7640_s18 + $0x938] sm:$0xff] }
 0x650   : > { %v7225_v18 = vadd.f32 %v7224_v10, %v6713_v63  ;;  %v3651_v63 = vld [vmem:[%s7645_s21 + $0x900] sm:$0xff]  ;;  %v5191_v10 = vadd.s32 %v8687_v5, %v4678_v52  ;;  %vm5702_vm0 = vcmp.lt.s32.totalorder %v5190_v0, 9216  ;;  %v6724_v27 = vmul.f32 %v6212_v15, %v6212_v15 }
 0x651   : > { %v4163_v13 = vsub.f32 %v3139_v62, %v3651_v63  ;;  %v6213_v23 = vsel %vm5701_vm15, %v4162_v4, 0.0  ;;  %v4687_v62 = vadd.s32 2384, %v8683_v3  ;;  %v3147_v0 = vld [vmem:[%s7640_s18 + $0x940] sm:$0xff] }
 0x652   : > { %v7226_v26 = vadd.f32 %v7225_v18, %v6714_v9  ;;  %v3652_v9 = vld [vmem:[%s7645_s21 + $0x908] sm:$0xff]  ;;  %v5192_v18 = vadd.s32 %v8687_v5, %v4679_v60  ;;  %vm5703_vm1 = vcmp.lt.s32.totalorder %v5191_v10, 9216  ;;  %v6725_v35 = vmul.f32 %v6213_v23, %v6213_v23 }
 0x653   : > { %v4164_v21 = vsub.f32 %v3140_v8, %v3652_v9  ;;  %v6214_v31 = vsel %vm5702_vm0, %v4163_v13, 0.0  ;;  %v4688_v8 = vadd.s32 2392, %v8683_v3  ;;  %v3148_v10 = vld [vmem:[%s7640_s18 + $0x948] sm:$0xff] }
 0x654   : > { %v7227_v34 = vadd.f32 %v7226_v26, %v6715_v17  ;;  %v3653_v17 = vld [vmem:[%s7645_s21 + $0x910] sm:$0xff]  ;;  %v5193_v26 = vadd.s32 %v8687_v5, %v4680_v6  ;;  %vm5704_vm2 = vcmp.lt.s32.totalorder %v5192_v18, 9216  ;;  %v6726_v43 = vmul.f32 %v6214_v31, %v6214_v31 }
 0x655   : > { %v4165_v29 = vsub.f32 %v3141_v16, %v3653_v17  ;;  %v6215_v39 = vsel %vm5703_vm1, %v4164_v21, 0.0  ;;  %v4689_v16 = vadd.s32 2400, %v8683_v3  ;;  %v3149_v18 = vld [vmem:[%s7640_s18 + $0x950] sm:$0xff] }
 0x656   : > { %v7228_v42 = vadd.f32 %v7227_v34, %v6716_v25  ;;  %v3654_v25 = vld [vmem:[%s7645_s21 + $0x918] sm:$0xff]  ;;  %v5194_v34 = vadd.s32 %v8687_v5, %v4681_v14  ;;  %vm5705_vm3 = vcmp.lt.s32.totalorder %v5193_v26, 9216  ;;  %v6727_v51 = vmul.f32 %v6215_v39, %v6215_v39 }
 0x657   : > { %v4166_v37 = vsub.f32 %v3142_v24, %v3654_v25  ;;  %v6216_v47 = vsel %vm5704_vm2, %v4165_v29, 0.0  ;;  %v4690_v24 = vadd.s32 2408, %v8683_v3  ;;  %v3150_v26 = vld [vmem:[%s7640_s18 + $0x958] sm:$0xff] }
 0x658   : > { %v7229_v50 = vadd.f32 %v7228_v42, %v6717_v33  ;;  %v3655_v33 = vld [vmem:[%s7645_s21 + $0x920] sm:$0xff]  ;;  %v5195_v42 = vadd.s32 %v8687_v5, %v4682_v22  ;;  %vm5706_vm4 = vcmp.lt.s32.totalorder %v5194_v34, 9216  ;;  %v6728_v59 = vmul.f32 %v6216_v47, %v6216_v47 }
 0x659   : > { %v4167_v45 = vsub.f32 %v3143_v32, %v3655_v33  ;;  %v6217_v55 = vsel %vm5705_vm3, %v4166_v37, 0.0  ;;  %v4691_v32 = vadd.s32 2416, %v8683_v3  ;;  %v3151_v34 = vld [vmem:[%s7640_s18 + $0x960] sm:$0xff] }
 0x65a   : > { %v7230_v58 = vadd.f32 %v7229_v50, %v6718_v41  ;;  %v3656_v41 = vld [vmem:[%s7645_s21 + $0x928] sm:$0xff]  ;;  %v5196_v50 = vadd.s32 %v8687_v5, %v4683_v30  ;;  %vm5707_vm5 = vcmp.lt.s32.totalorder %v5195_v42, 9216  ;;  %v6729_v4 = vmul.f32 %v6217_v55, %v6217_v55 }
 0x65b   : > { %v4168_v53 = vsub.f32 %v3144_v40, %v3656_v41  ;;  %v6218_v63 = vsel %vm5706_vm4, %v4167_v45, 0.0  ;;  %v4692_v40 = vadd.s32 2424, %v8683_v3  ;;  %v3152_v42 = vld [vmem:[%s7640_s18 + $0x968] sm:$0xff] }
 0x65c   : > { %v7231_v2 = vadd.f32 %v7230_v58, %v6719_v49  ;;  %v3657_v49 = vld [vmem:[%s7645_s21 + $0x930] sm:$0xff]  ;;  %v5197_v58 = vadd.s32 %v8687_v5, %v4684_v38  ;;  %vm5708_vm6 = vcmp.lt.s32.totalorder %v5196_v50, 9216  ;;  %v6730_v13 = vmul.f32 %v6218_v63, %v6218_v63 }
 0x65d   : > { %v4169_v61 = vsub.f32 %v3145_v48, %v3657_v49  ;;  %v6219_v9 = vsel %vm5707_vm5, %v4168_v53, 0.0  ;;  %v4693_v48 = vadd.s32 2432, %v8683_v3  ;;  %v3153_v50 = vld [vmem:[%s7640_s18 + $0x970] sm:$0xff] }
 0x65e   : > { %v7232_v12 = vadd.f32 %v7231_v2, %v6720_v57  ;;  %v3658_v57 = vld [vmem:[%s7645_s21 + $0x938] sm:$0xff]  ;;  %v5198_v2 = vadd.s32 %v8687_v5, %v4685_v46  ;;  %vm5709_vm7 = vcmp.lt.s32.totalorder %v5197_v58, 9216  ;;  %v6731_v21 = vmul.f32 %v6219_v9, %v6219_v9 }
 0x65f   : > { %v4170_v7 = vsub.f32 %v3146_v56, %v3658_v57  ;;  %v6220_v17 = vsel %vm5708_vm6, %v4169_v61, 0.0  ;;  %v4694_v56 = vadd.s32 2440, %v8683_v3  ;;  %v3154_v58 = vld [vmem:[%s7640_s18 + $0x978] sm:$0xff] }
 0x660   : > { %v7233_v20 = vadd.f32 %v7232_v12, %v6721_v1  ;;  %v3659_v1 = vld [vmem:[%s7645_s21 + $0x940] sm:$0xff]  ;;  %v5199_v12 = vadd.s32 %v8687_v5, %v4686_v54  ;;  %vm5710_vm8 = vcmp.lt.s32.totalorder %v5198_v2, 9216  ;;  %v6732_v29 = vmul.f32 %v6220_v17, %v6220_v17 }
 0x661   : > { %v4171_v15 = vsub.f32 %v3147_v0, %v3659_v1  ;;  %v6221_v25 = vsel %vm5709_vm7, %v4170_v7, 0.0  ;;  %v4695_v0 = vadd.s32 2448, %v8683_v3  ;;  %v3155_v2 = vld [vmem:[%s7640_s18 + $0x980] sm:$0xff] }
 0x662   : > { %v7234_v28 = vadd.f32 %v7233_v20, %v6722_v11  ;;  %v3660_v11 = vld [vmem:[%s7645_s21 + $0x948] sm:$0xff]  ;;  %v5200_v20 = vadd.s32 %v8687_v5, %v4687_v62  ;;  %vm5711_vm9 = vcmp.lt.s32.totalorder %v5199_v12, 9216  ;;  %v6733_v37 = vmul.f32 %v6221_v25, %v6221_v25 }
 0x663   : > { %v4172_v23 = vsub.f32 %v3148_v10, %v3660_v11  ;;  %v6222_v33 = vsel %vm5710_vm8, %v4171_v15, 0.0  ;;  %v4696_v10 = vadd.s32 2456, %v8683_v3  ;;  %v3156_v12 = vld [vmem:[%s7640_s18 + $0x988] sm:$0xff] }
 0x664   : > { %v7235_v36 = vadd.f32 %v7234_v28, %v6723_v19  ;;  %v3661_v19 = vld [vmem:[%s7645_s21 + $0x950] sm:$0xff]  ;;  %v5201_v28 = vadd.s32 %v8687_v5, %v4688_v8  ;;  %vm5712_vm10 = vcmp.lt.s32.totalorder %v5200_v20, 9216  ;;  %v6734_v45 = vmul.f32 %v6222_v33, %v6222_v33 }
 0x665   : > { %v4173_v31 = vsub.f32 %v3149_v18, %v3661_v19  ;;  %v6223_v41 = vsel %vm5711_vm9, %v4172_v23, 0.0  ;;  %v4697_v18 = vadd.s32 2464, %v8683_v3  ;;  %v3157_v20 = vld [vmem:[%s7640_s18 + $0x990] sm:$0xff] }
 0x666   : > { %v7236_v44 = vadd.f32 %v7235_v36, %v6724_v27  ;;  %v3662_v27 = vld [vmem:[%s7645_s21 + $0x958] sm:$0xff]  ;;  %v5202_v36 = vadd.s32 %v8687_v5, %v4689_v16  ;;  %vm5713_vm11 = vcmp.lt.s32.totalorder %v5201_v28, 9216  ;;  %v6735_v53 = vmul.f32 %v6223_v41, %v6223_v41 }
 0x667   : > { %v4174_v39 = vsub.f32 %v3150_v26, %v3662_v27  ;;  %v6224_v49 = vsel %vm5712_vm10, %v4173_v31, 0.0  ;;  %v4698_v26 = vadd.s32 2472, %v8683_v3  ;;  %v3158_v28 = vld [vmem:[%s7640_s18 + $0x998] sm:$0xff] }
 0x668   : > { %v7237_v52 = vadd.f32 %v7236_v44, %v6725_v35  ;;  %v3663_v35 = vld [vmem:[%s7645_s21 + $0x960] sm:$0xff]  ;;  %v5203_v44 = vadd.s32 %v8687_v5, %v4690_v24  ;;  %vm5714_vm12 = vcmp.lt.s32.totalorder %v5202_v36, 9216  ;;  %v6736_v61 = vmul.f32 %v6224_v49, %v6224_v49 }
 0x669   : > { %v4175_v47 = vsub.f32 %v3151_v34, %v3663_v35  ;;  %v6225_v57 = vsel %vm5713_vm11, %v4174_v39, 0.0  ;;  %v4699_v34 = vadd.s32 2480, %v8683_v3  ;;  %v3159_v36 = vld [vmem:[%s7640_s18 + $0x9a0] sm:$0xff] }
 0x66a   : > { %v7238_v60 = vadd.f32 %v7237_v52, %v6726_v43  ;;  %v3664_v43 = vld [vmem:[%s7645_s21 + $0x968] sm:$0xff]  ;;  %v5204_v52 = vadd.s32 %v8687_v5, %v4691_v32  ;;  %vm5715_vm13 = vcmp.lt.s32.totalorder %v5203_v44, 9216  ;;  %v6737_v7 = vmul.f32 %v6225_v57, %v6225_v57 }
 0x66b   : > { %v4176_v55 = vsub.f32 %v3152_v42, %v3664_v43  ;;  %v6226_v1 = vsel %vm5714_vm12, %v4175_v47, 0.0  ;;  %v4700_v42 = vadd.s32 2488, %v8683_v3  ;;  %v3160_v44 = vld [vmem:[%s7640_s18 + $0x9a8] sm:$0xff] }
 0x66c   : > { %v7239_v6 = vadd.f32 %v7238_v60, %v6727_v51  ;;  %v3665_v51 = vld [vmem:[%s7645_s21 + $0x970] sm:$0xff]  ;;  %v5205_v60 = vadd.s32 %v8687_v5, %v4692_v40  ;;  %vm5716_vm14 = vcmp.lt.s32.totalorder %v5204_v52, 9216  ;;  %v6738_v15 = vmul.f32 %v6226_v1, %v6226_v1 }
 0x66d   : > { %v4177_v63 = vsub.f32 %v3153_v50, %v3665_v51  ;;  %v6227_v11 = vsel %vm5715_vm13, %v4176_v55, 0.0  ;;  %v4701_v50 = vadd.s32 2496, %v8683_v3  ;;  %v3161_v52 = vld [vmem:[%s7640_s18 + $0x9b0] sm:$0xff] }
 0x66e   : > { %v7240_v14 = vadd.f32 %v7239_v6, %v6728_v59  ;;  %v3666_v59 = vld [vmem:[%s7645_s21 + $0x978] sm:$0xff]  ;;  %v5206_v6 = vadd.s32 %v8687_v5, %v4693_v48  ;;  %vm5717_vm15 = vcmp.lt.s32.totalorder %v5205_v60, 9216  ;;  %v6739_v23 = vmul.f32 %v6227_v11, %v6227_v11 }
 0x66f   : > { %v4178_v9 = vsub.f32 %v3154_v58, %v3666_v59  ;;  %v6228_v19 = vsel %vm5716_vm14, %v4177_v63, 0.0  ;;  %v4702_v58 = vadd.s32 2504, %v8683_v3  ;;  %v3162_v60 = vld [vmem:[%s7640_s18 + $0x9b8] sm:$0xff] }
 0x670   : > { %v7241_v22 = vadd.f32 %v7240_v14, %v6729_v4  ;;  %v3667_v4 = vld [vmem:[%s7645_s21 + $0x980] sm:$0xff]  ;;  %v5207_v14 = vadd.s32 %v8687_v5, %v4694_v56  ;;  %vm5718_vm0 = vcmp.lt.s32.totalorder %v5206_v6, 9216  ;;  %v6740_v31 = vmul.f32 %v6228_v19, %v6228_v19 }
 0x671   : > { %v4179_v17 = vsub.f32 %v3155_v2, %v3667_v4  ;;  %v6229_v27 = vsel %vm5717_vm15, %v4178_v9, 0.0  ;;  %v4703_v2 = vadd.s32 2512, %v8683_v3  ;;  %v3163_v6 = vld [vmem:[%s7640_s18 + $0x9c0] sm:$0xff] }
 0x672   : > { %v7242_v30 = vadd.f32 %v7241_v22, %v6730_v13  ;;  %v3668_v13 = vld [vmem:[%s7645_s21 + $0x988] sm:$0xff]  ;;  %v5208_v22 = vadd.s32 %v8687_v5, %v4695_v0  ;;  %vm5719_vm1 = vcmp.lt.s32.totalorder %v5207_v14, 9216  ;;  %v6741_v39 = vmul.f32 %v6229_v27, %v6229_v27 }
 0x673   : > { %v4180_v25 = vsub.f32 %v3156_v12, %v3668_v13  ;;  %v6230_v35 = vsel %vm5718_vm0, %v4179_v17, 0.0  ;;  %v4704_v12 = vadd.s32 2520, %v8683_v3  ;;  %v3164_v14 = vld [vmem:[%s7640_s18 + $0x9c8] sm:$0xff] }
 0x674   : > { %v7243_v38 = vadd.f32 %v7242_v30, %v6731_v21  ;;  %v3669_v21 = vld [vmem:[%s7645_s21 + $0x990] sm:$0xff]  ;;  %v5209_v30 = vadd.s32 %v8687_v5, %v4696_v10  ;;  %vm5720_vm2 = vcmp.lt.s32.totalorder %v5208_v22, 9216  ;;  %v6742_v47 = vmul.f32 %v6230_v35, %v6230_v35 }
 0x675   : > { %v4181_v33 = vsub.f32 %v3157_v20, %v3669_v21  ;;  %v6231_v43 = vsel %vm5719_vm1, %v4180_v25, 0.0  ;;  %v4705_v20 = vadd.s32 2528, %v8683_v3  ;;  %v3165_v22 = vld [vmem:[%s7640_s18 + $0x9d0] sm:$0xff] }
 0x676   : > { %v7244_v46 = vadd.f32 %v7243_v38, %v6732_v29  ;;  %v3670_v29 = vld [vmem:[%s7645_s21 + $0x998] sm:$0xff]  ;;  %v5210_v38 = vadd.s32 %v8687_v5, %v4697_v18  ;;  %vm5721_vm3 = vcmp.lt.s32.totalorder %v5209_v30, 9216  ;;  %v6743_v55 = vmul.f32 %v6231_v43, %v6231_v43 }
 0x677   : > { %v4182_v41 = vsub.f32 %v3158_v28, %v3670_v29  ;;  %v6232_v51 = vsel %vm5720_vm2, %v4181_v33, 0.0  ;;  %v4706_v28 = vadd.s32 2536, %v8683_v3  ;;  %v3166_v30 = vld [vmem:[%s7640_s18 + $0x9d8] sm:$0xff] }
 0x678   : > { %v7245_v54 = vadd.f32 %v7244_v46, %v6733_v37  ;;  %v3671_v37 = vld [vmem:[%s7645_s21 + $0x9a0] sm:$0xff]  ;;  %v5211_v46 = vadd.s32 %v8687_v5, %v4698_v26  ;;  %vm5722_vm4 = vcmp.lt.s32.totalorder %v5210_v38, 9216  ;;  %v6744_v63 = vmul.f32 %v6232_v51, %v6232_v51 }
 0x679   : > { %v4183_v49 = vsub.f32 %v3159_v36, %v3671_v37  ;;  %v6233_v59 = vsel %vm5721_vm3, %v4182_v41, 0.0  ;;  %v4707_v36 = vadd.s32 2544, %v8683_v3  ;;  %v3167_v38 = vld [vmem:[%s7640_s18 + $0x9e0] sm:$0xff] }
 0x67a   : > { %v7246_v62 = vadd.f32 %v7245_v54, %v6734_v45  ;;  %v3672_v45 = vld [vmem:[%s7645_s21 + $0x9a8] sm:$0xff]  ;;  %v5212_v54 = vadd.s32 %v8687_v5, %v4699_v34  ;;  %vm5723_vm5 = vcmp.lt.s32.totalorder %v5211_v46, 9216  ;;  %v6745_v9 = vmul.f32 %v6233_v59, %v6233_v59 }
 0x67b   : > { %v4184_v57 = vsub.f32 %v3160_v44, %v3672_v45  ;;  %v6234_v4 = vsel %vm5722_vm4, %v4183_v49, 0.0  ;;  %v4708_v44 = vadd.s32 2552, %v8683_v3  ;;  %v3168_v46 = vld [vmem:[%s7640_s18 + $0x9e8] sm:$0xff] }
 0x67c   : > { %v7247_v8 = vadd.f32 %v7246_v62, %v6735_v53  ;;  %v3673_v53 = vld [vmem:[%s7645_s21 + $0x9b0] sm:$0xff]  ;;  %v5213_v62 = vadd.s32 %v8687_v5, %v4700_v42  ;;  %vm5724_vm6 = vcmp.lt.s32.totalorder %v5212_v54, 9216  ;;  %v6746_v17 = vmul.f32 %v6234_v4, %v6234_v4 }
 0x67d   : > { %v4185_v1 = vsub.f32 %v3161_v52, %v3673_v53  ;;  %v6235_v13 = vsel %vm5723_vm5, %v4184_v57, 0.0  ;;  %v4709_v52 = vadd.s32 2560, %v8683_v3  ;;  %v3169_v54 = vld [vmem:[%s7640_s18 + $0x9f0] sm:$0xff] }
 0x67e   : > { %v7248_v16 = vadd.f32 %v7247_v8, %v6736_v61  ;;  %v3674_v61 = vld [vmem:[%s7645_s21 + $0x9b8] sm:$0xff]  ;;  %v5214_v8 = vadd.s32 %v8687_v5, %v4701_v50  ;;  %vm5725_vm7 = vcmp.lt.s32.totalorder %v5213_v62, 9216  ;;  %v6747_v25 = vmul.f32 %v6235_v13, %v6235_v13 }
 0x67f   : > { %v4186_v11 = vsub.f32 %v3162_v60, %v3674_v61  ;;  %v6236_v21 = vsel %vm5724_vm6, %v4185_v1, 0.0  ;;  %v4710_v60 = vadd.s32 2568, %v8683_v3  ;;  %v3170_v62 = vld [vmem:[%s7640_s18 + $0x9f8] sm:$0xff] }
 0x680   : > { %v7249_v24 = vadd.f32 %v7248_v16, %v6737_v7  ;;  %v3675_v7 = vld [vmem:[%s7645_s21 + $0x9c0] sm:$0xff]  ;;  %v5215_v16 = vadd.s32 %v8687_v5, %v4702_v58  ;;  %vm5726_vm8 = vcmp.lt.s32.totalorder %v5214_v8, 9216  ;;  %v6748_v33 = vmul.f32 %v6236_v21, %v6236_v21 }
 0x681   : > { %v4187_v19 = vsub.f32 %v3163_v6, %v3675_v7  ;;  %v6237_v29 = vsel %vm5725_vm7, %v4186_v11, 0.0  ;;  %v4711_v6 = vadd.s32 2576, %v8683_v3  ;;  %v3171_v8 = vld [vmem:[%s7640_s18 + $0xa00] sm:$0xff] }
 0x682   : > { %v7250_v32 = vadd.f32 %v7249_v24, %v6738_v15  ;;  %v3676_v15 = vld [vmem:[%s7645_s21 + $0x9c8] sm:$0xff]  ;;  %v5216_v24 = vadd.s32 %v8687_v5, %v4703_v2  ;;  %vm5727_vm9 = vcmp.lt.s32.totalorder %v5215_v16, 9216  ;;  %v6749_v41 = vmul.f32 %v6237_v29, %v6237_v29 }
 0x683   : > { %v4188_v27 = vsub.f32 %v3164_v14, %v3676_v15  ;;  %v6238_v37 = vsel %vm5726_vm8, %v4187_v19, 0.0  ;;  %v4712_v14 = vadd.s32 2584, %v8683_v3  ;;  %v3172_v16 = vld [vmem:[%s7640_s18 + $0xa08] sm:$0xff] }
 0x684   : > { %v7251_v40 = vadd.f32 %v7250_v32, %v6739_v23  ;;  %v3677_v23 = vld [vmem:[%s7645_s21 + $0x9d0] sm:$0xff]  ;;  %v5217_v32 = vadd.s32 %v8687_v5, %v4704_v12  ;;  %vm5728_vm10 = vcmp.lt.s32.totalorder %v5216_v24, 9216  ;;  %v6750_v49 = vmul.f32 %v6238_v37, %v6238_v37 }
 0x685   : > { %v4189_v35 = vsub.f32 %v3165_v22, %v3677_v23  ;;  %v6239_v45 = vsel %vm5727_vm9, %v4188_v27, 0.0  ;;  %v4713_v22 = vadd.s32 2592, %v8683_v3  ;;  %v3173_v24 = vld [vmem:[%s7640_s18 + $0xa10] sm:$0xff] }
 0x686   : > { %v7252_v48 = vadd.f32 %v7251_v40, %v6740_v31  ;;  %v3678_v31 = vld [vmem:[%s7645_s21 + $0x9d8] sm:$0xff]  ;;  %v5218_v40 = vadd.s32 %v8687_v5, %v4705_v20  ;;  %vm5729_vm11 = vcmp.lt.s32.totalorder %v5217_v32, 9216  ;;  %v6751_v57 = vmul.f32 %v6239_v45, %v6239_v45 }
 0x687   : > { %v4190_v43 = vsub.f32 %v3166_v30, %v3678_v31  ;;  %v6240_v53 = vsel %vm5728_vm10, %v4189_v35, 0.0  ;;  %v4714_v30 = vadd.s32 2600, %v8683_v3  ;;  %v3174_v32 = vld [vmem:[%s7640_s18 + $0xa18] sm:$0xff] }
 0x688   : > { %v7253_v56 = vadd.f32 %v7252_v48, %v6741_v39  ;;  %v3679_v39 = vld [vmem:[%s7645_s21 + $0x9e0] sm:$0xff]  ;;  %v5219_v48 = vadd.s32 %v8687_v5, %v4706_v28  ;;  %vm5730_vm12 = vcmp.lt.s32.totalorder %v5218_v40, 9216  ;;  %v6752_v1 = vmul.f32 %v6240_v53, %v6240_v53 }
 0x689   : > { %v4191_v51 = vsub.f32 %v3167_v38, %v3679_v39  ;;  %v6241_v61 = vsel %vm5729_vm11, %v4190_v43, 0.0  ;;  %v4715_v38 = vadd.s32 2608, %v8683_v3  ;;  %v3175_v40 = vld [vmem:[%s7640_s18 + $0xa20] sm:$0xff] }
 0x68a   : > { %v7254_v0 = vadd.f32 %v7253_v56, %v6742_v47  ;;  %v3680_v47 = vld [vmem:[%s7645_s21 + $0x9e8] sm:$0xff]  ;;  %v5220_v56 = vadd.s32 %v8687_v5, %v4707_v36  ;;  %vm5731_vm13 = vcmp.lt.s32.totalorder %v5219_v48, 9216  ;;  %v6753_v11 = vmul.f32 %v6241_v61, %v6241_v61 }
 0x68b   : > { %v4192_v59 = vsub.f32 %v3168_v46, %v3680_v47  ;;  %v6242_v7 = vsel %vm5730_vm12, %v4191_v51, 0.0  ;;  %v4716_v46 = vadd.s32 2616, %v8683_v3  ;;  %v3176_v48 = vld [vmem:[%s7640_s18 + $0xa28] sm:$0xff] }
 0x68c   : > { %v7255_v10 = vadd.f32 %v7254_v0, %v6743_v55  ;;  %v3681_v55 = vld [vmem:[%s7645_s21 + $0x9f0] sm:$0xff]  ;;  %v5221_v0 = vadd.s32 %v8687_v5, %v4708_v44  ;;  %vm5732_vm14 = vcmp.lt.s32.totalorder %v5220_v56, 9216  ;;  %v6754_v19 = vmul.f32 %v6242_v7, %v6242_v7 }
 0x68d   : > { %v4193_v4 = vsub.f32 %v3169_v54, %v3681_v55  ;;  %v6243_v15 = vsel %vm5731_vm13, %v4192_v59, 0.0  ;;  %v4717_v54 = vadd.s32 2624, %v8683_v3  ;;  %v3177_v56 = vld [vmem:[%s7640_s18 + $0xa30] sm:$0xff] }
 0x68e   : > { %v7256_v18 = vadd.f32 %v7255_v10, %v6744_v63  ;;  %v3682_v63 = vld [vmem:[%s7645_s21 + $0x9f8] sm:$0xff]  ;;  %v5222_v10 = vadd.s32 %v8687_v5, %v4709_v52  ;;  %vm5733_vm15 = vcmp.lt.s32.totalorder %v5221_v0, 9216  ;;  %v6755_v27 = vmul.f32 %v6243_v15, %v6243_v15 }
 0x68f   : > { %v4194_v13 = vsub.f32 %v3170_v62, %v3682_v63  ;;  %v6244_v23 = vsel %vm5732_vm14, %v4193_v4, 0.0  ;;  %v4718_v62 = vadd.s32 2632, %v8683_v3  ;;  %v3178_v0 = vld [vmem:[%s7640_s18 + $0xa38] sm:$0xff] }
 0x690   : > { %v7257_v26 = vadd.f32 %v7256_v18, %v6745_v9  ;;  %v3683_v9 = vld [vmem:[%s7645_s21 + $0xa00] sm:$0xff]  ;;  %v5223_v18 = vadd.s32 %v8687_v5, %v4710_v60  ;;  %vm5734_vm0 = vcmp.lt.s32.totalorder %v5222_v10, 9216  ;;  %v6756_v35 = vmul.f32 %v6244_v23, %v6244_v23 }
 0x691   : > { %v4195_v21 = vsub.f32 %v3171_v8, %v3683_v9  ;;  %v6245_v31 = vsel %vm5733_vm15, %v4194_v13, 0.0  ;;  %v4719_v8 = vadd.s32 2640, %v8683_v3  ;;  %v3179_v10 = vld [vmem:[%s7640_s18 + $0xa40] sm:$0xff] }
 0x692   : > { %v7258_v34 = vadd.f32 %v7257_v26, %v6746_v17  ;;  %v3684_v17 = vld [vmem:[%s7645_s21 + $0xa08] sm:$0xff]  ;;  %v5224_v26 = vadd.s32 %v8687_v5, %v4711_v6  ;;  %vm5735_vm1 = vcmp.lt.s32.totalorder %v5223_v18, 9216  ;;  %v6757_v43 = vmul.f32 %v6245_v31, %v6245_v31 }
 0x693   : > { %v4196_v29 = vsub.f32 %v3172_v16, %v3684_v17  ;;  %v6246_v39 = vsel %vm5734_vm0, %v4195_v21, 0.0  ;;  %v4720_v16 = vadd.s32 2648, %v8683_v3  ;;  %v3180_v18 = vld [vmem:[%s7640_s18 + $0xa48] sm:$0xff] }
 0x694   : > { %v7259_v42 = vadd.f32 %v7258_v34, %v6747_v25  ;;  %v3685_v25 = vld [vmem:[%s7645_s21 + $0xa10] sm:$0xff]  ;;  %v5225_v34 = vadd.s32 %v8687_v5, %v4712_v14  ;;  %vm5736_vm2 = vcmp.lt.s32.totalorder %v5224_v26, 9216  ;;  %v6758_v51 = vmul.f32 %v6246_v39, %v6246_v39 }
 0x695   : > { %v4197_v37 = vsub.f32 %v3173_v24, %v3685_v25  ;;  %v6247_v47 = vsel %vm5735_vm1, %v4196_v29, 0.0  ;;  %v4721_v24 = vadd.s32 2656, %v8683_v3  ;;  %v3181_v26 = vld [vmem:[%s7640_s18 + $0xa50] sm:$0xff] }
 0x696   : > { %v7260_v50 = vadd.f32 %v7259_v42, %v6748_v33  ;;  %v3686_v33 = vld [vmem:[%s7645_s21 + $0xa18] sm:$0xff]  ;;  %v5226_v42 = vadd.s32 %v8687_v5, %v4713_v22  ;;  %vm5737_vm3 = vcmp.lt.s32.totalorder %v5225_v34, 9216  ;;  %v6759_v59 = vmul.f32 %v6247_v47, %v6247_v47 }
 0x697   : > { %v4198_v45 = vsub.f32 %v3174_v32, %v3686_v33  ;;  %v6248_v55 = vsel %vm5736_vm2, %v4197_v37, 0.0  ;;  %v4722_v32 = vadd.s32 2664, %v8683_v3  ;;  %v3182_v34 = vld [vmem:[%s7640_s18 + $0xa58] sm:$0xff] }
 0x698   : > { %v7261_v58 = vadd.f32 %v7260_v50, %v6749_v41  ;;  %v3687_v41 = vld [vmem:[%s7645_s21 + $0xa20] sm:$0xff]  ;;  %v5227_v50 = vadd.s32 %v8687_v5, %v4714_v30  ;;  %vm5738_vm4 = vcmp.lt.s32.totalorder %v5226_v42, 9216  ;;  %v6760_v4 = vmul.f32 %v6248_v55, %v6248_v55 }
 0x699   : > { %v4199_v53 = vsub.f32 %v3175_v40, %v3687_v41  ;;  %v6249_v63 = vsel %vm5737_vm3, %v4198_v45, 0.0  ;;  %v4723_v40 = vadd.s32 2672, %v8683_v3  ;;  %v3183_v42 = vld [vmem:[%s7640_s18 + $0xa60] sm:$0xff] }
 0x69a   : > { %v7262_v2 = vadd.f32 %v7261_v58, %v6750_v49  ;;  %v3688_v49 = vld [vmem:[%s7645_s21 + $0xa28] sm:$0xff]  ;;  %v5228_v58 = vadd.s32 %v8687_v5, %v4715_v38  ;;  %vm5739_vm5 = vcmp.lt.s32.totalorder %v5227_v50, 9216  ;;  %v6761_v13 = vmul.f32 %v6249_v63, %v6249_v63 }
 0x69b   : > { %v4200_v61 = vsub.f32 %v3176_v48, %v3688_v49  ;;  %v6250_v9 = vsel %vm5738_vm4, %v4199_v53, 0.0  ;;  %v4724_v48 = vadd.s32 2680, %v8683_v3  ;;  %v3184_v50 = vld [vmem:[%s7640_s18 + $0xa68] sm:$0xff] }
 0x69c   : > { %v7263_v12 = vadd.f32 %v7262_v2, %v6751_v57  ;;  %v3689_v57 = vld [vmem:[%s7645_s21 + $0xa30] sm:$0xff]  ;;  %v5229_v2 = vadd.s32 %v8687_v5, %v4716_v46  ;;  %vm5740_vm6 = vcmp.lt.s32.totalorder %v5228_v58, 9216  ;;  %v6762_v21 = vmul.f32 %v6250_v9, %v6250_v9 }
 0x69d   : > { %v4201_v7 = vsub.f32 %v3177_v56, %v3689_v57  ;;  %v6251_v17 = vsel %vm5739_vm5, %v4200_v61, 0.0  ;;  %v4725_v56 = vadd.s32 2688, %v8683_v3  ;;  %v3185_v58 = vld [vmem:[%s7640_s18 + $0xa70] sm:$0xff] }
 0x69e   : > { %v7264_v20 = vadd.f32 %v7263_v12, %v6752_v1  ;;  %v3690_v1 = vld [vmem:[%s7645_s21 + $0xa38] sm:$0xff]  ;;  %v5230_v12 = vadd.s32 %v8687_v5, %v4717_v54  ;;  %vm5741_vm7 = vcmp.lt.s32.totalorder %v5229_v2, 9216  ;;  %v6763_v29 = vmul.f32 %v6251_v17, %v6251_v17 }
 0x69f   : > { %v4202_v15 = vsub.f32 %v3178_v0, %v3690_v1  ;;  %v6252_v25 = vsel %vm5740_vm6, %v4201_v7, 0.0  ;;  %v4726_v0 = vadd.s32 2696, %v8683_v3  ;;  %v3186_v2 = vld [vmem:[%s7640_s18 + $0xa78] sm:$0xff] }
 0x6a0   : > { %v7265_v28 = vadd.f32 %v7264_v20, %v6753_v11  ;;  %v3691_v11 = vld [vmem:[%s7645_s21 + $0xa40] sm:$0xff]  ;;  %v5231_v20 = vadd.s32 %v8687_v5, %v4718_v62  ;;  %vm5742_vm8 = vcmp.lt.s32.totalorder %v5230_v12, 9216  ;;  %v6764_v37 = vmul.f32 %v6252_v25, %v6252_v25 }
 0x6a1   : > { %v4203_v23 = vsub.f32 %v3179_v10, %v3691_v11  ;;  %v6253_v33 = vsel %vm5741_vm7, %v4202_v15, 0.0  ;;  %v4727_v10 = vadd.s32 2704, %v8683_v3  ;;  %v3187_v12 = vld [vmem:[%s7640_s18 + $0xa80] sm:$0xff] }
 0x6a2   : > { %v7266_v36 = vadd.f32 %v7265_v28, %v6754_v19  ;;  %v3692_v19 = vld [vmem:[%s7645_s21 + $0xa48] sm:$0xff]  ;;  %v5232_v28 = vadd.s32 %v8687_v5, %v4719_v8  ;;  %vm5743_vm9 = vcmp.lt.s32.totalorder %v5231_v20, 9216  ;;  %v6765_v45 = vmul.f32 %v6253_v33, %v6253_v33 }
 0x6a3   : > { %v4204_v31 = vsub.f32 %v3180_v18, %v3692_v19  ;;  %v6254_v41 = vsel %vm5742_vm8, %v4203_v23, 0.0  ;;  %v4728_v18 = vadd.s32 2712, %v8683_v3  ;;  %v3188_v20 = vld [vmem:[%s7640_s18 + $0xa88] sm:$0xff] }
 0x6a4   : > { %v7267_v44 = vadd.f32 %v7266_v36, %v6755_v27  ;;  %v3693_v27 = vld [vmem:[%s7645_s21 + $0xa50] sm:$0xff]  ;;  %v5233_v36 = vadd.s32 %v8687_v5, %v4720_v16  ;;  %vm5744_vm10 = vcmp.lt.s32.totalorder %v5232_v28, 9216  ;;  %v6766_v53 = vmul.f32 %v6254_v41, %v6254_v41 }
 0x6a5   : > { %v4205_v39 = vsub.f32 %v3181_v26, %v3693_v27  ;;  %v6255_v49 = vsel %vm5743_vm9, %v4204_v31, 0.0  ;;  %v4729_v26 = vadd.s32 2720, %v8683_v3  ;;  %v3189_v28 = vld [vmem:[%s7640_s18 + $0xa90] sm:$0xff] }
 0x6a6   : > { %v7268_v52 = vadd.f32 %v7267_v44, %v6756_v35  ;;  %v3694_v35 = vld [vmem:[%s7645_s21 + $0xa58] sm:$0xff]  ;;  %v5234_v44 = vadd.s32 %v8687_v5, %v4721_v24  ;;  %vm5745_vm11 = vcmp.lt.s32.totalorder %v5233_v36, 9216  ;;  %v6767_v61 = vmul.f32 %v6255_v49, %v6255_v49 }
 0x6a7   : > { %v4206_v47 = vsub.f32 %v3182_v34, %v3694_v35  ;;  %v6256_v57 = vsel %vm5744_vm10, %v4205_v39, 0.0  ;;  %v4730_v34 = vadd.s32 2728, %v8683_v3  ;;  %v3190_v36 = vld [vmem:[%s7640_s18 + $0xa98] sm:$0xff] }
 0x6a8   : > { %v7269_v60 = vadd.f32 %v7268_v52, %v6757_v43  ;;  %v3695_v43 = vld [vmem:[%s7645_s21 + $0xa60] sm:$0xff]  ;;  %v5235_v52 = vadd.s32 %v8687_v5, %v4722_v32  ;;  %vm5746_vm12 = vcmp.lt.s32.totalorder %v5234_v44, 9216  ;;  %v6768_v7 = vmul.f32 %v6256_v57, %v6256_v57 }
 0x6a9   : > { %v4207_v55 = vsub.f32 %v3183_v42, %v3695_v43  ;;  %v6257_v1 = vsel %vm5745_vm11, %v4206_v47, 0.0  ;;  %v4731_v42 = vadd.s32 2736, %v8683_v3  ;;  %v3191_v44 = vld [vmem:[%s7640_s18 + $0xaa0] sm:$0xff] }
 0x6aa   : > { %v7270_v6 = vadd.f32 %v7269_v60, %v6758_v51  ;;  %v3696_v51 = vld [vmem:[%s7645_s21 + $0xa68] sm:$0xff]  ;;  %v5236_v60 = vadd.s32 %v8687_v5, %v4723_v40  ;;  %vm5747_vm13 = vcmp.lt.s32.totalorder %v5235_v52, 9216  ;;  %v6769_v15 = vmul.f32 %v6257_v1, %v6257_v1 }
 0x6ab   : > { %v4208_v63 = vsub.f32 %v3184_v50, %v3696_v51  ;;  %v6258_v11 = vsel %vm5746_vm12, %v4207_v55, 0.0  ;;  %v4732_v50 = vadd.s32 2744, %v8683_v3  ;;  %v3192_v52 = vld [vmem:[%s7640_s18 + $0xaa8] sm:$0xff] }
 0x6ac   : > { %v7271_v14 = vadd.f32 %v7270_v6, %v6759_v59  ;;  %v3697_v59 = vld [vmem:[%s7645_s21 + $0xa70] sm:$0xff]  ;;  %v5237_v6 = vadd.s32 %v8687_v5, %v4724_v48  ;;  %vm5748_vm14 = vcmp.lt.s32.totalorder %v5236_v60, 9216  ;;  %v6770_v23 = vmul.f32 %v6258_v11, %v6258_v11 }
 0x6ad   : > { %v4209_v9 = vsub.f32 %v3185_v58, %v3697_v59  ;;  %v6259_v19 = vsel %vm5747_vm13, %v4208_v63, 0.0  ;;  %v4733_v58 = vadd.s32 2752, %v8683_v3  ;;  %v3193_v60 = vld [vmem:[%s7640_s18 + $0xab0] sm:$0xff] }
 0x6ae   : > { %v7272_v22 = vadd.f32 %v7271_v14, %v6760_v4  ;;  %v3698_v4 = vld [vmem:[%s7645_s21 + $0xa78] sm:$0xff]  ;;  %v5238_v14 = vadd.s32 %v8687_v5, %v4725_v56  ;;  %vm5749_vm15 = vcmp.lt.s32.totalorder %v5237_v6, 9216  ;;  %v6771_v31 = vmul.f32 %v6259_v19, %v6259_v19 }
 0x6af   : > { %v4210_v17 = vsub.f32 %v3186_v2, %v3698_v4  ;;  %v6260_v27 = vsel %vm5748_vm14, %v4209_v9, 0.0  ;;  %v4734_v2 = vadd.s32 2760, %v8683_v3  ;;  %v3194_v6 = vld [vmem:[%s7640_s18 + $0xab8] sm:$0xff] }
 0x6b0   : > { %v7273_v30 = vadd.f32 %v7272_v22, %v6761_v13  ;;  %v3699_v13 = vld [vmem:[%s7645_s21 + $0xa80] sm:$0xff]  ;;  %v5239_v22 = vadd.s32 %v8687_v5, %v4726_v0  ;;  %vm5750_vm0 = vcmp.lt.s32.totalorder %v5238_v14, 9216  ;;  %v6772_v39 = vmul.f32 %v6260_v27, %v6260_v27 }
 0x6b1   : > { %v4211_v25 = vsub.f32 %v3187_v12, %v3699_v13  ;;  %v6261_v35 = vsel %vm5749_vm15, %v4210_v17, 0.0  ;;  %v4735_v12 = vadd.s32 2768, %v8683_v3  ;;  %v3195_v14 = vld [vmem:[%s7640_s18 + $0xac0] sm:$0xff] }
 0x6b2   : > { %v7274_v38 = vadd.f32 %v7273_v30, %v6762_v21  ;;  %v3700_v21 = vld [vmem:[%s7645_s21 + $0xa88] sm:$0xff]  ;;  %v5240_v30 = vadd.s32 %v8687_v5, %v4727_v10  ;;  %vm5751_vm1 = vcmp.lt.s32.totalorder %v5239_v22, 9216  ;;  %v6773_v47 = vmul.f32 %v6261_v35, %v6261_v35 }
 0x6b3   : > { %v4212_v33 = vsub.f32 %v3188_v20, %v3700_v21  ;;  %v6262_v43 = vsel %vm5750_vm0, %v4211_v25, 0.0  ;;  %v4736_v20 = vadd.s32 2776, %v8683_v3  ;;  %v3196_v22 = vld [vmem:[%s7640_s18 + $0xac8] sm:$0xff] }
 0x6b4   : > { %v7275_v46 = vadd.f32 %v7274_v38, %v6763_v29  ;;  %v3701_v29 = vld [vmem:[%s7645_s21 + $0xa90] sm:$0xff]  ;;  %v5241_v38 = vadd.s32 %v8687_v5, %v4728_v18  ;;  %vm5752_vm2 = vcmp.lt.s32.totalorder %v5240_v30, 9216  ;;  %v6774_v55 = vmul.f32 %v6262_v43, %v6262_v43 }
 0x6b5   : > { %v4213_v41 = vsub.f32 %v3189_v28, %v3701_v29  ;;  %v6263_v51 = vsel %vm5751_vm1, %v4212_v33, 0.0  ;;  %v4737_v28 = vadd.s32 2784, %v8683_v3  ;;  %v3197_v30 = vld [vmem:[%s7640_s18 + $0xad0] sm:$0xff] }
 0x6b6   : > { %v7276_v54 = vadd.f32 %v7275_v46, %v6764_v37  ;;  %v3702_v37 = vld [vmem:[%s7645_s21 + $0xa98] sm:$0xff]  ;;  %v5242_v46 = vadd.s32 %v8687_v5, %v4729_v26  ;;  %vm5753_vm3 = vcmp.lt.s32.totalorder %v5241_v38, 9216  ;;  %v6775_v63 = vmul.f32 %v6263_v51, %v6263_v51 }
 0x6b7   : > { %v4214_v49 = vsub.f32 %v3190_v36, %v3702_v37  ;;  %v6264_v59 = vsel %vm5752_vm2, %v4213_v41, 0.0  ;;  %v4738_v36 = vadd.s32 2792, %v8683_v3  ;;  %v3198_v38 = vld [vmem:[%s7640_s18 + $0xad8] sm:$0xff] }
 0x6b8   : > { %v7277_v62 = vadd.f32 %v7276_v54, %v6765_v45  ;;  %v3703_v45 = vld [vmem:[%s7645_s21 + $0xaa0] sm:$0xff]  ;;  %v5243_v54 = vadd.s32 %v8687_v5, %v4730_v34  ;;  %vm5754_vm4 = vcmp.lt.s32.totalorder %v5242_v46, 9216  ;;  %v6776_v9 = vmul.f32 %v6264_v59, %v6264_v59 }
 0x6b9   : > { %v4215_v57 = vsub.f32 %v3191_v44, %v3703_v45  ;;  %v6265_v4 = vsel %vm5753_vm3, %v4214_v49, 0.0  ;;  %v4739_v44 = vadd.s32 2800, %v8683_v3  ;;  %v3199_v46 = vld [vmem:[%s7640_s18 + $0xae0] sm:$0xff] }
 0x6ba   : > { %v7278_v8 = vadd.f32 %v7277_v62, %v6766_v53  ;;  %v3704_v53 = vld [vmem:[%s7645_s21 + $0xaa8] sm:$0xff]  ;;  %v5244_v62 = vadd.s32 %v8687_v5, %v4731_v42  ;;  %vm5755_vm5 = vcmp.lt.s32.totalorder %v5243_v54, 9216  ;;  %v6777_v17 = vmul.f32 %v6265_v4, %v6265_v4 }
 0x6bb   : > { %v4216_v1 = vsub.f32 %v3192_v52, %v3704_v53  ;;  %v6266_v13 = vsel %vm5754_vm4, %v4215_v57, 0.0  ;;  %v4740_v52 = vadd.s32 2808, %v8683_v3  ;;  %v3200_v54 = vld [vmem:[%s7640_s18 + $0xae8] sm:$0xff] }
 0x6bc   : > { %v7279_v16 = vadd.f32 %v7278_v8, %v6767_v61  ;;  %v3705_v61 = vld [vmem:[%s7645_s21 + $0xab0] sm:$0xff]  ;;  %v5245_v8 = vadd.s32 %v8687_v5, %v4732_v50  ;;  %vm5756_vm6 = vcmp.lt.s32.totalorder %v5244_v62, 9216  ;;  %v6778_v25 = vmul.f32 %v6266_v13, %v6266_v13 }
 0x6bd   : > { %v4217_v11 = vsub.f32 %v3193_v60, %v3705_v61  ;;  %v6267_v21 = vsel %vm5755_vm5, %v4216_v1, 0.0  ;;  %v4741_v60 = vadd.s32 2816, %v8683_v3  ;;  %v3201_v62 = vld [vmem:[%s7640_s18 + $0xaf0] sm:$0xff] }
 0x6be   : > { %v7280_v24 = vadd.f32 %v7279_v16, %v6768_v7  ;;  %v3706_v7 = vld [vmem:[%s7645_s21 + $0xab8] sm:$0xff]  ;;  %v5246_v16 = vadd.s32 %v8687_v5, %v4733_v58  ;;  %vm5757_vm7 = vcmp.lt.s32.totalorder %v5245_v8, 9216  ;;  %v6779_v33 = vmul.f32 %v6267_v21, %v6267_v21 }
 0x6bf   : > { %v4218_v19 = vsub.f32 %v3194_v6, %v3706_v7  ;;  %v6268_v29 = vsel %vm5756_vm6, %v4217_v11, 0.0  ;;  %v4742_v6 = vadd.s32 2824, %v8683_v3  ;;  %v3202_v8 = vld [vmem:[%s7640_s18 + $0xaf8] sm:$0xff] }
 0x6c0   : > { %v7281_v32 = vadd.f32 %v7280_v24, %v6769_v15  ;;  %v3707_v15 = vld [vmem:[%s7645_s21 + $0xac0] sm:$0xff]  ;;  %v5247_v24 = vadd.s32 %v8687_v5, %v4734_v2  ;;  %vm5758_vm8 = vcmp.lt.s32.totalorder %v5246_v16, 9216  ;;  %v6780_v41 = vmul.f32 %v6268_v29, %v6268_v29 }
 0x6c1   : > { %v4219_v27 = vsub.f32 %v3195_v14, %v3707_v15  ;;  %v6269_v37 = vsel %vm5757_vm7, %v4218_v19, 0.0  ;;  %v4743_v14 = vadd.s32 2832, %v8683_v3  ;;  %v3203_v16 = vld [vmem:[%s7640_s18 + $0xb00] sm:$0xff] }
 0x6c2   : > { %v7282_v40 = vadd.f32 %v7281_v32, %v6770_v23  ;;  %v3708_v23 = vld [vmem:[%s7645_s21 + $0xac8] sm:$0xff]  ;;  %v5248_v32 = vadd.s32 %v8687_v5, %v4735_v12  ;;  %vm5759_vm9 = vcmp.lt.s32.totalorder %v5247_v24, 9216  ;;  %v6781_v49 = vmul.f32 %v6269_v37, %v6269_v37 }
 0x6c3   : > { %v4220_v35 = vsub.f32 %v3196_v22, %v3708_v23  ;;  %v6270_v45 = vsel %vm5758_vm8, %v4219_v27, 0.0  ;;  %v4744_v22 = vadd.s32 2840, %v8683_v3  ;;  %v3204_v24 = vld [vmem:[%s7640_s18 + $0xb08] sm:$0xff] }
 0x6c4   : > { %v7283_v48 = vadd.f32 %v7282_v40, %v6771_v31  ;;  %v3709_v31 = vld [vmem:[%s7645_s21 + $0xad0] sm:$0xff]  ;;  %v5249_v40 = vadd.s32 %v8687_v5, %v4736_v20  ;;  %vm5760_vm10 = vcmp.lt.s32.totalorder %v5248_v32, 9216  ;;  %v6782_v57 = vmul.f32 %v6270_v45, %v6270_v45 }
 0x6c5   : > { %v4221_v43 = vsub.f32 %v3197_v30, %v3709_v31  ;;  %v6271_v53 = vsel %vm5759_vm9, %v4220_v35, 0.0  ;;  %v4745_v30 = vadd.s32 2848, %v8683_v3  ;;  %v3205_v32 = vld [vmem:[%s7640_s18 + $0xb10] sm:$0xff] }
 0x6c6   : > { %v7284_v56 = vadd.f32 %v7283_v48, %v6772_v39  ;;  %v3710_v39 = vld [vmem:[%s7645_s21 + $0xad8] sm:$0xff]  ;;  %v5250_v48 = vadd.s32 %v8687_v5, %v4737_v28  ;;  %vm5761_vm11 = vcmp.lt.s32.totalorder %v5249_v40, 9216  ;;  %v6783_v1 = vmul.f32 %v6271_v53, %v6271_v53 }
 0x6c7   : > { %v4222_v51 = vsub.f32 %v3198_v38, %v3710_v39  ;;  %v6272_v61 = vsel %vm5760_vm10, %v4221_v43, 0.0  ;;  %v4746_v38 = vadd.s32 2856, %v8683_v3  ;;  %v3206_v40 = vld [vmem:[%s7640_s18 + $0xb18] sm:$0xff] }
 0x6c8   : > { %v7285_v0 = vadd.f32 %v7284_v56, %v6773_v47  ;;  %v3711_v47 = vld [vmem:[%s7645_s21 + $0xae0] sm:$0xff]  ;;  %v5251_v56 = vadd.s32 %v8687_v5, %v4738_v36  ;;  %vm5762_vm12 = vcmp.lt.s32.totalorder %v5250_v48, 9216  ;;  %v6784_v11 = vmul.f32 %v6272_v61, %v6272_v61 }
 0x6c9   : > { %v4223_v59 = vsub.f32 %v3199_v46, %v3711_v47  ;;  %v6273_v7 = vsel %vm5761_vm11, %v4222_v51, 0.0  ;;  %v4747_v46 = vadd.s32 2864, %v8683_v3  ;;  %v3207_v48 = vld [vmem:[%s7640_s18 + $0xb20] sm:$0xff] }
 0x6ca   : > { %v7286_v10 = vadd.f32 %v7285_v0, %v6774_v55  ;;  %v3712_v55 = vld [vmem:[%s7645_s21 + $0xae8] sm:$0xff]  ;;  %v5252_v0 = vadd.s32 %v8687_v5, %v4739_v44  ;;  %vm5763_vm13 = vcmp.lt.s32.totalorder %v5251_v56, 9216  ;;  %v6785_v19 = vmul.f32 %v6273_v7, %v6273_v7 }
 0x6cb   : > { %v4224_v4 = vsub.f32 %v3200_v54, %v3712_v55  ;;  %v6274_v15 = vsel %vm5762_vm12, %v4223_v59, 0.0  ;;  %v4748_v54 = vadd.s32 2872, %v8683_v3  ;;  %v3208_v56 = vld [vmem:[%s7640_s18 + $0xb28] sm:$0xff] }
 0x6cc   : > { %v7287_v18 = vadd.f32 %v7286_v10, %v6775_v63  ;;  %v3713_v63 = vld [vmem:[%s7645_s21 + $0xaf0] sm:$0xff]  ;;  %v5253_v10 = vadd.s32 %v8687_v5, %v4740_v52  ;;  %vm5764_vm14 = vcmp.lt.s32.totalorder %v5252_v0, 9216  ;;  %v6786_v27 = vmul.f32 %v6274_v15, %v6274_v15 }
 0x6cd   : > { %v4225_v13 = vsub.f32 %v3201_v62, %v3713_v63  ;;  %v6275_v23 = vsel %vm5763_vm13, %v4224_v4, 0.0  ;;  %v4749_v62 = vadd.s32 2880, %v8683_v3  ;;  %v3209_v0 = vld [vmem:[%s7640_s18 + $0xb30] sm:$0xff] }
 0x6ce   : > { %v7288_v26 = vadd.f32 %v7287_v18, %v6776_v9  ;;  %v3714_v9 = vld [vmem:[%s7645_s21 + $0xaf8] sm:$0xff]  ;;  %v5254_v18 = vadd.s32 %v8687_v5, %v4741_v60  ;;  %vm5765_vm15 = vcmp.lt.s32.totalorder %v5253_v10, 9216  ;;  %v6787_v35 = vmul.f32 %v6275_v23, %v6275_v23 }
 0x6cf   : > { %v4226_v21 = vsub.f32 %v3202_v8, %v3714_v9  ;;  %v6276_v31 = vsel %vm5764_vm14, %v4225_v13, 0.0  ;;  %v4750_v8 = vadd.s32 2888, %v8683_v3  ;;  %v3210_v10 = vld [vmem:[%s7640_s18 + $0xb38] sm:$0xff] }
 0x6d0   : > { %v7289_v34 = vadd.f32 %v7288_v26, %v6777_v17  ;;  %v3715_v17 = vld [vmem:[%s7645_s21 + $0xb00] sm:$0xff]  ;;  %v5255_v26 = vadd.s32 %v8687_v5, %v4742_v6  ;;  %vm5766_vm0 = vcmp.lt.s32.totalorder %v5254_v18, 9216  ;;  %v6788_v43 = vmul.f32 %v6276_v31, %v6276_v31 }
 0x6d1   : > { %v4227_v29 = vsub.f32 %v3203_v16, %v3715_v17  ;;  %v6277_v39 = vsel %vm5765_vm15, %v4226_v21, 0.0  ;;  %v4751_v16 = vadd.s32 2896, %v8683_v3  ;;  %v3211_v18 = vld [vmem:[%s7640_s18 + $0xb40] sm:$0xff] }
 0x6d2   : > { %v7290_v42 = vadd.f32 %v7289_v34, %v6778_v25  ;;  %v3716_v25 = vld [vmem:[%s7645_s21 + $0xb08] sm:$0xff]  ;;  %v5256_v34 = vadd.s32 %v8687_v5, %v4743_v14  ;;  %vm5767_vm1 = vcmp.lt.s32.totalorder %v5255_v26, 9216  ;;  %v6789_v51 = vmul.f32 %v6277_v39, %v6277_v39 }
 0x6d3   : > { %v4228_v37 = vsub.f32 %v3204_v24, %v3716_v25  ;;  %v6278_v47 = vsel %vm5766_vm0, %v4227_v29, 0.0  ;;  %v4752_v24 = vadd.s32 2904, %v8683_v3  ;;  %v3212_v26 = vld [vmem:[%s7640_s18 + $0xb48] sm:$0xff] }
 0x6d4   : > { %v7291_v50 = vadd.f32 %v7290_v42, %v6779_v33  ;;  %v3717_v33 = vld [vmem:[%s7645_s21 + $0xb10] sm:$0xff]  ;;  %v5257_v42 = vadd.s32 %v8687_v5, %v4744_v22  ;;  %vm5768_vm2 = vcmp.lt.s32.totalorder %v5256_v34, 9216  ;;  %v6790_v59 = vmul.f32 %v6278_v47, %v6278_v47 }
 0x6d5   : > { %v4229_v45 = vsub.f32 %v3205_v32, %v3717_v33  ;;  %v6279_v55 = vsel %vm5767_vm1, %v4228_v37, 0.0  ;;  %v4753_v32 = vadd.s32 2912, %v8683_v3  ;;  %v3213_v34 = vld [vmem:[%s7640_s18 + $0xb50] sm:$0xff] }
 0x6d6   : > { %v7292_v58 = vadd.f32 %v7291_v50, %v6780_v41  ;;  %v3718_v41 = vld [vmem:[%s7645_s21 + $0xb18] sm:$0xff]  ;;  %v5258_v50 = vadd.s32 %v8687_v5, %v4745_v30  ;;  %vm5769_vm3 = vcmp.lt.s32.totalorder %v5257_v42, 9216  ;;  %v6791_v4 = vmul.f32 %v6279_v55, %v6279_v55 }
 0x6d7   : > { %v4230_v53 = vsub.f32 %v3206_v40, %v3718_v41  ;;  %v6280_v63 = vsel %vm5768_vm2, %v4229_v45, 0.0  ;;  %v4754_v40 = vadd.s32 2920, %v8683_v3  ;;  %v3214_v42 = vld [vmem:[%s7640_s18 + $0xb58] sm:$0xff] }
 0x6d8   : > { %v7293_v2 = vadd.f32 %v7292_v58, %v6781_v49  ;;  %v3719_v49 = vld [vmem:[%s7645_s21 + $0xb20] sm:$0xff]  ;;  %v5259_v58 = vadd.s32 %v8687_v5, %v4746_v38  ;;  %vm5770_vm4 = vcmp.lt.s32.totalorder %v5258_v50, 9216  ;;  %v6792_v13 = vmul.f32 %v6280_v63, %v6280_v63 }
 0x6d9   : > { %v4231_v61 = vsub.f32 %v3207_v48, %v3719_v49  ;;  %v6281_v9 = vsel %vm5769_vm3, %v4230_v53, 0.0  ;;  %v4755_v48 = vadd.s32 2928, %v8683_v3  ;;  %v3215_v50 = vld [vmem:[%s7640_s18 + $0xb60] sm:$0xff] }
 0x6da   : > { %v7294_v12 = vadd.f32 %v7293_v2, %v6782_v57  ;;  %v3720_v57 = vld [vmem:[%s7645_s21 + $0xb28] sm:$0xff]  ;;  %v5260_v2 = vadd.s32 %v8687_v5, %v4747_v46  ;;  %vm5771_vm5 = vcmp.lt.s32.totalorder %v5259_v58, 9216  ;;  %v6793_v21 = vmul.f32 %v6281_v9, %v6281_v9 }
 0x6db   : > { %v4232_v7 = vsub.f32 %v3208_v56, %v3720_v57  ;;  %v6282_v17 = vsel %vm5770_vm4, %v4231_v61, 0.0  ;;  %v4756_v56 = vadd.s32 2936, %v8683_v3  ;;  %v3216_v58 = vld [vmem:[%s7640_s18 + $0xb68] sm:$0xff] }
 0x6dc   : > { %v7295_v20 = vadd.f32 %v7294_v12, %v6783_v1  ;;  %v3721_v1 = vld [vmem:[%s7645_s21 + $0xb30] sm:$0xff]  ;;  %v5261_v12 = vadd.s32 %v8687_v5, %v4748_v54  ;;  %vm5772_vm6 = vcmp.lt.s32.totalorder %v5260_v2, 9216  ;;  %v6794_v29 = vmul.f32 %v6282_v17, %v6282_v17 }
 0x6dd   : > { %v4233_v15 = vsub.f32 %v3209_v0, %v3721_v1  ;;  %v6283_v25 = vsel %vm5771_vm5, %v4232_v7, 0.0  ;;  %v4757_v0 = vadd.s32 2944, %v8683_v3  ;;  %v3217_v2 = vld [vmem:[%s7640_s18 + $0xb70] sm:$0xff] }
 0x6de   : > { %v7296_v28 = vadd.f32 %v7295_v20, %v6784_v11  ;;  %v3722_v11 = vld [vmem:[%s7645_s21 + $0xb38] sm:$0xff]  ;;  %v5262_v20 = vadd.s32 %v8687_v5, %v4749_v62  ;;  %vm5773_vm7 = vcmp.lt.s32.totalorder %v5261_v12, 9216  ;;  %v6795_v37 = vmul.f32 %v6283_v25, %v6283_v25 }
 0x6df   : > { %v4234_v23 = vsub.f32 %v3210_v10, %v3722_v11  ;;  %v6284_v33 = vsel %vm5772_vm6, %v4233_v15, 0.0  ;;  %v4758_v10 = vadd.s32 2952, %v8683_v3  ;;  %v3218_v12 = vld [vmem:[%s7640_s18 + $0xb78] sm:$0xff] }
 0x6e0   : > { %v7297_v36 = vadd.f32 %v7296_v28, %v6785_v19  ;;  %v3723_v19 = vld [vmem:[%s7645_s21 + $0xb40] sm:$0xff]  ;;  %v5263_v28 = vadd.s32 %v8687_v5, %v4750_v8  ;;  %vm5774_vm8 = vcmp.lt.s32.totalorder %v5262_v20, 9216  ;;  %v6796_v45 = vmul.f32 %v6284_v33, %v6284_v33 }
 0x6e1   : > { %v4235_v31 = vsub.f32 %v3211_v18, %v3723_v19  ;;  %v6285_v41 = vsel %vm5773_vm7, %v4234_v23, 0.0  ;;  %v4759_v18 = vadd.s32 2960, %v8683_v3  ;;  %v3219_v20 = vld [vmem:[%s7640_s18 + $0xb80] sm:$0xff] }
 0x6e2   : > { %v7298_v44 = vadd.f32 %v7297_v36, %v6786_v27  ;;  %v3724_v27 = vld [vmem:[%s7645_s21 + $0xb48] sm:$0xff]  ;;  %v5264_v36 = vadd.s32 %v8687_v5, %v4751_v16  ;;  %vm5775_vm9 = vcmp.lt.s32.totalorder %v5263_v28, 9216  ;;  %v6797_v53 = vmul.f32 %v6285_v41, %v6285_v41 }
 0x6e3   : > { %v4236_v39 = vsub.f32 %v3212_v26, %v3724_v27  ;;  %v6286_v49 = vsel %vm5774_vm8, %v4235_v31, 0.0  ;;  %v4760_v26 = vadd.s32 2968, %v8683_v3  ;;  %v3220_v28 = vld [vmem:[%s7640_s18 + $0xb88] sm:$0xff] }
 0x6e4   : > { %v7299_v52 = vadd.f32 %v7298_v44, %v6787_v35  ;;  %v3725_v35 = vld [vmem:[%s7645_s21 + $0xb50] sm:$0xff]  ;;  %v5265_v44 = vadd.s32 %v8687_v5, %v4752_v24  ;;  %vm5776_vm10 = vcmp.lt.s32.totalorder %v5264_v36, 9216  ;;  %v6798_v61 = vmul.f32 %v6286_v49, %v6286_v49 }
 0x6e5   : > { %v4237_v47 = vsub.f32 %v3213_v34, %v3725_v35  ;;  %v6287_v57 = vsel %vm5775_vm9, %v4236_v39, 0.0  ;;  %v4761_v34 = vadd.s32 2976, %v8683_v3  ;;  %v3221_v36 = vld [vmem:[%s7640_s18 + $0xb90] sm:$0xff] }
 0x6e6   : > { %v7300_v60 = vadd.f32 %v7299_v52, %v6788_v43  ;;  %v3726_v43 = vld [vmem:[%s7645_s21 + $0xb58] sm:$0xff]  ;;  %v5266_v52 = vadd.s32 %v8687_v5, %v4753_v32  ;;  %vm5777_vm11 = vcmp.lt.s32.totalorder %v5265_v44, 9216  ;;  %v6799_v7 = vmul.f32 %v6287_v57, %v6287_v57 }
 0x6e7   : > { %v4238_v55 = vsub.f32 %v3214_v42, %v3726_v43  ;;  %v6288_v1 = vsel %vm5776_vm10, %v4237_v47, 0.0  ;;  %v4762_v42 = vadd.s32 2984, %v8683_v3  ;;  %v3222_v44 = vld [vmem:[%s7640_s18 + $0xb98] sm:$0xff] }
 0x6e8   : > { %v7301_v6 = vadd.f32 %v7300_v60, %v6789_v51  ;;  %v3727_v51 = vld [vmem:[%s7645_s21 + $0xb60] sm:$0xff]  ;;  %v5267_v60 = vadd.s32 %v8687_v5, %v4754_v40  ;;  %vm5778_vm12 = vcmp.lt.s32.totalorder %v5266_v52, 9216  ;;  %v6800_v15 = vmul.f32 %v6288_v1, %v6288_v1 }
 0x6e9   : > { %v4239_v63 = vsub.f32 %v3215_v50, %v3727_v51  ;;  %v6289_v11 = vsel %vm5777_vm11, %v4238_v55, 0.0  ;;  %v4763_v50 = vadd.s32 2992, %v8683_v3  ;;  %v3223_v52 = vld [vmem:[%s7640_s18 + $0xba0] sm:$0xff] }
 0x6ea   : > { %v7302_v14 = vadd.f32 %v7301_v6, %v6790_v59  ;;  %v3728_v59 = vld [vmem:[%s7645_s21 + $0xb68] sm:$0xff]  ;;  %v5268_v6 = vadd.s32 %v8687_v5, %v4755_v48  ;;  %vm5779_vm13 = vcmp.lt.s32.totalorder %v5267_v60, 9216  ;;  %v6801_v23 = vmul.f32 %v6289_v11, %v6289_v11 }
 0x6eb   : > { %v4240_v9 = vsub.f32 %v3216_v58, %v3728_v59  ;;  %v6290_v19 = vsel %vm5778_vm12, %v4239_v63, 0.0  ;;  %v4764_v58 = vadd.s32 3000, %v8683_v3  ;;  %v3224_v60 = vld [vmem:[%s7640_s18 + $0xba8] sm:$0xff] }
 0x6ec   : > { %v7303_v22 = vadd.f32 %v7302_v14, %v6791_v4  ;;  %v3729_v4 = vld [vmem:[%s7645_s21 + $0xb70] sm:$0xff]  ;;  %v5269_v14 = vadd.s32 %v8687_v5, %v4756_v56  ;;  %vm5780_vm14 = vcmp.lt.s32.totalorder %v5268_v6, 9216  ;;  %v6802_v31 = vmul.f32 %v6290_v19, %v6290_v19 }
 0x6ed   : > { %v4241_v17 = vsub.f32 %v3217_v2, %v3729_v4  ;;  %v6291_v27 = vsel %vm5779_vm13, %v4240_v9, 0.0  ;;  %v4765_v2 = vadd.s32 3008, %v8683_v3  ;;  %v3225_v6 = vld [vmem:[%s7640_s18 + $0xbb0] sm:$0xff] }
 0x6ee   : > { %v7304_v30 = vadd.f32 %v7303_v22, %v6792_v13  ;;  %v3730_v13 = vld [vmem:[%s7645_s21 + $0xb78] sm:$0xff]  ;;  %v5270_v22 = vadd.s32 %v8687_v5, %v4757_v0  ;;  %vm5781_vm15 = vcmp.lt.s32.totalorder %v5269_v14, 9216  ;;  %v6803_v39 = vmul.f32 %v6291_v27, %v6291_v27 }
 0x6ef   : > { %v4242_v25 = vsub.f32 %v3218_v12, %v3730_v13  ;;  %v6292_v35 = vsel %vm5780_vm14, %v4241_v17, 0.0  ;;  %v4766_v12 = vadd.s32 3016, %v8683_v3  ;;  %v3226_v14 = vld [vmem:[%s7640_s18 + $0xbb8] sm:$0xff] }
 0x6f0   : > { %v7305_v38 = vadd.f32 %v7304_v30, %v6793_v21  ;;  %v3731_v21 = vld [vmem:[%s7645_s21 + $0xb80] sm:$0xff]  ;;  %v5271_v30 = vadd.s32 %v8687_v5, %v4758_v10  ;;  %vm5782_vm0 = vcmp.lt.s32.totalorder %v5270_v22, 9216  ;;  %v6804_v47 = vmul.f32 %v6292_v35, %v6292_v35 }
 0x6f1   : > { %v4243_v33 = vsub.f32 %v3219_v20, %v3731_v21  ;;  %v6293_v43 = vsel %vm5781_vm15, %v4242_v25, 0.0  ;;  %v4767_v20 = vadd.s32 3024, %v8683_v3  ;;  %v3227_v22 = vld [vmem:[%s7640_s18 + $0xbc0] sm:$0xff] }
 0x6f2   : > { %v7306_v46 = vadd.f32 %v7305_v38, %v6794_v29  ;;  %v3732_v29 = vld [vmem:[%s7645_s21 + $0xb88] sm:$0xff]  ;;  %v5272_v38 = vadd.s32 %v8687_v5, %v4759_v18  ;;  %vm5783_vm1 = vcmp.lt.s32.totalorder %v5271_v30, 9216  ;;  %v6805_v55 = vmul.f32 %v6293_v43, %v6293_v43 }
 0x6f3   : > { %v4244_v41 = vsub.f32 %v3220_v28, %v3732_v29  ;;  %v6294_v51 = vsel %vm5782_vm0, %v4243_v33, 0.0  ;;  %v4768_v28 = vadd.s32 3032, %v8683_v3  ;;  %v3228_v30 = vld [vmem:[%s7640_s18 + $0xbc8] sm:$0xff] }
 0x6f4   : > { %v7307_v54 = vadd.f32 %v7306_v46, %v6795_v37  ;;  %v3733_v37 = vld [vmem:[%s7645_s21 + $0xb90] sm:$0xff]  ;;  %v5273_v46 = vadd.s32 %v8687_v5, %v4760_v26  ;;  %vm5784_vm2 = vcmp.lt.s32.totalorder %v5272_v38, 9216  ;;  %v6806_v63 = vmul.f32 %v6294_v51, %v6294_v51 }
 0x6f5   : > { %v4245_v49 = vsub.f32 %v3221_v36, %v3733_v37  ;;  %v6295_v59 = vsel %vm5783_vm1, %v4244_v41, 0.0  ;;  %v4769_v36 = vadd.s32 3040, %v8683_v3  ;;  %v3229_v38 = vld [vmem:[%s7640_s18 + $0xbd0] sm:$0xff] }
 0x6f6   : > { %v7308_v62 = vadd.f32 %v7307_v54, %v6796_v45  ;;  %v3734_v45 = vld [vmem:[%s7645_s21 + $0xb98] sm:$0xff]  ;;  %v5274_v54 = vadd.s32 %v8687_v5, %v4761_v34  ;;  %vm5785_vm3 = vcmp.lt.s32.totalorder %v5273_v46, 9216  ;;  %v6807_v9 = vmul.f32 %v6295_v59, %v6295_v59 }
 0x6f7   : > { %v4246_v57 = vsub.f32 %v3222_v44, %v3734_v45  ;;  %v6296_v4 = vsel %vm5784_vm2, %v4245_v49, 0.0  ;;  %v4770_v44 = vadd.s32 3048, %v8683_v3  ;;  %v3230_v46 = vld [vmem:[%s7640_s18 + $0xbd8] sm:$0xff] }
 0x6f8   : > { %v7309_v8 = vadd.f32 %v7308_v62, %v6797_v53  ;;  %v3735_v53 = vld [vmem:[%s7645_s21 + $0xba0] sm:$0xff]  ;;  %v5275_v62 = vadd.s32 %v8687_v5, %v4762_v42  ;;  %vm5786_vm4 = vcmp.lt.s32.totalorder %v5274_v54, 9216  ;;  %v6808_v17 = vmul.f32 %v6296_v4, %v6296_v4 }
 0x6f9   : > { %v4247_v1 = vsub.f32 %v3223_v52, %v3735_v53  ;;  %v6297_v13 = vsel %vm5785_vm3, %v4246_v57, 0.0  ;;  %v4771_v52 = vadd.s32 3056, %v8683_v3  ;;  %v3231_v54 = vld [vmem:[%s7640_s18 + $0xbe0] sm:$0xff] }
 0x6fa   : > { %v7310_v16 = vadd.f32 %v7309_v8, %v6798_v61  ;;  %v3736_v61 = vld [vmem:[%s7645_s21 + $0xba8] sm:$0xff]  ;;  %v5276_v8 = vadd.s32 %v8687_v5, %v4763_v50  ;;  %vm5787_vm5 = vcmp.lt.s32.totalorder %v5275_v62, 9216  ;;  %v6809_v25 = vmul.f32 %v6297_v13, %v6297_v13 }
 0x6fb   : > { %v4248_v11 = vsub.f32 %v3224_v60, %v3736_v61  ;;  %v6298_v21 = vsel %vm5786_vm4, %v4247_v1, 0.0  ;;  %v4772_v60 = vadd.s32 3064, %v8683_v3  ;;  %v3232_v62 = vld [vmem:[%s7640_s18 + $0xbe8] sm:$0xff] }
 0x6fc   : > { %v7311_v24 = vadd.f32 %v7310_v16, %v6799_v7  ;;  %v3737_v7 = vld [vmem:[%s7645_s21 + $0xbb0] sm:$0xff]  ;;  %v5277_v16 = vadd.s32 %v8687_v5, %v4764_v58  ;;  %vm5788_vm6 = vcmp.lt.s32.totalorder %v5276_v8, 9216  ;;  %v6810_v33 = vmul.f32 %v6298_v21, %v6298_v21 }
 0x6fd   : > { %v4249_v19 = vsub.f32 %v3225_v6, %v3737_v7  ;;  %v6299_v29 = vsel %vm5787_vm5, %v4248_v11, 0.0  ;;  %v4773_v6 = vadd.s32 3072, %v8683_v3  ;;  %v3233_v8 = vld [vmem:[%s7640_s18 + $0xbf0] sm:$0xff] }
 0x6fe   : > { %v7312_v32 = vadd.f32 %v7311_v24, %v6800_v15  ;;  %v3738_v15 = vld [vmem:[%s7645_s21 + $0xbb8] sm:$0xff]  ;;  %v5278_v24 = vadd.s32 %v8687_v5, %v4765_v2  ;;  %vm5789_vm7 = vcmp.lt.s32.totalorder %v5277_v16, 9216  ;;  %v6811_v41 = vmul.f32 %v6299_v29, %v6299_v29 }
 0x6ff   : > { %v4250_v27 = vsub.f32 %v3226_v14, %v3738_v15  ;;  %v6300_v37 = vsel %vm5788_vm6, %v4249_v19, 0.0  ;;  %v4774_v14 = vadd.s32 3080, %v8683_v3  ;;  %v3234_v16 = vld [vmem:[%s7640_s18 + $0xbf8] sm:$0xff] }
 0x700   : > { %v7313_v40 = vadd.f32 %v7312_v32, %v6801_v23  ;;  %v3739_v23 = vld [vmem:[%s7645_s21 + $0xbc0] sm:$0xff]  ;;  %v5279_v32 = vadd.s32 %v8687_v5, %v4766_v12  ;;  %vm5790_vm8 = vcmp.lt.s32.totalorder %v5278_v24, 9216  ;;  %v6812_v49 = vmul.f32 %v6300_v37, %v6300_v37 }
 0x701   : > { %v4251_v35 = vsub.f32 %v3227_v22, %v3739_v23  ;;  %v6301_v45 = vsel %vm5789_vm7, %v4250_v27, 0.0  ;;  %v4775_v22 = vadd.s32 3088, %v8683_v3  ;;  %v3235_v24 = vld [vmem:[%s7640_s18 + $0xc00] sm:$0xff] }
 0x702   : > { %v7314_v48 = vadd.f32 %v7313_v40, %v6802_v31  ;;  %v3740_v31 = vld [vmem:[%s7645_s21 + $0xbc8] sm:$0xff]  ;;  %v5280_v40 = vadd.s32 %v8687_v5, %v4767_v20  ;;  %vm5791_vm9 = vcmp.lt.s32.totalorder %v5279_v32, 9216  ;;  %v6813_v57 = vmul.f32 %v6301_v45, %v6301_v45 }
 0x703   : > { %v4252_v43 = vsub.f32 %v3228_v30, %v3740_v31  ;;  %v6302_v53 = vsel %vm5790_vm8, %v4251_v35, 0.0  ;;  %v4776_v30 = vadd.s32 3096, %v8683_v3  ;;  %v3236_v32 = vld [vmem:[%s7640_s18 + $0xc08] sm:$0xff] }
 0x704   : > { %v7315_v56 = vadd.f32 %v7314_v48, %v6803_v39  ;;  %v3741_v39 = vld [vmem:[%s7645_s21 + $0xbd0] sm:$0xff]  ;;  %v5281_v48 = vadd.s32 %v8687_v5, %v4768_v28  ;;  %vm5792_vm10 = vcmp.lt.s32.totalorder %v5280_v40, 9216  ;;  %v6814_v1 = vmul.f32 %v6302_v53, %v6302_v53 }
 0x705   : > { %v4253_v51 = vsub.f32 %v3229_v38, %v3741_v39  ;;  %v6303_v61 = vsel %vm5791_vm9, %v4252_v43, 0.0  ;;  %v4777_v38 = vadd.s32 3104, %v8683_v3  ;;  %v3237_v40 = vld [vmem:[%s7640_s18 + $0xc10] sm:$0xff] }
 0x706   : > { %v7316_v0 = vadd.f32 %v7315_v56, %v6804_v47  ;;  %v3742_v47 = vld [vmem:[%s7645_s21 + $0xbd8] sm:$0xff]  ;;  %v5282_v56 = vadd.s32 %v8687_v5, %v4769_v36  ;;  %vm5793_vm11 = vcmp.lt.s32.totalorder %v5281_v48, 9216  ;;  %v6815_v11 = vmul.f32 %v6303_v61, %v6303_v61 }
 0x707   : > { %v4254_v59 = vsub.f32 %v3230_v46, %v3742_v47  ;;  %v6304_v7 = vsel %vm5792_vm10, %v4253_v51, 0.0  ;;  %v4778_v46 = vadd.s32 3112, %v8683_v3  ;;  %v3238_v48 = vld [vmem:[%s7640_s18 + $0xc18] sm:$0xff] }
 0x708   : > { %v7317_v10 = vadd.f32 %v7316_v0, %v6805_v55  ;;  %v3743_v55 = vld [vmem:[%s7645_s21 + $0xbe0] sm:$0xff]  ;;  %v5283_v0 = vadd.s32 %v8687_v5, %v4770_v44  ;;  %vm5794_vm12 = vcmp.lt.s32.totalorder %v5282_v56, 9216  ;;  %v6816_v19 = vmul.f32 %v6304_v7, %v6304_v7 }
 0x709   : > { %v4255_v4 = vsub.f32 %v3231_v54, %v3743_v55  ;;  %v6305_v15 = vsel %vm5793_vm11, %v4254_v59, 0.0  ;;  %v4779_v54 = vadd.s32 3120, %v8683_v3  ;;  %v3239_v56 = vld [vmem:[%s7640_s18 + $0xc20] sm:$0xff] }
 0x70a   : > { %v7318_v18 = vadd.f32 %v7317_v10, %v6806_v63  ;;  %v3744_v63 = vld [vmem:[%s7645_s21 + $0xbe8] sm:$0xff]  ;;  %v5284_v10 = vadd.s32 %v8687_v5, %v4771_v52  ;;  %vm5795_vm13 = vcmp.lt.s32.totalorder %v5283_v0, 9216  ;;  %v6817_v27 = vmul.f32 %v6305_v15, %v6305_v15 }
 0x70b   : > { %v4256_v13 = vsub.f32 %v3232_v62, %v3744_v63  ;;  %v6306_v23 = vsel %vm5794_vm12, %v4255_v4, 0.0  ;;  %v4780_v62 = vadd.s32 3128, %v8683_v3  ;;  %v3240_v0 = vld [vmem:[%s7640_s18 + $0xc28] sm:$0xff] }
 0x70c   : > { %v7319_v26 = vadd.f32 %v7318_v18, %v6807_v9  ;;  %v3745_v9 = vld [vmem:[%s7645_s21 + $0xbf0] sm:$0xff]  ;;  %v5285_v18 = vadd.s32 %v8687_v5, %v4772_v60  ;;  %vm5796_vm14 = vcmp.lt.s32.totalorder %v5284_v10, 9216  ;;  %v6818_v35 = vmul.f32 %v6306_v23, %v6306_v23 }
 0x70d   : > { %v4257_v21 = vsub.f32 %v3233_v8, %v3745_v9  ;;  %v6307_v31 = vsel %vm5795_vm13, %v4256_v13, 0.0  ;;  %v4781_v8 = vadd.s32 3136, %v8683_v3  ;;  %v3241_v10 = vld [vmem:[%s7640_s18 + $0xc30] sm:$0xff] }
 0x70e   : > { %v7320_v34 = vadd.f32 %v7319_v26, %v6808_v17  ;;  %v3746_v17 = vld [vmem:[%s7645_s21 + $0xbf8] sm:$0xff]  ;;  %v5286_v26 = vadd.s32 %v8687_v5, %v4773_v6  ;;  %vm5797_vm15 = vcmp.lt.s32.totalorder %v5285_v18, 9216  ;;  %v6819_v43 = vmul.f32 %v6307_v31, %v6307_v31 }
 0x70f   : > { %v4258_v29 = vsub.f32 %v3234_v16, %v3746_v17  ;;  %v6308_v39 = vsel %vm5796_vm14, %v4257_v21, 0.0  ;;  %v4782_v16 = vadd.s32 3144, %v8683_v3  ;;  %v3242_v18 = vld [vmem:[%s7640_s18 + $0xc38] sm:$0xff] }
 0x710   : > { %v7321_v42 = vadd.f32 %v7320_v34, %v6809_v25  ;;  %v3747_v25 = vld [vmem:[%s7645_s21 + $0xc00] sm:$0xff]  ;;  %v5287_v34 = vadd.s32 %v8687_v5, %v4774_v14  ;;  %vm5798_vm0 = vcmp.lt.s32.totalorder %v5286_v26, 9216  ;;  %v6820_v51 = vmul.f32 %v6308_v39, %v6308_v39 }
 0x711   : > { %v4259_v37 = vsub.f32 %v3235_v24, %v3747_v25  ;;  %v6309_v47 = vsel %vm5797_vm15, %v4258_v29, 0.0  ;;  %v4783_v24 = vadd.s32 3152, %v8683_v3  ;;  %v3243_v26 = vld [vmem:[%s7640_s18 + $0xc40] sm:$0xff] }
 0x712   : > { %v7322_v50 = vadd.f32 %v7321_v42, %v6810_v33  ;;  %v3748_v33 = vld [vmem:[%s7645_s21 + $0xc08] sm:$0xff]  ;;  %v5288_v42 = vadd.s32 %v8687_v5, %v4775_v22  ;;  %vm5799_vm1 = vcmp.lt.s32.totalorder %v5287_v34, 9216  ;;  %v6821_v59 = vmul.f32 %v6309_v47, %v6309_v47 }
 0x713   : > { %v4260_v45 = vsub.f32 %v3236_v32, %v3748_v33  ;;  %v6310_v55 = vsel %vm5798_vm0, %v4259_v37, 0.0  ;;  %v4784_v32 = vadd.s32 3160, %v8683_v3  ;;  %v3244_v34 = vld [vmem:[%s7640_s18 + $0xc48] sm:$0xff] }
 0x714   : > { %v7323_v58 = vadd.f32 %v7322_v50, %v6811_v41  ;;  %v3749_v41 = vld [vmem:[%s7645_s21 + $0xc10] sm:$0xff]  ;;  %v5289_v50 = vadd.s32 %v8687_v5, %v4776_v30  ;;  %vm5800_vm2 = vcmp.lt.s32.totalorder %v5288_v42, 9216  ;;  %v6822_v4 = vmul.f32 %v6310_v55, %v6310_v55 }
 0x715   : > { %v4261_v53 = vsub.f32 %v3237_v40, %v3749_v41  ;;  %v6311_v63 = vsel %vm5799_vm1, %v4260_v45, 0.0  ;;  %v4785_v40 = vadd.s32 3168, %v8683_v3  ;;  %v3245_v42 = vld [vmem:[%s7640_s18 + $0xc50] sm:$0xff] }
 0x716   : > { %v7324_v2 = vadd.f32 %v7323_v58, %v6812_v49  ;;  %v3750_v49 = vld [vmem:[%s7645_s21 + $0xc18] sm:$0xff]  ;;  %v5290_v58 = vadd.s32 %v8687_v5, %v4777_v38  ;;  %vm5801_vm3 = vcmp.lt.s32.totalorder %v5289_v50, 9216  ;;  %v6823_v13 = vmul.f32 %v6311_v63, %v6311_v63 }
 0x717   : > { %v4262_v61 = vsub.f32 %v3238_v48, %v3750_v49  ;;  %v6312_v9 = vsel %vm5800_vm2, %v4261_v53, 0.0  ;;  %v4786_v48 = vadd.s32 3176, %v8683_v3  ;;  %v3246_v50 = vld [vmem:[%s7640_s18 + $0xc58] sm:$0xff] }
 0x718   : > { %v7325_v12 = vadd.f32 %v7324_v2, %v6813_v57  ;;  %v3751_v57 = vld [vmem:[%s7645_s21 + $0xc20] sm:$0xff]  ;;  %v5291_v2 = vadd.s32 %v8687_v5, %v4778_v46  ;;  %vm5802_vm4 = vcmp.lt.s32.totalorder %v5290_v58, 9216  ;;  %v6824_v21 = vmul.f32 %v6312_v9, %v6312_v9 }
 0x719   : > { %v4263_v7 = vsub.f32 %v3239_v56, %v3751_v57  ;;  %v6313_v17 = vsel %vm5801_vm3, %v4262_v61, 0.0  ;;  %v4787_v56 = vadd.s32 3184, %v8683_v3  ;;  %v3247_v58 = vld [vmem:[%s7640_s18 + $0xc60] sm:$0xff] }
 0x71a   : > { %v7326_v20 = vadd.f32 %v7325_v12, %v6814_v1  ;;  %v3752_v1 = vld [vmem:[%s7645_s21 + $0xc28] sm:$0xff]  ;;  %v5292_v12 = vadd.s32 %v8687_v5, %v4779_v54  ;;  %vm5803_vm5 = vcmp.lt.s32.totalorder %v5291_v2, 9216  ;;  %v6825_v29 = vmul.f32 %v6313_v17, %v6313_v17 }
 0x71b   : > { %v4264_v15 = vsub.f32 %v3240_v0, %v3752_v1  ;;  %v6314_v25 = vsel %vm5802_vm4, %v4263_v7, 0.0  ;;  %v4788_v0 = vadd.s32 3192, %v8683_v3  ;;  %v3248_v2 = vld [vmem:[%s7640_s18 + $0xc68] sm:$0xff] }
 0x71c   : > { %v7327_v28 = vadd.f32 %v7326_v20, %v6815_v11  ;;  %v3753_v11 = vld [vmem:[%s7645_s21 + $0xc30] sm:$0xff]  ;;  %v5293_v20 = vadd.s32 %v8687_v5, %v4780_v62  ;;  %vm5804_vm6 = vcmp.lt.s32.totalorder %v5292_v12, 9216  ;;  %v6826_v37 = vmul.f32 %v6314_v25, %v6314_v25 }
 0x71d   : > { %v4265_v23 = vsub.f32 %v3241_v10, %v3753_v11  ;;  %v6315_v33 = vsel %vm5803_vm5, %v4264_v15, 0.0  ;;  %v4789_v10 = vadd.s32 3200, %v8683_v3  ;;  %v3249_v12 = vld [vmem:[%s7640_s18 + $0xc70] sm:$0xff] }
 0x71e   : > { %v7328_v36 = vadd.f32 %v7327_v28, %v6816_v19  ;;  %v3754_v19 = vld [vmem:[%s7645_s21 + $0xc38] sm:$0xff]  ;;  %v5294_v28 = vadd.s32 %v8687_v5, %v4781_v8  ;;  %vm5805_vm7 = vcmp.lt.s32.totalorder %v5293_v20, 9216  ;;  %v6827_v45 = vmul.f32 %v6315_v33, %v6315_v33 }
 0x71f   : > { %v4266_v31 = vsub.f32 %v3242_v18, %v3754_v19  ;;  %v6316_v41 = vsel %vm5804_vm6, %v4265_v23, 0.0  ;;  %v4790_v18 = vadd.s32 3208, %v8683_v3  ;;  %v3250_v20 = vld [vmem:[%s7640_s18 + $0xc78] sm:$0xff] }
 0x720   : > { %v7329_v44 = vadd.f32 %v7328_v36, %v6817_v27  ;;  %v3755_v27 = vld [vmem:[%s7645_s21 + $0xc40] sm:$0xff]  ;;  %v5295_v36 = vadd.s32 %v8687_v5, %v4782_v16  ;;  %vm5806_vm8 = vcmp.lt.s32.totalorder %v5294_v28, 9216  ;;  %v6828_v53 = vmul.f32 %v6316_v41, %v6316_v41 }
 0x721   : > { %v4267_v39 = vsub.f32 %v3243_v26, %v3755_v27  ;;  %v6317_v49 = vsel %vm5805_vm7, %v4266_v31, 0.0  ;;  %v4791_v26 = vadd.s32 3216, %v8683_v3  ;;  %v3251_v28 = vld [vmem:[%s7640_s18 + $0xc80] sm:$0xff] }
 0x722   : > { %v7330_v52 = vadd.f32 %v7329_v44, %v6818_v35  ;;  %v3756_v35 = vld [vmem:[%s7645_s21 + $0xc48] sm:$0xff]  ;;  %v5296_v44 = vadd.s32 %v8687_v5, %v4783_v24  ;;  %vm5807_vm9 = vcmp.lt.s32.totalorder %v5295_v36, 9216  ;;  %v6829_v61 = vmul.f32 %v6317_v49, %v6317_v49 }
 0x723   : > { %v4268_v47 = vsub.f32 %v3244_v34, %v3756_v35  ;;  %v6318_v57 = vsel %vm5806_vm8, %v4267_v39, 0.0  ;;  %v4792_v34 = vadd.s32 3224, %v8683_v3  ;;  %v3252_v36 = vld [vmem:[%s7640_s18 + $0xc88] sm:$0xff] }
 0x724   : > { %v7331_v60 = vadd.f32 %v7330_v52, %v6819_v43  ;;  %v3757_v43 = vld [vmem:[%s7645_s21 + $0xc50] sm:$0xff]  ;;  %v5297_v52 = vadd.s32 %v8687_v5, %v4784_v32  ;;  %vm5808_vm10 = vcmp.lt.s32.totalorder %v5296_v44, 9216  ;;  %v6830_v7 = vmul.f32 %v6318_v57, %v6318_v57 }
 0x725   : > { %v4269_v55 = vsub.f32 %v3245_v42, %v3757_v43  ;;  %v6319_v1 = vsel %vm5807_vm9, %v4268_v47, 0.0  ;;  %v4793_v42 = vadd.s32 3232, %v8683_v3  ;;  %v3253_v44 = vld [vmem:[%s7640_s18 + $0xc90] sm:$0xff] }
 0x726   : > { %v7332_v6 = vadd.f32 %v7331_v60, %v6820_v51  ;;  %v3758_v51 = vld [vmem:[%s7645_s21 + $0xc58] sm:$0xff]  ;;  %v5298_v60 = vadd.s32 %v8687_v5, %v4785_v40  ;;  %vm5809_vm11 = vcmp.lt.s32.totalorder %v5297_v52, 9216  ;;  %v6831_v15 = vmul.f32 %v6319_v1, %v6319_v1 }
 0x727   : > { %v4270_v63 = vsub.f32 %v3246_v50, %v3758_v51  ;;  %v6320_v11 = vsel %vm5808_vm10, %v4269_v55, 0.0  ;;  %v4794_v50 = vadd.s32 3240, %v8683_v3  ;;  %v3254_v52 = vld [vmem:[%s7640_s18 + $0xc98] sm:$0xff] }
 0x728   : > { %v7333_v14 = vadd.f32 %v7332_v6, %v6821_v59  ;;  %v3759_v59 = vld [vmem:[%s7645_s21 + $0xc60] sm:$0xff]  ;;  %v5299_v6 = vadd.s32 %v8687_v5, %v4786_v48  ;;  %vm5810_vm12 = vcmp.lt.s32.totalorder %v5298_v60, 9216  ;;  %v6832_v23 = vmul.f32 %v6320_v11, %v6320_v11 }
 0x729   : > { %v4271_v9 = vsub.f32 %v3247_v58, %v3759_v59  ;;  %v6321_v19 = vsel %vm5809_vm11, %v4270_v63, 0.0  ;;  %v4795_v58 = vadd.s32 3248, %v8683_v3  ;;  %v3255_v60 = vld [vmem:[%s7640_s18 + $0xca0] sm:$0xff] }
 0x72a   : > { %v7334_v22 = vadd.f32 %v7333_v14, %v6822_v4  ;;  %v3760_v4 = vld [vmem:[%s7645_s21 + $0xc68] sm:$0xff]  ;;  %v5300_v14 = vadd.s32 %v8687_v5, %v4787_v56  ;;  %vm5811_vm13 = vcmp.lt.s32.totalorder %v5299_v6, 9216  ;;  %v6833_v31 = vmul.f32 %v6321_v19, %v6321_v19 }
 0x72b   : > { %v4272_v17 = vsub.f32 %v3248_v2, %v3760_v4  ;;  %v6322_v27 = vsel %vm5810_vm12, %v4271_v9, 0.0  ;;  %v4796_v2 = vadd.s32 3256, %v8683_v3  ;;  %v3256_v6 = vld [vmem:[%s7640_s18 + $0xca8] sm:$0xff] }
 0x72c   : > { %v7335_v30 = vadd.f32 %v7334_v22, %v6823_v13  ;;  %v3761_v13 = vld [vmem:[%s7645_s21 + $0xc70] sm:$0xff]  ;;  %v5301_v22 = vadd.s32 %v8687_v5, %v4788_v0  ;;  %vm5812_vm14 = vcmp.lt.s32.totalorder %v5300_v14, 9216  ;;  %v6834_v39 = vmul.f32 %v6322_v27, %v6322_v27 }
 0x72d   : > { %v4273_v25 = vsub.f32 %v3249_v12, %v3761_v13  ;;  %v6323_v35 = vsel %vm5811_vm13, %v4272_v17, 0.0  ;;  %v4797_v12 = vadd.s32 3264, %v8683_v3  ;;  %v3257_v14 = vld [vmem:[%s7640_s18 + $0xcb0] sm:$0xff] }
 0x72e   : > { %v7336_v38 = vadd.f32 %v7335_v30, %v6824_v21  ;;  %v3762_v21 = vld [vmem:[%s7645_s21 + $0xc78] sm:$0xff]  ;;  %v5302_v30 = vadd.s32 %v8687_v5, %v4789_v10  ;;  %vm5813_vm15 = vcmp.lt.s32.totalorder %v5301_v22, 9216  ;;  %v6835_v47 = vmul.f32 %v6323_v35, %v6323_v35 }
 0x72f   : > { %v4274_v33 = vsub.f32 %v3250_v20, %v3762_v21  ;;  %v6324_v43 = vsel %vm5812_vm14, %v4273_v25, 0.0  ;;  %v4798_v20 = vadd.s32 3272, %v8683_v3  ;;  %v3258_v22 = vld [vmem:[%s7640_s18 + $0xcb8] sm:$0xff] }
 0x730   : > { %v7337_v46 = vadd.f32 %v7336_v38, %v6825_v29  ;;  %v3763_v29 = vld [vmem:[%s7645_s21 + $0xc80] sm:$0xff]  ;;  %v5303_v38 = vadd.s32 %v8687_v5, %v4790_v18  ;;  %vm5814_vm0 = vcmp.lt.s32.totalorder %v5302_v30, 9216  ;;  %v6836_v55 = vmul.f32 %v6324_v43, %v6324_v43 }
 0x731   : > { %v4275_v41 = vsub.f32 %v3251_v28, %v3763_v29  ;;  %v6325_v51 = vsel %vm5813_vm15, %v4274_v33, 0.0  ;;  %v4799_v28 = vadd.s32 3280, %v8683_v3  ;;  %v3259_v30 = vld [vmem:[%s7640_s18 + $0xcc0] sm:$0xff] }
 0x732   : > { %v7338_v54 = vadd.f32 %v7337_v46, %v6826_v37  ;;  %v3764_v37 = vld [vmem:[%s7645_s21 + $0xc88] sm:$0xff]  ;;  %v5304_v46 = vadd.s32 %v8687_v5, %v4791_v26  ;;  %vm5815_vm1 = vcmp.lt.s32.totalorder %v5303_v38, 9216  ;;  %v6837_v63 = vmul.f32 %v6325_v51, %v6325_v51 }
 0x733   : > { %v4276_v49 = vsub.f32 %v3252_v36, %v3764_v37  ;;  %v6326_v59 = vsel %vm5814_vm0, %v4275_v41, 0.0  ;;  %v4800_v36 = vadd.s32 3288, %v8683_v3  ;;  %v3260_v38 = vld [vmem:[%s7640_s18 + $0xcc8] sm:$0xff] }
 0x734   : > { %v7339_v62 = vadd.f32 %v7338_v54, %v6827_v45  ;;  %v3765_v45 = vld [vmem:[%s7645_s21 + $0xc90] sm:$0xff]  ;;  %v5305_v54 = vadd.s32 %v8687_v5, %v4792_v34  ;;  %vm5816_vm2 = vcmp.lt.s32.totalorder %v5304_v46, 9216  ;;  %v6838_v9 = vmul.f32 %v6326_v59, %v6326_v59 }
 0x735   : > { %v4277_v57 = vsub.f32 %v3253_v44, %v3765_v45  ;;  %v6327_v4 = vsel %vm5815_vm1, %v4276_v49, 0.0  ;;  %v4801_v44 = vadd.s32 3296, %v8683_v3  ;;  %v3261_v46 = vld [vmem:[%s7640_s18 + $0xcd0] sm:$0xff] }
 0x736   : > { %v7340_v8 = vadd.f32 %v7339_v62, %v6828_v53  ;;  %v3766_v53 = vld [vmem:[%s7645_s21 + $0xc98] sm:$0xff]  ;;  %v5306_v62 = vadd.s32 %v8687_v5, %v4793_v42  ;;  %vm5817_vm3 = vcmp.lt.s32.totalorder %v5305_v54, 9216  ;;  %v6839_v17 = vmul.f32 %v6327_v4, %v6327_v4 }
 0x737   : > { %v4278_v1 = vsub.f32 %v3254_v52, %v3766_v53  ;;  %v6328_v13 = vsel %vm5816_vm2, %v4277_v57, 0.0  ;;  %v4802_v52 = vadd.s32 3304, %v8683_v3  ;;  %v3262_v54 = vld [vmem:[%s7640_s18 + $0xcd8] sm:$0xff] }
 0x738   : > { %v7341_v16 = vadd.f32 %v7340_v8, %v6829_v61  ;;  %v3767_v61 = vld [vmem:[%s7645_s21 + $0xca0] sm:$0xff]  ;;  %v5307_v8 = vadd.s32 %v8687_v5, %v4794_v50  ;;  %vm5818_vm4 = vcmp.lt.s32.totalorder %v5306_v62, 9216  ;;  %v6840_v25 = vmul.f32 %v6328_v13, %v6328_v13 }
 0x739   : > { %v4279_v11 = vsub.f32 %v3255_v60, %v3767_v61  ;;  %v6329_v21 = vsel %vm5817_vm3, %v4278_v1, 0.0  ;;  %v4803_v60 = vadd.s32 3312, %v8683_v3  ;;  %v3263_v62 = vld [vmem:[%s7640_s18 + $0xce0] sm:$0xff] }
 0x73a   : > { %v7342_v24 = vadd.f32 %v7341_v16, %v6830_v7  ;;  %v3768_v7 = vld [vmem:[%s7645_s21 + $0xca8] sm:$0xff]  ;;  %v5308_v16 = vadd.s32 %v8687_v5, %v4795_v58  ;;  %vm5819_vm5 = vcmp.lt.s32.totalorder %v5307_v8, 9216  ;;  %v6841_v33 = vmul.f32 %v6329_v21, %v6329_v21 }
 0x73b   : > { %v4280_v19 = vsub.f32 %v3256_v6, %v3768_v7  ;;  %v6330_v29 = vsel %vm5818_vm4, %v4279_v11, 0.0  ;;  %v4804_v6 = vadd.s32 3320, %v8683_v3  ;;  %v3264_v8 = vld [vmem:[%s7640_s18 + $0xce8] sm:$0xff] }
 0x73c   : > { %v7343_v32 = vadd.f32 %v7342_v24, %v6831_v15  ;;  %v3769_v15 = vld [vmem:[%s7645_s21 + $0xcb0] sm:$0xff]  ;;  %v5309_v24 = vadd.s32 %v8687_v5, %v4796_v2  ;;  %vm5820_vm6 = vcmp.lt.s32.totalorder %v5308_v16, 9216  ;;  %v6842_v41 = vmul.f32 %v6330_v29, %v6330_v29 }
 0x73d   : > { %v4281_v27 = vsub.f32 %v3257_v14, %v3769_v15  ;;  %v6331_v37 = vsel %vm5819_vm5, %v4280_v19, 0.0  ;;  %v4805_v14 = vadd.s32 3328, %v8683_v3  ;;  %v3265_v16 = vld [vmem:[%s7640_s18 + $0xcf0] sm:$0xff] }
 0x73e   : > { %v7344_v40 = vadd.f32 %v7343_v32, %v6832_v23  ;;  %v3770_v23 = vld [vmem:[%s7645_s21 + $0xcb8] sm:$0xff]  ;;  %v5310_v32 = vadd.s32 %v8687_v5, %v4797_v12  ;;  %vm5821_vm7 = vcmp.lt.s32.totalorder %v5309_v24, 9216  ;;  %v6843_v49 = vmul.f32 %v6331_v37, %v6331_v37 }
 0x73f   : > { %v4282_v35 = vsub.f32 %v3258_v22, %v3770_v23  ;;  %v6332_v45 = vsel %vm5820_vm6, %v4281_v27, 0.0  ;;  %v4806_v22 = vadd.s32 3336, %v8683_v3  ;;  %v3266_v24 = vld [vmem:[%s7640_s18 + $0xcf8] sm:$0xff] }
 0x740   : > { %v7345_v48 = vadd.f32 %v7344_v40, %v6833_v31  ;;  %v3771_v31 = vld [vmem:[%s7645_s21 + $0xcc0] sm:$0xff]  ;;  %v5311_v40 = vadd.s32 %v8687_v5, %v4798_v20  ;;  %vm5822_vm8 = vcmp.lt.s32.totalorder %v5310_v32, 9216  ;;  %v6844_v57 = vmul.f32 %v6332_v45, %v6332_v45 }
 0x741   : > { %v4283_v43 = vsub.f32 %v3259_v30, %v3771_v31  ;;  %v6333_v53 = vsel %vm5821_vm7, %v4282_v35, 0.0  ;;  %v4807_v30 = vadd.s32 3344, %v8683_v3  ;;  %v3267_v32 = vld [vmem:[%s7640_s18 + $0xd00] sm:$0xff] }
 0x742   : > { %v7346_v56 = vadd.f32 %v7345_v48, %v6834_v39  ;;  %v3772_v39 = vld [vmem:[%s7645_s21 + $0xcc8] sm:$0xff]  ;;  %v5312_v48 = vadd.s32 %v8687_v5, %v4799_v28  ;;  %vm5823_vm9 = vcmp.lt.s32.totalorder %v5311_v40, 9216  ;;  %v6845_v1 = vmul.f32 %v6333_v53, %v6333_v53 }
 0x743   : > { %v4284_v51 = vsub.f32 %v3260_v38, %v3772_v39  ;;  %v6334_v61 = vsel %vm5822_vm8, %v4283_v43, 0.0  ;;  %v4808_v38 = vadd.s32 3352, %v8683_v3  ;;  %v3268_v40 = vld [vmem:[%s7640_s18 + $0xd08] sm:$0xff] }
 0x744   : > { %v7347_v0 = vadd.f32 %v7346_v56, %v6835_v47  ;;  %v3773_v47 = vld [vmem:[%s7645_s21 + $0xcd0] sm:$0xff]  ;;  %v5313_v56 = vadd.s32 %v8687_v5, %v4800_v36  ;;  %vm5824_vm10 = vcmp.lt.s32.totalorder %v5312_v48, 9216  ;;  %v6846_v11 = vmul.f32 %v6334_v61, %v6334_v61 }
 0x745   : > { %v4285_v59 = vsub.f32 %v3261_v46, %v3773_v47  ;;  %v6335_v7 = vsel %vm5823_vm9, %v4284_v51, 0.0  ;;  %v4809_v46 = vadd.s32 3360, %v8683_v3  ;;  %v3269_v48 = vld [vmem:[%s7640_s18 + $0xd10] sm:$0xff] }
 0x746   : > { %v7348_v10 = vadd.f32 %v7347_v0, %v6836_v55  ;;  %v3774_v55 = vld [vmem:[%s7645_s21 + $0xcd8] sm:$0xff]  ;;  %v5314_v0 = vadd.s32 %v8687_v5, %v4801_v44  ;;  %vm5825_vm11 = vcmp.lt.s32.totalorder %v5313_v56, 9216  ;;  %v6847_v19 = vmul.f32 %v6335_v7, %v6335_v7 }
 0x747   : > { %v4286_v4 = vsub.f32 %v3262_v54, %v3774_v55  ;;  %v6336_v15 = vsel %vm5824_vm10, %v4285_v59, 0.0  ;;  %v4810_v54 = vadd.s32 3368, %v8683_v3  ;;  %v3270_v56 = vld [vmem:[%s7640_s18 + $0xd18] sm:$0xff] }
 0x748   : > { %v7349_v18 = vadd.f32 %v7348_v10, %v6837_v63  ;;  %v3775_v63 = vld [vmem:[%s7645_s21 + $0xce0] sm:$0xff]  ;;  %v5315_v10 = vadd.s32 %v8687_v5, %v4802_v52  ;;  %vm5826_vm12 = vcmp.lt.s32.totalorder %v5314_v0, 9216  ;;  %v6848_v27 = vmul.f32 %v6336_v15, %v6336_v15 }
 0x749   : > { %v4287_v13 = vsub.f32 %v3263_v62, %v3775_v63  ;;  %v6337_v23 = vsel %vm5825_vm11, %v4286_v4, 0.0  ;;  %v4811_v62 = vadd.s32 3376, %v8683_v3  ;;  %v3271_v0 = vld [vmem:[%s7640_s18 + $0xd20] sm:$0xff] }
 0x74a   : > { %v7350_v26 = vadd.f32 %v7349_v18, %v6838_v9  ;;  %v3776_v9 = vld [vmem:[%s7645_s21 + $0xce8] sm:$0xff]  ;;  %v5316_v18 = vadd.s32 %v8687_v5, %v4803_v60  ;;  %vm5827_vm13 = vcmp.lt.s32.totalorder %v5315_v10, 9216  ;;  %v6849_v35 = vmul.f32 %v6337_v23, %v6337_v23 }
 0x74b   : > { %v4288_v21 = vsub.f32 %v3264_v8, %v3776_v9  ;;  %v6338_v31 = vsel %vm5826_vm12, %v4287_v13, 0.0  ;;  %v4812_v8 = vadd.s32 3384, %v8683_v3  ;;  %v3272_v10 = vld [vmem:[%s7640_s18 + $0xd28] sm:$0xff] }
 0x74c   : > { %v7351_v34 = vadd.f32 %v7350_v26, %v6839_v17  ;;  %v3777_v17 = vld [vmem:[%s7645_s21 + $0xcf0] sm:$0xff]  ;;  %v5317_v26 = vadd.s32 %v8687_v5, %v4804_v6  ;;  %vm5828_vm14 = vcmp.lt.s32.totalorder %v5316_v18, 9216  ;;  %v6850_v43 = vmul.f32 %v6338_v31, %v6338_v31 }
 0x74d   : > { %v4289_v29 = vsub.f32 %v3265_v16, %v3777_v17  ;;  %v6339_v39 = vsel %vm5827_vm13, %v4288_v21, 0.0  ;;  %v4813_v16 = vadd.s32 3392, %v8683_v3  ;;  %v3273_v18 = vld [vmem:[%s7640_s18 + $0xd30] sm:$0xff] }
 0x74e   : > { %v7352_v42 = vadd.f32 %v7351_v34, %v6840_v25  ;;  %v3778_v25 = vld [vmem:[%s7645_s21 + $0xcf8] sm:$0xff]  ;;  %v5318_v34 = vadd.s32 %v8687_v5, %v4805_v14  ;;  %vm5829_vm15 = vcmp.lt.s32.totalorder %v5317_v26, 9216  ;;  %v6851_v51 = vmul.f32 %v6339_v39, %v6339_v39 }
 0x74f   : > { %v4290_v37 = vsub.f32 %v3266_v24, %v3778_v25  ;;  %v6340_v47 = vsel %vm5828_vm14, %v4289_v29, 0.0  ;;  %v4814_v24 = vadd.s32 3400, %v8683_v3  ;;  %v3274_v26 = vld [vmem:[%s7640_s18 + $0xd38] sm:$0xff] }
 0x750   : > { %v7353_v50 = vadd.f32 %v7352_v42, %v6841_v33  ;;  %v3779_v33 = vld [vmem:[%s7645_s21 + $0xd00] sm:$0xff]  ;;  %v5319_v42 = vadd.s32 %v8687_v5, %v4806_v22  ;;  %vm5830_vm0 = vcmp.lt.s32.totalorder %v5318_v34, 9216  ;;  %v6852_v59 = vmul.f32 %v6340_v47, %v6340_v47 }
 0x751   : > { %v4291_v45 = vsub.f32 %v3267_v32, %v3779_v33  ;;  %v6341_v55 = vsel %vm5829_vm15, %v4290_v37, 0.0  ;;  %v4815_v32 = vadd.s32 3408, %v8683_v3  ;;  %v3275_v34 = vld [vmem:[%s7640_s18 + $0xd40] sm:$0xff] }
 0x752   : > { %v7354_v58 = vadd.f32 %v7353_v50, %v6842_v41  ;;  %v3780_v41 = vld [vmem:[%s7645_s21 + $0xd08] sm:$0xff]  ;;  %v5320_v50 = vadd.s32 %v8687_v5, %v4807_v30  ;;  %vm5831_vm1 = vcmp.lt.s32.totalorder %v5319_v42, 9216  ;;  %v6853_v4 = vmul.f32 %v6341_v55, %v6341_v55 }
 0x753   : > { %v4292_v53 = vsub.f32 %v3268_v40, %v3780_v41  ;;  %v6342_v63 = vsel %vm5830_vm0, %v4291_v45, 0.0  ;;  %v4816_v40 = vadd.s32 3416, %v8683_v3  ;;  %v3276_v42 = vld [vmem:[%s7640_s18 + $0xd48] sm:$0xff] }
 0x754   : > { %v7355_v2 = vadd.f32 %v7354_v58, %v6843_v49  ;;  %v3781_v49 = vld [vmem:[%s7645_s21 + $0xd10] sm:$0xff]  ;;  %v5321_v58 = vadd.s32 %v8687_v5, %v4808_v38  ;;  %vm5832_vm2 = vcmp.lt.s32.totalorder %v5320_v50, 9216  ;;  %v6854_v13 = vmul.f32 %v6342_v63, %v6342_v63 }
 0x755   : > { %v4293_v61 = vsub.f32 %v3269_v48, %v3781_v49  ;;  %v6343_v9 = vsel %vm5831_vm1, %v4292_v53, 0.0  ;;  %v4817_v48 = vadd.s32 3424, %v8683_v3  ;;  %v3277_v50 = vld [vmem:[%s7640_s18 + $0xd50] sm:$0xff] }
 0x756   : > { %v7356_v12 = vadd.f32 %v7355_v2, %v6844_v57  ;;  %v3782_v57 = vld [vmem:[%s7645_s21 + $0xd18] sm:$0xff]  ;;  %v5322_v2 = vadd.s32 %v8687_v5, %v4809_v46  ;;  %vm5833_vm3 = vcmp.lt.s32.totalorder %v5321_v58, 9216  ;;  %v6855_v21 = vmul.f32 %v6343_v9, %v6343_v9 }
 0x757   : > { %v4294_v7 = vsub.f32 %v3270_v56, %v3782_v57  ;;  %v6344_v17 = vsel %vm5832_vm2, %v4293_v61, 0.0  ;;  %v4818_v56 = vadd.s32 3432, %v8683_v3  ;;  %v3278_v58 = vld [vmem:[%s7640_s18 + $0xd58] sm:$0xff] }
 0x758   : > { %v7357_v20 = vadd.f32 %v7356_v12, %v6845_v1  ;;  %v3783_v1 = vld [vmem:[%s7645_s21 + $0xd20] sm:$0xff]  ;;  %v5323_v12 = vadd.s32 %v8687_v5, %v4810_v54  ;;  %vm5834_vm4 = vcmp.lt.s32.totalorder %v5322_v2, 9216  ;;  %v6856_v29 = vmul.f32 %v6344_v17, %v6344_v17 }
 0x759   : > { %v4295_v15 = vsub.f32 %v3271_v0, %v3783_v1  ;;  %v6345_v25 = vsel %vm5833_vm3, %v4294_v7, 0.0  ;;  %v4819_v0 = vadd.s32 3440, %v8683_v3  ;;  %v3279_v2 = vld [vmem:[%s7640_s18 + $0xd60] sm:$0xff] }
 0x75a   : > { %v7358_v28 = vadd.f32 %v7357_v20, %v6846_v11  ;;  %v3784_v11 = vld [vmem:[%s7645_s21 + $0xd28] sm:$0xff]  ;;  %v5324_v20 = vadd.s32 %v8687_v5, %v4811_v62  ;;  %vm5835_vm5 = vcmp.lt.s32.totalorder %v5323_v12, 9216  ;;  %v6857_v37 = vmul.f32 %v6345_v25, %v6345_v25 }
 0x75b   : > { %v4296_v23 = vsub.f32 %v3272_v10, %v3784_v11  ;;  %v6346_v33 = vsel %vm5834_vm4, %v4295_v15, 0.0  ;;  %v4820_v10 = vadd.s32 3448, %v8683_v3  ;;  %v3280_v12 = vld [vmem:[%s7640_s18 + $0xd68] sm:$0xff] }
 0x75c   : > { %v7359_v36 = vadd.f32 %v7358_v28, %v6847_v19  ;;  %v3785_v19 = vld [vmem:[%s7645_s21 + $0xd30] sm:$0xff]  ;;  %v5325_v28 = vadd.s32 %v8687_v5, %v4812_v8  ;;  %vm5836_vm6 = vcmp.lt.s32.totalorder %v5324_v20, 9216  ;;  %v6858_v45 = vmul.f32 %v6346_v33, %v6346_v33 }
 0x75d   : > { %v4297_v31 = vsub.f32 %v3273_v18, %v3785_v19  ;;  %v6347_v41 = vsel %vm5835_vm5, %v4296_v23, 0.0  ;;  %v4821_v18 = vadd.s32 3456, %v8683_v3  ;;  %v3281_v20 = vld [vmem:[%s7640_s18 + $0xd70] sm:$0xff] }
 0x75e   : > { %v7360_v44 = vadd.f32 %v7359_v36, %v6848_v27  ;;  %v3786_v27 = vld [vmem:[%s7645_s21 + $0xd38] sm:$0xff]  ;;  %v5326_v36 = vadd.s32 %v8687_v5, %v4813_v16  ;;  %vm5837_vm7 = vcmp.lt.s32.totalorder %v5325_v28, 9216  ;;  %v6859_v53 = vmul.f32 %v6347_v41, %v6347_v41 }
 0x75f   : > { %v4298_v39 = vsub.f32 %v3274_v26, %v3786_v27  ;;  %v6348_v49 = vsel %vm5836_vm6, %v4297_v31, 0.0  ;;  %v4822_v26 = vadd.s32 3464, %v8683_v3  ;;  %v3282_v28 = vld [vmem:[%s7640_s18 + $0xd78] sm:$0xff] }
 0x760   : > { %v7361_v52 = vadd.f32 %v7360_v44, %v6849_v35  ;;  %v3787_v35 = vld [vmem:[%s7645_s21 + $0xd40] sm:$0xff]  ;;  %v5327_v44 = vadd.s32 %v8687_v5, %v4814_v24  ;;  %vm5838_vm8 = vcmp.lt.s32.totalorder %v5326_v36, 9216  ;;  %v6860_v61 = vmul.f32 %v6348_v49, %v6348_v49 }
 0x761   : > { %v4299_v47 = vsub.f32 %v3275_v34, %v3787_v35  ;;  %v6349_v57 = vsel %vm5837_vm7, %v4298_v39, 0.0  ;;  %v4823_v34 = vadd.s32 3472, %v8683_v3  ;;  %v3283_v36 = vld [vmem:[%s7640_s18 + $0xd80] sm:$0xff] }
 0x762   : > { %v7362_v60 = vadd.f32 %v7361_v52, %v6850_v43  ;;  %v3788_v43 = vld [vmem:[%s7645_s21 + $0xd48] sm:$0xff]  ;;  %v5328_v52 = vadd.s32 %v8687_v5, %v4815_v32  ;;  %vm5839_vm9 = vcmp.lt.s32.totalorder %v5327_v44, 9216  ;;  %v6861_v7 = vmul.f32 %v6349_v57, %v6349_v57 }
 0x763   : > { %v4300_v55 = vsub.f32 %v3276_v42, %v3788_v43  ;;  %v6350_v1 = vsel %vm5838_vm8, %v4299_v47, 0.0  ;;  %v4824_v42 = vadd.s32 3480, %v8683_v3  ;;  %v3284_v44 = vld [vmem:[%s7640_s18 + $0xd88] sm:$0xff] }
 0x764   : > { %v7363_v6 = vadd.f32 %v7362_v60, %v6851_v51  ;;  %v3789_v51 = vld [vmem:[%s7645_s21 + $0xd50] sm:$0xff]  ;;  %v5329_v60 = vadd.s32 %v8687_v5, %v4816_v40  ;;  %vm5840_vm10 = vcmp.lt.s32.totalorder %v5328_v52, 9216  ;;  %v6862_v15 = vmul.f32 %v6350_v1, %v6350_v1 }
 0x765   : > { %v4301_v63 = vsub.f32 %v3277_v50, %v3789_v51  ;;  %v6351_v11 = vsel %vm5839_vm9, %v4300_v55, 0.0  ;;  %v4825_v50 = vadd.s32 3488, %v8683_v3  ;;  %v3285_v52 = vld [vmem:[%s7640_s18 + $0xd90] sm:$0xff] }
 0x766   : > { %v7364_v14 = vadd.f32 %v7363_v6, %v6852_v59  ;;  %v3790_v59 = vld [vmem:[%s7645_s21 + $0xd58] sm:$0xff]  ;;  %v5330_v6 = vadd.s32 %v8687_v5, %v4817_v48  ;;  %vm5841_vm11 = vcmp.lt.s32.totalorder %v5329_v60, 9216  ;;  %v6863_v23 = vmul.f32 %v6351_v11, %v6351_v11 }
 0x767   : > { %v4302_v9 = vsub.f32 %v3278_v58, %v3790_v59  ;;  %v6352_v19 = vsel %vm5840_vm10, %v4301_v63, 0.0  ;;  %v4826_v58 = vadd.s32 3496, %v8683_v3  ;;  %v3286_v60 = vld [vmem:[%s7640_s18 + $0xd98] sm:$0xff] }
 0x768   : > { %v7365_v22 = vadd.f32 %v7364_v14, %v6853_v4  ;;  %v3791_v4 = vld [vmem:[%s7645_s21 + $0xd60] sm:$0xff]  ;;  %v5331_v14 = vadd.s32 %v8687_v5, %v4818_v56  ;;  %vm5842_vm12 = vcmp.lt.s32.totalorder %v5330_v6, 9216  ;;  %v6864_v31 = vmul.f32 %v6352_v19, %v6352_v19 }
 0x769   : > { %v4303_v17 = vsub.f32 %v3279_v2, %v3791_v4  ;;  %v6353_v27 = vsel %vm5841_vm11, %v4302_v9, 0.0  ;;  %v4827_v2 = vadd.s32 3504, %v8683_v3  ;;  %v3287_v6 = vld [vmem:[%s7640_s18 + $0xda0] sm:$0xff] }
 0x76a   : > { %v7366_v30 = vadd.f32 %v7365_v22, %v6854_v13  ;;  %v3792_v13 = vld [vmem:[%s7645_s21 + $0xd68] sm:$0xff]  ;;  %v5332_v22 = vadd.s32 %v8687_v5, %v4819_v0  ;;  %vm5843_vm13 = vcmp.lt.s32.totalorder %v5331_v14, 9216  ;;  %v6865_v39 = vmul.f32 %v6353_v27, %v6353_v27 }
 0x76b   : > { %v4304_v25 = vsub.f32 %v3280_v12, %v3792_v13  ;;  %v6354_v35 = vsel %vm5842_vm12, %v4303_v17, 0.0  ;;  %v4828_v12 = vadd.s32 3512, %v8683_v3  ;;  %v3288_v14 = vld [vmem:[%s7640_s18 + $0xda8] sm:$0xff] }
 0x76c   : > { %v7367_v38 = vadd.f32 %v7366_v30, %v6855_v21  ;;  %v3793_v21 = vld [vmem:[%s7645_s21 + $0xd70] sm:$0xff]  ;;  %v5333_v30 = vadd.s32 %v8687_v5, %v4820_v10  ;;  %vm5844_vm14 = vcmp.lt.s32.totalorder %v5332_v22, 9216  ;;  %v6866_v47 = vmul.f32 %v6354_v35, %v6354_v35 }
 0x76d   : > { %v4305_v33 = vsub.f32 %v3281_v20, %v3793_v21  ;;  %v6355_v43 = vsel %vm5843_vm13, %v4304_v25, 0.0  ;;  %v4829_v20 = vadd.s32 3520, %v8683_v3  ;;  %v3289_v22 = vld [vmem:[%s7640_s18 + $0xdb0] sm:$0xff] }
 0x76e   : > { %v7368_v46 = vadd.f32 %v7367_v38, %v6856_v29  ;;  %v3794_v29 = vld [vmem:[%s7645_s21 + $0xd78] sm:$0xff]  ;;  %v5334_v38 = vadd.s32 %v8687_v5, %v4821_v18  ;;  %vm5845_vm15 = vcmp.lt.s32.totalorder %v5333_v30, 9216  ;;  %v6867_v55 = vmul.f32 %v6355_v43, %v6355_v43 }
 0x76f   : > { %v4306_v41 = vsub.f32 %v3282_v28, %v3794_v29  ;;  %v6356_v51 = vsel %vm5844_vm14, %v4305_v33, 0.0  ;;  %v4830_v28 = vadd.s32 3528, %v8683_v3  ;;  %v3290_v30 = vld [vmem:[%s7640_s18 + $0xdb8] sm:$0xff] }
 0x770   : > { %v7369_v54 = vadd.f32 %v7368_v46, %v6857_v37  ;;  %v3795_v37 = vld [vmem:[%s7645_s21 + $0xd80] sm:$0xff]  ;;  %v5335_v46 = vadd.s32 %v8687_v5, %v4822_v26  ;;  %vm5846_vm0 = vcmp.lt.s32.totalorder %v5334_v38, 9216  ;;  %v6868_v63 = vmul.f32 %v6356_v51, %v6356_v51 }
 0x771   : > { %v4307_v49 = vsub.f32 %v3283_v36, %v3795_v37  ;;  %v6357_v59 = vsel %vm5845_vm15, %v4306_v41, 0.0  ;;  %v4831_v36 = vadd.s32 3536, %v8683_v3  ;;  %v3291_v38 = vld [vmem:[%s7640_s18 + $0xdc0] sm:$0xff] }
 0x772   : > { %v7370_v62 = vadd.f32 %v7369_v54, %v6858_v45  ;;  %v3796_v45 = vld [vmem:[%s7645_s21 + $0xd88] sm:$0xff]  ;;  %v5336_v54 = vadd.s32 %v8687_v5, %v4823_v34  ;;  %vm5847_vm1 = vcmp.lt.s32.totalorder %v5335_v46, 9216  ;;  %v6869_v9 = vmul.f32 %v6357_v59, %v6357_v59 }
 0x773   : > { %v4308_v57 = vsub.f32 %v3284_v44, %v3796_v45  ;;  %v6358_v4 = vsel %vm5846_vm0, %v4307_v49, 0.0  ;;  %v4832_v44 = vadd.s32 3544, %v8683_v3  ;;  %v3292_v46 = vld [vmem:[%s7640_s18 + $0xdc8] sm:$0xff] }
 0x774   : > { %v7371_v8 = vadd.f32 %v7370_v62, %v6859_v53  ;;  %v3797_v53 = vld [vmem:[%s7645_s21 + $0xd90] sm:$0xff]  ;;  %v5337_v62 = vadd.s32 %v8687_v5, %v4824_v42  ;;  %vm5848_vm2 = vcmp.lt.s32.totalorder %v5336_v54, 9216  ;;  %v6870_v17 = vmul.f32 %v6358_v4, %v6358_v4 }
 0x775   : > { %v4309_v1 = vsub.f32 %v3285_v52, %v3797_v53  ;;  %v6359_v13 = vsel %vm5847_vm1, %v4308_v57, 0.0  ;;  %v4833_v52 = vadd.s32 3552, %v8683_v3  ;;  %v3293_v54 = vld [vmem:[%s7640_s18 + $0xdd0] sm:$0xff] }
 0x776   : > { %v7372_v16 = vadd.f32 %v7371_v8, %v6860_v61  ;;  %v3798_v61 = vld [vmem:[%s7645_s21 + $0xd98] sm:$0xff]  ;;  %v5338_v8 = vadd.s32 %v8687_v5, %v4825_v50  ;;  %vm5849_vm3 = vcmp.lt.s32.totalorder %v5337_v62, 9216  ;;  %v6871_v25 = vmul.f32 %v6359_v13, %v6359_v13 }
 0x777   : > { %v4310_v11 = vsub.f32 %v3286_v60, %v3798_v61  ;;  %v6360_v21 = vsel %vm5848_vm2, %v4309_v1, 0.0  ;;  %v4834_v60 = vadd.s32 3560, %v8683_v3  ;;  %v3294_v62 = vld [vmem:[%s7640_s18 + $0xdd8] sm:$0xff] }
 0x778   : > { %v7373_v24 = vadd.f32 %v7372_v16, %v6861_v7  ;;  %v3799_v7 = vld [vmem:[%s7645_s21 + $0xda0] sm:$0xff]  ;;  %v5339_v16 = vadd.s32 %v8687_v5, %v4826_v58  ;;  %vm5850_vm4 = vcmp.lt.s32.totalorder %v5338_v8, 9216  ;;  %v6872_v33 = vmul.f32 %v6360_v21, %v6360_v21 }
 0x779   : > { %v4311_v19 = vsub.f32 %v3287_v6, %v3799_v7  ;;  %v6361_v29 = vsel %vm5849_vm3, %v4310_v11, 0.0  ;;  %v4835_v6 = vadd.s32 3568, %v8683_v3  ;;  %v3295_v8 = vld [vmem:[%s7640_s18 + $0xde0] sm:$0xff] }
 0x77a   : > { %v7374_v32 = vadd.f32 %v7373_v24, %v6862_v15  ;;  %v3800_v15 = vld [vmem:[%s7645_s21 + $0xda8] sm:$0xff]  ;;  %v5340_v24 = vadd.s32 %v8687_v5, %v4827_v2  ;;  %vm5851_vm5 = vcmp.lt.s32.totalorder %v5339_v16, 9216  ;;  %v6873_v41 = vmul.f32 %v6361_v29, %v6361_v29 }
 0x77b   : > { %v4312_v27 = vsub.f32 %v3288_v14, %v3800_v15  ;;  %v6362_v37 = vsel %vm5850_vm4, %v4311_v19, 0.0  ;;  %v4836_v14 = vadd.s32 3576, %v8683_v3  ;;  %v3296_v16 = vld [vmem:[%s7640_s18 + $0xde8] sm:$0xff] }
 0x77c   : > { %v7375_v40 = vadd.f32 %v7374_v32, %v6863_v23  ;;  %v3801_v23 = vld [vmem:[%s7645_s21 + $0xdb0] sm:$0xff]  ;;  %v5341_v32 = vadd.s32 %v8687_v5, %v4828_v12  ;;  %vm5852_vm6 = vcmp.lt.s32.totalorder %v5340_v24, 9216  ;;  %v6874_v49 = vmul.f32 %v6362_v37, %v6362_v37 }
 0x77d   : > { %v4313_v35 = vsub.f32 %v3289_v22, %v3801_v23  ;;  %v6363_v45 = vsel %vm5851_vm5, %v4312_v27, 0.0  ;;  %v4837_v22 = vadd.s32 3584, %v8683_v3  ;;  %v3297_v24 = vld [vmem:[%s7640_s18 + $0xdf0] sm:$0xff] }
 0x77e   : > { %v7376_v48 = vadd.f32 %v7375_v40, %v6864_v31  ;;  %v3802_v31 = vld [vmem:[%s7645_s21 + $0xdb8] sm:$0xff]  ;;  %v5342_v40 = vadd.s32 %v8687_v5, %v4829_v20  ;;  %vm5853_vm7 = vcmp.lt.s32.totalorder %v5341_v32, 9216  ;;  %v6875_v57 = vmul.f32 %v6363_v45, %v6363_v45 }
 0x77f   : > { %v4314_v43 = vsub.f32 %v3290_v30, %v3802_v31  ;;  %v6364_v53 = vsel %vm5852_vm6, %v4313_v35, 0.0  ;;  %v4838_v30 = vadd.s32 3592, %v8683_v3  ;;  %v3298_v32 = vld [vmem:[%s7640_s18 + $0xdf8] sm:$0xff] }
 0x780   : > { %v7377_v56 = vadd.f32 %v7376_v48, %v6865_v39  ;;  %v3803_v39 = vld [vmem:[%s7645_s21 + $0xdc0] sm:$0xff]  ;;  %v5343_v48 = vadd.s32 %v8687_v5, %v4830_v28  ;;  %vm5854_vm8 = vcmp.lt.s32.totalorder %v5342_v40, 9216  ;;  %v6876_v1 = vmul.f32 %v6364_v53, %v6364_v53 }
 0x781   : > { %v4315_v51 = vsub.f32 %v3291_v38, %v3803_v39  ;;  %v6365_v61 = vsel %vm5853_vm7, %v4314_v43, 0.0  ;;  %v4839_v38 = vadd.s32 3600, %v8683_v3  ;;  %v3299_v40 = vld [vmem:[%s7640_s18 + $0xe00] sm:$0xff] }
 0x782   : > { %v7378_v0 = vadd.f32 %v7377_v56, %v6866_v47  ;;  %v3804_v47 = vld [vmem:[%s7645_s21 + $0xdc8] sm:$0xff]  ;;  %v5344_v56 = vadd.s32 %v8687_v5, %v4831_v36  ;;  %vm5855_vm9 = vcmp.lt.s32.totalorder %v5343_v48, 9216  ;;  %v6877_v11 = vmul.f32 %v6365_v61, %v6365_v61 }
 0x783   : > { %v4316_v59 = vsub.f32 %v3292_v46, %v3804_v47  ;;  %v6366_v7 = vsel %vm5854_vm8, %v4315_v51, 0.0  ;;  %v4840_v46 = vadd.s32 3608, %v8683_v3  ;;  %v3300_v48 = vld [vmem:[%s7640_s18 + $0xe08] sm:$0xff] }
 0x784   : > { %v7379_v10 = vadd.f32 %v7378_v0, %v6867_v55  ;;  %v3805_v55 = vld [vmem:[%s7645_s21 + $0xdd0] sm:$0xff]  ;;  %v5345_v0 = vadd.s32 %v8687_v5, %v4832_v44  ;;  %vm5856_vm10 = vcmp.lt.s32.totalorder %v5344_v56, 9216  ;;  %v6878_v19 = vmul.f32 %v6366_v7, %v6366_v7 }
 0x785   : > { %v4317_v4 = vsub.f32 %v3293_v54, %v3805_v55  ;;  %v6367_v15 = vsel %vm5855_vm9, %v4316_v59, 0.0  ;;  %v4841_v54 = vadd.s32 3616, %v8683_v3  ;;  %v3301_v56 = vld [vmem:[%s7640_s18 + $0xe10] sm:$0xff] }
 0x786   : > { %v7380_v18 = vadd.f32 %v7379_v10, %v6868_v63  ;;  %v3806_v63 = vld [vmem:[%s7645_s21 + $0xdd8] sm:$0xff]  ;;  %v5346_v10 = vadd.s32 %v8687_v5, %v4833_v52  ;;  %vm5857_vm11 = vcmp.lt.s32.totalorder %v5345_v0, 9216  ;;  %v6879_v27 = vmul.f32 %v6367_v15, %v6367_v15 }
 0x787   : > { %v4318_v13 = vsub.f32 %v3294_v62, %v3806_v63  ;;  %v6368_v23 = vsel %vm5856_vm10, %v4317_v4, 0.0  ;;  %v4842_v62 = vadd.s32 3624, %v8683_v3  ;;  %v3302_v0 = vld [vmem:[%s7640_s18 + $0xe18] sm:$0xff] }
 0x788   : > { %v7381_v26 = vadd.f32 %v7380_v18, %v6869_v9  ;;  %v3807_v9 = vld [vmem:[%s7645_s21 + $0xde0] sm:$0xff]  ;;  %v5347_v18 = vadd.s32 %v8687_v5, %v4834_v60  ;;  %vm5858_vm12 = vcmp.lt.s32.totalorder %v5346_v10, 9216  ;;  %v6880_v35 = vmul.f32 %v6368_v23, %v6368_v23 }
 0x789   : > { %v4319_v21 = vsub.f32 %v3295_v8, %v3807_v9  ;;  %v6369_v31 = vsel %vm5857_vm11, %v4318_v13, 0.0  ;;  %v4843_v8 = vadd.s32 3632, %v8683_v3  ;;  %v3303_v10 = vld [vmem:[%s7640_s18 + $0xe20] sm:$0xff] }
 0x78a   : > { %v7382_v34 = vadd.f32 %v7381_v26, %v6870_v17  ;;  %v3808_v17 = vld [vmem:[%s7645_s21 + $0xde8] sm:$0xff]  ;;  %v5348_v26 = vadd.s32 %v8687_v5, %v4835_v6  ;;  %vm5859_vm13 = vcmp.lt.s32.totalorder %v5347_v18, 9216  ;;  %v6881_v43 = vmul.f32 %v6369_v31, %v6369_v31 }
 0x78b   : > { %v4320_v29 = vsub.f32 %v3296_v16, %v3808_v17  ;;  %v6370_v39 = vsel %vm5858_vm12, %v4319_v21, 0.0  ;;  %v4844_v16 = vadd.s32 3640, %v8683_v3  ;;  %v3304_v18 = vld [vmem:[%s7640_s18 + $0xe28] sm:$0xff] }
 0x78c   : > { %v7383_v42 = vadd.f32 %v7382_v34, %v6871_v25  ;;  %v3809_v25 = vld [vmem:[%s7645_s21 + $0xdf0] sm:$0xff]  ;;  %v5349_v34 = vadd.s32 %v8687_v5, %v4836_v14  ;;  %vm5860_vm14 = vcmp.lt.s32.totalorder %v5348_v26, 9216  ;;  %v6882_v51 = vmul.f32 %v6370_v39, %v6370_v39 }
 0x78d   : > { %v4321_v37 = vsub.f32 %v3297_v24, %v3809_v25  ;;  %v6371_v47 = vsel %vm5859_vm13, %v4320_v29, 0.0  ;;  %v4845_v24 = vadd.s32 3648, %v8683_v3  ;;  %v3305_v26 = vld [vmem:[%s7640_s18 + $0xe30] sm:$0xff] }
 0x78e   : > { %v7384_v50 = vadd.f32 %v7383_v42, %v6872_v33  ;;  %v3810_v33 = vld [vmem:[%s7645_s21 + $0xdf8] sm:$0xff]  ;;  %v5350_v42 = vadd.s32 %v8687_v5, %v4837_v22  ;;  %vm5861_vm15 = vcmp.lt.s32.totalorder %v5349_v34, 9216  ;;  %v6883_v59 = vmul.f32 %v6371_v47, %v6371_v47 }
 0x78f   : > { %v4322_v45 = vsub.f32 %v3298_v32, %v3810_v33  ;;  %v6372_v55 = vsel %vm5860_vm14, %v4321_v37, 0.0  ;;  %v4846_v32 = vadd.s32 3656, %v8683_v3  ;;  %v3306_v34 = vld [vmem:[%s7640_s18 + $0xe38] sm:$0xff] }
 0x790   : > { %v7385_v58 = vadd.f32 %v7384_v50, %v6873_v41  ;;  %v3811_v41 = vld [vmem:[%s7645_s21 + $0xe00] sm:$0xff]  ;;  %v5351_v50 = vadd.s32 %v8687_v5, %v4838_v30  ;;  %vm5862_vm0 = vcmp.lt.s32.totalorder %v5350_v42, 9216  ;;  %v6884_v4 = vmul.f32 %v6372_v55, %v6372_v55 }
 0x791   : > { %v4323_v53 = vsub.f32 %v3299_v40, %v3811_v41  ;;  %v6373_v63 = vsel %vm5861_vm15, %v4322_v45, 0.0  ;;  %v4847_v40 = vadd.s32 3664, %v8683_v3  ;;  %v3307_v42 = vld [vmem:[%s7640_s18 + $0xe40] sm:$0xff] }
 0x792   : > { %v7386_v2 = vadd.f32 %v7385_v58, %v6874_v49  ;;  %v3812_v49 = vld [vmem:[%s7645_s21 + $0xe08] sm:$0xff]  ;;  %v5352_v58 = vadd.s32 %v8687_v5, %v4839_v38  ;;  %vm5863_vm1 = vcmp.lt.s32.totalorder %v5351_v50, 9216  ;;  %v6885_v13 = vmul.f32 %v6373_v63, %v6373_v63 }
 0x793   : > { %v4324_v61 = vsub.f32 %v3300_v48, %v3812_v49  ;;  %v6374_v9 = vsel %vm5862_vm0, %v4323_v53, 0.0  ;;  %v4848_v48 = vadd.s32 3672, %v8683_v3  ;;  %v3308_v50 = vld [vmem:[%s7640_s18 + $0xe48] sm:$0xff] }
 0x794   : > { %v7387_v12 = vadd.f32 %v7386_v2, %v6875_v57  ;;  %v3813_v57 = vld [vmem:[%s7645_s21 + $0xe10] sm:$0xff]  ;;  %v5353_v2 = vadd.s32 %v8687_v5, %v4840_v46  ;;  %vm5864_vm2 = vcmp.lt.s32.totalorder %v5352_v58, 9216  ;;  %v6886_v21 = vmul.f32 %v6374_v9, %v6374_v9 }
 0x795   : > { %v4325_v7 = vsub.f32 %v3301_v56, %v3813_v57  ;;  %v6375_v17 = vsel %vm5863_vm1, %v4324_v61, 0.0  ;;  %v4849_v56 = vadd.s32 3680, %v8683_v3  ;;  %v3309_v58 = vld [vmem:[%s7640_s18 + $0xe50] sm:$0xff] }
 0x796   : > { %v7388_v20 = vadd.f32 %v7387_v12, %v6876_v1  ;;  %v3814_v1 = vld [vmem:[%s7645_s21 + $0xe18] sm:$0xff]  ;;  %v5354_v12 = vadd.s32 %v8687_v5, %v4841_v54  ;;  %vm5865_vm3 = vcmp.lt.s32.totalorder %v5353_v2, 9216  ;;  %v6887_v29 = vmul.f32 %v6375_v17, %v6375_v17 }
 0x797   : > { %v4326_v15 = vsub.f32 %v3302_v0, %v3814_v1  ;;  %v6376_v25 = vsel %vm5864_vm2, %v4325_v7, 0.0  ;;  %v4850_v0 = vadd.s32 3688, %v8683_v3  ;;  %v3310_v2 = vld [vmem:[%s7640_s18 + $0xe58] sm:$0xff] }
 0x798   : > { %v7389_v28 = vadd.f32 %v7388_v20, %v6877_v11  ;;  %v3815_v11 = vld [vmem:[%s7645_s21 + $0xe20] sm:$0xff]  ;;  %v5355_v20 = vadd.s32 %v8687_v5, %v4842_v62  ;;  %vm5866_vm4 = vcmp.lt.s32.totalorder %v5354_v12, 9216  ;;  %v6888_v37 = vmul.f32 %v6376_v25, %v6376_v25 }
 0x799   : > { %v4327_v23 = vsub.f32 %v3303_v10, %v3815_v11  ;;  %v6377_v33 = vsel %vm5865_vm3, %v4326_v15, 0.0  ;;  %v4851_v10 = vadd.s32 3696, %v8683_v3  ;;  %v3311_v12 = vld [vmem:[%s7640_s18 + $0xe60] sm:$0xff] }
 0x79a   : > { %v7390_v36 = vadd.f32 %v7389_v28, %v6878_v19  ;;  %v3816_v19 = vld [vmem:[%s7645_s21 + $0xe28] sm:$0xff]  ;;  %v5356_v28 = vadd.s32 %v8687_v5, %v4843_v8  ;;  %vm5867_vm5 = vcmp.lt.s32.totalorder %v5355_v20, 9216  ;;  %v6889_v45 = vmul.f32 %v6377_v33, %v6377_v33 }
 0x79b   : > { %v4328_v31 = vsub.f32 %v3304_v18, %v3816_v19  ;;  %v6378_v41 = vsel %vm5866_vm4, %v4327_v23, 0.0  ;;  %v4852_v18 = vadd.s32 3704, %v8683_v3  ;;  %v3312_v20 = vld [vmem:[%s7640_s18 + $0xe68] sm:$0xff] }
 0x79c   : > { %v7391_v44 = vadd.f32 %v7390_v36, %v6879_v27  ;;  %v3817_v27 = vld [vmem:[%s7645_s21 + $0xe30] sm:$0xff]  ;;  %v5357_v36 = vadd.s32 %v8687_v5, %v4844_v16  ;;  %vm5868_vm6 = vcmp.lt.s32.totalorder %v5356_v28, 9216  ;;  %v6890_v53 = vmul.f32 %v6378_v41, %v6378_v41 }
 0x79d   : > { %v4329_v39 = vsub.f32 %v3305_v26, %v3817_v27  ;;  %v6379_v49 = vsel %vm5867_vm5, %v4328_v31, 0.0  ;;  %v4853_v26 = vadd.s32 3712, %v8683_v3  ;;  %v3313_v28 = vld [vmem:[%s7640_s18 + $0xe70] sm:$0xff] }
 0x79e   : > { %v7392_v52 = vadd.f32 %v7391_v44, %v6880_v35  ;;  %v3818_v35 = vld [vmem:[%s7645_s21 + $0xe38] sm:$0xff]  ;;  %v5358_v44 = vadd.s32 %v8687_v5, %v4845_v24  ;;  %vm5869_vm7 = vcmp.lt.s32.totalorder %v5357_v36, 9216  ;;  %v6891_v61 = vmul.f32 %v6379_v49, %v6379_v49 }
 0x79f   : > { %v4330_v47 = vsub.f32 %v3306_v34, %v3818_v35  ;;  %v6380_v57 = vsel %vm5868_vm6, %v4329_v39, 0.0  ;;  %v4854_v34 = vadd.s32 3720, %v8683_v3  ;;  %v3314_v36 = vld [vmem:[%s7640_s18 + $0xe78] sm:$0xff] }
 0x7a0   : > { %v7393_v60 = vadd.f32 %v7392_v52, %v6881_v43  ;;  %v3819_v43 = vld [vmem:[%s7645_s21 + $0xe40] sm:$0xff]  ;;  %v5359_v52 = vadd.s32 %v8687_v5, %v4846_v32  ;;  %vm5870_vm8 = vcmp.lt.s32.totalorder %v5358_v44, 9216  ;;  %v6892_v7 = vmul.f32 %v6380_v57, %v6380_v57 }
 0x7a1   : > { %v4331_v55 = vsub.f32 %v3307_v42, %v3819_v43  ;;  %v6381_v1 = vsel %vm5869_vm7, %v4330_v47, 0.0  ;;  %v4855_v42 = vadd.s32 3728, %v8683_v3  ;;  %v3315_v44 = vld [vmem:[%s7640_s18 + $0xe80] sm:$0xff] }
 0x7a2   : > { %v7394_v6 = vadd.f32 %v7393_v60, %v6882_v51  ;;  %v3820_v51 = vld [vmem:[%s7645_s21 + $0xe48] sm:$0xff]  ;;  %v5360_v60 = vadd.s32 %v8687_v5, %v4847_v40  ;;  %vm5871_vm9 = vcmp.lt.s32.totalorder %v5359_v52, 9216  ;;  %v6893_v15 = vmul.f32 %v6381_v1, %v6381_v1 }
 0x7a3   : > { %v4332_v63 = vsub.f32 %v3308_v50, %v3820_v51  ;;  %v6382_v11 = vsel %vm5870_vm8, %v4331_v55, 0.0  ;;  %v4856_v50 = vadd.s32 3736, %v8683_v3  ;;  %v3316_v52 = vld [vmem:[%s7640_s18 + $0xe88] sm:$0xff] }
 0x7a4   : > { %v7395_v14 = vadd.f32 %v7394_v6, %v6883_v59  ;;  %v3821_v59 = vld [vmem:[%s7645_s21 + $0xe50] sm:$0xff]  ;;  %v5361_v6 = vadd.s32 %v8687_v5, %v4848_v48  ;;  %vm5872_vm10 = vcmp.lt.s32.totalorder %v5360_v60, 9216  ;;  %v6894_v23 = vmul.f32 %v6382_v11, %v6382_v11 }
 0x7a5   : > { %v4333_v9 = vsub.f32 %v3309_v58, %v3821_v59  ;;  %v6383_v19 = vsel %vm5871_vm9, %v4332_v63, 0.0  ;;  %v4857_v58 = vadd.s32 3744, %v8683_v3  ;;  %v3317_v60 = vld [vmem:[%s7640_s18 + $0xe90] sm:$0xff] }
 0x7a6   : > { %v7396_v22 = vadd.f32 %v7395_v14, %v6884_v4  ;;  %v3822_v4 = vld [vmem:[%s7645_s21 + $0xe58] sm:$0xff]  ;;  %v5362_v14 = vadd.s32 %v8687_v5, %v4849_v56  ;;  %vm5873_vm11 = vcmp.lt.s32.totalorder %v5361_v6, 9216  ;;  %v6895_v31 = vmul.f32 %v6383_v19, %v6383_v19 }
 0x7a7   : > { %v4334_v17 = vsub.f32 %v3310_v2, %v3822_v4  ;;  %v6384_v27 = vsel %vm5872_vm10, %v4333_v9, 0.0  ;;  %v4858_v2 = vadd.s32 3752, %v8683_v3  ;;  %v3318_v6 = vld [vmem:[%s7640_s18 + $0xe98] sm:$0xff] }
 0x7a8   : > { %v7397_v30 = vadd.f32 %v7396_v22, %v6885_v13  ;;  %v3823_v13 = vld [vmem:[%s7645_s21 + $0xe60] sm:$0xff]  ;;  %v5363_v22 = vadd.s32 %v8687_v5, %v4850_v0  ;;  %vm5874_vm12 = vcmp.lt.s32.totalorder %v5362_v14, 9216  ;;  %v6896_v39 = vmul.f32 %v6384_v27, %v6384_v27 }
 0x7a9   : > { %v4335_v25 = vsub.f32 %v3311_v12, %v3823_v13  ;;  %v6385_v35 = vsel %vm5873_vm11, %v4334_v17, 0.0  ;;  %v4859_v12 = vadd.s32 3760, %v8683_v3  ;;  %v3319_v14 = vld [vmem:[%s7640_s18 + $0xea0] sm:$0xff] }
 0x7aa   : > { %v7398_v38 = vadd.f32 %v7397_v30, %v6886_v21  ;;  %v3824_v21 = vld [vmem:[%s7645_s21 + $0xe68] sm:$0xff]  ;;  %v5364_v30 = vadd.s32 %v8687_v5, %v4851_v10  ;;  %vm5875_vm13 = vcmp.lt.s32.totalorder %v5363_v22, 9216  ;;  %v6897_v47 = vmul.f32 %v6385_v35, %v6385_v35 }
 0x7ab   : > { %v4336_v33 = vsub.f32 %v3312_v20, %v3824_v21  ;;  %v6386_v43 = vsel %vm5874_vm12, %v4335_v25, 0.0  ;;  %v4860_v20 = vadd.s32 3768, %v8683_v3  ;;  %v3320_v22 = vld [vmem:[%s7640_s18 + $0xea8] sm:$0xff] }
 0x7ac   : > { %v7399_v46 = vadd.f32 %v7398_v38, %v6887_v29  ;;  %v3825_v29 = vld [vmem:[%s7645_s21 + $0xe70] sm:$0xff]  ;;  %v5365_v38 = vadd.s32 %v8687_v5, %v4852_v18  ;;  %vm5876_vm14 = vcmp.lt.s32.totalorder %v5364_v30, 9216  ;;  %v6898_v55 = vmul.f32 %v6386_v43, %v6386_v43 }
 0x7ad   : > { %v4337_v41 = vsub.f32 %v3313_v28, %v3825_v29  ;;  %v6387_v51 = vsel %vm5875_vm13, %v4336_v33, 0.0  ;;  %v4861_v28 = vadd.s32 3776, %v8683_v3  ;;  %v3321_v30 = vld [vmem:[%s7640_s18 + $0xeb0] sm:$0xff] }
 0x7ae   : > { %v7400_v54 = vadd.f32 %v7399_v46, %v6888_v37  ;;  %v3826_v37 = vld [vmem:[%s7645_s21 + $0xe78] sm:$0xff]  ;;  %v5366_v46 = vadd.s32 %v8687_v5, %v4853_v26  ;;  %vm5877_vm15 = vcmp.lt.s32.totalorder %v5365_v38, 9216  ;;  %v6899_v63 = vmul.f32 %v6387_v51, %v6387_v51 }
 0x7af   : > { %v4338_v49 = vsub.f32 %v3314_v36, %v3826_v37  ;;  %v6388_v59 = vsel %vm5876_vm14, %v4337_v41, 0.0  ;;  %v4862_v36 = vadd.s32 3784, %v8683_v3  ;;  %v3322_v38 = vld [vmem:[%s7640_s18 + $0xeb8] sm:$0xff] }
 0x7b0   : > { %v7401_v62 = vadd.f32 %v7400_v54, %v6889_v45  ;;  %v3827_v45 = vld [vmem:[%s7645_s21 + $0xe80] sm:$0xff]  ;;  %v5367_v54 = vadd.s32 %v8687_v5, %v4854_v34  ;;  %vm5878_vm0 = vcmp.lt.s32.totalorder %v5366_v46, 9216  ;;  %v6900_v9 = vmul.f32 %v6388_v59, %v6388_v59 }
 0x7b1   : > { %v4339_v57 = vsub.f32 %v3315_v44, %v3827_v45  ;;  %v6389_v4 = vsel %vm5877_vm15, %v4338_v49, 0.0  ;;  %v4863_v44 = vadd.s32 3792, %v8683_v3  ;;  %v3323_v46 = vld [vmem:[%s7640_s18 + $0xec0] sm:$0xff] }
 0x7b2   : > { %v7402_v8 = vadd.f32 %v7401_v62, %v6890_v53  ;;  %v3828_v53 = vld [vmem:[%s7645_s21 + $0xe88] sm:$0xff]  ;;  %v5368_v62 = vadd.s32 %v8687_v5, %v4855_v42  ;;  %vm5879_vm1 = vcmp.lt.s32.totalorder %v5367_v54, 9216  ;;  %v6901_v17 = vmul.f32 %v6389_v4, %v6389_v4 }
 0x7b3   : > { %v4340_v1 = vsub.f32 %v3316_v52, %v3828_v53  ;;  %v6390_v13 = vsel %vm5878_vm0, %v4339_v57, 0.0  ;;  %v4864_v52 = vadd.s32 3800, %v8683_v3  ;;  %v3324_v54 = vld [vmem:[%s7640_s18 + $0xec8] sm:$0xff] }
 0x7b4   : > { %v7403_v16 = vadd.f32 %v7402_v8, %v6891_v61  ;;  %v3829_v61 = vld [vmem:[%s7645_s21 + $0xe90] sm:$0xff]  ;;  %v5369_v8 = vadd.s32 %v8687_v5, %v4856_v50  ;;  %vm5880_vm2 = vcmp.lt.s32.totalorder %v5368_v62, 9216  ;;  %v6902_v25 = vmul.f32 %v6390_v13, %v6390_v13 }
 0x7b5   : > { %v4341_v11 = vsub.f32 %v3317_v60, %v3829_v61  ;;  %v6391_v21 = vsel %vm5879_vm1, %v4340_v1, 0.0  ;;  %v4865_v60 = vadd.s32 3808, %v8683_v3  ;;  %v3325_v62 = vld [vmem:[%s7640_s18 + $0xed0] sm:$0xff] }
 0x7b6   : > { %v7404_v24 = vadd.f32 %v7403_v16, %v6892_v7  ;;  %v3830_v7 = vld [vmem:[%s7645_s21 + $0xe98] sm:$0xff]  ;;  %v5370_v16 = vadd.s32 %v8687_v5, %v4857_v58  ;;  %vm5881_vm3 = vcmp.lt.s32.totalorder %v5369_v8, 9216  ;;  %v6903_v33 = vmul.f32 %v6391_v21, %v6391_v21 }
 0x7b7   : > { %v4342_v19 = vsub.f32 %v3318_v6, %v3830_v7  ;;  %v6392_v29 = vsel %vm5880_vm2, %v4341_v11, 0.0  ;;  %v4866_v6 = vadd.s32 3816, %v8683_v3  ;;  %v3326_v8 = vld [vmem:[%s7640_s18 + $0xed8] sm:$0xff] }
 0x7b8   : > { %v7405_v32 = vadd.f32 %v7404_v24, %v6893_v15  ;;  %v3831_v15 = vld [vmem:[%s7645_s21 + $0xea0] sm:$0xff]  ;;  %v5371_v24 = vadd.s32 %v8687_v5, %v4858_v2  ;;  %vm5882_vm4 = vcmp.lt.s32.totalorder %v5370_v16, 9216  ;;  %v6904_v41 = vmul.f32 %v6392_v29, %v6392_v29 }
 0x7b9   : > { %v4343_v27 = vsub.f32 %v3319_v14, %v3831_v15  ;;  %v6393_v37 = vsel %vm5881_vm3, %v4342_v19, 0.0  ;;  %v4867_v14 = vadd.s32 3824, %v8683_v3  ;;  %v3327_v16 = vld [vmem:[%s7640_s18 + $0xee0] sm:$0xff] }
 0x7ba   : > { %v7406_v40 = vadd.f32 %v7405_v32, %v6894_v23  ;;  %v3832_v23 = vld [vmem:[%s7645_s21 + $0xea8] sm:$0xff]  ;;  %v5372_v32 = vadd.s32 %v8687_v5, %v4859_v12  ;;  %vm5883_vm5 = vcmp.lt.s32.totalorder %v5371_v24, 9216  ;;  %v6905_v49 = vmul.f32 %v6393_v37, %v6393_v37 }
 0x7bb   : > { %v4344_v35 = vsub.f32 %v3320_v22, %v3832_v23  ;;  %v6394_v45 = vsel %vm5882_vm4, %v4343_v27, 0.0  ;;  %v4868_v22 = vadd.s32 3832, %v8683_v3  ;;  %v3328_v24 = vld [vmem:[%s7640_s18 + $0xee8] sm:$0xff] }
 0x7bc   : > { %v7407_v48 = vadd.f32 %v7406_v40, %v6895_v31  ;;  %v3833_v31 = vld [vmem:[%s7645_s21 + $0xeb0] sm:$0xff]  ;;  %v5373_v40 = vadd.s32 %v8687_v5, %v4860_v20  ;;  %vm5884_vm6 = vcmp.lt.s32.totalorder %v5372_v32, 9216  ;;  %v6906_v57 = vmul.f32 %v6394_v45, %v6394_v45 }
 0x7bd   : > { %v4345_v43 = vsub.f32 %v3321_v30, %v3833_v31  ;;  %v6395_v53 = vsel %vm5883_vm5, %v4344_v35, 0.0  ;;  %v4869_v30 = vadd.s32 3840, %v8683_v3  ;;  %v3329_v32 = vld [vmem:[%s7640_s18 + $0xef0] sm:$0xff] }
 0x7be   : > { %v7408_v56 = vadd.f32 %v7407_v48, %v6896_v39  ;;  %v3834_v39 = vld [vmem:[%s7645_s21 + $0xeb8] sm:$0xff]  ;;  %v5374_v48 = vadd.s32 %v8687_v5, %v4861_v28  ;;  %vm5885_vm7 = vcmp.lt.s32.totalorder %v5373_v40, 9216  ;;  %v6907_v1 = vmul.f32 %v6395_v53, %v6395_v53 }
 0x7bf   : > { %v4346_v51 = vsub.f32 %v3322_v38, %v3834_v39  ;;  %v6396_v61 = vsel %vm5884_vm6, %v4345_v43, 0.0  ;;  %v4870_v38 = vadd.s32 3848, %v8683_v3  ;;  %v3330_v40 = vld [vmem:[%s7640_s18 + $0xef8] sm:$0xff] }
 0x7c0   : > { %v7409_v0 = vadd.f32 %v7408_v56, %v6897_v47  ;;  %v3835_v47 = vld [vmem:[%s7645_s21 + $0xec0] sm:$0xff]  ;;  %v5375_v56 = vadd.s32 %v8687_v5, %v4862_v36  ;;  %vm5886_vm8 = vcmp.lt.s32.totalorder %v5374_v48, 9216  ;;  %v6908_v11 = vmul.f32 %v6396_v61, %v6396_v61 }
 0x7c1   : > { %v4347_v59 = vsub.f32 %v3323_v46, %v3835_v47  ;;  %v6397_v7 = vsel %vm5885_vm7, %v4346_v51, 0.0  ;;  %v4871_v46 = vadd.s32 3856, %v8683_v3  ;;  %v3331_v48 = vld [vmem:[%s7640_s18 + $0xf00] sm:$0xff] }
 0x7c2   : > { %v7410_v10 = vadd.f32 %v7409_v0, %v6898_v55  ;;  %v3836_v55 = vld [vmem:[%s7645_s21 + $0xec8] sm:$0xff]  ;;  %v5376_v0 = vadd.s32 %v8687_v5, %v4863_v44  ;;  %vm5887_vm9 = vcmp.lt.s32.totalorder %v5375_v56, 9216  ;;  %v6909_v19 = vmul.f32 %v6397_v7, %v6397_v7 }
 0x7c3   : > { %v4348_v4 = vsub.f32 %v3324_v54, %v3836_v55  ;;  %v6398_v15 = vsel %vm5886_vm8, %v4347_v59, 0.0  ;;  %v4872_v54 = vadd.s32 3864, %v8683_v3  ;;  %v3332_v56 = vld [vmem:[%s7640_s18 + $0xf08] sm:$0xff] }
 0x7c4   : > { %v7411_v18 = vadd.f32 %v7410_v10, %v6899_v63  ;;  %v3837_v63 = vld [vmem:[%s7645_s21 + $0xed0] sm:$0xff]  ;;  %v5377_v10 = vadd.s32 %v8687_v5, %v4864_v52  ;;  %vm5888_vm10 = vcmp.lt.s32.totalorder %v5376_v0, 9216  ;;  %v6910_v27 = vmul.f32 %v6398_v15, %v6398_v15 }
 0x7c5   : > { %v4349_v13 = vsub.f32 %v3325_v62, %v3837_v63  ;;  %v6399_v23 = vsel %vm5887_vm9, %v4348_v4, 0.0  ;;  %v4873_v62 = vadd.s32 3872, %v8683_v3  ;;  %v3333_v0 = vld [vmem:[%s7640_s18 + $0xf10] sm:$0xff] }
 0x7c6   : > { %v7412_v26 = vadd.f32 %v7411_v18, %v6900_v9  ;;  %v3838_v9 = vld [vmem:[%s7645_s21 + $0xed8] sm:$0xff]  ;;  %v5378_v18 = vadd.s32 %v8687_v5, %v4865_v60  ;;  %vm5889_vm11 = vcmp.lt.s32.totalorder %v5377_v10, 9216  ;;  %v6911_v35 = vmul.f32 %v6399_v23, %v6399_v23 }
 0x7c7   : > { %v4350_v21 = vsub.f32 %v3326_v8, %v3838_v9  ;;  %v6400_v31 = vsel %vm5888_vm10, %v4349_v13, 0.0  ;;  %v4874_v8 = vadd.s32 3880, %v8683_v3  ;;  %v3334_v10 = vld [vmem:[%s7640_s18 + $0xf18] sm:$0xff] }
 0x7c8   : > { %v7413_v34 = vadd.f32 %v7412_v26, %v6901_v17  ;;  %v3839_v17 = vld [vmem:[%s7645_s21 + $0xee0] sm:$0xff]  ;;  %v5379_v26 = vadd.s32 %v8687_v5, %v4866_v6  ;;  %vm5890_vm12 = vcmp.lt.s32.totalorder %v5378_v18, 9216  ;;  %v6912_v43 = vmul.f32 %v6400_v31, %v6400_v31 }
 0x7c9   : > { %v4351_v29 = vsub.f32 %v3327_v16, %v3839_v17  ;;  %v6401_v39 = vsel %vm5889_vm11, %v4350_v21, 0.0  ;;  %v4875_v16 = vadd.s32 3888, %v8683_v3  ;;  %v3335_v18 = vld [vmem:[%s7640_s18 + $0xf20] sm:$0xff] }
 0x7ca   : > { %v7414_v42 = vadd.f32 %v7413_v34, %v6902_v25  ;;  %v3840_v25 = vld [vmem:[%s7645_s21 + $0xee8] sm:$0xff]  ;;  %v5380_v34 = vadd.s32 %v8687_v5, %v4867_v14  ;;  %vm5891_vm13 = vcmp.lt.s32.totalorder %v5379_v26, 9216  ;;  %v6913_v51 = vmul.f32 %v6401_v39, %v6401_v39 }
 0x7cb   : > { %v4352_v37 = vsub.f32 %v3328_v24, %v3840_v25  ;;  %v6402_v47 = vsel %vm5890_vm12, %v4351_v29, 0.0  ;;  %v4876_v24 = vadd.s32 3896, %v8683_v3  ;;  %v3336_v26 = vld [vmem:[%s7640_s18 + $0xf28] sm:$0xff] }
 0x7cc   : > { %v7415_v50 = vadd.f32 %v7414_v42, %v6903_v33  ;;  %v3841_v33 = vld [vmem:[%s7645_s21 + $0xef0] sm:$0xff]  ;;  %v5381_v42 = vadd.s32 %v8687_v5, %v4868_v22  ;;  %vm5892_vm14 = vcmp.lt.s32.totalorder %v5380_v34, 9216  ;;  %v6914_v59 = vmul.f32 %v6402_v47, %v6402_v47 }
 0x7cd   : > { %v4353_v45 = vsub.f32 %v3329_v32, %v3841_v33  ;;  %v6403_v55 = vsel %vm5891_vm13, %v4352_v37, 0.0  ;;  %v4877_v32 = vadd.s32 3904, %v8683_v3  ;;  %v3337_v34 = vld [vmem:[%s7640_s18 + $0xf30] sm:$0xff] }
 0x7ce   : > { %v7416_v58 = vadd.f32 %v7415_v50, %v6904_v41  ;;  %v3842_v41 = vld [vmem:[%s7645_s21 + $0xef8] sm:$0xff]  ;;  %v5382_v50 = vadd.s32 %v8687_v5, %v4869_v30  ;;  %vm5893_vm15 = vcmp.lt.s32.totalorder %v5381_v42, 9216  ;;  %v6915_v4 = vmul.f32 %v6403_v55, %v6403_v55 }
 0x7cf   : > { %v4354_v53 = vsub.f32 %v3330_v40, %v3842_v41  ;;  %v6404_v63 = vsel %vm5892_vm14, %v4353_v45, 0.0  ;;  %v4878_v40 = vadd.s32 3912, %v8683_v3  ;;  %v3338_v42 = vld [vmem:[%s7640_s18 + $0xf38] sm:$0xff] }
 0x7d0   : > { %v7417_v2 = vadd.f32 %v7416_v58, %v6905_v49  ;;  %v3843_v49 = vld [vmem:[%s7645_s21 + $0xf00] sm:$0xff]  ;;  %v5383_v58 = vadd.s32 %v8687_v5, %v4870_v38  ;;  %vm5894_vm0 = vcmp.lt.s32.totalorder %v5382_v50, 9216  ;;  %v6916_v13 = vmul.f32 %v6404_v63, %v6404_v63 }
 0x7d1   : > { %v4355_v61 = vsub.f32 %v3331_v48, %v3843_v49  ;;  %v6405_v9 = vsel %vm5893_vm15, %v4354_v53, 0.0  ;;  %v4879_v48 = vadd.s32 3920, %v8683_v3  ;;  %v3339_v50 = vld [vmem:[%s7640_s18 + $0xf40] sm:$0xff] }
 0x7d2   : > { %v7418_v12 = vadd.f32 %v7417_v2, %v6906_v57  ;;  %v3844_v57 = vld [vmem:[%s7645_s21 + $0xf08] sm:$0xff]  ;;  %v5384_v2 = vadd.s32 %v8687_v5, %v4871_v46  ;;  %vm5895_vm1 = vcmp.lt.s32.totalorder %v5383_v58, 9216  ;;  %v6917_v21 = vmul.f32 %v6405_v9, %v6405_v9 }
 0x7d3   : > { %v4356_v7 = vsub.f32 %v3332_v56, %v3844_v57  ;;  %v6406_v17 = vsel %vm5894_vm0, %v4355_v61, 0.0  ;;  %v4880_v56 = vadd.s32 3928, %v8683_v3  ;;  %v3340_v58 = vld [vmem:[%s7640_s18 + $0xf48] sm:$0xff] }
 0x7d4   : > { %v7419_v20 = vadd.f32 %v7418_v12, %v6907_v1  ;;  %v3845_v1 = vld [vmem:[%s7645_s21 + $0xf10] sm:$0xff]  ;;  %v5385_v12 = vadd.s32 %v8687_v5, %v4872_v54  ;;  %vm5896_vm2 = vcmp.lt.s32.totalorder %v5384_v2, 9216  ;;  %v6918_v29 = vmul.f32 %v6406_v17, %v6406_v17 }
 0x7d5   : > { %v4357_v15 = vsub.f32 %v3333_v0, %v3845_v1  ;;  %v6407_v25 = vsel %vm5895_vm1, %v4356_v7, 0.0  ;;  %v4881_v0 = vadd.s32 3936, %v8683_v3  ;;  %v3341_v2 = vld [vmem:[%s7640_s18 + $0xf50] sm:$0xff] }
 0x7d6   : > { %v7420_v28 = vadd.f32 %v7419_v20, %v6908_v11  ;;  %v3846_v11 = vld [vmem:[%s7645_s21 + $0xf18] sm:$0xff]  ;;  %v5386_v20 = vadd.s32 %v8687_v5, %v4873_v62  ;;  %vm5897_vm3 = vcmp.lt.s32.totalorder %v5385_v12, 9216  ;;  %v6919_v37 = vmul.f32 %v6407_v25, %v6407_v25 }
 0x7d7   : > { %v4358_v23 = vsub.f32 %v3334_v10, %v3846_v11  ;;  %v6408_v33 = vsel %vm5896_vm2, %v4357_v15, 0.0  ;;  %v4882_v10 = vadd.s32 3944, %v8683_v3  ;;  %v3342_v12 = vld [vmem:[%s7640_s18 + $0xf58] sm:$0xff] }
 0x7d8   : > { %v7421_v36 = vadd.f32 %v7420_v28, %v6909_v19  ;;  %v3847_v19 = vld [vmem:[%s7645_s21 + $0xf20] sm:$0xff]  ;;  %v5387_v28 = vadd.s32 %v8687_v5, %v4874_v8  ;;  %vm5898_vm4 = vcmp.lt.s32.totalorder %v5386_v20, 9216  ;;  %v6920_v45 = vmul.f32 %v6408_v33, %v6408_v33 }
 0x7d9   : > { %v4359_v31 = vsub.f32 %v3335_v18, %v3847_v19  ;;  %v6409_v41 = vsel %vm5897_vm3, %v4358_v23, 0.0  ;;  %v4883_v18 = vadd.s32 3952, %v8683_v3  ;;  %v3343_v20 = vld [vmem:[%s7640_s18 + $0xf60] sm:$0xff] }
 0x7da   : > { %v7422_v44 = vadd.f32 %v7421_v36, %v6910_v27  ;;  %v3848_v27 = vld [vmem:[%s7645_s21 + $0xf28] sm:$0xff]  ;;  %v5388_v36 = vadd.s32 %v8687_v5, %v4875_v16  ;;  %vm5899_vm5 = vcmp.lt.s32.totalorder %v5387_v28, 9216  ;;  %v6921_v53 = vmul.f32 %v6409_v41, %v6409_v41 }
 0x7db   : > { %v4360_v39 = vsub.f32 %v3336_v26, %v3848_v27  ;;  %v6410_v49 = vsel %vm5898_vm4, %v4359_v31, 0.0  ;;  %v4884_v26 = vadd.s32 3960, %v8683_v3  ;;  %v3344_v28 = vld [vmem:[%s7640_s18 + $0xf68] sm:$0xff] }
 0x7dc   : > { %v7423_v52 = vadd.f32 %v7422_v44, %v6911_v35  ;;  %v3849_v35 = vld [vmem:[%s7645_s21 + $0xf30] sm:$0xff]  ;;  %v5389_v44 = vadd.s32 %v8687_v5, %v4876_v24  ;;  %vm5900_vm6 = vcmp.lt.s32.totalorder %v5388_v36, 9216  ;;  %v6922_v61 = vmul.f32 %v6410_v49, %v6410_v49 }
 0x7dd   : > { %v4361_v47 = vsub.f32 %v3337_v34, %v3849_v35  ;;  %v6411_v57 = vsel %vm5899_vm5, %v4360_v39, 0.0  ;;  %v4885_v34 = vadd.s32 3968, %v8683_v3  ;;  %v3345_v36 = vld [vmem:[%s7640_s18 + $0xf70] sm:$0xff] }
 0x7de   : > { %v7424_v60 = vadd.f32 %v7423_v52, %v6912_v43  ;;  %v3850_v43 = vld [vmem:[%s7645_s21 + $0xf38] sm:$0xff]  ;;  %v5390_v52 = vadd.s32 %v8687_v5, %v4877_v32  ;;  %vm5901_vm7 = vcmp.lt.s32.totalorder %v5389_v44, 9216  ;;  %v6923_v7 = vmul.f32 %v6411_v57, %v6411_v57 }
 0x7df   : > { %v4362_v55 = vsub.f32 %v3338_v42, %v3850_v43  ;;  %v6412_v1 = vsel %vm5900_vm6, %v4361_v47, 0.0  ;;  %v4886_v42 = vadd.s32 3976, %v8683_v3  ;;  %v3346_v44 = vld [vmem:[%s7640_s18 + $0xf78] sm:$0xff] }
 0x7e0   : > { %v7425_v6 = vadd.f32 %v7424_v60, %v6913_v51  ;;  %v3851_v51 = vld [vmem:[%s7645_s21 + $0xf40] sm:$0xff]  ;;  %v5391_v60 = vadd.s32 %v8687_v5, %v4878_v40  ;;  %vm5902_vm8 = vcmp.lt.s32.totalorder %v5390_v52, 9216  ;;  %v6924_v15 = vmul.f32 %v6412_v1, %v6412_v1 }
 0x7e1   : > { %v4363_v63 = vsub.f32 %v3339_v50, %v3851_v51  ;;  %v6413_v11 = vsel %vm5901_vm7, %v4362_v55, 0.0  ;;  %v4887_v50 = vadd.s32 3984, %v8683_v3  ;;  %v3347_v52 = vld [vmem:[%s7640_s18 + $0xf80] sm:$0xff] }
 0x7e2   : > { %v7426_v14 = vadd.f32 %v7425_v6, %v6914_v59  ;;  %v3852_v59 = vld [vmem:[%s7645_s21 + $0xf48] sm:$0xff]  ;;  %v5392_v6 = vadd.s32 %v8687_v5, %v4879_v48  ;;  %vm5903_vm9 = vcmp.lt.s32.totalorder %v5391_v60, 9216  ;;  %v6925_v23 = vmul.f32 %v6413_v11, %v6413_v11 }
 0x7e3   : > { %v4364_v9 = vsub.f32 %v3340_v58, %v3852_v59  ;;  %v6414_v19 = vsel %vm5902_vm8, %v4363_v63, 0.0  ;;  %v4888_v58 = vadd.s32 3992, %v8683_v3  ;;  %v3348_v60 = vld [vmem:[%s7640_s18 + $0xf88] sm:$0xff] }
 0x7e4   : > { %v7427_v22 = vadd.f32 %v7426_v14, %v6915_v4  ;;  %v3853_v4 = vld [vmem:[%s7645_s21 + $0xf50] sm:$0xff]  ;;  %v5393_v14 = vadd.s32 %v8687_v5, %v4880_v56  ;;  %vm5904_vm10 = vcmp.lt.s32.totalorder %v5392_v6, 9216  ;;  %v6926_v31 = vmul.f32 %v6414_v19, %v6414_v19 }
 0x7e5   : > { %v4365_v17 = vsub.f32 %v3341_v2, %v3853_v4  ;;  %v6415_v27 = vsel %vm5903_vm9, %v4364_v9, 0.0  ;;  %v4889_v2 = vadd.s32 4000, %v8683_v3  ;;  %v3349_v6 = vld [vmem:[%s7640_s18 + $0xf90] sm:$0xff] }
 0x7e6   : > { %v7428_v30 = vadd.f32 %v7427_v22, %v6916_v13  ;;  %v3854_v13 = vld [vmem:[%s7645_s21 + $0xf58] sm:$0xff]  ;;  %v5394_v22 = vadd.s32 %v8687_v5, %v4881_v0  ;;  %vm5905_vm11 = vcmp.lt.s32.totalorder %v5393_v14, 9216  ;;  %v6927_v39 = vmul.f32 %v6415_v27, %v6415_v27 }
 0x7e7   : > { %v4366_v25 = vsub.f32 %v3342_v12, %v3854_v13  ;;  %v6416_v35 = vsel %vm5904_vm10, %v4365_v17, 0.0  ;;  %v4890_v12 = vadd.s32 4008, %v8683_v3  ;;  %v3350_v14 = vld [vmem:[%s7640_s18 + $0xf98] sm:$0xff] }
 0x7e8   : > { %v7429_v38 = vadd.f32 %v7428_v30, %v6917_v21  ;;  %v3855_v21 = vld [vmem:[%s7645_s21 + $0xf60] sm:$0xff]  ;;  %v5395_v30 = vadd.s32 %v8687_v5, %v4882_v10  ;;  %vm5906_vm12 = vcmp.lt.s32.totalorder %v5394_v22, 9216  ;;  %v6928_v47 = vmul.f32 %v6416_v35, %v6416_v35 }
 0x7e9   : > { %v4367_v33 = vsub.f32 %v3343_v20, %v3855_v21  ;;  %v6417_v43 = vsel %vm5905_vm11, %v4366_v25, 0.0  ;;  %v4891_v20 = vadd.s32 4016, %v8683_v3  ;;  %v3351_v22 = vld [vmem:[%s7640_s18 + $0xfa0] sm:$0xff] }
 0x7ea   : > { %v7430_v46 = vadd.f32 %v7429_v38, %v6918_v29  ;;  %v3856_v29 = vld [vmem:[%s7645_s21 + $0xf68] sm:$0xff]  ;;  %v5396_v38 = vadd.s32 %v8687_v5, %v4883_v18  ;;  %vm5907_vm13 = vcmp.lt.s32.totalorder %v5395_v30, 9216  ;;  %v6929_v55 = vmul.f32 %v6417_v43, %v6417_v43 }
 0x7eb   : > { %v4368_v41 = vsub.f32 %v3344_v28, %v3856_v29  ;;  %v6418_v51 = vsel %vm5906_vm12, %v4367_v33, 0.0  ;;  %v4892_v28 = vadd.s32 4024, %v8683_v3  ;;  %v3352_v30 = vld [vmem:[%s7640_s18 + $0xfa8] sm:$0xff] }
 0x7ec   : > { %v7431_v54 = vadd.f32 %v7430_v46, %v6919_v37  ;;  %v3857_v37 = vld [vmem:[%s7645_s21 + $0xf70] sm:$0xff]  ;;  %v5397_v46 = vadd.s32 %v8687_v5, %v4884_v26  ;;  %vm5908_vm14 = vcmp.lt.s32.totalorder %v5396_v38, 9216  ;;  %v6930_v63 = vmul.f32 %v6418_v51, %v6418_v51 }
 0x7ed   : > { %v4369_v49 = vsub.f32 %v3345_v36, %v3857_v37  ;;  %v6419_v59 = vsel %vm5907_vm13, %v4368_v41, 0.0  ;;  %v4893_v36 = vadd.s32 4032, %v8683_v3  ;;  %v3353_v38 = vld [vmem:[%s7640_s18 + $0xfb0] sm:$0xff] }
 0x7ee   : > { %v7432_v62 = vadd.f32 %v7431_v54, %v6920_v45  ;;  %v3858_v45 = vld [vmem:[%s7645_s21 + $0xf78] sm:$0xff]  ;;  %v5398_v54 = vadd.s32 %v8687_v5, %v4885_v34  ;;  %vm5909_vm15 = vcmp.lt.s32.totalorder %v5397_v46, 9216  ;;  %v6931_v9 = vmul.f32 %v6419_v59, %v6419_v59 }
 0x7ef   : > { %v4370_v57 = vsub.f32 %v3346_v44, %v3858_v45  ;;  %v6420_v4 = vsel %vm5908_vm14, %v4369_v49, 0.0  ;;  %v4894_v44 = vadd.s32 4040, %v8683_v3  ;;  %v3354_v46 = vld [vmem:[%s7640_s18 + $0xfb8] sm:$0xff] }
 0x7f0   : > { %v7433_v8 = vadd.f32 %v7432_v62, %v6921_v53  ;;  %v3859_v53 = vld [vmem:[%s7645_s21 + $0xf80] sm:$0xff]  ;;  %v5399_v62 = vadd.s32 %v8687_v5, %v4886_v42  ;;  %vm5910_vm0 = vcmp.lt.s32.totalorder %v5398_v54, 9216  ;;  %v6932_v17 = vmul.f32 %v6420_v4, %v6420_v4 }
 0x7f1   : > { %v4371_v1 = vsub.f32 %v3347_v52, %v3859_v53  ;;  %v6421_v13 = vsel %vm5909_vm15, %v4370_v57, 0.0  ;;  %v4895_v52 = vadd.s32 4048, %v8683_v3  ;;  %v3355_v54 = vld [vmem:[%s7640_s18 + $0xfc0] sm:$0xff] }
 0x7f2   : > { %v7434_v16 = vadd.f32 %v7433_v8, %v6922_v61  ;;  %v3860_v61 = vld [vmem:[%s7645_s21 + $0xf88] sm:$0xff]  ;;  %v5400_v8 = vadd.s32 %v8687_v5, %v4887_v50  ;;  %vm5911_vm1 = vcmp.lt.s32.totalorder %v5399_v62, 9216  ;;  %v6933_v25 = vmul.f32 %v6421_v13, %v6421_v13 }
 0x7f3   : > { %v4372_v11 = vsub.f32 %v3348_v60, %v3860_v61  ;;  %v6422_v21 = vsel %vm5910_vm0, %v4371_v1, 0.0  ;;  %v4896_v60 = vadd.s32 4056, %v8683_v3  ;;  %v3356_v62 = vld [vmem:[%s7640_s18 + $0xfc8] sm:$0xff] }
 0x7f4   : > { %v7435_v24 = vadd.f32 %v7434_v16, %v6923_v7  ;;  %v3861_v7 = vld [vmem:[%s7645_s21 + $0xf90] sm:$0xff]  ;;  %v5401_v16 = vadd.s32 %v8687_v5, %v4888_v58  ;;  %vm5912_vm2 = vcmp.lt.s32.totalorder %v5400_v8, 9216  ;;  %v6934_v33 = vmul.f32 %v6422_v21, %v6422_v21 }
 0x7f5   : > { %v4373_v19 = vsub.f32 %v3349_v6, %v3861_v7  ;;  %v6423_v29 = vsel %vm5911_vm1, %v4372_v11, 0.0  ;;  %v4897_v6 = vadd.s32 4064, %v8683_v3  ;;  %v3357_v8 = vld [vmem:[%s7640_s18 + $0xfd0] sm:$0xff] }
 0x7f6   : > { %v7436_v32 = vadd.f32 %v7435_v24, %v6924_v15  ;;  %v3862_v15 = vld [vmem:[%s7645_s21 + $0xf98] sm:$0xff]  ;;  %v5402_v24 = vadd.s32 %v8687_v5, %v4889_v2  ;;  %vm5913_vm3 = vcmp.lt.s32.totalorder %v5401_v16, 9216  ;;  %v6935_v41 = vmul.f32 %v6423_v29, %v6423_v29 }
 0x7f7   : > { %v4374_v27 = vsub.f32 %v3350_v14, %v3862_v15  ;;  %v6424_v37 = vsel %vm5912_vm2, %v4373_v19, 0.0  ;;  %v4898_v14 = vadd.s32 4072, %v8683_v3  ;;  %v3358_v16 = vld [vmem:[%s7640_s18 + $0xfd8] sm:$0xff] }
 0x7f8   : > { %v7437_v40 = vadd.f32 %v7436_v32, %v6925_v23  ;;  %v3863_v23 = vld [vmem:[%s7645_s21 + $0xfa0] sm:$0xff]  ;;  %v5403_v32 = vadd.s32 %v8687_v5, %v4890_v12  ;;  %vm5914_vm4 = vcmp.lt.s32.totalorder %v5402_v24, 9216  ;;  %v6936_v49 = vmul.f32 %v6424_v37, %v6424_v37 }
 0x7f9   : > { %v4375_v35 = vsub.f32 %v3351_v22, %v3863_v23  ;;  %v6425_v45 = vsel %vm5913_vm3, %v4374_v27, 0.0  ;;  %v4899_v22 = vadd.s32 4080, %v8683_v3  ;;  %v3359_v24 = vld [vmem:[%s7640_s18 + $0xfe0] sm:$0xff] }
 0x7fa   : > { %v7438_v48 = vadd.f32 %v7437_v40, %v6926_v31  ;;  %v3864_v31 = vld [vmem:[%s7645_s21 + $0xfa8] sm:$0xff]  ;;  %v5404_v40 = vadd.s32 %v8687_v5, %v4891_v20  ;;  %vm5915_vm5 = vcmp.lt.s32.totalorder %v5403_v32, 9216  ;;  %v6937_v57 = vmul.f32 %v6425_v45, %v6425_v45  ;;  %v3362_v45 = vld [vmem:[%s7640_s18 + $0xff8] sm:$0xff] }
 0x7fb   : > { %v4376_v43 = vsub.f32 %v3352_v30, %v3864_v31  ;;  %v6426_v53 = vsel %vm5914_vm4, %v4375_v35, 0.0  ;;  %v4900_v30 = vadd.s32 4088, %v8683_v3  ;;  %v3360_v32 = vld [vmem:[%s7640_s18 + $0xfe8] sm:$0xff] }
 0x7fc   : > { %v7439_v56 = vadd.f32 %v7438_v48, %v6927_v39  ;;  %v3865_v39 = vld [vmem:[%s7645_s21 + $0xfb0] sm:$0xff]  ;;  %v5405_v48 = vadd.s32 %v8687_v5, %v4892_v28  ;;  %vm5916_vm6 = vcmp.lt.s32.totalorder %v5404_v40, 9216  ;;  %v6938_v1 = vmul.f32 %v6426_v53, %v6426_v53 }
 0x7fd   : > { %v4377_v51 = vsub.f32 %v3353_v38, %v3865_v39  ;;  %v6427_v61 = vsel %vm5915_vm5, %v4376_v43, 0.0  ;;  %v3361_v39 = vld [vmem:[%s7640_s18 + $0xff0] sm:$0xff] }
 0x7fe   : > { %v7440_v0 = vadd.f32 %v7439_v56, %v6928_v47  ;;  %v3866_v47 = vld [vmem:[%s7645_s21 + $0xfb8] sm:$0xff]  ;;  %v5406_v56 = vadd.s32 %v8687_v5, %v4893_v36  ;;  %vm5917_vm7 = vcmp.lt.s32.totalorder %v5405_v48, 9216  ;;  %v6939_v11 = vmul.f32 %v6427_v61, %v6427_v61  ;;  %v3873_v40 = vld [vmem:[%s7645_s21 + $0xff0] sm:$0xff] }
 0x7ff   : > { %v4378_v59 = vsub.f32 %v3354_v46, %v3866_v47  ;;  %v6428_v7 = vsel %vm5916_vm6, %v4377_v51, 0.0  ;;  %v3874_v46 = vld [vmem:[%s7645_s21 + $0xff8] sm:$0xff]  ;;  %v5413_v47 = vadd.s32 %v8687_v5, %v4900_v30 }
 0x800   : > { %v7441_v10 = vadd.f32 %v7440_v0, %v6929_v55  ;;  %v3867_v55 = vld [vmem:[%s7645_s21 + $0xfc0] sm:$0xff]  ;;  %v5407_v0 = vadd.s32 %v8687_v5, %v4894_v44  ;;  %vm5918_vm8 = vcmp.lt.s32.totalorder %v5406_v56, 9216  ;;  %v6940_v19 = vmul.f32 %v6428_v7, %v6428_v7 }
 0x801   : > { %v4379_v4 = vsub.f32 %v3355_v54, %v3867_v55  ;;  %v6429_v15 = vsel %vm5917_vm7, %v4378_v59, 0.0  ;;  %v4386_v54 = vsub.f32 %v3362_v45, %v3874_v46  ;;  %vm5925_vm15 = vcmp.lt.s32.totalorder %v5413_v47, 9216 }
 0x802   : > { %v7442_v18 = vadd.f32 %v7441_v10, %v6930_v63  ;;  %v3868_v63 = vld [vmem:[%s7645_s21 + $0xfc8] sm:$0xff]  ;;  %v5408_v10 = vadd.s32 %v8687_v5, %v4895_v52  ;;  %vm5919_vm9 = vcmp.lt.s32.totalorder %v5407_v0, 9216  ;;  %v6941_v27 = vmul.f32 %v6429_v15, %v6429_v15 }
 0x803   : > { %v4380_v13 = vsub.f32 %v3356_v62, %v3868_v63  ;;  %v6430_v23 = vsel %vm5918_vm8, %v4379_v4, 0.0  ;;  %v6437_v61 = vsel %vm5925_vm15, %v4386_v54, 0.0 }
 0x804   : > { %v7443_v26 = vadd.f32 %v7442_v18, %v6931_v9  ;;  %v3869_v9 = vld [vmem:[%s7645_s21 + $0xfd0] sm:$0xff]  ;;  %v5409_v18 = vadd.s32 %v8687_v5, %v4896_v60  ;;  %vm5920_vm10 = vcmp.lt.s32.totalorder %v5408_v10, 9216  ;;  %v6942_v35 = vmul.f32 %v6430_v23, %v6430_v23 }
 0x805   : > { %v4381_v21 = vsub.f32 %v3357_v8, %v3869_v9  ;;  %v6431_v31 = vsel %vm5919_vm9, %v4380_v13, 0.0 }
 0x806   : > { %v7444_v34 = vadd.f32 %v7443_v26, %v6932_v17  ;;  %v3870_v17 = vld [vmem:[%s7645_s21 + $0xfd8] sm:$0xff]  ;;  %v5410_v26 = vadd.s32 %v8687_v5, %v4897_v6  ;;  %vm5921_vm11 = vcmp.lt.s32.totalorder %v5409_v18, 9216 }
 0x807   : > { %v4382_v29 = vsub.f32 %v3358_v16, %v3870_v17  ;;  %v6432_v38 = vsel %vm5920_vm10, %v4381_v21, 0.0 }
 0x808   : > { %v7445_v42 = vadd.f32 %v7444_v34, %v6933_v25  ;;  %v3871_v25 = vld [vmem:[%s7645_s21 + $0xfe0] sm:$0xff]  ;;  %v5411_v34 = vadd.s32 %v8687_v5, %v4898_v14  ;;  %vm5922_vm12 = vcmp.lt.s32.totalorder %v5410_v26, 9216  ;;  %v6944_v48 = vmul.f32 %v6432_v38, %v6432_v38 }
 0x809   : > { %v4383_v37 = vsub.f32 %v3359_v24, %v3871_v25  ;;  %v6433_v44 = vsel %vm5921_vm11, %v4382_v29, 0.0 }
 0x80a   : > { %v7446_v50 = vadd.f32 %v7445_v42, %v6934_v33  ;;  %v3872_v33 = vld [vmem:[%s7645_s21 + $0xfe8] sm:$0xff]  ;;  %v6943_v42 = vmul.f32 %v6431_v31, %v6431_v31  ;;  %vm5923_vm13 = vcmp.lt.s32.totalorder %v5411_v34, 9216  ;;  %v6945_v52 = vmul.f32 %v6433_v44, %v6433_v44 }
 0x80b   : > { %v4384_v3 = vsub.f32 %v3360_v32, %v3872_v33  ;;  %v6434_v51 = vsel %vm5922_vm12, %v4383_v37, 0.0 }
 0x80c   : > { %v7447_v58 = vadd.f32 %v7446_v50, %v6935_v41  ;;  %v5412_v41 = vadd.s32 %v8687_v5, %v4899_v22  ;;  %v4385_v50 = vsub.f32 %v3361_v39, %v3873_v40  ;;  %v6946_v56 = vmul.f32 %v6434_v51, %v6434_v51 }
 0x80d   : > { %v6435_v55 = vsel %vm5923_vm13, %v4384_v3, 0.0  ;;  %v6949_v5 = vmul.f32 %v6437_v61, %v6437_v61 }
 0x80e   : > { %v7448_v2 = vadd.f32 %v7447_v58, %v6936_v49  ;;  %vm5924_vm14 = vcmp.lt.s32.totalorder %v5412_v41, 9216  ;;  %v6947_v59 = vmul.f32 %v6435_v55, %v6435_v55 }
 0x80f   : > { %v6436_v58 = vsel %vm5924_vm14, %v4385_v50, 0.0 }
 0x810   : > { %v7449_v12 = vadd.f32 %v7448_v2, %v6937_v57  ;;  %v6948_v62 = vmul.f32 %v6436_v58, %v6436_v58  ;;  %v6950_v2 = vld [vmem:[%s10753_s2] sm:$0xff] }
 0x812   : > { %v7450_v20 = vadd.f32 %v7449_v12, %v6938_v1 }
 0x814   : > { %v7451_v28 = vadd.f32 %v7450_v20, %v6939_v11 }
 0x816   : > { %v7452_v36 = vadd.f32 %v7451_v28, %v6940_v19 }
 0x818   : > { %v7453_v43 = vadd.f32 %v7452_v36, %v6941_v27 }
 0x81a   : > { %v7454_v49 = vadd.f32 %v7453_v43, %v6942_v35 }
 0x81c   : > { %v7455_v53 = vadd.f32 %v7454_v49, %v6943_v42 }
 0x81e   : > { %v7456_v57 = vadd.f32 %v7455_v53, %v6944_v48 }
 0x820   : > { %v7457_v60 = vadd.f32 %v7456_v57, %v6945_v52 }
 0x822   : > { %v7458_v63 = vadd.f32 %v7457_v60, %v6946_v56 }
 0x824   : > { %v7459_v0 = vadd.f32 %v7458_v63, %v6947_v59 }
 0x826   : > { %v7460_v1 = vadd.f32 %v7459_v0, %v6948_v62 }
 0x828   : > { %v7461_v4 = vadd.f32 %v7460_v1, %v6949_v5 }
 0x82a   : > { %v7462_v6 = vadd.f32 %v7461_v4, %v6950_v2 }
 0x82c   : > { %7463 = vst [vmem:[%s10753_s2] sm:$0xff] %v7462_v6 }
 0x82d PF: > { %s12_s11 = sadd.s32 1, %s7597_s11   ;;  %s10754_s9 = smov %s7593_s10 }
 0x82e   : > { %p9_p9 = scmp.ge.s32.totalorder %s12_s11, 5   ;;  %s10755_s10 = smov %s10757_s12 }
 0x830   :  { %11 = sbr.rel (!%p9_p9) target bundleno = 2 (0x2), region = 73 }

</bundles_post_ra>
